<compile_context>
chip_gen: v7x
topology: tpu7x:2x2x1
jax: 0.10.0
libtpu: 0.0.40
codegen_flags: <defaults>
</compile_context>

<pallas_src>
import jax
import jax.numpy as jnp
from jax.experimental import pallas as pl
from jax.experimental.pallas import tpu as pltpu

# Feature dims of the timm backbones used by the PyTorch module.
VIT_DIM = 768        # vit_base_patch16_224.num_features
CONVNEXT_DIM = 1024  # convnext_base.num_features
EFFNET_DIM = 1536    # efficientnet_b3.num_features
TOTAL_DIM = VIT_DIM + CONVNEXT_DIM + EFFNET_DIM   # 3328
FUSION_DIM = 512
NUM_HEADS = 8
HEAD_DIM = FUSION_DIM // NUM_HEADS                # 64
NUM_CLASSES = 4
H1_DIM = 256
H2_DIM = 128
CONF_DIM = 128
HEAD_SLAB = 128      # lane-dense output slab: [logits(4) | confidence(1) | pad]


def _round_up(x, m):
    return (x + m - 1) // m * m


def _resident_spec(shape):
    """Full-array block whose index never changes -> stays resident in VMEM."""
    nd = len(shape)
    return pl.BlockSpec(shape, lambda i, _nd=nd: (0,) * _nd)


# ---------------------------------------------------------------------------
# Fused kernel: backbone stubs -> projection -> (degenerate) attention ->
# 4 subtype heads + confidence head.  Grid iterates over batch-row tiles.
# ---------------------------------------------------------------------------
def _fused_kernel(x_ref,
                  w_bb_ref, b_bb_ref,
                  w_proj_ref, b_proj_ref,
                  w_vo_ref, b_vo_ref,
                  w_h1_ref, b_h1_ref,
                  w_h2_ref, b_h2_ref,
                  w_h3_ref, b_h3_ref,
                  w_c1_ref, b_c1_ref,
                  w_c2_ref, b_c2_ref,
                  feat_ref, head_ref):
    rows = x_ref.shape[0]

    # --- backbone stubs: GAP over spatial + one fused Linear producing the
    # concatenated [vit | convnext | efficientnet] feature vector [rows, 3328].
    pooled = jnp.mean(x_ref[...], axis=-1)                               # [rows, C]
    combined = jnp.dot(pooled.astype(jnp.bfloat16), w_bb_ref[...],
                       preferred_element_type=jnp.float32) + b_bb_ref[...]

    # --- feature_projection: Linear(3328, 512)
    proj = jnp.dot(combined.astype(jnp.bfloat16), w_proj_ref[...],
                   preferred_element_type=jnp.float32) + b_proj_ref[...]

    # --- MultiheadAttention with seq_len == 1: the softmax over the single
    # key is exactly 1.0, so attention reduces to out_proj(v_proj(x)); the V
    # and output projections were folded into w_vo / b_vo on the host.
    fusion = jnp.dot(proj.astype(jnp.bfloat16), w_vo_ref[...],
                     preferred_element_type=jnp.float32) + b_vo_ref[...]  # [rows, 512]
    feat_ref[...] = fusion
    fusion_bf = fusion.astype(jnp.bfloat16)

    # --- 4 subtype heads, batched (Dropout = identity in eval mode).
    # layer 1: all four heads concatenated along the output lanes -> [rows, 1024]
    h1 = jnp.maximum(
        jnp.dot(fusion_bf, w_h1_ref[...],
                preferred_element_type=jnp.float32) + b_h1_ref[...], 0.0)
    # layer 2: block-diagonal weight -> one matmul producing [rows, 4*128]
    h2 = jnp.maximum(
        jnp.dot(h1.astype(jnp.bfloat16), w_h2_ref[...],
                preferred_element_type=jnp.float32) + b_h2_ref[...], 0.0)
    # layer 3 (out dim 1 per head): VPU multiply + lane reduce -> [rows, 4]
    h2r = h2.reshape(rows, NUM_CLASSES, H2_DIM)
    logits = jnp.sum(h2r * w_h3_ref[...][None, :, :], axis=-1) + b_h3_ref[...]

    # --- confidence head: Linear(512,128)->ReLU->Linear(128,1)->Sigmoid
    c1 = jnp.maximum(
        jnp.dot(fusion_bf, w_c1_ref[...],
                preferred_element_type=jnp.float32) + b_c1_ref[...], 0.0)
    conf = jax.nn.sigmoid(
        jnp.sum(c1 * w_c2_ref[...], axis=-1, keepdims=True) + b_c2_ref[...])  # [rows, 1]

    # --- single lane-dense output slab: [logits | confidence | zero pad]
    pad = jnp.zeros((rows, HEAD_SLAB - NUM_CLASSES - 1), jnp.float32)
    head_ref[...] = jnp.concatenate([logits, conf, pad], axis=1)


# ---------------------------------------------------------------------------
# Parameters (mirror the PyTorch module's parameter set)
# ---------------------------------------------------------------------------
def init_params(in_channels, seed=0):
    keys = iter(jax.random.split(jax.random.PRNGKey(seed), 64))

    def nk():
        return next(keys)

    def dense(fan_in, fan_out):
        w = jax.random.normal(nk(), (fan_in, fan_out), jnp.float32) * 0.02
        b = jax.random.normal(nk(), (1, fan_out), jnp.float32) * 0.02
        return w, b

    p = {}
    # backbone stubs
    p['bb_wv'], p['bb_bv'] = dense(in_channels, VIT_DIM)
    p['bb_wc'], p['bb_bc'] = dense(in_channels, CONVNEXT_DIM)
    p['bb_we'], p['bb_be'] = dense(in_channels, EFFNET_DIM)
    # feature_projection: Linear(total_dim, 512)
    p['proj_w'], p['proj_b'] = dense(TOTAL_DIM, FUSION_DIM)
    # attention_fusion: MultiheadAttention(embed_dim=512, num_heads=8)
    p['attn_wq'], p['attn_bq'] = dense(FUSION_DIM, FUSION_DIM)
    p['attn_wk'], p['attn_bk'] = dense(FUSION_DIM, FUSION_DIM)
    p['attn_wv'], p['attn_bv'] = dense(FUSION_DIM, FUSION_DIM)
    p['attn_wo'], p['attn_bo'] = dense(FUSION_DIM, FUSION_DIM)
    # 4 subtype heads: Linear(512,256)->ReLU->Linear(256,128)->ReLU->Linear(128,1)
    p['head_w1'] = jax.random.normal(nk(), (NUM_CLASSES, FUSION_DIM, H1_DIM), jnp.float32) * 0.02
    p['head_b1'] = jax.random.normal(nk(), (NUM_CLASSES, 1, H1_DIM), jnp.float32) * 0.02
    p['head_w2'] = jax.random.normal(nk(), (NUM_CLASSES, H1_DIM, H2_DIM), jnp.float32) * 0.02
    p['head_b2'] = jax.random.normal(nk(), (NUM_CLASSES, 1, H2_DIM), jnp.float32) * 0.02
    p['head_w3'] = jax.random.normal(nk(), (NUM_CLASSES, H2_DIM, 1), jnp.float32) * 0.02
    p['head_b3'] = jax.random.normal(nk(), (NUM_CLASSES, 1, 1), jnp.float32) * 0.02
    # confidence head: Linear(512,128)->ReLU->Linear(128,1)->Sigmoid
    p['conf_w1'], p['conf_b1'] = dense(FUSION_DIM, CONF_DIM)
    p['conf_w2'], p['conf_b2'] = dense(CONF_DIM, 1)
    return p


def prepare_params(p):
    """Fuse / fold / cast parameters into the kernel-ready form (host, once)."""
    bf16 = jnp.bfloat16
    # backbone: one concatenated weight -> single matmul, no in-kernel concat
    w_bb = jnp.concatenate([p['bb_wv'], p['bb_wc'], p['bb_we']], axis=1)      # [C, 3328]
    b_bb = jnp.concatenate([p['bb_bv'], p['bb_bc'], p['bb_be']], axis=1)      # [1, 3328]
    # seq_len == 1 attention: q/k/softmax are dead; fold V proj into out proj (f32)
    w_vo = p['attn_wv'] @ p['attn_wo']                                        # [512, 512]
    b_vo = p['attn_bv'] @ p['attn_wo'] + p['attn_bo']                         # [1, 512]
    # heads layer 1: concat along output lanes
    w_h1 = jnp.concatenate([p['head_w1'][h] for h in range(NUM_CLASSES)], axis=1)  # [512,1024]
    b_h1 = jnp.concatenate([p['head_b1'][h] for h in range(NUM_CLASSES)], axis=1)  # [1,1024]
    # heads layer 2: block-diagonal so all 4 heads run as one matmul
    w_h2 = jnp.zeros((NUM_CLASSES * H1_DIM, NUM_CLASSES * H2_DIM), jnp.float32)
    for h in range(NUM_CLASSES):
        w_h2 = w_h2.at[h * H1_DIM:(h + 1) * H1_DIM,
                       h * H2_DIM:(h + 1) * H2_DIM].set(p['head_w2'][h])
    b_h2 = jnp.concatenate([p['head_b2'][h] for h in range(NUM_CLASSES)], axis=1)  # [1,512]
    # heads layer 3: [4, 128] rows (used as VPU multiply + lane reduce)
    w_h3 = jnp.concatenate([p['head_w3'][h].T for h in range(NUM_CLASSES)], axis=0)  # [4,128]
    b_h3 = jnp.concatenate([p['head_b3'][h] for h in range(NUM_CLASSES)], axis=1)    # [1,4]
    return dict(
        w_bb=w_bb.astype(bf16), b_bb=b_bb,
        w_proj=p['proj_w'].astype(bf16), b_proj=p['proj_b'],
        w_vo=w_vo.astype(bf16), b_vo=b_vo,
        w_h1=w_h1.astype(bf16), b_h1=b_h1,
        w_h2=w_h2.astype(bf16), b_h2=b_h2,
        w_h3=w_h3, b_h3=b_h3,                                  # tiny, keep f32 (VPU path)
        w_c1=p['conf_w1'].astype(bf16), b_c1=p['conf_b1'],
        w_c2=p['conf_w2'].T, b_c2=p['conf_b2'],                # [1,128], [1,1]
    )


_WEIGHT_ORDER = ('w_bb', 'b_bb', 'w_proj', 'b_proj', 'w_vo', 'b_vo',
                 'w_h1', 'b_h1', 'w_h2', 'b_h2', 'w_h3', 'b_h3',
                 'w_c1', 'b_c1', 'w_c2', 'b_c2')


# ---------------------------------------------------------------------------
# Forward pass (use_ensemble=True, use_attention=True, eval mode)
# ---------------------------------------------------------------------------
@jax.jit
def multiscale_forward(x, kp):
    b, c, hgt, wdt = x.shape
    hw = hgt * wdt
    x_flat = x.reshape(b, c, hw)

    # Pad the batch (sublane) dim to a multiple of 8; block rows at <=128 so a
    # "parallel" grid axis can be split across TensorCores (v7x) for big batches.
    row_block = 128 if b >= 128 else _round_up(b, 8)
    padded_b = _round_up(b, row_block)
    if padded_b != b:
        x_flat = jnp.pad(x_flat, ((0, padded_b - b), (0, 0), (0, 0)))
    grid = (padded_b // row_block,)

    weights = [kp[k] for k in _WEIGHT_ORDER]
    in_specs = [pl.BlockSpec((row_block, c, hw), lambda i: (i, 0, 0))]
    in_specs += [_resident_spec(w.shape) for w in weights]
    out_specs = (pl.BlockSpec((row_block, FUSION_DIM), lambda i: (i, 0)),
                 pl.BlockSpec((row_block, HEAD_SLAB), lambda i: (i, 0)))

    feat, head_slab = pl.pallas_call(
        _fused_kernel,
        grid=grid,
        out_shape=(jax.ShapeDtypeStruct((padded_b, FUSION_DIM), jnp.float32),
                   jax.ShapeDtypeStruct((padded_b, HEAD_SLAB), jnp.float32)),
        in_specs=in_specs,
        out_specs=out_specs,
        compiler_params=pltpu.CompilerParams(
            dimension_semantics=("parallel",),
            vmem_limit_bytes=32 * 1024 * 1024),
    )(x_flat, *weights)

    logits = head_slab[:b, :NUM_CLASSES]                 # torch.cat of the 4 heads
    confidence = head_slab[:b, NUM_CLASSES:NUM_CLASSES + 1]
    features = feat[:b]
    return {'logits': logits, 'confidence': confidence, 'features': features}


if __name__ == "__main__":
    key = jax.random.PRNGKey(0)
    B, C, H, W = 2, 3, 32, 32          # small RGB image batch
    x = jax.random.normal(key, (B, C, H, W), jnp.float32)

    params = init_params(in_channels=C, seed=0)
    kparams = prepare_params(params)

    out = multiscale_forward(x, kparams)
    jax.block_until_ready(out)

    assert out['logits'].shape == (B, NUM_CLASSES)
    assert out['confidence'].shape == (B, 1)
    assert out['features'].shape == (B, FUSION_DIM)
    print("KERNEL_OK")
</pallas_src>

<mosaic_0001>
module attributes {stable_mosaic.version = 11 : i64} {
  func.func @_fused_kernel(%arg0: i32, %arg1: memref<8x3x1024xf32, #tpu.memory_space<vmem>>, %arg2: memref<3x3328xbf16, #tpu.memory_space<vmem>>, %arg3: memref<1x3328xf32, #tpu.memory_space<vmem>>, %arg4: memref<3328x512xbf16, #tpu.memory_space<vmem>>, %arg5: memref<1x512xf32, #tpu.memory_space<vmem>>, %arg6: memref<512x512xbf16, #tpu.memory_space<vmem>>, %arg7: memref<1x512xf32, #tpu.memory_space<vmem>>, %arg8: memref<512x1024xbf16, #tpu.memory_space<vmem>>, %arg9: memref<1x1024xf32, #tpu.memory_space<vmem>>, %arg10: memref<1024x512xbf16, #tpu.memory_space<vmem>>, %arg11: memref<1x512xf32, #tpu.memory_space<vmem>>, %arg12: memref<4x128xf32, #tpu.memory_space<vmem>>, %arg13: memref<1x4xf32, #tpu.memory_space<vmem>>, %arg14: memref<512x128xbf16, #tpu.memory_space<vmem>>, %arg15: memref<1x128xf32, #tpu.memory_space<vmem>>, %arg16: memref<1x128xf32, #tpu.memory_space<vmem>>, %arg17: memref<1x1xf32, #tpu.memory_space<vmem>>, %arg18: memref<8x512xf32, #tpu.memory_space<vmem>>, %arg19: memref<8x128xf32, #tpu.memory_space<vmem>>) attributes {dimension_semantics = [#tpu.dimension_semantics<parallel>], iteration_bounds = array<i64: 1>, scalar_prefetch = 0 : i64, scratch_operands = 0 : i64, tpu.core_type = #tpu.core_type<tc>, window_params = [{transform_indices = @transform_0, window_bounds = array<i64: 8, 3, 1024>}, {pipeline_mode = #tpu.pipeline_mode<synchronous>, transform_indices = @transform_1, window_bounds = array<i64: 3, 3328>}, {pipeline_mode = #tpu.pipeline_mode<synchronous>, transform_indices = @transform_2, window_bounds = array<i64: 1, 3328>}, {pipeline_mode = #tpu.pipeline_mode<synchronous>, transform_indices = @transform_3, window_bounds = array<i64: 3328, 512>}, {pipeline_mode = #tpu.pipeline_mode<synchronous>, transform_indices = @transform_4, window_bounds = array<i64: 1, 512>}, {pipeline_mode = #tpu.pipeline_mode<synchronous>, transform_indices = @transform_5, window_bounds = array<i64: 512, 512>}, {pipeline_mode = #tpu.pipeline_mode<synchronous>, transform_indices = @transform_6, window_bounds = array<i64: 1, 512>}, {pipeline_mode = #tpu.pipeline_mode<synchronous>, transform_indices = @transform_7, window_bounds = array<i64: 512, 1024>}, {pipeline_mode = #tpu.pipeline_mode<synchronous>, transform_indices = @transform_8, window_bounds = array<i64: 1, 1024>}, {pipeline_mode = #tpu.pipeline_mode<synchronous>, transform_indices = @transform_9, window_bounds = array<i64: 1024, 512>}, {pipeline_mode = #tpu.pipeline_mode<synchronous>, transform_indices = @transform_10, window_bounds = array<i64: 1, 512>}, {pipeline_mode = #tpu.pipeline_mode<synchronous>, transform_indices = @transform_11, window_bounds = array<i64: 4, 128>}, {pipeline_mode = #tpu.pipeline_mode<synchronous>, transform_indices = @transform_12, window_bounds = array<i64: 1, 4>}, {pipeline_mode = #tpu.pipeline_mode<synchronous>, transform_indices = @transform_13, window_bounds = array<i64: 512, 128>}, {pipeline_mode = #tpu.pipeline_mode<synchronous>, transform_indices = @transform_14, window_bounds = array<i64: 1, 128>}, {pipeline_mode = #tpu.pipeline_mode<synchronous>, transform_indices = @transform_15, window_bounds = array<i64: 1, 128>}, {pipeline_mode = #tpu.pipeline_mode<synchronous>, transform_indices = @transform_16, window_bounds = array<i64: 1, 1>}, {transform_indices = @transform_17, window_bounds = array<i64: 8, 512>}, {transform_indices = @transform_18, window_bounds = array<i64: 8, 128>}]} {
    %c0 = arith.constant 0 : index
    %c0_0 = arith.constant 0 : index
    %c0_1 = arith.constant 0 : index
    %0 = vector.load %arg1[%c0, %c0_0, %c0_1] : memref<8x3x1024xf32, #tpu.memory_space<vmem>>, vector<8x3x1024xf32>
    %cst = arith.constant dense<0.000000e+00> : vector<8x3xf32>
    %1 = vector.multi_reduction <add>, %0, %cst [2] : vector<8x3x1024xf32> to vector<8x3xf32>
    %cst_2 = arith.constant 1.024000e+03 : f32
    %2 = vector.broadcast %cst_2 : f32 to vector<8x3xf32>
    %3 = arith.divf %1, %2 : vector<8x3xf32>
    %4 = arith.truncf %3 : vector<8x3xf32> to vector<8x3xbf16>
    %c0_3 = arith.constant 0 : index
    %c0_4 = arith.constant 0 : index
    %5 = vector.load %arg2[%c0_3, %c0_4] : memref<3x3328xbf16, #tpu.memory_space<vmem>>, vector<3x3328xbf16>
    %cst_5 = arith.constant dense<0.000000e+00> : vector<8x3328xf32>
    %6 = tpu.matmul %4, %5, %cst_5 {dimension_numbers = #tpu.dot_dimension_numbers<[1], [0], [0], [1], [0, 0, 1, 1], [], []>} : vector<8x3xbf16>, vector<3x3328xbf16>, vector<8x3328xf32> -> vector<8x3328xf32>
    %c0_6 = arith.constant 0 : index
    %c0_7 = arith.constant 0 : index
    %7 = vector.load %arg3[%c0_6, %c0_7] : memref<1x3328xf32, #tpu.memory_space<vmem>>, vector<1x3328xf32>
    %8 = vector.broadcast %7 : vector<1x3328xf32> to vector<8x3328xf32>
    %9 = arith.addf %6, %8 : vector<8x3328xf32>
    %10 = arith.truncf %9 : vector<8x3328xf32> to vector<8x3328xbf16>
    %c0_8 = arith.constant 0 : index
    %c0_9 = arith.constant 0 : index
    %11 = vector.load %arg4[%c0_8, %c0_9] : memref<3328x512xbf16, #tpu.memory_space<vmem>>, vector<3328x512xbf16>
    %cst_10 = arith.constant dense<0.000000e+00> : vector<8x512xf32>
    %12 = tpu.matmul %10, %11, %cst_10 {dimension_numbers = #tpu.dot_dimension_numbers<[1], [0], [0], [1], [0, 0, 1, 1], [], []>} : vector<8x3328xbf16>, vector<3328x512xbf16>, vector<8x512xf32> -> vector<8x512xf32>
    %c0_11 = arith.constant 0 : index
    %c0_12 = arith.constant 0 : index
    %13 = vector.load %arg5[%c0_11, %c0_12] : memref<1x512xf32, #tpu.memory_space<vmem>>, vector<1x512xf32>
    %14 = vector.broadcast %13 : vector<1x512xf32> to vector<8x512xf32>
    %15 = arith.addf %12, %14 : vector<8x512xf32>
    %16 = arith.truncf %15 : vector<8x512xf32> to vector<8x512xbf16>
    %c0_13 = arith.constant 0 : index
    %c0_14 = arith.constant 0 : index
    %17 = vector.load %arg6[%c0_13, %c0_14] : memref<512x512xbf16, #tpu.memory_space<vmem>>, vector<512x512xbf16>
    %cst_15 = arith.constant dense<0.000000e+00> : vector<8x512xf32>
    %18 = tpu.matmul %16, %17, %cst_15 {dimension_numbers = #tpu.dot_dimension_numbers<[1], [0], [0], [1], [0, 0, 1, 1], [], []>} : vector<8x512xbf16>, vector<512x512xbf16>, vector<8x512xf32> -> vector<8x512xf32>
    %c0_16 = arith.constant 0 : index
    %c0_17 = arith.constant 0 : index
    %19 = vector.load %arg7[%c0_16, %c0_17] : memref<1x512xf32, #tpu.memory_space<vmem>>, vector<1x512xf32>
    %20 = vector.broadcast %19 : vector<1x512xf32> to vector<8x512xf32>
    %21 = arith.addf %18, %20 : vector<8x512xf32>
    %c0_18 = arith.constant 0 : index
    %c0_19 = arith.constant 0 : index
    %22 = vector.load %arg18[%c0_18, %c0_19] : memref<8x512xf32, #tpu.memory_space<vmem>>, vector<8x512xf32>
    tpu.vector_store %arg18[%c0_18, %c0_19], %21 {strides = array<i32>} : memref<8x512xf32, #tpu.memory_space<vmem>>, vector<8x512xf32>,
    %23 = arith.truncf %21 : vector<8x512xf32> to vector<8x512xbf16>
    %c0_20 = arith.constant 0 : index
    %c0_21 = arith.constant 0 : index
    %24 = vector.load %arg8[%c0_20, %c0_21] : memref<512x1024xbf16, #tpu.memory_space<vmem>>, vector<512x1024xbf16>
    %cst_22 = arith.constant dense<0.000000e+00> : vector<8x1024xf32>
    %25 = tpu.matmul %23, %24, %cst_22 {dimension_numbers = #tpu.dot_dimension_numbers<[1], [0], [0], [1], [0, 0, 1, 1], [], []>} : vector<8x512xbf16>, vector<512x1024xbf16>, vector<8x1024xf32> -> vector<8x1024xf32>
    %c0_23 = arith.constant 0 : index
    %c0_24 = arith.constant 0 : index
    %26 = vector.load %arg9[%c0_23, %c0_24] : memref<1x1024xf32, #tpu.memory_space<vmem>>, vector<1x1024xf32>
    %27 = vector.broadcast %26 : vector<1x1024xf32> to vector<8x1024xf32>
    %28 = arith.addf %25, %27 : vector<8x1024xf32>
    %cst_25 = arith.constant 0.000000e+00 : f32
    %29 = vector.broadcast %cst_25 : f32 to vector<8x1024xf32>
    %30 = arith.maximumf %28, %29 : vector<8x1024xf32>
    %31 = arith.truncf %30 : vector<8x1024xf32> to vector<8x1024xbf16>
    %c0_26 = arith.constant 0 : index
    %c0_27 = arith.constant 0 : index
    %32 = vector.load %arg10[%c0_26, %c0_27] : memref<1024x512xbf16, #tpu.memory_space<vmem>>, vector<1024x512xbf16>
    %cst_28 = arith.constant dense<0.000000e+00> : vector<8x512xf32>
    %33 = tpu.matmul %31, %32, %cst_28 {dimension_numbers = #tpu.dot_dimension_numbers<[1], [0], [0], [1], [0, 0, 1, 1], [], []>} : vector<8x1024xbf16>, vector<1024x512xbf16>, vector<8x512xf32> -> vector<8x512xf32>
    %c0_29 = arith.constant 0 : index
    %c0_30 = arith.constant 0 : index
    %34 = vector.load %arg11[%c0_29, %c0_30] : memref<1x512xf32, #tpu.memory_space<vmem>>, vector<1x512xf32>
    %35 = vector.broadcast %34 : vector<1x512xf32> to vector<8x512xf32>
    %36 = arith.addf %33, %35 : vector<8x512xf32>
    %cst_31 = arith.constant 0.000000e+00 : f32
    %37 = vector.broadcast %cst_31 : f32 to vector<8x512xf32>
    %38 = arith.maximumf %36, %37 : vector<8x512xf32>
    %39 = vector.shape_cast %38 : vector<8x512xf32> to vector<8x4x128xf32>
    %c0_32 = arith.constant 0 : index
    %c0_33 = arith.constant 0 : index
    %40 = vector.load %arg12[%c0_32, %c0_33] : memref<4x128xf32, #tpu.memory_space<vmem>>, vector<4x128xf32>
    %41 = vector.shape_cast %40 : vector<4x128xf32> to vector<1x4x128xf32>
    %42 = vector.broadcast %41 : vector<1x4x128xf32> to vector<8x4x128xf32>
    %43 = arith.mulf %39, %42 : vector<8x4x128xf32>
    %cst_34 = arith.constant dense<0.000000e+00> : vector<8x4xf32>
    %44 = vector.multi_reduction <add>, %43, %cst_34 [2] : vector<8x4x128xf32> to vector<8x4xf32>
    %c0_35 = arith.constant 0 : index
    %c0_36 = arith.constant 0 : index
    %45 = vector.load %arg13[%c0_35, %c0_36] : memref<1x4xf32, #tpu.memory_space<vmem>>, vector<1x4xf32>
    %46 = vector.broadcast %45 : vector<1x4xf32> to vector<8x4xf32>
    %47 = arith.addf %44, %46 : vector<8x4xf32>
    %c0_37 = arith.constant 0 : index
    %c0_38 = arith.constant 0 : index
    %48 = vector.load %arg14[%c0_37, %c0_38] : memref<512x128xbf16, #tpu.memory_space<vmem>>, vector<512x128xbf16>
    %cst_39 = arith.constant dense<0.000000e+00> : vector<8x128xf32>
    %49 = tpu.matmul %23, %48, %cst_39 {dimension_numbers = #tpu.dot_dimension_numbers<[1], [0], [0], [1], [0, 0, 1, 1], [], []>} : vector<8x512xbf16>, vector<512x128xbf16>, vector<8x128xf32> -> vector<8x128xf32>
    %c0_40 = arith.constant 0 : index
    %c0_41 = arith.constant 0 : index
    %50 = vector.load %arg15[%c0_40, %c0_41] : memref<1x128xf32, #tpu.memory_space<vmem>>, vector<1x128xf32>
    %51 = vector.broadcast %50 : vector<1x128xf32> to vector<8x128xf32>
    %52 = arith.addf %49, %51 : vector<8x128xf32>
    %cst_42 = arith.constant 0.000000e+00 : f32
    %53 = vector.broadcast %cst_42 : f32 to vector<8x128xf32>
    %54 = arith.maximumf %52, %53 : vector<8x128xf32>
    %c0_43 = arith.constant 0 : index
    %c0_44 = arith.constant 0 : index
    %55 = vector.load %arg16[%c0_43, %c0_44] : memref<1x128xf32, #tpu.memory_space<vmem>>, vector<1x128xf32>
    %56 = vector.broadcast %55 : vector<1x128xf32> to vector<8x128xf32>
    %57 = arith.mulf %54, %56 : vector<8x128xf32>
    %cst_45 = arith.constant dense<0.000000e+00> : vector<8xf32>
    %58 = vector.multi_reduction <add>, %57, %cst_45 [1] : vector<8x128xf32> to vector<8xf32>
    %59 = vector.shape_cast %58 : vector<8xf32> to vector<8x1xf32>
    %c0_46 = arith.constant 0 : index
    %c0_47 = arith.constant 0 : index
    %60 = vector.load %arg17[%c0_46, %c0_47] : memref<1x1xf32, #tpu.memory_space<vmem>>, vector<1x1xf32>
    %61 = vector.broadcast %60 : vector<1x1xf32> to vector<8x1xf32>
    %62 = arith.addf %59, %61 : vector<8x1xf32>
    %63 = arith.negf %62 : vector<8x1xf32>
    %64 = math.exp %63 : vector<8x1xf32>
    %cst_48 = arith.constant 1.000000e+00 : f32
    %65 = vector.broadcast %cst_48 : f32 to vector<8x1xf32>
    %66 = arith.addf %65, %64 : vector<8x1xf32>
    %67 = arith.divf %65, %66 : vector<8x1xf32>
    %cst_49 = arith.constant 0.000000e+00 : f32
    %68 = vector.broadcast %cst_49 : f32 to vector<8x123xf32>
    %69 = tpu.concatenate %47, %67, %68 in 1 : vector<8x4xf32>, vector<8x1xf32>, vector<8x123xf32> -> vector<8x128xf32>
    %c0_50 = arith.constant 0 : index
    %c0_51 = arith.constant 0 : index
    %70 = vector.load %arg19[%c0_50, %c0_51] : memref<8x128xf32, #tpu.memory_space<vmem>>, vector<8x128xf32>
    tpu.vector_store %arg19[%c0_50, %c0_51], %69 {strides = array<i32>} : memref<8x128xf32, #tpu.memory_space<vmem>>, vector<8x128xf32>,
    return
  }
  func.func @transform_0(%arg0: i32) -> (i32, i32, i32) {
    %c0_i32 = arith.constant 0 : i32
    %c0_i32_0 = arith.constant 0 : i32
    %c0_i32_1 = arith.constant 0 : i32
    return %arg0, %c0_i32, %c0_i32_0 : i32, i32, i32
  }
  func.func @transform_1(%arg0: i32) -> (i32, i32) {
    %c0_i32 = arith.constant 0 : i32
    %c0_i32_0 = arith.constant 0 : i32
    %c0_i32_1 = arith.constant 0 : i32
    return %c0_i32, %c0_i32_0 : i32, i32
  }
  func.func @transform_2(%arg0: i32) -> (i32, i32) {
    %c0_i32 = arith.constant 0 : i32
    %c0_i32_0 = arith.constant 0 : i32
    %c0_i32_1 = arith.constant 0 : i32
    return %c0_i32, %c0_i32_0 : i32, i32
  }
  func.func @transform_3(%arg0: i32) -> (i32, i32) {
    %c0_i32 = arith.constant 0 : i32
    %c0_i32_0 = arith.constant 0 : i32
    %c0_i32_1 = arith.constant 0 : i32
    return %c0_i32, %c0_i32_0 : i32, i32
  }
  func.func @transform_4(%arg0: i32) -> (i32, i32) {
    %c0_i32 = arith.constant 0 : i32
    %c0_i32_0 = arith.constant 0 : i32
    %c0_i32_1 = arith.constant 0 : i32
    return %c0_i32, %c0_i32_0 : i32, i32
  }
  func.func @transform_5(%arg0: i32) -> (i32, i32) {
    %c0_i32 = arith.constant 0 : i32
    %c0_i32_0 = arith.constant 0 : i32
    %c0_i32_1 = arith.constant 0 : i32
    return %c0_i32, %c0_i32_0 : i32, i32
  }
  func.func @transform_6(%arg0: i32) -> (i32, i32) {
    %c0_i32 = arith.constant 0 : i32
    %c0_i32_0 = arith.constant 0 : i32
    %c0_i32_1 = arith.constant 0 : i32
    return %c0_i32, %c0_i32_0 : i32, i32
  }
  func.func @transform_7(%arg0: i32) -> (i32, i32) {
    %c0_i32 = arith.constant 0 : i32
    %c0_i32_0 = arith.constant 0 : i32
    %c0_i32_1 = arith.constant 0 : i32
    return %c0_i32, %c0_i32_0 : i32, i32
  }
  func.func @transform_8(%arg0: i32) -> (i32, i32) {
    %c0_i32 = arith.constant 0 : i32
    %c0_i32_0 = arith.constant 0 : i32
    %c0_i32_1 = arith.constant 0 : i32
    return %c0_i32, %c0_i32_0 : i32, i32
  }
  func.func @transform_9(%arg0: i32) -> (i32, i32) {
    %c0_i32 = arith.constant 0 : i32
    %c0_i32_0 = arith.constant 0 : i32
    %c0_i32_1 = arith.constant 0 : i32
    return %c0_i32, %c0_i32_0 : i32, i32
  }
  func.func @transform_10(%arg0: i32) -> (i32, i32) {
    %c0_i32 = arith.constant 0 : i32
    %c0_i32_0 = arith.constant 0 : i32
    %c0_i32_1 = arith.constant 0 : i32
    return %c0_i32, %c0_i32_0 : i32, i32
  }
  func.func @transform_11(%arg0: i32) -> (i32, i32) {
    %c0_i32 = arith.constant 0 : i32
    %c0_i32_0 = arith.constant 0 : i32
    %c0_i32_1 = arith.constant 0 : i32
    return %c0_i32, %c0_i32_0 : i32, i32
  }
  func.func @transform_12(%arg0: i32) -> (i32, i32) {
    %c0_i32 = arith.constant 0 : i32
    %c0_i32_0 = arith.constant 0 : i32
    %c0_i32_1 = arith.constant 0 : i32
    return %c0_i32, %c0_i32_0 : i32, i32
  }
  func.func @transform_13(%arg0: i32) -> (i32, i32) {
    %c0_i32 = arith.constant 0 : i32
    %c0_i32_0 = arith.constant 0 : i32
    %c0_i32_1 = arith.constant 0 : i32
    return %c0_i32, %c0_i32_0 : i32, i32
  }
  func.func @transform_14(%arg0: i32) -> (i32, i32) {
    %c0_i32 = arith.constant 0 : i32
    %c0_i32_0 = arith.constant 0 : i32
    %c0_i32_1 = arith.constant 0 : i32
    return %c0_i32, %c0_i32_0 : i32, i32
  }
  func.func @transform_15(%arg0: i32) -> (i32, i32) {
    %c0_i32 = arith.constant 0 : i32
    %c0_i32_0 = arith.constant 0 : i32
    %c0_i32_1 = arith.constant 0 : i32
    return %c0_i32, %c0_i32_0 : i32, i32
  }
  func.func @transform_16(%arg0: i32) -> (i32, i32) {
    %c0_i32 = arith.constant 0 : i32
    %c0_i32_0 = arith.constant 0 : i32
    %c0_i32_1 = arith.constant 0 : i32
    return %c0_i32, %c0_i32_0 : i32, i32
  }
  func.func @transform_17(%arg0: i32) -> (i32, i32) {
    %c0_i32 = arith.constant 0 : i32
    %c0_i32_0 = arith.constant 0 : i32
    return %arg0, %c0_i32 : i32, i32
  }
  func.func @transform_18(%arg0: i32) -> (i32, i32) {
    %c0_i32 = arith.constant 0 : i32
    %c0_i32_0 = arith.constant 0 : i32
    return %arg0, %c0_i32 : i32, i32
  }
}

</mosaic_0001>

<bundles_post_ra>
// kernel: multiscale_forward.1
= control target key start
LH: loop header
LB: loop body
LE: loop exit
PB: predicated region body
PF: predicated region fallthrough
CT: control target
= control target key end

     0   :  { %s17828_s0 = inlined_call_operand.vmem [shape: f32[8,3,1024], index: 0, kind: input, shape index: {}]   ;;  %s17829_s1 = inlined_call_operand.hbm [shape: bf16[3,3328], index: 1, kind: input, shape index: {}]   ;;  %s17830_s2 = inlined_call_operand.hbm [shape: f32[1,3328], index: 2, kind: input, shape index: {}]   ;;  %s17831_s3 = inlined_call_operand.hbm [shape: bf16[3328,512], index: 3, kind: input, shape index: {}]   ;;  %s17832_s4 = inlined_call_operand.hbm [shape: f32[1,512], index: 4, kind: input, shape index: {}]   ;;  %s17833_s5 = inlined_call_operand.hbm [shape: bf16[512,512], index: 5, kind: input, shape index: {}]   ;;  %s17834_s6 = inlined_call_operand.hbm [shape: f32[1,512], index: 6, kind: input, shape index: {}]   ;;  %s17835_s7 = inlined_call_operand.hbm [shape: bf16[512,1024], index: 7, kind: input, shape index: {}]   ;;  %s17836_s8 = inlined_call_operand.hbm [shape: f32[1,1024], index: 8, kind: input, shape index: {}]   ;;  %s17837_s9 = inlined_call_operand.hbm [shape: bf16[1024,512], index: 9, kind: input, shape index: {}]   ;;  %s17838_s10 = inlined_call_operand.hbm [shape: f32[1,512], index: 10, kind: input, shape index: {}]   ;;  %s17839_s11 = inlined_call_operand.hbm [shape: f32[4,128], index: 11, kind: input, shape index: {}]   ;;  %s17840_s12 = inlined_call_operand.hbm [shape: f32[1,4], index: 12, kind: input, shape index: {}]   ;;  %s17841_s13 = inlined_call_operand.hbm [shape: bf16[512,128], index: 13, kind: input, shape index: {}]   ;;  %s17842_s14 = inlined_call_operand.hbm [shape: f32[1,128], index: 14, kind: input, shape index: {}]   ;;  %s17843_s15 = inlined_call_operand.hbm [shape: f32[1,128], index: 15, kind: input, shape index: {}]   ;;  %s17844_s16 = inlined_call_operand.<no memory space> [shape: f32[1,1], index: 16, kind: input, shape index: {}]   ;;  %s17845_s17 = inlined_call_operand.vmem [shape: f32[8,512], index: 17, kind: output, shape index: {0}]   ;;  %s17846_s18 = inlined_call_operand.vmem [shape: f32[8,128], index: 18, kind: output, shape index: {1}]  }
   0x1   :  { %17850 = sst [smem:[#allocation34_spill]] %s17828_s0  ;;  %v24_v0 = vstv %s17844_s16 }
   0x2   :  { %17851 = sst [smem:[#allocation35_spill]] %s17829_s1  ;;  %25 = vst [vmem:[#allocation2] sm:$0x1] %v24_v0 }
   0x3   :  { %17852 = sst [smem:[#allocation36_spill]] %s17830_s2 }
   0x4   :  { %26 = vsyncpa [#allocation4], 0 }
   0x5   :  { %27 = vsyncpa [#allocation6], 0 }
   0x6   :  { %28 = vsyncpa [#allocation9], 0 }
   0x7   :  { %29 = vsyncpa [#allocation12], 0 }
   0x8   :  { %30 = vsyncpa [#allocation15], 0 }
   0x9   :  { %31 = vsyncpa [#allocation18], 0 }
   0xa   :  { %32 = vsyncpa [#allocation21], 0 }
   0xb   :  { %33 = vsyncpa [#allocation24], 0  ;;  %s16947_s29 = smov [#allocation5]   ;;  %s16948_s0 = smov [#allocation8]  }
   0xc   :  { %s52_s30 = sshll.u32 %s16947_s29, 4  ;;  %s74_s19 = sshll.u32 %s16948_s0, 4  ;;  %s53_s30 = int_to_ptr.vmem [resolvable:$true] %s52_s30  ;;  %s75_s19 = int_to_ptr.vmem [resolvable:$true] %s74_s19 }
   0xd   :  { %s17853_s21 = sld [smem:[#allocation36_spill]] }
  0x13   :  { %s16601_s22 = scalar_lea.hbm %s17853_s21, 416 }
  0x14   :  { %p16602_p0 = scmp.ne.s32.totalorder %s17853_s21, %s16601_s22  ;;  %p16605_p1 = scmp.lt.u32.totalorder %s16601_s22, %s17853_s21 }
  0x16   :  { %p16607_p2 = pnand %p16605_p1, %p16602_p0 }
  0x18   :  { %16610 = shalt.err (!%p16607_p2)
}
  0x19   :  { %s16611_s25 = scalar_lea.vmem %s53_s30, 416  ;;  %p16616_p4 = scmp.lt.s32.totalorder %s53_s30, %s53_s30 }
  0x1a   :  { %p16612_p3 = scmp.ne.s32.totalorder %s53_s30, %s16611_s25  ;;  %p16617_p5 = scmp.lt.s32.totalorder %s16611_s25, %s16611_s25 }
  0x1c   :  { %p16618_p6 = por %p16617_p5, %p16616_p4 }
  0x1e   :  { %p16619_p7 = pnand %p16618_p6, %p16612_p3 }
  0x20   :  { %16622 = shalt.err (!%p16619_p7)
}
  0x21   :  { %55 = dma.hbm_to_vmem [thread:$0]  %s17853_s21, 416, %s53_s30, [#allocation6]  }
  0x22   :  { %s16623_s0 = scalar_lea.hbm %s17832_s4, 64 }
  0x23   :  { %p16624_p8 = scmp.ne.s32.totalorder %s17832_s4, %s16623_s0  ;;  %p16627_p9 = scmp.lt.u32.totalorder %s16623_s0, %s17832_s4 }
  0x25   :  { %p16629_p10 = pnand %p16627_p9, %p16624_p8 }
  0x27   :  { %16632 = shalt.err (!%p16629_p10)
}
  0x28   :  { %s16633_s2 = scalar_lea.vmem %s75_s19, 64  ;;  %p16638_p12 = scmp.lt.s32.totalorder %s75_s19, %s75_s19 }
  0x29   :  { %p16634_p11 = scmp.ne.s32.totalorder %s75_s19, %s16633_s2  ;;  %p16639_p13 = scmp.lt.s32.totalorder %s16633_s2, %s16633_s2 }
  0x2b   :  { %p16640_p0 = por %p16639_p13, %p16638_p12 }
  0x2d   :  { %p16641_p1 = pnand %p16640_p0, %p16634_p11 }
  0x2f   :  { %16644 = shalt.err (!%p16641_p1)
}
  0x30   :  { %77 = dma.hbm_to_vmem [thread:$0]  %s17832_s4, 64, %s75_s19, [#allocation9]  }
  0x31   :  { %s16949_s23 = smov [#allocation11]   ;;  %s16950_s25 = smov [#allocation14]  }
  0x32   :  { %s96_s24 = sshll.u32 %s16949_s23, 4  ;;  %s118_s26 = sshll.u32 %s16950_s25, 4  ;;  %s97_s24 = int_to_ptr.vmem [resolvable:$true] %s96_s24  ;;  %s119_s26 = int_to_ptr.vmem [resolvable:$true] %s118_s26 }
  0x33   :  { %s16645_s29 = scalar_lea.hbm %s17834_s6, 64 }
  0x34   :  { %p16646_p2 = scmp.ne.s32.totalorder %s17834_s6, %s16645_s29  ;;  %p16649_p3 = scmp.lt.u32.totalorder %s16645_s29, %s17834_s6 }
  0x36   :  { %p16651_p4 = pnand %p16649_p3, %p16646_p2 }
  0x38   :  { %16654 = shalt.err (!%p16651_p4)
}
  0x39   :  { %s16655_s4 = scalar_lea.vmem %s97_s24, 64  ;;  %p16660_p6 = scmp.lt.s32.totalorder %s97_s24, %s97_s24 }
  0x3a   :  { %p16656_p5 = scmp.ne.s32.totalorder %s97_s24, %s16655_s4  ;;  %p16661_p7 = scmp.lt.s32.totalorder %s16655_s4, %s16655_s4 }
  0x3c   :  { %p16662_p8 = por %p16661_p7, %p16660_p6 }
  0x3e   :  { %p16663_p9 = pnand %p16662_p8, %p16656_p5 }
  0x40   :  { %16666 = shalt.err (!%p16663_p9)
}
  0x41   :  { %99 = dma.hbm_to_vmem [thread:$0]  %s17834_s6, 64, %s97_s24, [#allocation12]  }
  0x42   :  { %s16667_s21 = scalar_lea.hbm %s17836_s8, 128 }
  0x43   :  { %p16668_p10 = scmp.ne.s32.totalorder %s17836_s8, %s16667_s21  ;;  %p16671_p11 = scmp.lt.u32.totalorder %s16667_s21, %s17836_s8 }
  0x45   :  { %p16673_p12 = pnand %p16671_p11, %p16668_p10 }
  0x47   :  { %16676 = shalt.err (!%p16673_p12)
}
  0x48   :  { %s16677_s29 = scalar_lea.vmem %s119_s26, 128  ;;  %p16682_p0 = scmp.lt.s32.totalorder %s119_s26, %s119_s26 }
  0x49   :  { %p16678_p13 = scmp.ne.s32.totalorder %s119_s26, %s16677_s29  ;;  %p16683_p1 = scmp.lt.s32.totalorder %s16677_s29, %s16677_s29 }
  0x4b   :  { %p16684_p2 = por %p16683_p1, %p16682_p0 }
  0x4d   :  { %p16685_p3 = pnand %p16684_p2, %p16678_p13 }
  0x4f   :  { %16688 = shalt.err (!%p16685_p3)
}
  0x50   :  { %121 = dma.hbm_to_vmem [thread:$0]  %s17836_s8, 128, %s119_s26, [#allocation15]  }
  0x51   :  { %s16951_s0 = smov [#allocation17]   ;;  %s16952_s20 = smov [#allocation20]  }
  0x52   :  { %s140_s1 = sshll.u32 %s16951_s0, 4  ;;  %s160_s22 = sshll.u32 %s16952_s20, 4  ;;  %s141_s1 = int_to_ptr.vmem [resolvable:$true] %s140_s1  ;;  %s161_s22 = int_to_ptr.vmem [resolvable:$true] %s160_s22 }
  0x53   :  { %s16689_s16 = scalar_lea.hbm %s17838_s10, 64 }
  0x54   :  { %p16690_p4 = scmp.ne.s32.totalorder %s17838_s10, %s16689_s16  ;;  %p16693_p5 = scmp.lt.u32.totalorder %s16689_s16, %s17838_s10 }
  0x56   :  { %p16695_p6 = pnand %p16693_p5, %p16690_p4 }
  0x58   :  { %16698 = shalt.err (!%p16695_p6)
}
  0x59   :  { %s16699_s8 = scalar_lea.vmem %s141_s1, 64  ;;  %p16704_p8 = scmp.lt.s32.totalorder %s141_s1, %s141_s1 }
  0x5a   :  { %p16700_p7 = scmp.ne.s32.totalorder %s141_s1, %s16699_s8  ;;  %p16705_p9 = scmp.lt.s32.totalorder %s16699_s8, %s16699_s8 }
  0x5c   :  { %p16706_p10 = por %p16705_p9, %p16704_p8 }
  0x5e   :  { %p16707_p11 = pnand %p16706_p10, %p16700_p7 }
  0x60   :  { %16710 = shalt.err (!%p16707_p11)
}
  0x61   :  { %143 = dma.hbm_to_vmem [thread:$0]  %s17838_s10, 64, %s141_s1, [#allocation18]  }
  0x62   :  { %s16711_s29 = scalar_lea.hbm %s17840_s12, 16 }
  0x63   :  { %p16712_p12 = scmp.ne.s32.totalorder %s17840_s12, %s16711_s29  ;;  %p16715_p13 = scmp.lt.u32.totalorder %s16711_s29, %s17840_s12 }
  0x65   :  { %p16717_p0 = pnand %p16715_p13, %p16712_p12 }
  0x67   :  { %16720 = shalt.err (!%p16717_p0)
}
  0x68   :  { %s16721_s4 = scalar_lea.vmem %s161_s22, 16  ;;  %s16725_s19 = scalar_lea.vmem %s161_s22, 32 }
  0x69   :  { %p16722_p1 = scmp.ne.s32.totalorder %s161_s22, %s16721_s4  ;;  %p16726_p2 = scmp.lt.s32.totalorder %s161_s22, %s161_s22 }
  0x6a   :  { %p16727_p3 = scmp.lt.s32.totalorder %s16725_s19, %s16721_s4 }
  0x6c   :  { %p16728_p4 = por %p16727_p3, %p16726_p2 }
  0x6e   :  { %p16729_p5 = pnand %p16728_p4, %p16722_p1 }
  0x70   :  { %16732 = shalt.err (!%p16729_p5)
}
  0x71   :  { %163 = dma.hbm_to_vmem [thread:$0]  %s17840_s12, 16, %s161_s22, [#allocation21]  }
  0x72   :  { %s16953_s16 = smov [#allocation23]   ;;  %s16954_s30 = smov [#allocation3]  }
  0x73   :  { %s182_s2 = sshll.u32 %s16953_s16, 4  ;;  %s42_s21 = sshll.u32 %s16954_s30, 4  ;;  %s183_s2 = int_to_ptr.vmem [resolvable:$true] %s182_s2  ;;  %s43_s21 = int_to_ptr.vmem [resolvable:$true] %s42_s21 }
  0x74   :  { %s16733_s26 = scalar_lea.hbm %s17842_s14, 16 }
  0x75   :  { %p16734_p6 = scmp.ne.s32.totalorder %s17842_s14, %s16733_s26  ;;  %p16737_p7 = scmp.lt.u32.totalorder %s16733_s26, %s17842_s14 }
  0x77   :  { %p16739_p8 = pnand %p16737_p7, %p16734_p6 }
  0x79   :  { %16742 = shalt.err (!%p16739_p8)
}
  0x7a   :  { %s16743_s12 = scalar_lea.vmem %s183_s2, 16  ;;  %s16747_s22 = scalar_lea.vmem %s183_s2, 32 }
  0x7b   :  { %p16744_p9 = scmp.ne.s32.totalorder %s183_s2, %s16743_s12  ;;  %p16748_p10 = scmp.lt.s32.totalorder %s183_s2, %s183_s2 }
  0x7c   :  { %p16749_p11 = scmp.lt.s32.totalorder %s16747_s22, %s16743_s12 }
  0x7e   :  { %p16750_p12 = por %p16749_p11, %p16748_p10 }
  0x80   :  { %p16751_p13 = pnand %p16750_p12, %p16744_p9 }
  0x82   :  { %16754 = shalt.err (!%p16751_p13)
}
  0x83   :  { %185 = dma.hbm_to_vmem [thread:$0]  %s17842_s14, 16, %s183_s2, [#allocation24]  }
  0x84   :  { %s17854_s4 = sld [smem:[#allocation35_spill]] }
  0x8a   :  { %s16755_s19 = scalar_lea.hbm %s17854_s4, 832 }
  0x8b   :  { %p16756_p0 = scmp.ne.s32.totalorder %s17854_s4, %s16755_s19  ;;  %p16759_p1 = scmp.lt.u32.totalorder %s16755_s19, %s17854_s4 }
  0x8d   :  { %p16761_p2 = pnand %p16759_p1, %p16756_p0 }
  0x8f   :  { %16764 = shalt.err (!%p16761_p2)
}
  0x90   :  { %s16765_s23 = scalar_lea.vmem %s43_s21, 832  ;;  %p16770_p4 = scmp.lt.s32.totalorder %s43_s21, %s43_s21 }
  0x91   :  { %p16766_p3 = scmp.ne.s32.totalorder %s43_s21, %s16765_s23  ;;  %p16771_p5 = scmp.lt.s32.totalorder %s16765_s23, %s16765_s23 }
  0x93   :  { %p16772_p6 = por %p16771_p5, %p16770_p4 }
  0x95   :  { %p16773_p7 = pnand %p16772_p6, %p16766_p3 }
  0x97   :  { %16776 = shalt.err (!%p16773_p7)
}
  0x98   :  { %45 = dma.hbm_to_vmem [thread:$0]  %s17854_s4, 832, %s43_s21, [#allocation4]  }
  0x99   :  { %s16955_s8 = smov [#allocation7]   ;;  %s16777_s28 = scalar_lea.hbm %s17831_s3, 106496 }
  0x9a   :  { %s61_s26 = sshll.u32 %s16955_s8, 4  ;;  %p16778_p8 = scmp.ne.s32.totalorder %s17831_s3, %s16777_s28  ;;  %s62_s26 = int_to_ptr.vmem [resolvable:$true] %s61_s26 }
  0x9b   :  { %p16781_p9 = scmp.lt.u32.totalorder %s16777_s28, %s17831_s3 }
  0x9d   :  { %p16783_p10 = pnand %p16781_p9, %p16778_p8 }
  0x9f   :  { %16786 = shalt.err (!%p16783_p10)
}
  0xa0   :  { %s16787_s24 = scalar_lea.vmem %s62_s26, 106496  ;;  %p16792_p12 = scmp.lt.s32.totalorder %s62_s26, %s62_s26 }
  0xa1   :  { %p16788_p11 = scmp.ne.s32.totalorder %s62_s26, %s16787_s24  ;;  %p16793_p13 = scmp.lt.s32.totalorder %s16787_s24, %s16787_s24 }
  0xa3   :  { %p16794_p0 = por %p16793_p13, %p16792_p12 }
  0xa5   :  { %p16795_p1 = pnand %p16794_p0, %p16788_p11 }
  0xa7   :  { %16798 = shalt.err (!%p16795_p1)
}
  0xa8   :  { %s16956_s21 = smov 256   ;;  %s16957_s0 = smov 16  }
  0xa9   :  { %67 = dma.hbm_to_vmem [thread:$0]  %s17831_s3, 106496, %s62_s26, [#allocation6], %s16956_s21, %s16956_s21, %s16957_s0  }
  0xaa   :  { %s16958_s19 = smov [#allocation10]   ;;  %s16959_s1 = smov [#allocation13]  }
  0xab   :  { %s83_s10 = sshll.u32 %s16958_s19, 4  ;;  %s105_s16 = sshll.u32 %s16959_s1, 4  ;;  %s84_s10 = int_to_ptr.vmem [resolvable:$true] %s83_s10  ;;  %s106_s16 = int_to_ptr.vmem [resolvable:$true] %s105_s16 }
  0xac   :  { %s16799_s14 = scalar_lea.hbm %s17833_s5, 16384 }
  0xad   :  { %p16800_p2 = scmp.ne.s32.totalorder %s17833_s5, %s16799_s14  ;;  %p16803_p3 = scmp.lt.u32.totalorder %s16799_s14, %s17833_s5 }
  0xaf   :  { %p16805_p4 = pnand %p16803_p3, %p16800_p2 }
  0xb1   :  { %16808 = shalt.err (!%p16805_p4)
}
  0xb2   :  { %s16809_s3 = scalar_lea.vmem %s84_s10, 16384  ;;  %p16814_p6 = scmp.lt.s32.totalorder %s84_s10, %s84_s10 }
  0xb3   :  { %p16810_p5 = scmp.ne.s32.totalorder %s84_s10, %s16809_s3  ;;  %p16815_p7 = scmp.lt.s32.totalorder %s16809_s3, %s16809_s3 }
  0xb5   :  { %p16816_p8 = por %p16815_p7, %p16814_p6 }
  0xb7   :  { %p16817_p9 = pnand %p16816_p8, %p16810_p5 }
  0xb9   :  { %16820 = shalt.err (!%p16817_p9)
}
  0xba   :  { %89 = dma.hbm_to_vmem [thread:$0]  %s17833_s5, 16384, %s84_s10, [#allocation9], %s16956_s21, %s16956_s21, %s16957_s0  }
  0xbb   :  { %s16821_s22 = scalar_lea.hbm %s17835_s7, 32768 }
  0xbc   :  { %p16822_p10 = scmp.ne.s32.totalorder %s17835_s7, %s16821_s22  ;;  %p16825_p11 = scmp.lt.u32.totalorder %s16821_s22, %s17835_s7 }
  0xbe   :  { %p16827_p12 = pnand %p16825_p11, %p16822_p10 }
  0xc0   :  { %16830 = shalt.err (!%p16827_p12)
}
  0xc1   :  { %s16831_s19 = scalar_lea.vmem %s106_s16, 32768  ;;  %p16836_p0 = scmp.lt.s32.totalorder %s106_s16, %s106_s16 }
  0xc2   :  { %p16832_p13 = scmp.ne.s32.totalorder %s106_s16, %s16831_s19  ;;  %p16837_p1 = scmp.lt.s32.totalorder %s16831_s19, %s16831_s19 }
  0xc4   :  { %p16838_p2 = por %p16837_p1, %p16836_p0 }
  0xc6   :  { %p16839_p3 = pnand %p16838_p2, %p16832_p13 }
  0xc8   :  { %16842 = shalt.err (!%p16839_p3)
}
  0xc9   :  { %s16960_s5 = smov 512   ;;  %s16961_s10 = smov 32  }
  0xca   :  { %111 = dma.hbm_to_vmem [thread:$0]  %s17835_s7, 32768, %s106_s16, [#allocation12], %s16960_s5, %s16960_s5, %s16961_s10  }
  0xcb   :  { %s16962_s23 = smov [#allocation16]   ;;  %s16963_s2 = smov [#allocation19]  }
  0xcc   :  { %s127_s14 = sshll.u32 %s16962_s23, 4  ;;  %s150_s8 = sshll.u32 %s16963_s2, 4  ;;  %s128_s14 = int_to_ptr.vmem [resolvable:$true] %s127_s14  ;;  %s151_s8 = int_to_ptr.vmem [resolvable:$true] %s150_s8 }
  0xcd   :  { %s16843_s3 = scalar_lea.hbm %s17837_s9, 32768 }
  0xce   :  { %p16844_p4 = scmp.ne.s32.totalorder %s17837_s9, %s16843_s3  ;;  %p16847_p5 = scmp.lt.u32.totalorder %s16843_s3, %s17837_s9 }
  0xd0   :  { %p16849_p6 = pnand %p16847_p5, %p16844_p4 }
  0xd2   :  { %16852 = shalt.err (!%p16849_p6)
}
  0xd3   :  { %s16853_s7 = scalar_lea.vmem %s128_s14, 32768  ;;  %p16858_p8 = scmp.lt.s32.totalorder %s128_s14, %s128_s14 }
  0xd4   :  { %p16854_p7 = scmp.ne.s32.totalorder %s128_s14, %s16853_s7  ;;  %p16859_p9 = scmp.lt.s32.totalorder %s16853_s7, %s16853_s7 }
  0xd6   :  { %p16860_p10 = por %p16859_p9, %p16858_p8 }
  0xd8   :  { %p16861_p11 = pnand %p16860_p10, %p16854_p7 }
  0xda   :  { %16864 = shalt.err (!%p16861_p11)
}
  0xdb   :  { %133 = dma.hbm_to_vmem [thread:$0]  %s17837_s9, 32768, %s128_s14, [#allocation15], %s16956_s21, %s16956_s21, %s16957_s0  }
  0xdc   :  { %s16865_s20 = scalar_lea.hbm %s17839_s11, 64 }
  0xdd   :  { %p16866_p12 = scmp.ne.s32.totalorder %s17839_s11, %s16865_s20  ;;  %p16869_p13 = scmp.lt.u32.totalorder %s16865_s20, %s17839_s11 }
  0xdf   :  { %p16871_p0 = pnand %p16869_p13, %p16866_p12 }
  0xe1   :  { %16874 = shalt.err (!%p16871_p0)
}
  0xe2   :  { %s16875_s1 = scalar_lea.vmem %s151_s8, 64  ;;  %p16880_p2 = scmp.lt.s32.totalorder %s151_s8, %s151_s8 }
  0xe3   :  { %p16876_p1 = scmp.ne.s32.totalorder %s151_s8, %s16875_s1  ;;  %p16881_p3 = scmp.lt.s32.totalorder %s16875_s1, %s16875_s1 }
  0xe5   :  { %p16882_p4 = por %p16881_p3, %p16880_p2 }
  0xe7   :  { %p16883_p5 = pnand %p16882_p4, %p16876_p1 }
  0xe9   :  { %16886 = shalt.err (!%p16883_p5)
}
  0xea   :  { %153 = dma.hbm_to_vmem [thread:$0]  %s17839_s11, 64, %s151_s8, [#allocation18]  }
  0xeb   :  { %s16964_s0 = smov [#allocation22]   ;;  %s16887_s2 = scalar_lea.hbm %s17841_s13, 4096 }
  0xec   :  { %s169_s30 = sshll.u32 %s16964_s0, 4  ;;  %p16888_p6 = scmp.ne.s32.totalorder %s17841_s13, %s16887_s2  ;;  %s170_s30 = int_to_ptr.vmem [resolvable:$true] %s169_s30 }
  0xed   :  { %p16891_p7 = scmp.lt.u32.totalorder %s16887_s2, %s17841_s13 }
  0xef   :  { %p16893_p8 = pnand %p16891_p7, %p16888_p6 }
  0xf1   :  { %16896 = shalt.err (!%p16893_p8)
}
  0xf2   :  { %s16897_s28 = scalar_lea.vmem %s170_s30, 4096  ;;  %p16902_p10 = scmp.lt.s32.totalorder %s170_s30, %s170_s30 }
  0xf3   :  { %p16898_p9 = scmp.ne.s32.totalorder %s170_s30, %s16897_s28  ;;  %p16903_p11 = scmp.lt.s32.totalorder %s16897_s28, %s16897_s28 }
  0xf5   :  { %p16904_p12 = por %p16903_p11, %p16902_p10 }
  0xf7   :  { %p16905_p13 = pnand %p16904_p12, %p16898_p9 }
  0xf9   :  { %16908 = shalt.err (!%p16905_p13)
}
  0xfa   :  { %s16965_s11 = smov 64   ;;  %s16966_s8 = smov 4  }
  0xfb   :  { %175 = dma.hbm_to_vmem [thread:$0]  %s17841_s13, 4096, %s170_s30, [#allocation21], %s16965_s11, %s16965_s11, %s16966_s8  }
  0xfc   :  { %s16967_s7 = smov [#allocation25]   ;;  %s16909_s24 = scalar_lea.hbm %s17843_s15, 16 }
  0xfd   :  { %s192_s16 = sshll.u32 %s16967_s7, 4  ;;  %p16910_p0 = scmp.ne.s32.totalorder %s17843_s15, %s16909_s24  ;;  %s193_s16 = int_to_ptr.vmem [resolvable:$true] %s192_s16 }
  0xfe   :  { %p16913_p1 = scmp.lt.u32.totalorder %s16909_s24, %s17843_s15 }
 0x100   :  { %p16915_p2 = pnand %p16913_p1, %p16910_p0 }
 0x102   :  { %16918 = shalt.err (!%p16915_p2)
}
 0x103   :  { %s16919_s10 = scalar_lea.vmem %s193_s16, 16  ;;  %s16923_s13 = scalar_lea.vmem %s193_s16, 32 }
 0x104   :  { %p16920_p3 = scmp.ne.s32.totalorder %s193_s16, %s16919_s10  ;;  %p16924_p4 = scmp.lt.s32.totalorder %s193_s16, %s193_s16 }
 0x105   :  { %p16925_p5 = scmp.lt.s32.totalorder %s16923_s13, %s16919_s10 }
 0x107   :  { %p16926_p6 = por %p16925_p5, %p16924_p4 }
 0x109   :  { %p16927_p7 = pnand %p16926_p6, %p16920_p3 }
 0x10b   :  { %16930 = shalt.err (!%p16927_p7)
}
 0x10c   :  { %195 = dma.hbm_to_vmem [thread:$0]  %s17843_s15, 16, %s193_s16, [#allocation24]  }
 0x10d   :  { %16931 = dma.done.wait [#allocation4], 832  }
 0x10e   :  { %16932 = vsyncadd [#allocation4], 4294966464 }
 0x10f   :  { %16933 = dma.done.wait [#allocation6], 106912  }
 0x110   :  { %16934 = vsyncadd [#allocation6], 4294860384 }
 0x111   :  { %16935 = dma.done.wait [#allocation9], 16448  }
 0x112   :  { %16936 = vsyncadd [#allocation9], 4294950848 }
 0x113   :  { %16937 = dma.done.wait [#allocation12], 32832  }
 0x114   :  { %16938 = vsyncadd [#allocation12], 4294934464 }
 0x115   :  { %16939 = dma.done.wait [#allocation15], 32896  }
 0x116   :  { %16940 = vsyncadd [#allocation15], 4294934400 }
 0x117   :  { %16941 = dma.done.wait [#allocation18], 128  }
 0x118   :  { %16942 = vsyncadd [#allocation18], 4294967168 }
 0x119   :  { %16943 = dma.done.wait [#allocation21], 4112  }
 0x11a   :  { %16944 = vsyncadd [#allocation21], 4294963184 }
 0x11b   :  { %16945 = dma.done.wait [#allocation24], 32  }
 0x11c   :  { %16946 = vsyncadd [#allocation24], 4294967264  ;;  %vm372_vm0 = vcmask 1042432   ;;  %s17855_s15 = sld [smem:[#allocation34_spill]]  ;;  %vm857_vm1 = vcmask 1040384   ;;  %vm858_vm2 = vcmask 1041408  }
 0x11d   :  { %vm721_vm3 = vcmask 1041409   ;;  %vm723_vm4 = vcmask 1042434   ;;  %vm725_vm5 = vcmask 1043459   ;;  %vm727_vm6 = vcmask 1044484  }
 0x11e   :  { %vm729_vm7 = vcmask 1045509   ;;  %vm731_vm8 = vcmask 1046534   ;;  %vm733_vm9 = vcmask 1047559   ;;  %vm853_vm10 = vcmask 23552  }
 0x11f   :  { %vm12433_vm11 = vcmask 1043456   ;;  %vm12920_vm12 = vcmask 31744   ;;  %vm12922_vm13 = vcmask 39936  }
 0x122   :  { %v244_v1 = vld [vmem:[%s17855_s15] sm:$0x77]  ;;  %v245_v2 = vld [vmem:[%s17855_s15 + $0x8] sm:$0x77]  ;;  %v246_v3 = vld [vmem:[%s17855_s15 + $0x10] sm:$0x77] }
 0x123   :  { %v247_v4 = vld [vmem:[%s17855_s15 + $0x18] sm:$0x77]  ;;  %v308_v5 = vcombine.high %v244_v1, %v244_v1  ;;  %v309_v6 = vcombine.high %v245_v2, %v245_v2  ;;  %v373_v7 = vsel %vm372_vm0, %v244_v1, 0.0  ;;  %v252_v8 = vld [vmem:[%s17855_s15 + $0x40] sm:$0x77]  ;;  %v310_v9 = vcombine.high %v246_v3, %v246_v3 }
 0x124   :  { %v311_v10 = vcombine.high %v247_v4, %v247_v4  ;;  %v376_v11 = vsel %vm372_vm0, %v245_v2, 0.0  ;;  %v253_v12 = vld [vmem:[%s17855_s15 + $0x48] sm:$0x77]  ;;  %v380_v14 = vsel %vm372_vm0, %v246_v3, 0.0  ;;  %v384_v15 = vsel %vm372_vm0, %v247_v4, 0.0 }
 0x125   :  { %v374_v13 = vsel %vm372_vm0, %v308_v5, 0.0  ;;  %v254_v16 = vld [vmem:[%s17855_s15 + $0x50] sm:$0x77]  ;;  %v316_v17 = vcombine.high %v252_v8, %v252_v8  ;;  %v378_v19 = vsel %vm372_vm0, %v309_v6, 0.0  ;;  %v255_v20 = vld [vmem:[%s17855_s15 + $0x58] sm:$0x77]  ;;  %v317_v21 = vcombine.high %v253_v12, %v253_v12 }
 0x126   :  { %v375_v18 = vadd.f32 %v374_v13, %v373_v7  ;;  %v248_v22 = vld [vmem:[%s17855_s15 + $0x20] sm:$0x77]  ;;  %v407_v23 = vsel %vm372_vm0, %v252_v8, 0.0  ;;  %v410_v25 = vsel %vm372_vm0, %v253_v12, 0.0  ;;  %v249_v26 = vld [vmem:[%s17855_s15 + $0x28] sm:$0x77]  ;;  %v318_v29 = vcombine.high %v254_v16, %v254_v16 }
 0x127   :  { %v408_v24 = vsel %vm372_vm0, %v316_v17, 0.0  ;;  %v382_v28 = vsel %vm372_vm0, %v310_v9, 0.0  ;;  %v386_v31 = vsel %vm372_vm0, %v311_v10, 0.0  ;;  %v319_v32 = vcombine.high %v255_v20, %v255_v20  ;;  %v250_v38 = vld [vmem:[%s17855_s15 + $0x30] sm:$0x77] }
 0x128   :  { %v377_v27 = vadd.f32 %v376_v11, %v375_v18  ;;  %v409_v30 = vadd.f32 %v408_v24, %v407_v23  ;;  %v412_v33 = vsel %vm372_vm0, %v317_v21, 0.0  ;;  %v312_v34 = vcombine.high %v248_v22, %v248_v22  ;;  %v256_v43 = vld [vmem:[%s17855_s15 + $0x60] sm:$0x77]  ;;  %v251_v47 = vld [vmem:[%s17855_s15 + $0x38] sm:$0x77] }
 0x129   :  { %v414_v37 = vsel %vm372_vm0, %v254_v16, 0.0  ;;  %v313_v39 = vcombine.high %v249_v26, %v249_v26  ;;  %v390_v40 = vsel %vm372_vm0, %v248_v22, 0.0  ;;  %v393_v42 = vsel %vm372_vm0, %v249_v26, 0.0  ;;  %v257_v49 = vld [vmem:[%s17855_s15 + $0x68] sm:$0x77] }
 0x12a   :  { %v379_v35 = vadd.f32 %v378_v19, %v377_v27  ;;  %v411_v36 = vadd.f32 %v410_v25, %v409_v30  ;;  %v391_v41 = vsel %vm372_vm0, %v312_v34, 0.0  ;;  %v416_v46 = vsel %vm372_vm0, %v318_v29, 0.0  ;;  %v258_v57 = vld [vmem:[%s17855_s15 + $0x70] sm:$0x77]  ;;  %v260_v3 = vld [vmem:[%s17855_s15 + $0x80] sm:$0x77] }
 0x12b   :  { %v392_v48 = vadd.f32 %v391_v41, %v390_v40  ;;  %v418_v50 = vsel %vm372_vm0, %v255_v20, 0.0  ;;  %v420_v51 = vsel %vm372_vm0, %v319_v32, 0.0  ;;  %v314_v52 = vcombine.high %v250_v38, %v250_v38  ;;  %v261_v8 = vld [vmem:[%s17855_s15 + $0x88] sm:$0x77]  ;;  %v259_v12 = vld [vmem:[%s17855_s15 + $0x78] sm:$0x77] }
 0x12c   :  { %v381_v44 = vadd.f32 %v380_v14, %v379_v35  ;;  %v413_v45 = vadd.f32 %v412_v33, %v411_v36  ;;  %v395_v53 = vsel %vm372_vm0, %v313_v39, 0.0  ;;  %v320_v58 = vcombine.high %v256_v43, %v256_v43  ;;  %v262_v17 = vld [vmem:[%s17855_s15 + $0x90] sm:$0x77]  ;;  %v264_v19 = vld [vmem:[%s17855_s15 + $0xa0] sm:$0x77] }
 0x12d   :  { %v394_v56 = vadd.f32 %v393_v42, %v392_v48  ;;  %v315_v59 = vcombine.high %v251_v47, %v251_v47  ;;  %v397_v60 = vsel %vm372_vm0, %v250_v38, 0.0  ;;  %v321_v61 = vcombine.high %v257_v49, %v257_v49  ;;  %v265_v24 = vld [vmem:[%s17855_s15 + $0xa8] sm:$0x77]  ;;  %v268_v42 = vld [vmem:[%s17855_s15 + $0xc0] sm:$0x77] }
 0x12e   :  { %v383_v54 = vadd.f32 %v382_v28, %v381_v44  ;;  %v415_v55 = vadd.f32 %v414_v37, %v413_v45  ;;  %v424_v62 = vsel %vm372_vm0, %v256_v43, 0.0  ;;  %v425_v2 = vsel %vm372_vm0, %v320_v58, 0.0  ;;  %v266_v37 = vld [vmem:[%s17855_s15 + $0xb0] sm:$0x77]  ;;  %v269_v43 = vld [vmem:[%s17855_s15 + $0xc8] sm:$0x77] }
 0x12f   :  { %v396_v1 = vadd.f32 %v395_v53, %v394_v56  ;;  %v399_v4 = vsel %vm372_vm0, %v314_v52, 0.0  ;;  %v322_v5 = vcombine.high %v258_v57, %v258_v57  ;;  %v426_v6 = vadd.f32 %v425_v2, %v424_v62  ;;  %v272_v62 = vld [vmem:[%s17855_s15 + $0xe0] sm:$0x77] }
 0x130   :  { %v385_v63 = vadd.f32 %v384_v15, %v383_v54  ;;  %v417_v0 = vadd.f32 %v416_v46, %v415_v55  ;;  %v427_v7 = vsel %vm372_vm0, %v257_v49, 0.0  ;;  %v429_v13 = vsel %vm372_vm0, %v321_v61, 0.0  ;;  %v270_v61 = vld [vmem:[%s17855_s15 + $0xd0] sm:$0x77] }
 0x131   :  { %v398_v11 = vadd.f32 %v397_v60, %v396_v1  ;;  %v401_v14 = vsel %vm372_vm0, %v251_v47, 0.0  ;;  %v403_v15 = vsel %vm372_vm0, %v315_v59, 0.0  ;;  %v428_v16 = vadd.f32 %v427_v7, %v426_v6  ;;  %v267_v47 = vld [vmem:[%s17855_s15 + $0xb8] sm:$0x77] }
 0x132   :  { %v387_v9 = vadd.f32 %v386_v31, %v385_v63  ;;  %v419_v10 = vadd.f32 %v418_v50, %v417_v0  ;;  %v324_v18 = vcombine.high %v260_v3, %v260_v3  ;;  %v431_v22 = vsel %vm372_vm0, %v258_v57, 0.0  ;;  %v263_v31 = vld [vmem:[%s17855_s15 + $0x98] sm:$0x77] }
 0x133   :  { %v400_v21 = vadd.f32 %v399_v4, %v398_v11  ;;  %v325_v23 = vcombine.high %v261_v8, %v261_v8  ;;  %v323_v25 = vcombine.high %v259_v12, %v259_v12  ;;  %v430_v26 = vadd.f32 %v429_v13, %v428_v16 }
 0x134   :  { %388 = vadd.xlane.f32.xlu0 %v387_v9  ;;  %v421_v20 = vadd.f32 %v420_v51, %v419_v10  ;;  %v441_v27 = vsel %vm372_vm0, %v260_v3, 0.0  ;;  %v442_v28 = vsel %vm372_vm0, %v324_v18, 0.0  ;;  %v433_v30 = vsel %vm372_vm0, %v322_v5, 0.0  ;;  %v273_v3 = vld [vmem:[%s17855_s15 + $0xe8] sm:$0x77] }
 0x135   :  { %v402_v29 = vadd.f32 %v401_v14, %v400_v21  ;;  %v443_v32 = vadd.f32 %v442_v28, %v441_v27  ;;  %v444_v33 = vsel %vm372_vm0, %v261_v8, 0.0  ;;  %v432_v34 = vadd.f32 %v431_v22, %v430_v26  ;;  %v271_v10 = vld [vmem:[%s17855_s15 + $0xd8] sm:$0x77] }
 0x136   :  { %422 = vadd.xlane.f32.xlu1 %v421_v20  ;;  %v326_v35 = vcombine.high %v262_v17, %v262_v17  ;;  %v446_v36 = vsel %vm372_vm0, %v325_v23, 0.0  ;;  %v435_v39 = vsel %vm372_vm0, %v259_v12, 0.0  ;;  %v328_v41 = vcombine.high %v264_v19, %v264_v19 }
 0x137   :  { %v404_v38 = vadd.f32 %v403_v15, %v402_v29  ;;  %v445_v40 = vadd.f32 %v444_v33, %v443_v32  ;;  %v434_v44 = vadd.f32 %v433_v30, %v432_v34  ;;  %v437_v45 = vsel %vm372_vm0, %v323_v25, 0.0  ;;  %v275_v32 = vld [vmem:[%s17855_s15 + $0xf8] sm:$0x77] }
 0x138   :  { %v448_v46 = vsel %vm372_vm0, %v262_v17, 0.0  ;;  %v329_v48 = vcombine.high %v265_v24, %v265_v24  ;;  %v458_v50 = vsel %vm372_vm0, %v264_v19, 0.0  ;;  %v459_v51 = vsel %vm372_vm0, %v328_v41, 0.0  ;;  %v274_v17 = vld [vmem:[%s17855_s15 + $0xf0] sm:$0x77] }
 0x139   :  { %405 = vadd.xlane.f32.xlu0 %v404_v38  ;;  %v447_v49 = vadd.f32 %v446_v36, %v445_v40  ;;  %v461_v52 = vsel %vm372_vm0, %v265_v24, 0.0  ;;  %v436_v53 = vadd.f32 %v435_v39, %v434_v44  ;;  %v327_v54 = vcombine.high %v263_v31, %v263_v31 }
 0x13a   :  { %v450_v55 = vsel %vm372_vm0, %v326_v35, 0.0  ;;  %v460_v56 = vadd.f32 %v459_v51, %v458_v50  ;;  %v452_v58 = vsel %vm372_vm0, %v263_v31, 0.0  ;;  %v330_v59 = vcombine.high %v266_v37, %v266_v37 }
 0x13b   :  { %v449_v57 = vadd.f32 %v448_v46, %v447_v49  ;;  %v463_v60 = vsel %vm372_vm0, %v329_v48, 0.0  ;;  %v438_v63 = vadd.f32 %v437_v45, %v436_v53  ;;  %v332_v1 = vcombine.high %v268_v42, %v268_v42 }
 0x13c   :  { %v462_v0 = vadd.f32 %v461_v52, %v460_v56  ;;  %v333_v2 = vcombine.high %v269_v43, %v269_v43  ;;  %v331_v5 = vcombine.high %v267_v47, %v267_v47  ;;  %v465_v6 = vsel %vm372_vm0, %v266_v37, 0.0 }
 0x13d   :  { %v451_v4 = vadd.f32 %v450_v55, %v449_v57  ;;  %v475_v7 = vsel %vm372_vm0, %v268_v42, 0.0  ;;  %439 = vadd.xlane.f32.xlu1 %v438_v63  ;;  %v454_v8 = vsel %vm372_vm0, %v327_v54, 0.0  ;;  %v476_v11 = vsel %vm372_vm0, %v332_v1, 0.0 }
 0x13e   :  { %v464_v9 = vadd.f32 %v463_v60, %v462_v0  ;;  %v478_v12 = vsel %vm372_vm0, %v269_v43, 0.0  ;;  %v467_v14 = vsel %vm372_vm0, %v330_v59, 0.0  ;;  %v469_v15 = vsel %vm372_vm0, %v267_v47, 0.0 }
 0x13f   :  { %v453_v13 = vadd.f32 %v452_v58, %v451_v4  ;;  %v477_v16 = vadd.f32 %v476_v11, %v475_v7  ;;  %v334_v19 = vcombine.high %v270_v61, %v270_v61  ;;  %v480_v20 = vsel %vm372_vm0, %v333_v2, 0.0 }
 0x140   :  { %v466_v18 = vadd.f32 %v465_v6, %v464_v9  ;;  %v336_v21 = vcombine.high %v272_v62, %v272_v62  ;;  %v471_v23 = vsel %vm372_vm0, %v331_v5, 0.0  ;;  %v337_v25 = vcombine.high %v273_v3, %v273_v3 }
 0x141   :  { %v455_v22 = vadd.f32 %v454_v8, %v453_v13  ;;  %v479_v24 = vadd.f32 %v478_v12, %v477_v16  ;;  %v482_v27 = vsel %vm372_vm0, %v270_v61, 0.0  ;;  %v492_v28 = vsel %vm372_vm0, %v272_v62, 0.0  ;;  %v526_v62 = vld [vmem:[#allocation3] sm:$0xff]  ;;  %v527_v12 = vld [vmem:[#allocation3 + $0x8] sm:$0xff] }
 0x142   :  { %v468_v26 = vadd.f32 %v467_v14, %v466_v18  ;;  %v493_v29 = vsel %vm372_vm0, %v336_v21, 0.0  ;;  %v335_v30 = vcombine.high %v271_v10, %v271_v10  ;;  %v495_v34 = vsel %vm372_vm0, %v273_v3, 0.0 }
 0x143   :  { %456 = vadd.xlane.f32.xlu0 %v455_v22  ;;  %v481_v31 = vadd.f32 %v480_v20, %v479_v24  ;;  %v494_v33 = vadd.f32 %v493_v29, %v492_v28  ;;  %v484_v36 = vsel %vm372_vm0, %v334_v19, 0.0  ;;  %v338_v37 = vcombine.high %v274_v17, %v274_v17 }
 0x144   :  { %v470_v35 = vadd.f32 %v469_v15, %v468_v26  ;;  %v497_v38 = vsel %vm372_vm0, %v337_v25, 0.0  ;;  %v486_v42 = vsel %vm372_vm0, %v271_v10, 0.0  ;;  %v499_v43 = vsel %vm372_vm0, %v274_v17, 0.0 }
 0x145   :  { %v483_v39 = vadd.f32 %v482_v27, %v481_v31  ;;  %v496_v40 = vadd.f32 %v495_v34, %v494_v33  ;;  %v488_v46 = vsel %vm372_vm0, %v335_v30, 0.0  ;;  %v339_v47 = vcombine.high %v275_v32, %v275_v32 }
 0x146   :  { %v472_v41 = vadd.f32 %v471_v23, %v470_v35  ;;  %v501_v48 = vsel %vm372_vm0, %v338_v37, 0.0  ;;  %v503_v51 = vsel %vm372_vm0, %v275_v32, 0.0  ;;  %v541_v57 = vlaneseq }
 0x147   :  { %v485_v44 = vadd.f32 %v484_v36, %v483_v39  ;;  %v498_v45 = vadd.f32 %v497_v38, %v496_v40  ;;  %v505_v54 = vsel %vm372_vm0, %v339_v47, 0.0  ;;  %v16968_v58 = vmov 1983009808  }
 0x148   :  { %473 = vadd.xlane.f32.xlu1 %v472_v41  ;;  %v745_v59 = vunpack.c.l.s4 %v16968_v58  ;;  %v17421_v60 = vshrl.u32 %v541_v57, 7  ;;  %v743_v0 = vcombine.high %v526_v62, %v526_v62  ;;  %v16969_v4 = vmov 65535  }
 0x149   :  { %v487_v49 = vadd.f32 %v486_v42, %v485_v44  ;;  %v500_v50 = vadd.f32 %v499_v43, %v498_v45  ;;  %v859_v5 = vsel %vm857_vm1, 4294967295, %v16969_v4  ;;  %v760_v13 = vcombine.high %v527_v12, %v527_v12 }
 0x14a   :  { %v746_v61 = vunpack.c.0.s8 %v745_v59  ;;  %v17428_v7 = vsel %vm858_vm2, %v859_v5, 0  ;;  %v16970_v16 = vmov 0   ;;  %v688_v31 = vand.u32 127, %v541_v57  ;;  %v529_v5 = vld [vmem:[#allocation3 + $0x18] sm:$0xff] }
 0x14b   :  { %v489_v52 = vadd.f32 %v488_v46, %v487_v49  ;;  %v502_v53 = vadd.f32 %v501_v48, %v500_v50  ;;  %971 = vmatprep.mubr.bf16.mxu0 %v16970_v16  ;;  %1012 = vmatprep.mubr.bf16.mxu1 %v16970_v16 }
 0x14c   :  { %v17424_v63 = vsub.s32 %v746_v61, %v17421_v60  ;;  %14699 = vset.pattern.permute.xlu1 %v16970_v16  ;;  %14698 = vset.pattern.permute.xlu0 %v16970_v16  ;;  %v17455_v37 = vsub.s32 %v688_v31, %v17421_v60 }
 0x14d   :  { %490 = vadd.xlane.f32.xlu0 %v489_v52  ;;  %v504_v55 = vadd.f32 %v503_v51, %v502_v53  ;;  %v528_v52 = vld [vmem:[#allocation3 + $0x10] sm:$0xff] }
 0x14e   :  { %v750_v1 = vrot.slane %v526_v62, %v17424_v63  ;;  %v757_v2 = vrot.slane %v743_v0, %v17424_v63  ;;  %v17435_v14 = vrot.slane %v527_v12, %v17424_v63  ;;  %v17438_v15 = vrot.slane %v760_v13, %v17424_v63 }
 0x14f   :  { %v506_v56 = vadd.f32 %v505_v54, %v504_v55  ;;  %v777_v62 = vcombine.high %v528_v52, %v528_v52 }
 0x150   :  { %v758_v3 = vcombine.high %v750_v1, %v750_v1  ;;  %v759_v6 = vcombine.high %v757_v2, %v757_v2  ;;  %v862_v10 = vand.u32 %v17428_v7, %v750_v1  ;;  %v868_v11 = vand.u32 %v17428_v7, %v757_v2 }
 0x151   :  { %507 = vadd.xlane.f32.xlu1 %v506_v56  ;;  %v775_v17 = vcombine.high %v17435_v14, %v17435_v14  ;;  %v776_v18 = vcombine.high %v17438_v15, %v17438_v15  ;;  %v874_v19 = vand.u32 %v17428_v7, %v17435_v14  ;;  %v880_v20 = vand.u32 %v17428_v7, %v17438_v15 }
 0x152   :  { %v865_v8 = vand.u32 %v17428_v7, %v758_v3  ;;  %v871_v9 = vand.u32 %v17428_v7, %v759_v6 }
 0x153   :  { %v877_v21 = vand.u32 %v17428_v7, %v775_v17  ;;  %v883_v22 = vand.u32 %v17428_v7, %v776_v18 }
 0x154   :  { %939 = vmatprep.subr.bf16.mxu0 %v865_v8  ;;  %980 = vmatprep.subr.bf16.mxu1 %v871_v9  ;;  %v784_v9 = vrot.slane %v528_v52, %v17424_v63 }
 0x155   :  { %940 = vmatpush1.bf16.msra.mxu0 %v862_v10  ;;  %981 = vmatpush1.bf16.msra.mxu1 %v868_v11  ;;  %v791_v10 = vrot.slane %v777_v62, %v17424_v63  ;;  %v14746_v62 = vld [vmem:[#allocation7 + $0x24] ss:$16 sps:$4 sm:$0xff]  }
 0x156   :  { %1021 = vmatprep.subr.bf16.mxu0 %v877_v21  ;;  %1062 = vmatprep.subr.bf16.mxu1 %v883_v22  ;;  %v792_v18 = vcombine.high %v784_v9, %v784_v9  ;;  %v794_v22 = vcombine.high %v529_v5, %v529_v5 }
 0x157   :  { %v793_v21 = vcombine.high %v791_v10, %v791_v10 }
 0x1c1   :  { %v389_v23 = vpop.xlane.xlu0 %388 }
 0x1c2   :  { %v510_v27 = vmul.f32 0.0009765625, %v389_v23 }
 0x1c3   :  { %v423_v24 = vpop.xlane.xlu1 %422 }
 0x1c4   :  { %v512_v30 = vmul.f32 0.0009765625, %v423_v24  ;;  %v518_v32 = vpack.c.bf16 %v510_v27, %v510_v27  ;;  %v895_v27 = vand.u32 %v17428_v7, %v793_v21  ;;  %v14776_v21 = vld [vmem:[#allocation7 + $0xc4] ss:$16 sps:$4 sm:$0xff]  }
 0x1c6   :  { %v406_v25 = vpop.xlane.xlu0 %405  ;;  %v520_v35 = vpack.c.bf16 %v512_v30, %v512_v30  ;;  %v679_v38 = vunpack.c.l.b16 %v518_v32 }
 0x1c7   :  { %v511_v26 = vmul.f32 0.0009765625, %v406_v25  ;;  %v530_v25 = vld [vmem:[#allocation3 + $0x20] sm:$0xff] }
 0x1c8   :  { %v681_v42 = vunpack.c.l.b16 %v520_v35  ;;  %v692_v44 = vrot.slane %v679_v38, %v17455_v37  ;;  %v811_v32 = vcombine.high %v530_v25, %v530_v25  ;;  %v531_v35 = vld [vmem:[#allocation3 + $0x28] sm:$0xff]  ;;  %v818_v15 = vrot.slane %v530_v25, %v17424_v63  ;;  %v14782_v25 = vld [vmem:[#allocation7 + $0xe4] ss:$16 sps:$4 sm:$0xff]  }
 0x1c9   :  { %v519_v28 = vpack.c.bf16 %v511_v26, %v511_v26  ;;  %v889_v26 = vand.u32 %v17428_v7, %v792_v18  ;;  %v14768_v18 = vld [vmem:[#allocation7 + $0xa0] ss:$16 sps:$4 sm:$0xff]  }
 0x1ca   :  { %v440_v29 = vpop.xlane.xlu1 %439  ;;  %v700_v49 = vrot.slane %v681_v42, %v17455_v37 }
 0x1cb   :  { %v513_v33 = vmul.f32 0.0009765625, %v440_v29  ;;  %v680_v34 = vunpack.c.l.b16 %v519_v28  ;;  %v801_v28 = vrot.slane %v529_v5, %v17424_v63  ;;  %v808_v29 = vrot.slane %v794_v22, %v17424_v63  ;;  %v14758_v5 = vld [vmem:[#allocation7 + $0x64] ss:$16 sps:$4 sm:$0xff]   ;;  %v14765_v22 = vld [vmem:[#allocation7 + $0x88] ss:$16 sps:$4 sm:$0xff]  }
 0x1cd   :  { %v521_v39 = vpack.c.bf16 %v513_v33, %v513_v33  ;;  %v696_v41 = vrot.slane %v680_v34, %v17455_v37  ;;  %v809_v30 = vcombine.high %v801_v28, %v801_v28  ;;  %v810_v31 = vcombine.high %v808_v29, %v808_v29 }
 0x1ce   :  { %v886_v33 = vand.u32 %v17428_v7, %v784_v9  ;;  %v892_v34 = vand.u32 %v17428_v7, %v791_v10  ;;  %v14764_v9 = vld [vmem:[#allocation7 + $0x84] ss:$16 sps:$4 sm:$0xff]   ;;  %v14761_v10 = vld [vmem:[#allocation7 + $0x6c] ss:$16 sps:$4 sm:$0xff]  }
 0x1cf   :  { %v682_v45 = vunpack.c.l.b16 %v521_v39  ;;  %v722_v48 = vsel %vm721_vm3, %v696_v41, %v692_v44  ;;  %v901_v14 = vand.u32 %v17428_v7, %v809_v30  ;;  %v828_v39 = vcombine.high %v531_v35, %v531_v35  ;;  %v14777_v30 = vld [vmem:[#allocation7 + $0xc8] ss:$16 sps:$4 sm:$0xff]  }
 0x1d0   :  { %v457_v36 = vpop.xlane.xlu0 %456  ;;  %v724_v54 = vsel %vm723_vm4, %v700_v49, %v722_v48  ;;  %v904_v41 = vand.u32 %v17428_v7, %v808_v29  ;;  %v835_v44 = vrot.slane %v531_v35, %v17424_v63  ;;  %v910_v48 = vand.u32 %v17428_v7, %v818_v15  ;;  %v14788_v29 = vld [vmem:[#allocation7 + $0x104] ss:$16 sps:$4 sm:$0xff]   ;;  %v14791_v35 = vld [vmem:[#allocation7 + $0x10c] ss:$16 sps:$4 sm:$0xff]  }
 0x1d1   :  { %v514_v40 = vmul.f32 0.0009765625, %v457_v36  ;;  %v704_v53 = vrot.slane %v682_v45, %v17455_v37  ;;  %v826_v36 = vcombine.high %v818_v15, %v818_v15  ;;  %v842_v45 = vrot.slane %v828_v39, %v17424_v63  ;;  %v14789_v15 = vld [vmem:[#allocation7 + $0x108] ss:$16 sps:$4 sm:$0xff]  }
 0x1d2   :  { %v14795_v39 = vld [vmem:[#allocation7 + $0x128] ss:$16 sps:$4 sm:$0xff]  }
 0x1d3   :  { %v522_v43 = vpack.c.bf16 %v514_v40, %v514_v40  ;;  %v726_v59 = vsel %vm725_vm5, %v704_v53, %v724_v54  ;;  %v898_v40 = vand.u32 %v17428_v7, %v801_v28  ;;  %v913_v42 = vand.u32 %v17428_v7, %v826_v36  ;;  %v14780_v28 = vld [vmem:[#allocation7 + $0xe0] ss:$16 sps:$4 sm:$0xff]  }
 0x1d4   :  { %v922_v54 = vand.u32 %v17428_v7, %v835_v44  ;;  %v14798_v36 = vld [vmem:[#allocation7 + $0x140] ss:$16 sps:$4 sm:$0xff]  }
 0x1d5   :  { %v474_v46 = vpop.xlane.xlu1 %473  ;;  %v683_v50 = vunpack.c.l.b16 %v522_v43 }
 0x1d6   :  { %v515_v47 = vmul.f32 0.0009765625, %v474_v46  ;;  %v843_v46 = vcombine.high %v835_v44, %v835_v44  ;;  %v14809_v44 = vld [vmem:[#allocation7 + $0x16c] ss:$16 sps:$4 sm:$0xff]  }
 0x1d7   :  { %v708_v58 = vrot.slane %v683_v50, %v17455_v37  ;;  %v12941_v50 = vld.sshfl [vmem:[#allocation3 + $0x30] sm:$0x33 pattern:$0x76325410] }
 0x1d8   :  { %v523_v51 = vpack.c.bf16 %v515_v47, %v515_v47  ;;  %v844_v47 = vcombine.high %v842_v45, %v842_v45  ;;  %v852_v53 = vcombine.high %v12941_v50, %v12941_v50 }
 0x1d9   :  { %v728_v4 = vsel %vm727_vm6, %v708_v58, %v726_v59  ;;  %v14738_v58 = vld [vmem:[#allocation7] ss:$16 sps:$4 sm:$0xff]   ;;  %v14743_v59 = vld [vmem:[#allocation7 + $0xc] ss:$16 sps:$4 sm:$0xff]  }
 0x1da   :  { %v491_v55 = vpop.xlane.xlu0 %490  ;;  %v684_v56 = vunpack.c.l.b16 %v523_v51  ;;  %v925_v51 = vand.u32 %v17428_v7, %v843_v46  ;;  %v931_v52 = vand.u32 %v17428_v7, %v844_v47  ;;  %v14807_v46 = vld [vmem:[#allocation7 + $0x168] ss:$16 sps:$4 sm:$0xff]   ;;  %v14818_v47 = vld [vmem:[#allocation7 + $0x1a4] ss:$16 sps:$4 sm:$0xff]  }
 0x1db   :  { %v516_v57 = vmul.f32 0.0009765625, %v491_v55  ;;  %v928_v55 = vand.u32 %v17428_v7, %v842_v45  ;;  %v14810_v45 = vld [vmem:[#allocation7 + $0x180] ss:$16 sps:$4 sm:$0xff]  }
 0x1dc   :  { %v712_v1 = vrot.slane %v684_v56, %v17455_v37  ;;  %v14740_v56 = vld [vmem:[#allocation7 + $0x4] ss:$16 sps:$4 sm:$0xff]  }
 0x1dd   :  { %v524_v61 = vpack.c.bf16 %v516_v57, %v516_v57  ;;  %v937_v57 = vand.u32 %v17428_v7, %v852_v53  ;;  %v14822_v53 = vld [vmem:[#allocation7 + $0x1c0] ss:$16 sps:$4 sm:$0xff]  }
 0x1de   :  { %v508_v0 = vpop.xlane.xlu1 %507  ;;  %v730_v11 = vsel %vm729_vm7, %v712_v1, %v728_v4  ;;  %v14752_v1 = vld [vmem:[#allocation7 + $0x44] ss:$16 sps:$4 sm:$0xff]   ;;  %v14750_v4 = vld [vmem:[#allocation7 + $0x40] ss:$16 sps:$4 sm:$0xff]  }
 0x1df   :  { %v685_v2 = vunpack.c.l.b16 %v524_v61  ;;  %v517_v3 = vmul.f32 0.0009765625, %v508_v0  ;;  %v934_v61 = vand.u32 %v12941_v50, %v17428_v7  ;;  %v14744_v0 = vld [vmem:[#allocation7 + $0x20] ss:$16 sps:$4 sm:$0xff]   ;;  %v14824_v50 = vld [vmem:[#allocation7 + $0x1c4] ss:$16 sps:$4 sm:$0xff]  }
 0x1e1   :  { %v716_v6 = vrot.slane %v685_v2, %v17455_v37  ;;  %v525_v8 = vpack.c.bf16 %v517_v3, %v517_v3  ;;  %v14741_v2 = vld [vmem:[#allocation7 + $0x8] ss:$16 sps:$4 sm:$0xff]   ;;  %v14749_v3 = vld [vmem:[#allocation7 + $0x2c] ss:$16 sps:$4 sm:$0xff]  }
 0x1e3   :  { %v686_v12 = vunpack.c.l.b16 %v525_v8  ;;  %v732_v13 = vsel %vm731_vm8, %v716_v6, %v730_v11  ;;  %v14755_v6 = vld [vmem:[#allocation7 + $0x4c] ss:$16 sps:$4 sm:$0xff]   ;;  %v14756_v8 = vld [vmem:[#allocation7 + $0x60] ss:$16 sps:$4 sm:$0xff]  }
 0x1e4   :  { %v14762_v11 = vld [vmem:[#allocation7 + $0x80] ss:$16 sps:$4 sm:$0xff]  }
 0x1e5   :  { %v720_v17 = vrot.slane %v686_v12, %v17455_v37  ;;  %v14770_v12 = vld [vmem:[#allocation7 + $0xa4] ss:$16 sps:$4 sm:$0xff]  }
 0x1e7   :  { %v734_v23 = vsel %vm733_vm9, %v720_v17, %v732_v13  ;;  %v14759_v13 = vld [vmem:[#allocation7 + $0x68] ss:$16 sps:$4 sm:$0xff]   ;;  %v14767_v17 = vld [vmem:[#allocation7 + $0x8c] ss:$16 sps:$4 sm:$0xff]  }
 0x1e8   :  { %v17474_v24 = vpack.c.b16 %v734_v23, %v734_v23  ;;  %v14773_v23 = vld [vmem:[#allocation7 + $0xac] ss:$16 sps:$4 sm:$0xff]  }
 0x1ea   :  { %12942 = vmatmul.mubr.msk.bf16.vlgmr.msra.gmra.mrb[0].mxu0 %vm853_vm10, %v17474_v24  ;;  %12943 = vmatmul.mubr.msk.bf16.vlgmr.msra.gmra.mrb[0].mxu1 %vm853_vm10, %v17474_v24 }
 0x1eb   :  { %1022 = vmatpush1.bf16.msra.mxu0 %v874_v19  ;;  %1063 = vmatpush1.bf16.msra.mxu1 %v880_v20  ;;  %v907_v19 = vand.u32 %v17428_v7, %v810_v31  ;;  %v825_v20 = vrot.slane %v811_v32, %v17424_v63  ;;  %v14785_v31 = vld [vmem:[#allocation7 + $0xec] ss:$16 sps:$4 sm:$0xff]   ;;  %v14786_v32 = vld [vmem:[#allocation7 + $0x100] ss:$16 sps:$4 sm:$0xff]  }
 0x1ec   :  { %1053 = vmatprep.mubr.bf16.mxu0 %v16970_v16  ;;  %1094 = vmatprep.mubr.bf16.mxu1 %v16970_v16 }
 0x1ed   :  { %1103 = vmatprep.subr.bf16.mxu0 %v889_v26  ;;  %1144 = vmatprep.subr.bf16.mxu1 %v895_v27  ;;  %v827_v38 = vcombine.high %v825_v20, %v825_v20  ;;  %v916_v49 = vand.u32 %v17428_v7, %v825_v20  ;;  %v14771_v26 = vld [vmem:[#allocation7 + $0xa8] ss:$16 sps:$4 sm:$0xff]   ;;  %v14779_v27 = vld [vmem:[#allocation7 + $0xcc] ss:$16 sps:$4 sm:$0xff]  }
 0x1ee   :  { %v14797_v20 = vld [vmem:[#allocation7 + $0x12c] ss:$16 sps:$4 sm:$0xff]  }
 0x1ef   :  { %v919_v43 = vand.u32 %v17428_v7, %v827_v38  ;;  %v14747_v7 = vld [vmem:[#allocation7 + $0x28] ss:$16 sps:$4 sm:$0xff]   ;;  %v14806_v38 = vld [vmem:[#allocation7 + $0x164] ss:$16 sps:$4 sm:$0xff]  }
 0x1f2   :  { %12944 = vmatmul.mubr.msk.bf16.vlgmr.msra.gmra.mrb[4].mxu0 %vm853_vm10, %v17474_v24  ;;  %12945 = vmatmul.mubr.msk.bf16.vlgmr.msra.gmra.mrb[4].mxu1 %vm853_vm10, %v17474_v24 }
 0x1f3   :  { %1104 = vmatpush1.bf16.msra.mxu0 %v886_v33  ;;  %1145 = vmatpush1.bf16.msra.mxu1 %v892_v34  ;;  %v14794_v33 = vld [vmem:[#allocation7 + $0x124] ss:$16 sps:$4 sm:$0xff]   ;;  %v14783_v34 = vld [vmem:[#allocation7 + $0xe8] ss:$16 sps:$4 sm:$0xff]  }
 0x1f4   :  { %1135 = vmatprep.mubr.bf16.mxu0 %v16970_v16  ;;  %1176 = vmatprep.mubr.bf16.mxu1 %v16970_v16 }
 0x1f5   :  { %1185 = vmatprep.subr.bf16.mxu0 %v901_v14  ;;  %1226 = vmatprep.subr.bf16.mxu1 %v907_v19  ;;  %v14792_v14 = vld [vmem:[#allocation7 + $0x120] ss:$16 sps:$4 sm:$0xff]   ;;  %v14800_v19 = vld [vmem:[#allocation7 + $0x144] ss:$16 sps:$4 sm:$0xff]  }
 0x1fa   :  { %12946 = vmatmul.mubr.msk.bf16.vlgmr.msra.gmra.mrb[8].mxu0 %vm853_vm10, %v17474_v24  ;;  %12947 = vmatmul.mubr.msk.bf16.vlgmr.msra.gmra.mrb[8].mxu1 %vm853_vm10, %v17474_v24 }
 0x1fb   :  { %1186 = vmatpush1.bf16.msra.mxu0 %v898_v40  ;;  %1227 = vmatpush1.bf16.msra.mxu1 %v904_v41  ;;  %v14803_v40 = vld [vmem:[#allocation7 + $0x14c] ss:$16 sps:$4 sm:$0xff]   ;;  %v14804_v41 = vld [vmem:[#allocation7 + $0x160] ss:$16 sps:$4 sm:$0xff]  }
 0x1fc   :  { %1217 = vmatprep.mubr.bf16.mxu0 %v16970_v16  ;;  %1258 = vmatprep.mubr.bf16.mxu1 %v16970_v16 }
 0x1fd   :  { %1267 = vmatprep.subr.bf16.mxu0 %v913_v42  ;;  %1308 = vmatprep.subr.bf16.mxu1 %v919_v43  ;;  %v14801_v42 = vld [vmem:[#allocation7 + $0x148] ss:$16 sps:$4 sm:$0xff]   ;;  %v14812_v43 = vld [vmem:[#allocation7 + $0x184] ss:$16 sps:$4 sm:$0xff]  }
 0x202   :  { %12948 = vmatmul.mubr.msk.bf16.vlgmr.msra.gmra.mrb[12].mxu0 %vm853_vm10, %v17474_v24  ;;  %12949 = vmatmul.mubr.msk.bf16.vlgmr.msra.gmra.mrb[12].mxu1 %vm853_vm10, %v17474_v24 }
 0x203   :  { %1268 = vmatpush1.bf16.msra.mxu0 %v910_v48  ;;  %1309 = vmatpush1.bf16.msra.mxu1 %v916_v49  ;;  %v14815_v48 = vld [vmem:[#allocation7 + $0x18c] ss:$16 sps:$4 sm:$0xff]   ;;  %v14816_v49 = vld [vmem:[#allocation7 + $0x1a0] ss:$16 sps:$4 sm:$0xff]  }
 0x204   :  { %1299 = vmatprep.mubr.bf16.mxu0 %v16970_v16  ;;  %1340 = vmatprep.mubr.bf16.mxu1 %v16970_v16 }
 0x205   :  { %1349 = vmatprep.subr.bf16.mxu0 %v925_v51  ;;  %1390 = vmatprep.subr.bf16.mxu1 %v931_v52  ;;  %v14813_v51 = vld [vmem:[#allocation7 + $0x188] ss:$16 sps:$4 sm:$0xff]   ;;  %v14821_v52 = vld [vmem:[#allocation7 + $0x1ac] ss:$16 sps:$4 sm:$0xff]  }
 0x20a   :  { %12950 = vmatmul.mubr.msk.bf16.vlgmr.msra.gmra.mrb[16].mxu0 %vm853_vm10, %v17474_v24  ;;  %12951 = vmatmul.mubr.msk.bf16.vlgmr.msra.gmra.mrb[16].mxu1 %vm853_vm10, %v17474_v24 }
 0x20b   :  { %1350 = vmatpush1.bf16.msra.mxu0 %v922_v54  ;;  %1391 = vmatpush1.bf16.msra.mxu1 %v928_v55  ;;  %v14819_v54 = vld [vmem:[#allocation7 + $0x1a8] ss:$16 sps:$4 sm:$0xff]   ;;  %v14830_v55 = vld [vmem:[#allocation7 + $0x1e4] ss:$16 sps:$4 sm:$0xff]  }
 0x20c   :  { %1381 = vmatprep.mubr.bf16.mxu0 %v16970_v16  ;;  %1422 = vmatprep.mubr.bf16.mxu1 %v16970_v16 }
 0x20d   :  { %1431 = vmatprep.subr.bf16.mxu0 %v937_v57  ;;  %6512 = vmatprep.subr.bf16.mxu1 %v14740_v56  ;;  %v14827_v56 = vld [vmem:[#allocation7 + $0x1cc] ss:$16 sps:$4 sm:$0xff]   ;;  %v14828_v57 = vld [vmem:[#allocation7 + $0x1e0] ss:$16 sps:$4 sm:$0xff]  }
 0x212   :  { %12952 = vmatmul.mubr.msk.bf16.vlgmr.msra.gmra.mrb[20].mxu0 %vm853_vm10, %v17474_v24  ;;  %12953 = vmatmul.mubr.msk.bf16.vlgmr.msra.gmra.mrb[20].mxu1 %vm853_vm10, %v17474_v24 }
 0x213   :  { %1432 = vmatpush1.bf16.msra.mxu0 %v934_v61  ;;  %1463 = vmatprep.mubr.bf16.mxu0 %v16970_v16  ;;  %v14753_v16 = vld [vmem:[#allocation7 + $0x48] ss:$16 sps:$4 sm:$0xff]   ;;  %v14833_v61 = vld [vmem:[#allocation7 + $0x1ec] ss:$16 sps:$4 sm:$0xff]  }
 0x214   :  { %7045 = vmatprep.subr.bf16.mxu0 %v14743_v59  ;;  %6513 = vmatpush1.bf16.msra.mxu1 %v14738_v58  ;;  %v14836_v58 = vld [vmem:[#allocation7 + $0x204] ss:$16 sps:$4 sm:$0xff]   ;;  %v14825_v59 = vld [vmem:[#allocation7 + $0x1c8] ss:$16 sps:$4 sm:$0xff]  }
 0x215   :  { %6514 = vmatprep.subr.bf16.mxu1 %v14746_v62  ;;  %v14831_v62 = vld [vmem:[#allocation7 + $0x1e8] ss:$16 sps:$4 sm:$0xff]  }
 0x218   :  { %6515 = vmatpush1.bf16.msra.mxu1 %v14744_v0  ;;  %v14839_v0 = vld [vmem:[#allocation7 + $0x20c] ss:$16 sps:$4 sm:$0xff]  }
 0x219   :  { %6516 = vmatprep.subr.bf16.mxu1 %v14752_v1  ;;  %v17544_v1 = vsub.s32 0, %v17421_v60 }
 0x21a   :  { %12954 = vmatmul.mubr.msk.bf16.vlgmr.msra.gmra.mrb[24].mxu0 %vm853_vm10, %v17474_v24  ;;  %v14774_v24 = vld [vmem:[#allocation7 + $0xc0] ss:$16 sps:$4 sm:$0xff]  }
 0x21b   :  { %7046 = vmatpush1.bf16.msra.mxu0 %v14741_v2  ;;  %v17546_v2 = vld [vmem:[#allocation5] sm:$0xff] }
 0x21c   :  { %7047 = vmatprep.subr.bf16.mxu0 %v14749_v3  ;;  %6517 = vmatpush1.bf16.msra.mxu1 %v14750_v4  ;;  %v17549_v3 = vsub.s32 1, %v17421_v60  ;;  %v17552_v4 = vsub.s32 3, %v17421_v60 }
 0x21d   :  { %6518 = vmatprep.subr.bf16.mxu1 %v14758_v5  ;;  %v544_v5 = vrot.slane %v17546_v2, %v17544_v1 }
 0x21f   :  { %7048 = vmatpush1.bf16.msra.mxu0 %v14747_v7  ;;  %v548_v7 = vrot.slane %v17546_v2, %v17549_v3 }
 0x220   :  { %7049 = vmatprep.subr.bf16.mxu0 %v14755_v6  ;;  %6519 = vmatpush1.bf16.msra.mxu1 %v14756_v8  ;;  %v556_v6 = vrot.slane %v17546_v2, %v17552_v4 }
 0x221   :  { %6520 = vmatprep.subr.bf16.mxu1 %v14764_v9 }
 0x223   :  { %7050 = vmatpush1.bf16.msra.mxu0 %v14753_v16 }
 0x224   :  { %7051 = vmatprep.subr.bf16.mxu0 %v14761_v10  ;;  %6521 = vmatpush1.bf16.msra.mxu1 %v14762_v11 }
 0x225   :  { %6522 = vmatprep.subr.bf16.mxu1 %v14770_v12 }
 0x227   :  { %7052 = vmatpush1.bf16.msra.mxu0 %v14759_v13 }
 0x228   :  { %7053 = vmatprep.subr.bf16.mxu0 %v14767_v17  ;;  %6523 = vmatpush1.bf16.msra.mxu1 %v14768_v18  ;;  %v14834_v18 = vld [vmem:[#allocation7 + $0x200] ss:$16 sps:$4 sm:$0xff]  }
 0x229   :  { %6524 = vmatprep.subr.bf16.mxu1 %v14776_v21  ;;  %v14837_v21 = vld [vmem:[#allocation7 + $0x208] ss:$16 sps:$4 sm:$0xff]  }
 0x22b   :  { %7054 = vmatpush1.bf16.msra.mxu0 %v14765_v22 }
 0x22c   :  { %7055 = vmatprep.subr.bf16.mxu0 %v14773_v23  ;;  %6525 = vmatpush1.bf16.msra.mxu1 %v14774_v24 }
 0x22d   :  { %6526 = vmatprep.subr.bf16.mxu1 %v14782_v25 }
 0x22f   :  { %7056 = vmatpush1.bf16.msra.mxu0 %v14771_v26  ;;  %v14842_v26 = vld [vmem:[#allocation7 + $0x224] ss:$16 sps:$4 sm:$0xff]  }
 0x230   :  { %7057 = vmatprep.subr.bf16.mxu0 %v14779_v27  ;;  %6527 = vmatpush1.bf16.msra.mxu1 %v14780_v28  ;;  %v14845_v27 = vld [vmem:[#allocation7 + $0x22c] ss:$16 sps:$4 sm:$0xff]  }
 0x231   :  { %6528 = vmatprep.subr.bf16.mxu1 %v14788_v29  ;;  %v14840_v29 = vld [vmem:[#allocation7 + $0x220] ss:$16 sps:$4 sm:$0xff]  }
 0x233   :  { %7058 = vmatpush1.bf16.msra.mxu0 %v14777_v30  ;;  %v14843_v30 = vld [vmem:[#allocation7 + $0x228] ss:$16 sps:$4 sm:$0xff]  }
 0x234   :  { %7059 = vmatprep.subr.bf16.mxu0 %v14785_v31  ;;  %6529 = vmatpush1.bf16.msra.mxu1 %v14786_v32  ;;  %v14848_v32 = vld [vmem:[#allocation7 + $0x244] ss:$16 sps:$4 sm:$0xff]  }
 0x235   :  { %6530 = vmatprep.subr.bf16.mxu1 %v14794_v33  ;;  %v14851_v33 = vld [vmem:[#allocation7 + $0x24c] ss:$16 sps:$4 sm:$0xff]  }
 0x237   :  { %7060 = vmatpush1.bf16.msra.mxu0 %v14783_v34 }
 0x238   :  { %7061 = vmatprep.subr.bf16.mxu0 %v14791_v35  ;;  %6531 = vmatpush1.bf16.msra.mxu1 %v14792_v14 }
 0x239   :  { %6532 = vmatprep.subr.bf16.mxu1 %v14800_v19 }
 0x23b   :  { %7062 = vmatpush1.bf16.msra.mxu0 %v14789_v15  ;;  %v17571_v15 = vsub.s32 2, %v17421_v60 }
 0x23c   :  { %7063 = vmatprep.subr.bf16.mxu0 %v14797_v20  ;;  %6533 = vmatpush1.bf16.msra.mxu1 %v14798_v36 }
 0x23d   :  { %6534 = vmatprep.subr.bf16.mxu1 %v14806_v38  ;;  %v17573_v38 = vld [vmem:[#allocation5 + $0x8] sm:$0xff] }
 0x23f   :  { %7064 = vmatpush1.bf16.msra.mxu0 %v14795_v39 }
 0x240   :  { %7065 = vmatprep.subr.bf16.mxu0 %v14803_v40  ;;  %6535 = vmatpush1.bf16.msra.mxu1 %v14804_v41  ;;  %v14846_v41 = vld [vmem:[#allocation7 + $0x240] ss:$16 sps:$4 sm:$0xff]  }
 0x241   :  { %6536 = vmatprep.subr.bf16.mxu1 %v14812_v43  ;;  %v584_v43 = vrot.slane %v17573_v38, %v17571_v15 }
 0x243   :  { %7066 = vmatpush1.bf16.msra.mxu0 %v14801_v42  ;;  %v14849_v42 = vld [vmem:[#allocation7 + $0x248] ss:$16 sps:$4 sm:$0xff]  }
 0x244   :  { %7067 = vmatprep.subr.bf16.mxu0 %v14809_v44  ;;  %6537 = vmatpush1.bf16.msra.mxu1 %v14810_v45  ;;  %v14854_v44 = vld [vmem:[#allocation7 + $0x264] ss:$16 sps:$4 sm:$0xff]   ;;  %v14857_v45 = vld [vmem:[#allocation7 + $0x26c] ss:$16 sps:$4 sm:$0xff]  }
 0x245   :  { %6538 = vmatprep.subr.bf16.mxu1 %v14818_v47  ;;  %v14852_v47 = vld [vmem:[#allocation7 + $0x260] ss:$16 sps:$4 sm:$0xff]  }
 0x247   :  { %7068 = vmatpush1.bf16.msra.mxu0 %v14807_v46  ;;  %v588_v46 = vrot.slane %v17573_v38, %v17552_v4 }
 0x248   :  { %7069 = vmatprep.subr.bf16.mxu0 %v14815_v48  ;;  %6539 = vmatpush1.bf16.msra.mxu1 %v14816_v49  ;;  %v14855_v48 = vld [vmem:[#allocation7 + $0x268] ss:$16 sps:$4 sm:$0xff]   ;;  %v17580_v49 = vsub.s32 4, %v17421_v60 }
 0x249   :  { %6540 = vmatprep.subr.bf16.mxu1 %v14824_v50 }
 0x24b   :  { %7070 = vmatpush1.bf16.msra.mxu0 %v14813_v51 }
 0x24c   :  { %7071 = vmatprep.subr.bf16.mxu0 %v14821_v52  ;;  %6541 = vmatpush1.bf16.msra.mxu1 %v14822_v53 }
 0x24d   :  { %6542 = vmatprep.subr.bf16.mxu1 %v14830_v55  ;;  %v14860_v55 = vld [vmem:[#allocation7 + $0x284] ss:$16 sps:$4 sm:$0xff]  }
 0x24f   :  { %7072 = vmatpush1.bf16.msra.mxu0 %v14819_v54 }
 0x250   :  { %7073 = vmatprep.subr.bf16.mxu0 %v14827_v56  ;;  %6543 = vmatpush1.bf16.msra.mxu1 %v14828_v57  ;;  %v14863_v56 = vld [vmem:[#allocation7 + $0x28c] ss:$16 sps:$4 sm:$0xff]  }
 0x251   :  { %6553 = vmatprep.subr.bf16.mxu1 %v14836_v58 }
 0x253   :  { %7074 = vmatpush1.bf16.msra.mxu0 %v14825_v59 }
 0x254   :  { %7075 = vmatprep.subr.bf16.mxu0 %v14833_v61  ;;  %v14858_v61 = vld [vmem:[#allocation7 + $0x280] ss:$16 sps:$4 sm:$0xff]  }
 0x257   :  { %7076 = vmatpush1.bf16.msra.mxu0 %v14831_v62  ;;  %v14861_v62 = vld [vmem:[#allocation7 + $0x288] ss:$16 sps:$4 sm:$0xff]  }
 0x258   :  { %7086 = vmatprep.subr.bf16.mxu0 %v14839_v0  ;;  %v17591_v0 = vsub.s32 6, %v17421_v60 }
 0x2bd   :  { %v973_v8 = vpop.f32.mrb[0].mxu0  ;;  %v17560_v9 = vpop.f32.mrb[0].mxu1 }
 0x2be   :  { %v974_v16 = vadd.f32 %v973_v8, %v544_v5  ;;  %v975_v10 = vpop.f32.mrb[1].mxu0  ;;  %v1016_v11 = vpop.f32.mrb[1].mxu1  ;;  %v17597_v8 = vsub.s32 7, %v17421_v60 }
 0x2bf   :  { %v976_v12 = vadd.f32 %v975_v10, %v548_v7  ;;  %v977_v13 = vpop.f32.mrb[2].mxu0  ;;  %v1018_v17 = vpop.f32.mrb[2].mxu1  ;;  %v1017_v22 = vadd.f32 %v1016_v11, %v556_v6  ;;  %v17594_v6 = vsub.s32 5, %v17421_v60  ;;  %v600_v10 = vrot.slane %v17573_v38, %v17591_v0  ;;  %v14866_v11 = vld [vmem:[#allocation7 + $0x2a4] ss:$16 sps:$4 sm:$0xff]  }
 0x2c0   :  { %v978_v23 = vpop.f32.mrb[3].mxu0  ;;  %v1019_v24 = vpop.f32.mrb[3].mxu1  ;;  %v1472_v28 = vpack.c.bf16 %v974_v16, %v974_v16  ;;  %v592_v16 = vrot.slane %v17573_v38, %v17580_v49  ;;  %v604_v17 = vrot.slane %v17573_v38, %v17597_v8 }
 0x2c1   :  { %v1473_v25 = vpack.c.bf16 %v976_v12, %v976_v12  ;;  %v1475_v31 = vpack.c.bf16 %v1017_v22, %v1017_v22  ;;  %v14869_v12 = vld [vmem:[#allocation7 + $0x2ac] ss:$16 sps:$4 sm:$0xff]   ;;  %v596_v13 = vrot.slane %v17573_v38, %v17594_v6 }
 0x2c2   :  { %v535_v38 = vld [vmem:[#allocation5 + $0x10] sm:$0xff] }
 0x2c3   :  { %6544 = vmatprep.mubr.bf16.mxu1 %v1473_v25  ;;  %7077 = vmatprep.mubr.bf16.mxu0 %v1473_v25 }
 0x2c4   :  { %6545 = vmatmul.mubr.bf16.vlgmr.msra.gmra.mrb[24].mxu1 %v1472_v28  ;;  %7078 = vmatmul.mubr.bf16.vlgmr.msra.gmra.mrb[28].mxu0 %v1472_v28  ;;  %v14872_v28 = vld [vmem:[#allocation7 + $0x2c4] ss:$16 sps:$4 sm:$0xff]  }
 0x2c5   :  { %6554 = vmatpush1.bf16.msra.mxu1 %v14834_v18  ;;  %7087 = vmatpush1.bf16.msra.mxu0 %v14837_v21  ;;  %v17562_v34 = vpop.f32.mrb[4].mxu0  ;;  %v17564_v35 = vpop.f32.mrb[4].mxu1  ;;  %v14864_v18 = vld [vmem:[#allocation7 + $0x2a0] ss:$16 sps:$4 sm:$0xff]   ;;  %v14867_v21 = vld [vmem:[#allocation7 + $0x2a8] ss:$16 sps:$4 sm:$0xff]  }
 0x2c6   :  { %6585 = vmatprep.mubr.bf16.mxu1 %v1475_v31  ;;  %7118 = vmatprep.mubr.bf16.mxu0 %v1475_v31  ;;  %v17566_v14 = vpop.f32.mrb[5].mxu0  ;;  %v17568_v19 = vpop.f32.mrb[5].mxu1 }
 0x2c7   :  { %v1059_v20 = vpop.f32.mrb[6].mxu0  ;;  %v1100_v36 = vpop.f32.mrb[6].mxu1  ;;  %6555 = vmatprep.subr.bf16.mxu1 %v14842_v26  ;;  %7088 = vmatprep.subr.bf16.mxu0 %v14845_v27 }
 0x2c8   :  { %v1060_v39 = vpop.f32.mrb[7].mxu0  ;;  %v1101_v40 = vpop.f32.mrb[7].mxu1  ;;  %v14870_v20 = vld [vmem:[#allocation7 + $0x2c0] ss:$16 sps:$4 sm:$0xff]   ;;  %v14873_v36 = vld [vmem:[#allocation7 + $0x2c8] ss:$16 sps:$4 sm:$0xff]  }
 0x2c9   :  { %6556 = vmatpush1.bf16.msra.mxu1 %v14840_v29  ;;  %7089 = vmatpush1.bf16.msra.mxu0 %v14843_v30  ;;  %v14875_v29 = vld [vmem:[#allocation7 + $0x2cc] ss:$16 sps:$4 sm:$0xff]  }
 0x2ca   :  { %6557 = vmatprep.subr.bf16.mxu1 %v14848_v32  ;;  %7090 = vmatprep.subr.bf16.mxu0 %v14851_v33 }
 0x2cd   :  { %6558 = vmatpush1.bf16.msra.mxu1 %v14846_v41  ;;  %7091 = vmatpush1.bf16.msra.mxu0 %v14849_v42  ;;  %v17582_v50 = vpop.f32.mrb[8].mxu0  ;;  %v1178_v51 = vpop.f32.mrb[8].mxu1  ;;  %v616_v41 = vrot.slane %v535_v38, %v17571_v15  ;;  %v14878_v42 = vld [vmem:[#allocation7 + $0x2e4] ss:$16 sps:$4 sm:$0xff]  }
 0x2ce   :  { %v17584_v52 = vadd.f32 %v1178_v51, %v584_v43  ;;  %v17586_v53 = vpop.f32.mrb[9].mxu0  ;;  %v1180_v54 = vpop.f32.mrb[9].mxu1  ;;  %6559 = vmatprep.subr.bf16.mxu1 %v14854_v44  ;;  %7092 = vmatprep.subr.bf16.mxu0 %v14857_v45  ;;  %v14881_v43 = vld [vmem:[#allocation7 + $0x2ec] ss:$16 sps:$4 sm:$0xff]   ;;  %v620_v44 = vrot.slane %v535_v38, %v17552_v4  ;;  %v14876_v45 = vld [vmem:[#allocation7 + $0x2e0] ss:$16 sps:$4 sm:$0xff]  }
 0x2cf   :  { %v17588_v57 = vadd.f32 %v1180_v54, %v588_v46  ;;  %v1141_v58 = vpop.f32.mrb[10].mxu0  ;;  %v1182_v59 = vpop.f32.mrb[10].mxu1  ;;  %v14879_v46 = vld [vmem:[#allocation7 + $0x2e8] ss:$16 sps:$4 sm:$0xff]  }
 0x2d0   :  { %v1142_v5 = vpop.f32.mrb[11].mxu0  ;;  %v1183_v7 = vpop.f32.mrb[11].mxu1  ;;  %v14887_v58 = vld [vmem:[#allocation7 + $0x30c] ss:$16 sps:$4 sm:$0xff]  }
 0x2d1   :  { %6560 = vmatpush1.bf16.msra.mxu1 %v14852_v47  ;;  %7093 = vmatpush1.bf16.msra.mxu0 %v14855_v48  ;;  %v14882_v5 = vld [vmem:[#allocation7 + $0x300] ss:$16 sps:$4 sm:$0xff]   ;;  %v14885_v7 = vld [vmem:[#allocation7 + $0x308] ss:$16 sps:$4 sm:$0xff]  }
 0x2d2   :  { %6561 = vmatprep.subr.bf16.mxu1 %v14860_v55  ;;  %7094 = vmatprep.subr.bf16.mxu0 %v14863_v56  ;;  %v14884_v56 = vld [vmem:[#allocation7 + $0x304] ss:$16 sps:$4 sm:$0xff]  }
 0x2d5   :  { %6562 = vmatpush1.bf16.msra.mxu1 %v14858_v61  ;;  %7095 = vmatpush1.bf16.msra.mxu0 %v14861_v62  ;;  %v1219_v22 = vpop.f32.mrb[12].mxu0  ;;  %v1260_v23 = vpop.f32.mrb[12].mxu1 }
 0x2d6   :  { %v17607_v24 = vadd.f32 %v1219_v22, %v592_v16  ;;  %v17609_v25 = vadd.f32 %v1260_v23, %v600_v10  ;;  %v1221_v26 = vpop.f32.mrb[13].mxu0  ;;  %v1262_v27 = vpop.f32.mrb[13].mxu1  ;;  %6563 = vmatprep.subr.bf16.mxu1 %v14866_v11  ;;  %7096 = vmatprep.subr.bf16.mxu0 %v14869_v12  ;;  %v624_v11 = vrot.slane %v535_v38, %v17580_v49  ;;  %v14888_v22 = vld [vmem:[#allocation7 + $0x320] ss:$16 sps:$4 sm:$0xff]   ;;  %v14891_v23 = vld [vmem:[#allocation7 + $0x328] ss:$16 sps:$4 sm:$0xff]  }
 0x2d7   :  { %v17611_v30 = vadd.f32 %v1221_v26, %v596_v13  ;;  %v17613_v31 = vadd.f32 %v1262_v27, %v604_v17  ;;  %v1223_v32 = vpop.f32.mrb[14].mxu0  ;;  %v1264_v33 = vpop.f32.mrb[14].mxu1  ;;  %v632_v12 = vrot.slane %v535_v38, %v17591_v0  ;;  %v14890_v13 = vld [vmem:[#allocation7 + $0x324] ss:$16 sps:$4 sm:$0xff]   ;;  %v14893_v17 = vld [vmem:[#allocation7 + $0x32c] ss:$16 sps:$4 sm:$0xff]  }
 0x2d8   :  { %v1224_v39 = vpop.f32.mrb[15].mxu0  ;;  %v1265_v40 = vpop.f32.mrb[15].mxu1 }
 0x2d9   :  { %6564 = vmatpush1.bf16.msra.mxu1 %v14864_v18  ;;  %7097 = vmatpush1.bf16.msra.mxu0 %v14867_v21  ;;  %v628_v18 = vrot.slane %v535_v38, %v17594_v6  ;;  %v636_v21 = vrot.slane %v535_v38, %v17597_v8 }
 0x2da   :  { %6565 = vmatprep.subr.bf16.mxu1 %v14872_v28  ;;  %7098 = vmatprep.subr.bf16.mxu0 %v14875_v29 }
 0x2dd   :  { %6566 = vmatpush1.bf16.msra.mxu1 %v14870_v20  ;;  %7099 = vmatpush1.bf16.msra.mxu0 %v14873_v36  ;;  %v17617_v47 = vpop.f32.mrb[16].mxu0  ;;  %v1342_v48 = vpop.f32.mrb[16].mxu1  ;;  %v14896_v20 = vld [vmem:[#allocation7 + $0x344] ss:$16 sps:$4 sm:$0xff]   ;;  %v14899_v36 = vld [vmem:[#allocation7 + $0x34c] ss:$16 sps:$4 sm:$0xff]  }
 0x2de   :  { %v17619_v51 = vadd.f32 %v1342_v48, %v616_v41  ;;  %v17621_v54 = vpop.f32.mrb[17].mxu0  ;;  %v1344_v55 = vpop.f32.mrb[17].mxu1  ;;  %6567 = vmatprep.subr.bf16.mxu1 %v14878_v42  ;;  %7100 = vmatprep.subr.bf16.mxu0 %v14881_v43  ;;  %v14894_v42 = vld [vmem:[#allocation7 + $0x340] ss:$16 sps:$4 sm:$0xff]   ;;  %v14897_v43 = vld [vmem:[#allocation7 + $0x348] ss:$16 sps:$4 sm:$0xff]  }
 0x2df   :  { %v17623_v59 = vadd.f32 %v1344_v55, %v620_v44  ;;  %v1305_v61 = vpop.f32.mrb[18].mxu0  ;;  %v1346_v62 = vpop.f32.mrb[18].mxu1  ;;  %v14905_v48 = vld [vmem:[#allocation7 + $0x36c] ss:$16 sps:$4 sm:$0xff]   ;;  %v14900_v55 = vld [vmem:[#allocation7 + $0x360] ss:$16 sps:$4 sm:$0xff]  }
 0x2e0   :  { %v1306_v16 = vpop.f32.mrb[19].mxu0  ;;  %v1347_v10 = vpop.f32.mrb[19].mxu1  ;;  %v14908_v62 = vld [vmem:[#allocation7 + $0x384] ss:$16 sps:$4 sm:$0xff]  }
 0x2e1   :  { %6568 = vmatpush1.bf16.msra.mxu1 %v14876_v45  ;;  %7101 = vmatpush1.bf16.msra.mxu0 %v14879_v46  ;;  %v14902_v46 = vld [vmem:[#allocation7 + $0x364] ss:$16 sps:$4 sm:$0xff]   ;;  %v14906_v16 = vld [vmem:[#allocation7 + $0x380] ss:$16 sps:$4 sm:$0xff]   ;;  %v14909_v10 = vld [vmem:[#allocation7 + $0x388] ss:$16 sps:$4 sm:$0xff]  }
 0x2e2   :  { %6569 = vmatprep.subr.bf16.mxu1 %v14884_v56  ;;  %7102 = vmatprep.subr.bf16.mxu0 %v14887_v58  ;;  %v14903_v56 = vld [vmem:[#allocation7 + $0x368] ss:$16 sps:$4 sm:$0xff]  }
 0x2e5   :  { %6570 = vmatpush1.bf16.msra.mxu1 %v14882_v5  ;;  %7103 = vmatpush1.bf16.msra.mxu0 %v14885_v7  ;;  %v1383_v26 = vpop.f32.mrb[20].mxu0  ;;  %v1424_v27 = vpop.f32.mrb[20].mxu1  ;;  %v14911_v5 = vld [vmem:[#allocation7 + $0x38c] ss:$16 sps:$4 sm:$0xff]  }
 0x2e6   :  { %v17629_v28 = vadd.f32 %v1383_v26, %v624_v11  ;;  %v17631_v29 = vadd.f32 %v1424_v27, %v632_v12  ;;  %v1385_v32 = vpop.f32.mrb[21].mxu0  ;;  %v1426_v33 = vpop.f32.mrb[21].mxu1  ;;  %6571 = vmatprep.subr.bf16.mxu1 %v14890_v13  ;;  %7104 = vmatprep.subr.bf16.mxu0 %v14893_v17  ;;  %v14914_v12 = vld [vmem:[#allocation7 + $0x3a4] ss:$16 sps:$4 sm:$0xff]   ;;  %v14917_v13 = vld [vmem:[#allocation7 + $0x3ac] ss:$16 sps:$4 sm:$0xff]   ;;  %v552_v27 = vrot.slane %v17546_v2, %v17571_v15 }
 0x2e7   :  { %v17633_v39 = vadd.f32 %v1385_v32, %v628_v18  ;;  %v17635_v40 = vadd.f32 %v1426_v33, %v636_v21  ;;  %v1387_v38 = vpop.f32.mrb[22].mxu0  ;;  %v1428_v41 = vpop.f32.mrb[22].mxu1  ;;  %v14912_v17 = vld [vmem:[#allocation7 + $0x3a0] ss:$16 sps:$4 sm:$0xff]   ;;  %v14915_v18 = vld [vmem:[#allocation7 + $0x3a8] ss:$16 sps:$4 sm:$0xff]  }
 0x2e8   :  { %v1388_v44 = vpop.f32.mrb[23].mxu0  ;;  %v1429_v45 = vpop.f32.mrb[23].mxu1  ;;  %v14920_v21 = vld [vmem:[#allocation7 + $0x3c4] ss:$16 sps:$4 sm:$0xff]   ;;  %v14921_v26 = vld [vmem:[#allocation7 + $0x3c8] ss:$16 sps:$4 sm:$0xff]   ;;  %v1015_v41 = vadd.f32 %v17560_v9, %v552_v27 }
 0x2e9   :  { %6572 = vmatpush1.bf16.msra.mxu1 %v14888_v22  ;;  %7105 = vmatpush1.bf16.msra.mxu0 %v14891_v23  ;;  %v14923_v22 = vld [vmem:[#allocation7 + $0x3cc] ss:$16 sps:$4 sm:$0xff]   ;;  %v14918_v23 = vld [vmem:[#allocation7 + $0x3c0] ss:$16 sps:$4 sm:$0xff]   ;;  %v14926_v32 = vld [vmem:[#allocation7 + $0x3e4] ss:$16 sps:$4 sm:$0xff]  }
 0x2ea   :  { %6573 = vmatprep.subr.bf16.mxu1 %v14896_v20  ;;  %7106 = vmatprep.subr.bf16.mxu0 %v14899_v36  ;;  %v14929_v33 = vld [vmem:[#allocation7 + $0x3ec] ss:$16 sps:$4 sm:$0xff]   ;;  %v564_v20 = vrot.slane %v17546_v2, %v17594_v6  ;;  %v14924_v36 = vld [vmem:[#allocation7 + $0x3e0] ss:$16 sps:$4 sm:$0xff]   ;;  %v14927_v38 = vld [vmem:[#allocation7 + $0x3e8] ss:$16 sps:$4 sm:$0xff]  }
 0x2eb   :  { %v14930_v45 = vld [vmem:[#allocation7 + $0x400] ss:$16 sps:$4 sm:$0xff]   ;;  %v14939_v9 = vld [vmem:[#allocation7 + $0x428] ss:$16 sps:$4 sm:$0xff]   ;;  %v14965_v27 = vld [vmem:[#allocation7 + $0x4ac] ss:$16 sps:$4 sm:$0xff]  }
 0x2ec   :  { %v1058_v44 = vadd.f32 %v17566_v14, %v564_v20  ;;  %v14947_v14 = vld [vmem:[#allocation7 + $0x44c] ss:$16 sps:$4 sm:$0xff]   ;;  %v14966_v20 = vld [vmem:[#allocation7 + $0x4c0] ss:$16 sps:$4 sm:$0xff]  }
 0x2ed   :  { %6574 = vmatpush1.bf16.msra.mxu1 %v14894_v42  ;;  %7107 = vmatpush1.bf16.msra.mxu0 %v14897_v43  ;;  %v17637_v58 = vpop.f32.mrb[24].mxu0  ;;  %v14932_v42 = vld [vmem:[#allocation7 + $0x404] ss:$16 sps:$4 sm:$0xff]   ;;  %v14935_v43 = vld [vmem:[#allocation7 + $0x40c] ss:$16 sps:$4 sm:$0xff]  }
 0x2ee   :  { %v17639_v61 = vpop.f32.mrb[25].mxu0  ;;  %6575 = vmatprep.subr.bf16.mxu1 %v14902_v46  ;;  %7108 = vmatprep.subr.bf16.mxu0 %v14905_v48  ;;  %v14933_v46 = vld [vmem:[#allocation7 + $0x408] ss:$16 sps:$4 sm:$0xff]   ;;  %v14938_v48 = vld [vmem:[#allocation7 + $0x424] ss:$16 sps:$4 sm:$0xff]   ;;  %v1477_v2 = vpack.c.bf16 %v1058_v44, %v1058_v44 }
 0x2ef   :  { %v1469_v7 = vpop.f32.mrb[26].mxu0  ;;  %v14975_v44 = vld [vmem:[#allocation7 + $0x4e8] ss:$16 sps:$4 sm:$0xff]  }
 0x2f0   :  { %v1470_v11 = vpop.f32.mrb[27].mxu0  ;;  %v14942_v7 = vld [vmem:[#allocation7 + $0x440] ss:$16 sps:$4 sm:$0xff]  }
 0x2f1   :  { %6576 = vmatpush1.bf16.msra.mxu1 %v14900_v55  ;;  %7109 = vmatpush1.bf16.msra.mxu0 %v14903_v56  ;;  %v14941_v55 = vld [vmem:[#allocation7 + $0x42c] ss:$16 sps:$4 sm:$0xff]   ;;  %v1474_v56 = vpack.c.bf16 %v1015_v41, %v1015_v41  ;;  %v14948_v11 = vld [vmem:[#allocation7 + $0x460] ss:$16 sps:$4 sm:$0xff]   ;;  %v14974_v41 = vld [vmem:[#allocation7 + $0x4e4] ss:$16 sps:$4 sm:$0xff]  }
 0x2f2   :  { %6577 = vmatprep.subr.bf16.mxu1 %v14908_v62  ;;  %7110 = vmatprep.subr.bf16.mxu0 %v14911_v5  ;;  %v14936_v62 = vld [vmem:[#allocation7 + $0x420] ss:$16 sps:$4 sm:$0xff]   ;;  %v14944_v5 = vld [vmem:[#allocation7 + $0x444] ss:$16 sps:$4 sm:$0xff]  }
 0x2f5   :  { %6578 = vmatpush1.bf16.msra.mxu1 %v14906_v16  ;;  %7111 = vmatpush1.bf16.msra.mxu0 %v14909_v10  ;;  %v14945_v16 = vld [vmem:[#allocation7 + $0x448] ss:$16 sps:$4 sm:$0xff]   ;;  %v14950_v10 = vld [vmem:[#allocation7 + $0x464] ss:$16 sps:$4 sm:$0xff]  }
 0x2f6   :  { %6579 = vmatprep.subr.bf16.mxu1 %v14914_v12  ;;  %7112 = vmatprep.subr.bf16.mxu0 %v14917_v13  ;;  %v14953_v12 = vld [vmem:[#allocation7 + $0x46c] ss:$16 sps:$4 sm:$0xff]   ;;  %v14951_v13 = vld [vmem:[#allocation7 + $0x468] ss:$16 sps:$4 sm:$0xff]  }
 0x2f9   :  { %6580 = vmatpush1.bf16.msra.mxu1 %v14912_v17  ;;  %7113 = vmatpush1.bf16.msra.mxu0 %v14915_v18  ;;  %v14956_v17 = vld [vmem:[#allocation7 + $0x484] ss:$16 sps:$4 sm:$0xff]   ;;  %v14954_v18 = vld [vmem:[#allocation7 + $0x480] ss:$16 sps:$4 sm:$0xff]  }
 0x2fa   :  { %6581 = vmatprep.subr.bf16.mxu1 %v14920_v21  ;;  %7114 = vmatprep.subr.bf16.mxu0 %v14923_v22  ;;  %v14959_v21 = vld [vmem:[#allocation7 + $0x48c] ss:$16 sps:$4 sm:$0xff]   ;;  %v14957_v22 = vld [vmem:[#allocation7 + $0x488] ss:$16 sps:$4 sm:$0xff]  }
 0x2fd   :  { %6582 = vmatpush1.bf16.msra.mxu1 %v14918_v23  ;;  %7115 = vmatpush1.bf16.msra.mxu0 %v14921_v26  ;;  %v14962_v23 = vld [vmem:[#allocation7 + $0x4a4] ss:$16 sps:$4 sm:$0xff]   ;;  %v14960_v26 = vld [vmem:[#allocation7 + $0x4a0] ss:$16 sps:$4 sm:$0xff]  }
 0x2fe   :  { %6583 = vmatprep.subr.bf16.mxu1 %v14926_v32  ;;  %7116 = vmatprep.subr.bf16.mxu0 %v14929_v33  ;;  %v14963_v32 = vld [vmem:[#allocation7 + $0x4a8] ss:$16 sps:$4 sm:$0xff]   ;;  %v14968_v33 = vld [vmem:[#allocation7 + $0x4c4] ss:$16 sps:$4 sm:$0xff]  }
 0x301   :  { %6584 = vmatpush1.bf16.msra.mxu1 %v14924_v36  ;;  %7117 = vmatpush1.bf16.msra.mxu0 %v14927_v38  ;;  %v14971_v36 = vld [vmem:[#allocation7 + $0x4cc] ss:$16 sps:$4 sm:$0xff]   ;;  %v14969_v38 = vld [vmem:[#allocation7 + $0x4c8] ss:$16 sps:$4 sm:$0xff]  }
 0x302   :  { %6594 = vmatprep.subr.bf16.mxu1 %v14932_v42  ;;  %7127 = vmatprep.subr.bf16.mxu0 %v14935_v43  ;;  %v14972_v42 = vld [vmem:[#allocation7 + $0x4e0] ss:$16 sps:$4 sm:$0xff]   ;;  %v14977_v43 = vld [vmem:[#allocation7 + $0x4ec] ss:$16 sps:$4 sm:$0xff]  }
 0x304   :  { %6586 = vmatmul.mubr.bf16.vlgmr.msra.gmra.mrb[24].mxu1 %v1474_v56  ;;  %7119 = vmatmul.mubr.bf16.vlgmr.msra.gmra.mrb[28].mxu0 %v1474_v56  ;;  %v14986_v56 = vld [vmem:[#allocation7 + $0x524] ss:$16 sps:$4 sm:$0xff]  }
 0x305   :  { %6595 = vmatpush1.bf16.msra.mxu1 %v14930_v45  ;;  %6626 = vmatprep.mubr.bf16.mxu1 %v1477_v2  ;;  %v14980_v45 = vld [vmem:[#allocation7 + $0x504] ss:$16 sps:$4 sm:$0xff]  }
 0x306   :  { %7128 = vmatpush1.bf16.msra.mxu0 %v14933_v46  ;;  %7159 = vmatprep.mubr.bf16.mxu0 %v1477_v2  ;;  %v14978_v46 = vld [vmem:[#allocation7 + $0x500] ss:$16 sps:$4 sm:$0xff]  }
 0x307   :  { %6596 = vmatprep.subr.bf16.mxu1 %v14938_v48  ;;  %7129 = vmatprep.subr.bf16.mxu0 %v14941_v55  ;;  %v14983_v48 = vld [vmem:[#allocation7 + $0x50c] ss:$16 sps:$4 sm:$0xff]   ;;  %v14981_v55 = vld [vmem:[#allocation7 + $0x508] ss:$16 sps:$4 sm:$0xff]   ;;  %v14984_v2 = vld [vmem:[#allocation7 + $0x520] ss:$16 sps:$4 sm:$0xff]  }
 0x309   :  { %6597 = vmatpush1.bf16.msra.mxu1 %v14936_v62  ;;  %v14989_v62 = vld [vmem:[#allocation7 + $0x52c] ss:$16 sps:$4 sm:$0xff]  }
 0x30a   :  { %7130 = vmatpush1.bf16.msra.mxu0 %v14939_v9  ;;  %6598 = vmatprep.subr.bf16.mxu1 %v14944_v5  ;;  %v14987_v9 = vld [vmem:[#allocation7 + $0x528] ss:$16 sps:$4 sm:$0xff]   ;;  %v14992_v5 = vld [vmem:[#allocation7 + $0x544] ss:$16 sps:$4 sm:$0xff]  }
 0x30b   :  { %7131 = vmatprep.subr.bf16.mxu0 %v14947_v14  ;;  %v14990_v14 = vld [vmem:[#allocation7 + $0x540] ss:$16 sps:$4 sm:$0xff]  }
 0x30d   :  { %6599 = vmatpush1.bf16.msra.mxu1 %v14942_v7  ;;  %v14995_v7 = vld [vmem:[#allocation7 + $0x54c] ss:$16 sps:$4 sm:$0xff]  }
 0x30e   :  { %7132 = vmatpush1.bf16.msra.mxu0 %v14945_v16  ;;  %6600 = vmatprep.subr.bf16.mxu1 %v14950_v10  ;;  %v14993_v16 = vld [vmem:[#allocation7 + $0x548] ss:$16 sps:$4 sm:$0xff]   ;;  %v14998_v10 = vld [vmem:[#allocation7 + $0x564] ss:$16 sps:$4 sm:$0xff]  }
 0x30f   :  { %7133 = vmatprep.subr.bf16.mxu0 %v14953_v12  ;;  %v15001_v12 = vld [vmem:[#allocation7 + $0x56c] ss:$16 sps:$4 sm:$0xff]  }
 0x311   :  { %6601 = vmatpush1.bf16.msra.mxu1 %v14948_v11  ;;  %v14996_v11 = vld [vmem:[#allocation7 + $0x560] ss:$16 sps:$4 sm:$0xff]  }
 0x312   :  { %7134 = vmatpush1.bf16.msra.mxu0 %v14951_v13  ;;  %6602 = vmatprep.subr.bf16.mxu1 %v14956_v17  ;;  %v14999_v13 = vld [vmem:[#allocation7 + $0x568] ss:$16 sps:$4 sm:$0xff]   ;;  %v15004_v17 = vld [vmem:[#allocation7 + $0x584] ss:$16 sps:$4 sm:$0xff]  }
 0x313   :  { %7135 = vmatprep.subr.bf16.mxu0 %v14959_v21  ;;  %v15007_v21 = vld [vmem:[#allocation7 + $0x58c] ss:$16 sps:$4 sm:$0xff]  }
 0x315   :  { %6603 = vmatpush1.bf16.msra.mxu1 %v14954_v18  ;;  %v15002_v18 = vld [vmem:[#allocation7 + $0x580] ss:$16 sps:$4 sm:$0xff]  }
 0x316   :  { %7136 = vmatpush1.bf16.msra.mxu0 %v14957_v22  ;;  %6604 = vmatprep.subr.bf16.mxu1 %v14962_v23  ;;  %v15005_v22 = vld [vmem:[#allocation7 + $0x588] ss:$16 sps:$4 sm:$0xff]   ;;  %v15010_v23 = vld [vmem:[#allocation7 + $0x5a4] ss:$16 sps:$4 sm:$0xff]  }
 0x317   :  { %7137 = vmatprep.subr.bf16.mxu0 %v14965_v27  ;;  %v15013_v27 = vld [vmem:[#allocation7 + $0x5ac] ss:$16 sps:$4 sm:$0xff]  }
 0x319   :  { %6605 = vmatpush1.bf16.msra.mxu1 %v14960_v26  ;;  %v15008_v26 = vld [vmem:[#allocation7 + $0x5a0] ss:$16 sps:$4 sm:$0xff]  }
 0x31a   :  { %7138 = vmatpush1.bf16.msra.mxu0 %v14963_v32  ;;  %6606 = vmatprep.subr.bf16.mxu1 %v14968_v33  ;;  %v15011_v32 = vld [vmem:[#allocation7 + $0x5a8] ss:$16 sps:$4 sm:$0xff]   ;;  %v15016_v33 = vld [vmem:[#allocation7 + $0x5c4] ss:$16 sps:$4 sm:$0xff]  }
 0x31b   :  { %7139 = vmatprep.subr.bf16.mxu0 %v14971_v36  ;;  %v15019_v36 = vld [vmem:[#allocation7 + $0x5cc] ss:$16 sps:$4 sm:$0xff]  }
 0x31d   :  { %6607 = vmatpush1.bf16.msra.mxu1 %v14966_v20  ;;  %v15014_v20 = vld [vmem:[#allocation7 + $0x5c0] ss:$16 sps:$4 sm:$0xff]  }
 0x31e   :  { %7140 = vmatpush1.bf16.msra.mxu0 %v14969_v38  ;;  %6608 = vmatprep.subr.bf16.mxu1 %v14974_v41  ;;  %v17647_v38 = vld [vmem:[#allocation5] sm:$0xff] }
 0x31f   :  { %7141 = vmatprep.subr.bf16.mxu0 %v14977_v43  ;;  %v560_v41 = vrot.slane %v17647_v38, %v17580_v49  ;;  %v15022_v43 = vld [vmem:[#allocation7 + $0x5e4] ss:$16 sps:$4 sm:$0xff]  }
 0x321   :  { %6609 = vmatpush1.bf16.msra.mxu1 %v14972_v42  ;;  %v15017_v42 = vld [vmem:[#allocation7 + $0x5c8] ss:$16 sps:$4 sm:$0xff]  }
 0x322   :  { %7142 = vmatpush1.bf16.msra.mxu0 %v14975_v44  ;;  %6610 = vmatprep.subr.bf16.mxu1 %v14980_v45  ;;  %v15020_v44 = vld [vmem:[#allocation7 + $0x5e0] ss:$16 sps:$4 sm:$0xff]   ;;  %v15025_v45 = vld [vmem:[#allocation7 + $0x5ec] ss:$16 sps:$4 sm:$0xff]  }
 0x323   :  { %7143 = vmatprep.subr.bf16.mxu0 %v14983_v48  ;;  %v1056_v48 = vadd.f32 %v17562_v34, %v560_v41  ;;  %v15035_v34 = vld [vmem:[#allocation7 + $0x628] ss:$16 sps:$4 sm:$0xff]   ;;  %v15056_v41 = vld [vmem:[#allocation7 + $0x6a0] ss:$16 sps:$4 sm:$0xff]  }
 0x325   :  { %6611 = vmatpush1.bf16.msra.mxu1 %v14978_v46  ;;  %v572_v46 = vrot.slane %v17647_v38, %v17597_v8 }
 0x326   :  { %7144 = vmatpush1.bf16.msra.mxu0 %v14981_v55  ;;  %6612 = vmatprep.subr.bf16.mxu1 %v14986_v56  ;;  %v15023_v55 = vld [vmem:[#allocation7 + $0x5e8] ss:$16 sps:$4 sm:$0xff]   ;;  %v15028_v56 = vld [vmem:[#allocation7 + $0x604] ss:$16 sps:$4 sm:$0xff]  }
 0x327   :  { %7145 = vmatprep.subr.bf16.mxu0 %v14989_v62  ;;  %v15026_v62 = vld [vmem:[#allocation7 + $0x600] ss:$16 sps:$4 sm:$0xff]  }
 0x329   :  { %6613 = vmatpush1.bf16.msra.mxu1 %v14984_v2  ;;  %v15031_v2 = vld [vmem:[#allocation7 + $0x60c] ss:$16 sps:$4 sm:$0xff]  }
 0x32a   :  { %7146 = vmatpush1.bf16.msra.mxu0 %v14987_v9  ;;  %6614 = vmatprep.subr.bf16.mxu1 %v14992_v5  ;;  %v1099_v9 = vadd.f32 %v17568_v19, %v572_v46  ;;  %v15029_v5 = vld [vmem:[#allocation7 + $0x608] ss:$16 sps:$4 sm:$0xff]   ;;  %v15043_v19 = vld [vmem:[#allocation7 + $0x64c] ss:$16 sps:$4 sm:$0xff]  }
 0x32b   :  { %7147 = vmatprep.subr.bf16.mxu0 %v14995_v7  ;;  %v1476_v7 = vpack.c.bf16 %v1056_v48, %v1056_v48  ;;  %v15065_v46 = vld [vmem:[#allocation7 + $0x6c8] ss:$16 sps:$4 sm:$0xff]   ;;  %v15070_v48 = vld [vmem:[#allocation7 + $0x6e4] ss:$16 sps:$4 sm:$0xff]  }
 0x32d   :  { %6615 = vmatpush1.bf16.msra.mxu1 %v14990_v14  ;;  %v15034_v14 = vld [vmem:[#allocation7 + $0x624] ss:$16 sps:$4 sm:$0xff]  }
 0x32e   :  { %7148 = vmatpush1.bf16.msra.mxu0 %v14993_v16  ;;  %6616 = vmatprep.subr.bf16.mxu1 %v14998_v10  ;;  %v1479_v16 = vpack.c.bf16 %v1099_v9, %v1099_v9  ;;  %v15032_v10 = vld [vmem:[#allocation7 + $0x620] ss:$16 sps:$4 sm:$0xff]   ;;  %v15079_v9 = vld [vmem:[#allocation7 + $0x70c] ss:$16 sps:$4 sm:$0xff]  }
 0x32f   :  { %7149 = vmatprep.subr.bf16.mxu0 %v15001_v12  ;;  %v15040_v12 = vld [vmem:[#allocation7 + $0x644] ss:$16 sps:$4 sm:$0xff]  }
 0x331   :  { %6617 = vmatpush1.bf16.msra.mxu1 %v14996_v11  ;;  %v15037_v11 = vld [vmem:[#allocation7 + $0x62c] ss:$16 sps:$4 sm:$0xff]  }
 0x332   :  { %7150 = vmatpush1.bf16.msra.mxu0 %v14999_v13  ;;  %6618 = vmatprep.subr.bf16.mxu1 %v15004_v17  ;;  %v15038_v13 = vld [vmem:[#allocation7 + $0x640] ss:$16 sps:$4 sm:$0xff]   ;;  %v15041_v17 = vld [vmem:[#allocation7 + $0x648] ss:$16 sps:$4 sm:$0xff]  }
 0x333   :  { %7151 = vmatprep.subr.bf16.mxu0 %v15007_v21  ;;  %v15044_v21 = vld [vmem:[#allocation7 + $0x660] ss:$16 sps:$4 sm:$0xff]  }
 0x335   :  { %6619 = vmatpush1.bf16.msra.mxu1 %v15002_v18  ;;  %v15046_v18 = vld [vmem:[#allocation7 + $0x664] ss:$16 sps:$4 sm:$0xff]  }
 0x336   :  { %7152 = vmatpush1.bf16.msra.mxu0 %v15005_v22  ;;  %6620 = vmatprep.subr.bf16.mxu1 %v15010_v23  ;;  %v15049_v22 = vld [vmem:[#allocation7 + $0x66c] ss:$16 sps:$4 sm:$0xff]   ;;  %v15047_v23 = vld [vmem:[#allocation7 + $0x668] ss:$16 sps:$4 sm:$0xff]  }
 0x337   :  { %7153 = vmatprep.subr.bf16.mxu0 %v15013_v27  ;;  %v15055_v27 = vld [vmem:[#allocation7 + $0x68c] ss:$16 sps:$4 sm:$0xff]  }
 0x339   :  { %6621 = vmatpush1.bf16.msra.mxu1 %v15008_v26  ;;  %v15052_v26 = vld [vmem:[#allocation7 + $0x684] ss:$16 sps:$4 sm:$0xff]  }
 0x33a   :  { %7154 = vmatpush1.bf16.msra.mxu0 %v15011_v32  ;;  %6622 = vmatprep.subr.bf16.mxu1 %v15016_v33  ;;  %v15050_v32 = vld [vmem:[#allocation7 + $0x680] ss:$16 sps:$4 sm:$0xff]   ;;  %v15053_v33 = vld [vmem:[#allocation7 + $0x688] ss:$16 sps:$4 sm:$0xff]  }
 0x33b   :  { %7155 = vmatprep.subr.bf16.mxu0 %v15019_v36  ;;  %v15061_v36 = vld [vmem:[#allocation7 + $0x6ac] ss:$16 sps:$4 sm:$0xff]  }
 0x33d   :  { %6623 = vmatpush1.bf16.msra.mxu1 %v15014_v20  ;;  %v15058_v20 = vld [vmem:[#allocation7 + $0x6a4] ss:$16 sps:$4 sm:$0xff]  }
 0x33e   :  { %7156 = vmatpush1.bf16.msra.mxu0 %v15017_v42  ;;  %6624 = vmatprep.subr.bf16.mxu1 %v15022_v43  ;;  %v15059_v42 = vld [vmem:[#allocation7 + $0x6a8] ss:$16 sps:$4 sm:$0xff]   ;;  %v15064_v43 = vld [vmem:[#allocation7 + $0x6c4] ss:$16 sps:$4 sm:$0xff]  }
 0x33f   :  { %7157 = vmatprep.subr.bf16.mxu0 %v15025_v45  ;;  %v15062_v45 = vld [vmem:[#allocation7 + $0x6c0] ss:$16 sps:$4 sm:$0xff]  }
 0x341   :  { %6625 = vmatpush1.bf16.msra.mxu1 %v15020_v44  ;;  %v15067_v44 = vld [vmem:[#allocation7 + $0x6cc] ss:$16 sps:$4 sm:$0xff]  }
 0x342   :  { %7158 = vmatpush1.bf16.msra.mxu0 %v15023_v55  ;;  %6635 = vmatprep.subr.bf16.mxu1 %v15028_v56  ;;  %v15073_v55 = vld [vmem:[#allocation7 + $0x6ec] ss:$16 sps:$4 sm:$0xff]   ;;  %v15068_v56 = vld [vmem:[#allocation7 + $0x6e0] ss:$16 sps:$4 sm:$0xff]  }
 0x343   :  { %7168 = vmatprep.subr.bf16.mxu0 %v15031_v2  ;;  %v15071_v2 = vld [vmem:[#allocation7 + $0x6e8] ss:$16 sps:$4 sm:$0xff]  }
 0x344   :  { %6627 = vmatmul.mubr.bf16.vlgmr.msra.gmra.mrb[24].mxu1 %v1476_v7 }
 0x345   :  { %7160 = vmatmul.mubr.bf16.vlgmr.msra.gmra.mrb[28].mxu0 %v1476_v7  ;;  %6636 = vmatpush1.bf16.msra.mxu1 %v15026_v62  ;;  %v15076_v62 = vld [vmem:[#allocation7 + $0x704] ss:$16 sps:$4 sm:$0xff]  }
 0x346   :  { %6667 = vmatprep.mubr.bf16.mxu1 %v1479_v16  ;;  %7169 = vmatpush1.bf16.msra.mxu0 %v15029_v5  ;;  %v15074_v5 = vld [vmem:[#allocation7 + $0x700] ss:$16 sps:$4 sm:$0xff]   ;;  %v15082_v7 = vld [vmem:[#allocation7 + $0x724] ss:$16 sps:$4 sm:$0xff]  }
 0x347   :  { %7200 = vmatprep.mubr.bf16.mxu0 %v1479_v16  ;;  %6637 = vmatprep.subr.bf16.mxu1 %v15034_v14  ;;  %v15077_v14 = vld [vmem:[#allocation7 + $0x708] ss:$16 sps:$4 sm:$0xff]   ;;  %v15085_v16 = vld [vmem:[#allocation7 + $0x72c] ss:$16 sps:$4 sm:$0xff]  }
 0x348   :  { %7170 = vmatprep.subr.bf16.mxu0 %v15037_v11  ;;  %v15088_v11 = vld [vmem:[#allocation7 + $0x744] ss:$16 sps:$4 sm:$0xff]  }
 0x349   :  { %6638 = vmatpush1.bf16.msra.mxu1 %v15032_v10  ;;  %v15080_v10 = vld [vmem:[#allocation7 + $0x720] ss:$16 sps:$4 sm:$0xff]  }
 0x34a   :  { %7171 = vmatpush1.bf16.msra.mxu0 %v15035_v34  ;;  %6639 = vmatprep.subr.bf16.mxu1 %v15040_v12  ;;  %v15083_v34 = vld [vmem:[#allocation7 + $0x728] ss:$16 sps:$4 sm:$0xff]   ;;  %v15091_v12 = vld [vmem:[#allocation7 + $0x74c] ss:$16 sps:$4 sm:$0xff]  }
 0x34b   :  { %7172 = vmatprep.subr.bf16.mxu0 %v15043_v19  ;;  %v15086_v19 = vld [vmem:[#allocation7 + $0x740] ss:$16 sps:$4 sm:$0xff]  }
 0x34d   :  { %6640 = vmatpush1.bf16.msra.mxu1 %v15038_v13  ;;  %v15089_v13 = vld [vmem:[#allocation7 + $0x748] ss:$16 sps:$4 sm:$0xff]  }
 0x34e   :  { %7173 = vmatpush1.bf16.msra.mxu0 %v15041_v17  ;;  %6641 = vmatprep.subr.bf16.mxu1 %v15046_v18  ;;  %v15094_v17 = vld [vmem:[#allocation7 + $0x764] ss:$16 sps:$4 sm:$0xff]   ;;  %v15097_v18 = vld [vmem:[#allocation7 + $0x76c] ss:$16 sps:$4 sm:$0xff]  }
 0x34f   :  { %7174 = vmatprep.subr.bf16.mxu0 %v15049_v22  ;;  %v15095_v22 = vld [vmem:[#allocation7 + $0x768] ss:$16 sps:$4 sm:$0xff]  }
 0x351   :  { %6642 = vmatpush1.bf16.msra.mxu1 %v15044_v21  ;;  %v15092_v21 = vld [vmem:[#allocation7 + $0x760] ss:$16 sps:$4 sm:$0xff]  }
 0x352   :  { %7175 = vmatpush1.bf16.msra.mxu0 %v15047_v23  ;;  %6643 = vmatprep.subr.bf16.mxu1 %v15052_v26  ;;  %v15100_v23 = vld [vmem:[#allocation7 + $0x784] ss:$16 sps:$4 sm:$0xff]   ;;  %v15103_v26 = vld [vmem:[#allocation7 + $0x78c] ss:$16 sps:$4 sm:$0xff]  }
 0x353   :  { %7176 = vmatprep.subr.bf16.mxu0 %v15055_v27  ;;  %v15098_v27 = vld [vmem:[#allocation7 + $0x780] ss:$16 sps:$4 sm:$0xff]  }
 0x355   :  { %6644 = vmatpush1.bf16.msra.mxu1 %v15050_v32  ;;  %v15101_v32 = vld [vmem:[#allocation7 + $0x788] ss:$16 sps:$4 sm:$0xff]  }
 0x356   :  { %7177 = vmatpush1.bf16.msra.mxu0 %v15053_v33  ;;  %6645 = vmatprep.subr.bf16.mxu1 %v15058_v20  ;;  %v15106_v33 = vld [vmem:[#allocation7 + $0x7a4] ss:$16 sps:$4 sm:$0xff]   ;;  %v15109_v20 = vld [vmem:[#allocation7 + $0x7ac] ss:$16 sps:$4 sm:$0xff]  }
 0x357   :  { %7178 = vmatprep.subr.bf16.mxu0 %v15061_v36  ;;  %v15104_v36 = vld [vmem:[#allocation7 + $0x7a0] ss:$16 sps:$4 sm:$0xff]  }
 0x359   :  { %6646 = vmatpush1.bf16.msra.mxu1 %v15056_v41  ;;  %v15107_v41 = vld [vmem:[#allocation7 + $0x7a8] ss:$16 sps:$4 sm:$0xff]  }
 0x35a   :  { %7179 = vmatpush1.bf16.msra.mxu0 %v15059_v42  ;;  %6647 = vmatprep.subr.bf16.mxu1 %v15064_v43  ;;  %v15112_v42 = vld [vmem:[#allocation7 + $0x7c4] ss:$16 sps:$4 sm:$0xff]   ;;  %v15115_v43 = vld [vmem:[#allocation7 + $0x7cc] ss:$16 sps:$4 sm:$0xff]  }
 0x35b   :  { %7180 = vmatprep.subr.bf16.mxu0 %v15067_v44  ;;  %v15110_v44 = vld [vmem:[#allocation7 + $0x7c0] ss:$16 sps:$4 sm:$0xff]  }
 0x35d   :  { %6648 = vmatpush1.bf16.msra.mxu1 %v15062_v45  ;;  %v568_v45 = vrot.slane %v17647_v38, %v17591_v0  ;;  %v15127_v38 = vld [vmem:[#allocation7 + $0x80c] ss:$16 sps:$4 sm:$0xff]  }
 0x35e   :  { %7181 = vmatpush1.bf16.msra.mxu0 %v15065_v46  ;;  %6649 = vmatprep.subr.bf16.mxu1 %v15070_v48  ;;  %v15113_v46 = vld [vmem:[#allocation7 + $0x7c8] ss:$16 sps:$4 sm:$0xff]   ;;  %v15118_v48 = vld [vmem:[#allocation7 + $0x7e4] ss:$16 sps:$4 sm:$0xff]  }
 0x35f   :  { %7182 = vmatprep.subr.bf16.mxu0 %v15073_v55  ;;  %v15121_v55 = vld [vmem:[#allocation7 + $0x7ec] ss:$16 sps:$4 sm:$0xff]  }
 0x361   :  { %6650 = vmatpush1.bf16.msra.mxu1 %v15068_v56  ;;  %v17657_v56 = vld [vmem:[#allocation5 + $0x8] sm:$0xff] }
 0x362   :  { %7183 = vmatpush1.bf16.msra.mxu0 %v15071_v2  ;;  %6651 = vmatprep.subr.bf16.mxu1 %v15076_v62  ;;  %v580_v2 = vrot.slane %v17657_v56, %v17549_v3  ;;  %v15116_v62 = vld [vmem:[#allocation7 + $0x7e0] ss:$16 sps:$4 sm:$0xff]  }
 0x363   :  { %7184 = vmatprep.subr.bf16.mxu0 %v15079_v9  ;;  %v1097_v9 = vadd.f32 %v17564_v35, %v568_v45  ;;  %v15128_v35 = vld [vmem:[#allocation7 + $0x820] ss:$16 sps:$4 sm:$0xff]   ;;  %v15160_v45 = vld [vmem:[#allocation7 + $0x8c4] ss:$16 sps:$4 sm:$0xff]  }
 0x365   :  { %6652 = vmatpush1.bf16.msra.mxu1 %v15074_v5  ;;  %v15119_v5 = vld [vmem:[#allocation7 + $0x7e8] ss:$16 sps:$4 sm:$0xff]  }
 0x366   :  { %7185 = vmatpush1.bf16.msra.mxu0 %v15077_v14  ;;  %6653 = vmatprep.subr.bf16.mxu1 %v15082_v7  ;;  %v15124_v14 = vld [vmem:[#allocation7 + $0x804] ss:$16 sps:$4 sm:$0xff]   ;;  %v1140_v7 = vadd.f32 %v17586_v53, %v580_v2  ;;  %v15139_v53 = vld [vmem:[#allocation7 + $0x84c] ss:$16 sps:$4 sm:$0xff]  }
 0x367   :  { %7186 = vmatprep.subr.bf16.mxu0 %v15085_v16  ;;  %v15122_v16 = vld [vmem:[#allocation7 + $0x800] ss:$16 sps:$4 sm:$0xff]   ;;  %v15166_v2 = vld [vmem:[#allocation7 + $0x8e4] ss:$16 sps:$4 sm:$0xff]  }
 0x369   :  { %6654 = vmatpush1.bf16.msra.mxu1 %v15080_v10  ;;  %v1478_v10 = vpack.c.bf16 %v1097_v9, %v1097_v9  ;;  %v15164_v9 = vld [vmem:[#allocation7 + $0x8e0] ss:$16 sps:$4 sm:$0xff]  }
 0x36a   :  { %7187 = vmatpush1.bf16.msra.mxu0 %v15083_v34  ;;  %6655 = vmatprep.subr.bf16.mxu1 %v15088_v11  ;;  %v15125_v34 = vld [vmem:[#allocation7 + $0x808] ss:$16 sps:$4 sm:$0xff]   ;;  %v15130_v11 = vld [vmem:[#allocation7 + $0x824] ss:$16 sps:$4 sm:$0xff]  }
 0x36b   :  { %7188 = vmatprep.subr.bf16.mxu0 %v15091_v12  ;;  %v1481_v12 = vpack.c.bf16 %v1140_v7, %v1140_v7  ;;  %v15170_v7 = vld [vmem:[#allocation7 + $0x900] ss:$16 sps:$4 sm:$0xff]  }
 0x36d   :  { %6656 = vmatpush1.bf16.msra.mxu1 %v15086_v19  ;;  %v15133_v19 = vld [vmem:[#allocation7 + $0x82c] ss:$16 sps:$4 sm:$0xff]  }
 0x36e   :  { %7189 = vmatpush1.bf16.msra.mxu0 %v15089_v13  ;;  %6657 = vmatprep.subr.bf16.mxu1 %v15094_v17  ;;  %v15131_v13 = vld [vmem:[#allocation7 + $0x828] ss:$16 sps:$4 sm:$0xff]   ;;  %v15136_v17 = vld [vmem:[#allocation7 + $0x844] ss:$16 sps:$4 sm:$0xff]  }
 0x36f   :  { %7190 = vmatprep.subr.bf16.mxu0 %v15097_v18  ;;  %v15134_v18 = vld [vmem:[#allocation7 + $0x840] ss:$16 sps:$4 sm:$0xff]  }
 0x371   :  { %6658 = vmatpush1.bf16.msra.mxu1 %v15092_v21  ;;  %v15137_v21 = vld [vmem:[#allocation7 + $0x848] ss:$16 sps:$4 sm:$0xff]  }
 0x372   :  { %7191 = vmatpush1.bf16.msra.mxu0 %v15095_v22  ;;  %6659 = vmatprep.subr.bf16.mxu1 %v15100_v23  ;;  %v15142_v22 = vld [vmem:[#allocation7 + $0x864] ss:$16 sps:$4 sm:$0xff]   ;;  %v15145_v23 = vld [vmem:[#allocation7 + $0x86c] ss:$16 sps:$4 sm:$0xff]  }
 0x373   :  { %7192 = vmatprep.subr.bf16.mxu0 %v15103_v26  ;;  %v15140_v26 = vld [vmem:[#allocation7 + $0x860] ss:$16 sps:$4 sm:$0xff]  }
 0x375   :  { %6660 = vmatpush1.bf16.msra.mxu1 %v15098_v27  ;;  %v15143_v27 = vld [vmem:[#allocation7 + $0x868] ss:$16 sps:$4 sm:$0xff]  }
 0x376   :  { %7193 = vmatpush1.bf16.msra.mxu0 %v15101_v32  ;;  %6661 = vmatprep.subr.bf16.mxu1 %v15106_v33  ;;  %v15148_v32 = vld [vmem:[#allocation7 + $0x884] ss:$16 sps:$4 sm:$0xff]   ;;  %v15151_v33 = vld [vmem:[#allocation7 + $0x88c] ss:$16 sps:$4 sm:$0xff]  }
 0x377   :  { %7194 = vmatprep.subr.bf16.mxu0 %v15109_v20  ;;  %v15146_v20 = vld [vmem:[#allocation7 + $0x880] ss:$16 sps:$4 sm:$0xff]  }
 0x379   :  { %6662 = vmatpush1.bf16.msra.mxu1 %v15104_v36  ;;  %v15149_v36 = vld [vmem:[#allocation7 + $0x888] ss:$16 sps:$4 sm:$0xff]  }
 0x37a   :  { %7195 = vmatpush1.bf16.msra.mxu0 %v15107_v41  ;;  %6663 = vmatprep.subr.bf16.mxu1 %v15112_v42  ;;  %v15154_v41 = vld [vmem:[#allocation7 + $0x8a4] ss:$16 sps:$4 sm:$0xff]   ;;  %v15157_v42 = vld [vmem:[#allocation7 + $0x8ac] ss:$16 sps:$4 sm:$0xff]  }
 0x37b   :  { %7196 = vmatprep.subr.bf16.mxu0 %v15115_v43  ;;  %v15152_v43 = vld [vmem:[#allocation7 + $0x8a0] ss:$16 sps:$4 sm:$0xff]  }
 0x37d   :  { %6664 = vmatpush1.bf16.msra.mxu1 %v15110_v44  ;;  %v15155_v44 = vld [vmem:[#allocation7 + $0x8a8] ss:$16 sps:$4 sm:$0xff]  }
 0x37e   :  { %7197 = vmatpush1.bf16.msra.mxu0 %v15113_v46  ;;  %6665 = vmatprep.subr.bf16.mxu1 %v15118_v48  ;;  %v15163_v46 = vld [vmem:[#allocation7 + $0x8cc] ss:$16 sps:$4 sm:$0xff]   ;;  %v15158_v48 = vld [vmem:[#allocation7 + $0x8c0] ss:$16 sps:$4 sm:$0xff]  }
 0x37f   :  { %7198 = vmatprep.subr.bf16.mxu0 %v15121_v55  ;;  %v15161_v55 = vld [vmem:[#allocation7 + $0x8c8] ss:$16 sps:$4 sm:$0xff]  }
 0x381   :  { %6666 = vmatpush1.bf16.msra.mxu1 %v15116_v62  ;;  %v15169_v62 = vld [vmem:[#allocation7 + $0x8ec] ss:$16 sps:$4 sm:$0xff]  }
 0x382   :  { %7199 = vmatpush1.bf16.msra.mxu0 %v15119_v5  ;;  %6676 = vmatprep.subr.bf16.mxu1 %v15124_v14  ;;  %v15167_v5 = vld [vmem:[#allocation7 + $0x8e8] ss:$16 sps:$4 sm:$0xff]   ;;  %v15172_v14 = vld [vmem:[#allocation7 + $0x904] ss:$16 sps:$4 sm:$0xff]  }
 0x383   :  { %7209 = vmatprep.subr.bf16.mxu0 %v15127_v38  ;;  %v15175_v38 = vld [vmem:[#allocation7 + $0x90c] ss:$16 sps:$4 sm:$0xff]  }
 0x384   :  { %6668 = vmatmul.mubr.bf16.vlgmr.msra.gmra.mrb[24].mxu1 %v1478_v10 }
 0x385   :  { %7201 = vmatmul.mubr.bf16.vlgmr.msra.gmra.mrb[28].mxu0 %v1478_v10  ;;  %6677 = vmatpush1.bf16.msra.mxu1 %v15122_v16  ;;  %v15173_v16 = vld [vmem:[#allocation7 + $0x908] ss:$16 sps:$4 sm:$0xff]   ;;  %v15178_v10 = vld [vmem:[#allocation7 + $0x924] ss:$16 sps:$4 sm:$0xff]  }
 0x386   :  { %6708 = vmatprep.mubr.bf16.mxu1 %v1481_v12  ;;  %7210 = vmatpush1.bf16.msra.mxu0 %v15125_v34  ;;  %v15181_v34 = vld [vmem:[#allocation7 + $0x92c] ss:$16 sps:$4 sm:$0xff]  }
 0x387   :  { %7241 = vmatprep.mubr.bf16.mxu0 %v1481_v12  ;;  %6678 = vmatprep.subr.bf16.mxu1 %v15130_v11  ;;  %v15176_v11 = vld [vmem:[#allocation7 + $0x920] ss:$16 sps:$4 sm:$0xff]   ;;  %v15179_v12 = vld [vmem:[#allocation7 + $0x928] ss:$16 sps:$4 sm:$0xff]  }
 0x388   :  { %7211 = vmatprep.subr.bf16.mxu0 %v15133_v19  ;;  %v15184_v19 = vld [vmem:[#allocation7 + $0x944] ss:$16 sps:$4 sm:$0xff]  }
 0x389   :  { %6679 = vmatpush1.bf16.msra.mxu1 %v15128_v35  ;;  %v15187_v35 = vld [vmem:[#allocation7 + $0x94c] ss:$16 sps:$4 sm:$0xff]  }
 0x38a   :  { %7212 = vmatpush1.bf16.msra.mxu0 %v15131_v13  ;;  %6680 = vmatprep.subr.bf16.mxu1 %v15136_v17  ;;  %v15182_v13 = vld [vmem:[#allocation7 + $0x940] ss:$16 sps:$4 sm:$0xff]   ;;  %v15185_v17 = vld [vmem:[#allocation7 + $0x948] ss:$16 sps:$4 sm:$0xff]  }
 0x38b   :  { %7213 = vmatprep.subr.bf16.mxu0 %v15139_v53  ;;  %v15190_v53 = vld [vmem:[#allocation7 + $0x964] ss:$16 sps:$4 sm:$0xff]  }
 0x38d   :  { %6681 = vmatpush1.bf16.msra.mxu1 %v15134_v18  ;;  %v15193_v18 = vld [vmem:[#allocation7 + $0x96c] ss:$16 sps:$4 sm:$0xff]  }
 0x38e   :  { %7214 = vmatpush1.bf16.msra.mxu0 %v15137_v21  ;;  %6682 = vmatprep.subr.bf16.mxu1 %v15142_v22  ;;  %v15188_v21 = vld [vmem:[#allocation7 + $0x960] ss:$16 sps:$4 sm:$0xff]   ;;  %v15191_v22 = vld [vmem:[#allocation7 + $0x968] ss:$16 sps:$4 sm:$0xff]  }
 0x38f   :  { %7215 = vmatprep.subr.bf16.mxu0 %v15145_v23  ;;  %v15196_v23 = vld [vmem:[#allocation7 + $0x984] ss:$16 sps:$4 sm:$0xff]  }
 0x391   :  { %6683 = vmatpush1.bf16.msra.mxu1 %v15140_v26  ;;  %v15199_v26 = vld [vmem:[#allocation7 + $0x98c] ss:$16 sps:$4 sm:$0xff]  }
 0x392   :  { %7216 = vmatpush1.bf16.msra.mxu0 %v15143_v27  ;;  %6684 = vmatprep.subr.bf16.mxu1 %v15148_v32  ;;  %v15194_v27 = vld [vmem:[#allocation7 + $0x980] ss:$16 sps:$4 sm:$0xff]   ;;  %v15197_v32 = vld [vmem:[#allocation7 + $0x988] ss:$16 sps:$4 sm:$0xff]  }
 0x393   :  { %7217 = vmatprep.subr.bf16.mxu0 %v15151_v33  ;;  %v15202_v33 = vld [vmem:[#allocation7 + $0x9a4] ss:$16 sps:$4 sm:$0xff]  }
 0x395   :  { %6685 = vmatpush1.bf16.msra.mxu1 %v15146_v20  ;;  %v15205_v20 = vld [vmem:[#allocation7 + $0x9ac] ss:$16 sps:$4 sm:$0xff]  }
 0x396   :  { %7218 = vmatpush1.bf16.msra.mxu0 %v15149_v36  ;;  %6686 = vmatprep.subr.bf16.mxu1 %v15154_v41  ;;  %v15200_v36 = vld [vmem:[#allocation7 + $0x9a0] ss:$16 sps:$4 sm:$0xff]   ;;  %v15203_v41 = vld [vmem:[#allocation7 + $0x9a8] ss:$16 sps:$4 sm:$0xff]  }
 0x397   :  { %7219 = vmatprep.subr.bf16.mxu0 %v15157_v42  ;;  %v15208_v42 = vld [vmem:[#allocation7 + $0x9c4] ss:$16 sps:$4 sm:$0xff]  }
 0x399   :  { %6687 = vmatpush1.bf16.msra.mxu1 %v15152_v43  ;;  %v15211_v43 = vld [vmem:[#allocation7 + $0x9cc] ss:$16 sps:$4 sm:$0xff]  }
 0x39a   :  { %7220 = vmatpush1.bf16.msra.mxu0 %v15155_v44  ;;  %6688 = vmatprep.subr.bf16.mxu1 %v15160_v45  ;;  %v15206_v44 = vld [vmem:[#allocation7 + $0x9c0] ss:$16 sps:$4 sm:$0xff]   ;;  %v576_v45 = vrot.slane %v17657_v56, %v17544_v1  ;;  %v15221_v56 = vld [vmem:[#allocation7 + $0xa08] ss:$16 sps:$4 sm:$0xff]  }
 0x39b   :  { %7221 = vmatprep.subr.bf16.mxu0 %v15163_v46  ;;  %v15209_v46 = vld [vmem:[#allocation7 + $0x9c8] ss:$16 sps:$4 sm:$0xff]  }
 0x39d   :  { %6689 = vmatpush1.bf16.msra.mxu1 %v15158_v48  ;;  %v15214_v48 = vld [vmem:[#allocation7 + $0x9e4] ss:$16 sps:$4 sm:$0xff]  }
 0x39e   :  { %7222 = vmatpush1.bf16.msra.mxu0 %v15161_v55  ;;  %6690 = vmatprep.subr.bf16.mxu1 %v15166_v2  ;;  %v15217_v55 = vld [vmem:[#allocation7 + $0x9ec] ss:$16 sps:$4 sm:$0xff]   ;;  %v15212_v2 = vld [vmem:[#allocation7 + $0x9e0] ss:$16 sps:$4 sm:$0xff]  }
 0x39f   :  { %7223 = vmatprep.subr.bf16.mxu0 %v15169_v62  ;;  %v1138_v62 = vadd.f32 %v17582_v50, %v576_v45  ;;  %v15224_v50 = vld [vmem:[#allocation7 + $0xa20] ss:$16 sps:$4 sm:$0xff]   ;;  %v15265_v45 = vld [vmem:[#allocation7 + $0xaec] ss:$16 sps:$4 sm:$0xff]  }
 0x3a1   :  { %6691 = vmatpush1.bf16.msra.mxu1 %v15164_v9  ;;  %v15215_v9 = vld [vmem:[#allocation7 + $0x9e8] ss:$16 sps:$4 sm:$0xff]  }
 0x3a2   :  { %7224 = vmatpush1.bf16.msra.mxu0 %v15167_v5  ;;  %6692 = vmatprep.subr.bf16.mxu1 %v15172_v14  ;;  %v15220_v5 = vld [vmem:[#allocation7 + $0xa04] ss:$16 sps:$4 sm:$0xff]   ;;  %v15223_v14 = vld [vmem:[#allocation7 + $0xa0c] ss:$16 sps:$4 sm:$0xff]  }
 0x3a3   :  { %7225 = vmatprep.subr.bf16.mxu0 %v15175_v38  ;;  %v15218_v38 = vld [vmem:[#allocation7 + $0xa00] ss:$16 sps:$4 sm:$0xff]  }
 0x3a5   :  { %6693 = vmatpush1.bf16.msra.mxu1 %v15170_v7  ;;  %v1480_v7 = vpack.c.bf16 %v1138_v62, %v1138_v62  ;;  %v15266_v62 = vld [vmem:[#allocation7 + $0xb00] ss:$16 sps:$4 sm:$0xff]  }
 0x3a6   :  { %7226 = vmatpush1.bf16.msra.mxu0 %v15173_v16  ;;  %6694 = vmatprep.subr.bf16.mxu1 %v15178_v10  ;;  %v15226_v16 = vld [vmem:[#allocation7 + $0xa24] ss:$16 sps:$4 sm:$0xff]   ;;  %v1483_v10 = vpack.c.bf16 %v17588_v57, %v17588_v57  ;;  %v15241_v57 = vld [vmem:[#allocation7 + $0xa6c] ss:$16 sps:$4 sm:$0xff]  }
 0x3a7   :  { %7227 = vmatprep.subr.bf16.mxu0 %v15181_v34  ;;  %v15229_v34 = vld [vmem:[#allocation7 + $0xa2c] ss:$16 sps:$4 sm:$0xff]  }
 0x3a9   :  { %6695 = vmatpush1.bf16.msra.mxu1 %v15176_v11  ;;  %v15227_v11 = vld [vmem:[#allocation7 + $0xa28] ss:$16 sps:$4 sm:$0xff]  }
 0x3aa   :  { %7228 = vmatpush1.bf16.msra.mxu0 %v15179_v12  ;;  %6696 = vmatprep.subr.bf16.mxu1 %v15184_v19  ;;  %v15232_v12 = vld [vmem:[#allocation7 + $0xa44] ss:$16 sps:$4 sm:$0xff]   ;;  %v15235_v19 = vld [vmem:[#allocation7 + $0xa4c] ss:$16 sps:$4 sm:$0xff]  }
 0x3ab   :  { %7229 = vmatprep.subr.bf16.mxu0 %v15187_v35  ;;  %v15230_v35 = vld [vmem:[#allocation7 + $0xa40] ss:$16 sps:$4 sm:$0xff]  }
 0x3ad   :  { %6697 = vmatpush1.bf16.msra.mxu1 %v15182_v13  ;;  %v15233_v13 = vld [vmem:[#allocation7 + $0xa48] ss:$16 sps:$4 sm:$0xff]  }
 0x3ae   :  { %7230 = vmatpush1.bf16.msra.mxu0 %v15185_v17  ;;  %6698 = vmatprep.subr.bf16.mxu1 %v15190_v53  ;;  %v15238_v17 = vld [vmem:[#allocation7 + $0xa64] ss:$16 sps:$4 sm:$0xff]   ;;  %v15236_v53 = vld [vmem:[#allocation7 + $0xa60] ss:$16 sps:$4 sm:$0xff]  }
 0x3af   :  { %7231 = vmatprep.subr.bf16.mxu0 %v15193_v18  ;;  %v15239_v18 = vld [vmem:[#allocation7 + $0xa68] ss:$16 sps:$4 sm:$0xff]  }
 0x3b1   :  { %6699 = vmatpush1.bf16.msra.mxu1 %v15188_v21  ;;  %v15244_v21 = vld [vmem:[#allocation7 + $0xa84] ss:$16 sps:$4 sm:$0xff]  }
 0x3b2   :  { %7232 = vmatpush1.bf16.msra.mxu0 %v15191_v22  ;;  %6700 = vmatprep.subr.bf16.mxu1 %v15196_v23  ;;  %v15247_v22 = vld [vmem:[#allocation7 + $0xa8c] ss:$16 sps:$4 sm:$0xff]   ;;  %v15242_v23 = vld [vmem:[#allocation7 + $0xa80] ss:$16 sps:$4 sm:$0xff]  }
 0x3b3   :  { %7233 = vmatprep.subr.bf16.mxu0 %v15199_v26  ;;  %v15245_v26 = vld [vmem:[#allocation7 + $0xa88] ss:$16 sps:$4 sm:$0xff]  }
 0x3b5   :  { %6701 = vmatpush1.bf16.msra.mxu1 %v15194_v27  ;;  %v15250_v27 = vld [vmem:[#allocation7 + $0xaa4] ss:$16 sps:$4 sm:$0xff]  }
 0x3b6   :  { %7234 = vmatpush1.bf16.msra.mxu0 %v15197_v32  ;;  %6702 = vmatprep.subr.bf16.mxu1 %v15202_v33  ;;  %v15253_v32 = vld [vmem:[#allocation7 + $0xaac] ss:$16 sps:$4 sm:$0xff]   ;;  %v15248_v33 = vld [vmem:[#allocation7 + $0xaa0] ss:$16 sps:$4 sm:$0xff]  }
 0x3b7   :  { %7235 = vmatprep.subr.bf16.mxu0 %v15205_v20  ;;  %v15251_v20 = vld [vmem:[#allocation7 + $0xaa8] ss:$16 sps:$4 sm:$0xff]  }
 0x3b9   :  { %6703 = vmatpush1.bf16.msra.mxu1 %v15200_v36  ;;  %v15256_v36 = vld [vmem:[#allocation7 + $0xac4] ss:$16 sps:$4 sm:$0xff]  }
 0x3ba   :  { %7236 = vmatpush1.bf16.msra.mxu0 %v15203_v41  ;;  %6704 = vmatprep.subr.bf16.mxu1 %v15208_v42  ;;  %v15259_v41 = vld [vmem:[#allocation7 + $0xacc] ss:$16 sps:$4 sm:$0xff]   ;;  %v15254_v42 = vld [vmem:[#allocation7 + $0xac0] ss:$16 sps:$4 sm:$0xff]  }
 0x3bb   :  { %7237 = vmatprep.subr.bf16.mxu0 %v15211_v43  ;;  %v15257_v43 = vld [vmem:[#allocation7 + $0xac8] ss:$16 sps:$4 sm:$0xff]  }
 0x3bd   :  { %6705 = vmatpush1.bf16.msra.mxu1 %v15206_v44  ;;  %v15262_v44 = vld [vmem:[#allocation7 + $0xae4] ss:$16 sps:$4 sm:$0xff]  }
 0x3be   :  { %7238 = vmatpush1.bf16.msra.mxu0 %v15209_v46  ;;  %6706 = vmatprep.subr.bf16.mxu1 %v15214_v48  ;;  %v15260_v46 = vld [vmem:[#allocation7 + $0xae0] ss:$16 sps:$4 sm:$0xff]   ;;  %v15263_v48 = vld [vmem:[#allocation7 + $0xae8] ss:$16 sps:$4 sm:$0xff]  }
 0x3bf   :  { %7239 = vmatprep.subr.bf16.mxu0 %v15217_v55  ;;  %v15268_v55 = vld [vmem:[#allocation7 + $0xb04] ss:$16 sps:$4 sm:$0xff]  }
 0x3c1   :  { %6707 = vmatpush1.bf16.msra.mxu1 %v15212_v2  ;;  %v15271_v2 = vld [vmem:[#allocation7 + $0xb0c] ss:$16 sps:$4 sm:$0xff]  }
 0x3c2   :  { %7240 = vmatpush1.bf16.msra.mxu0 %v15215_v9  ;;  %6717 = vmatprep.subr.bf16.mxu1 %v15220_v5  ;;  %v15269_v9 = vld [vmem:[#allocation7 + $0xb08] ss:$16 sps:$4 sm:$0xff]   ;;  %v15274_v5 = vld [vmem:[#allocation7 + $0xb24] ss:$16 sps:$4 sm:$0xff]  }
 0x3c3   :  { %7250 = vmatprep.subr.bf16.mxu0 %v15223_v14  ;;  %v15277_v14 = vld [vmem:[#allocation7 + $0xb2c] ss:$16 sps:$4 sm:$0xff]  }
 0x3c4   :  { %6709 = vmatmul.mubr.bf16.vlgmr.msra.gmra.mrb[24].mxu1 %v1480_v7 }
 0x3c5   :  { %7242 = vmatmul.mubr.bf16.vlgmr.msra.gmra.mrb[28].mxu0 %v1480_v7  ;;  %6718 = vmatpush1.bf16.msra.mxu1 %v15218_v38  ;;  %v15272_v38 = vld [vmem:[#allocation7 + $0xb20] ss:$16 sps:$4 sm:$0xff]   ;;  %v15275_v7 = vld [vmem:[#allocation7 + $0xb28] ss:$16 sps:$4 sm:$0xff]  }
 0x3c6   :  { %6749 = vmatprep.mubr.bf16.mxu1 %v1483_v10  ;;  %7251 = vmatpush1.bf16.msra.mxu0 %v15221_v56  ;;  %v15280_v56 = vld [vmem:[#allocation7 + $0xb44] ss:$16 sps:$4 sm:$0xff]  }
 0x3c7   :  { %7282 = vmatprep.mubr.bf16.mxu0 %v1483_v10  ;;  %6719 = vmatprep.subr.bf16.mxu1 %v15226_v16  ;;  %v15283_v16 = vld [vmem:[#allocation7 + $0xb4c] ss:$16 sps:$4 sm:$0xff]   ;;  %v15278_v10 = vld [vmem:[#allocation7 + $0xb40] ss:$16 sps:$4 sm:$0xff]  }
 0x3c8   :  { %7252 = vmatprep.subr.bf16.mxu0 %v15229_v34  ;;  %v15281_v34 = vld [vmem:[#allocation7 + $0xb48] ss:$16 sps:$4 sm:$0xff]  }
 0x3c9   :  { %6720 = vmatpush1.bf16.msra.mxu1 %v15224_v50  ;;  %v15286_v50 = vld [vmem:[#allocation7 + $0xb64] ss:$16 sps:$4 sm:$0xff]  }
 0x3ca   :  { %7253 = vmatpush1.bf16.msra.mxu0 %v15227_v11  ;;  %6721 = vmatprep.subr.bf16.mxu1 %v15232_v12  ;;  %v15289_v11 = vld [vmem:[#allocation7 + $0xb6c] ss:$16 sps:$4 sm:$0xff]   ;;  %v15284_v12 = vld [vmem:[#allocation7 + $0xb60] ss:$16 sps:$4 sm:$0xff]  }
 0x3cb   :  { %7254 = vmatprep.subr.bf16.mxu0 %v15235_v19  ;;  %v15287_v19 = vld [vmem:[#allocation7 + $0xb68] ss:$16 sps:$4 sm:$0xff]  }
 0x3cd   :  { %6722 = vmatpush1.bf16.msra.mxu1 %v15230_v35  ;;  %v15292_v35 = vld [vmem:[#allocation7 + $0xb84] ss:$16 sps:$4 sm:$0xff]  }
 0x3ce   :  { %7255 = vmatpush1.bf16.msra.mxu0 %v15233_v13  ;;  %6723 = vmatprep.subr.bf16.mxu1 %v15238_v17  ;;  %v15295_v13 = vld [vmem:[#allocation7 + $0xb8c] ss:$16 sps:$4 sm:$0xff]   ;;  %v15290_v17 = vld [vmem:[#allocation7 + $0xb80] ss:$16 sps:$4 sm:$0xff]  }
 0x3cf   :  { %7256 = vmatprep.subr.bf16.mxu0 %v15241_v57  ;;  %v15293_v57 = vld [vmem:[#allocation7 + $0xb88] ss:$16 sps:$4 sm:$0xff]  }
 0x3d1   :  { %6724 = vmatpush1.bf16.msra.mxu1 %v15236_v53  ;;  %v15298_v53 = vld [vmem:[#allocation7 + $0xba4] ss:$16 sps:$4 sm:$0xff]  }
 0x3d2   :  { %7257 = vmatpush1.bf16.msra.mxu0 %v15239_v18  ;;  %6725 = vmatprep.subr.bf16.mxu1 %v15244_v21  ;;  %v15301_v18 = vld [vmem:[#allocation7 + $0xbac] ss:$16 sps:$4 sm:$0xff]   ;;  %v15296_v21 = vld [vmem:[#allocation7 + $0xba0] ss:$16 sps:$4 sm:$0xff]  }
 0x3d3   :  { %7258 = vmatprep.subr.bf16.mxu0 %v15247_v22  ;;  %v15299_v22 = vld [vmem:[#allocation7 + $0xba8] ss:$16 sps:$4 sm:$0xff]  }
 0x3d5   :  { %6726 = vmatpush1.bf16.msra.mxu1 %v15242_v23  ;;  %v15304_v23 = vld [vmem:[#allocation7 + $0xbc4] ss:$16 sps:$4 sm:$0xff]  }
 0x3d6   :  { %7259 = vmatpush1.bf16.msra.mxu0 %v15245_v26  ;;  %6727 = vmatprep.subr.bf16.mxu1 %v15250_v27  ;;  %v15307_v26 = vld [vmem:[#allocation7 + $0xbcc] ss:$16 sps:$4 sm:$0xff]   ;;  %v15302_v27 = vld [vmem:[#allocation7 + $0xbc0] ss:$16 sps:$4 sm:$0xff]  }
 0x3d7   :  { %7260 = vmatprep.subr.bf16.mxu0 %v15253_v32  ;;  %v15305_v32 = vld [vmem:[#allocation7 + $0xbc8] ss:$16 sps:$4 sm:$0xff]  }
 0x3d9   :  { %6728 = vmatpush1.bf16.msra.mxu1 %v15248_v33  ;;  %v15310_v33 = vld [vmem:[#allocation7 + $0xbe4] ss:$16 sps:$4 sm:$0xff]  }
 0x3da   :  { %7261 = vmatpush1.bf16.msra.mxu0 %v15251_v20  ;;  %6729 = vmatprep.subr.bf16.mxu1 %v15256_v36  ;;  %v15313_v20 = vld [vmem:[#allocation7 + $0xbec] ss:$16 sps:$4 sm:$0xff]   ;;  %v15308_v36 = vld [vmem:[#allocation7 + $0xbe0] ss:$16 sps:$4 sm:$0xff]  }
 0x3db   :  { %7262 = vmatprep.subr.bf16.mxu0 %v15259_v41  ;;  %v15311_v41 = vld [vmem:[#allocation7 + $0xbe8] ss:$16 sps:$4 sm:$0xff]  }
 0x3dd   :  { %6730 = vmatpush1.bf16.msra.mxu1 %v15254_v42  ;;  %v15316_v42 = vld [vmem:[#allocation7 + $0xc04] ss:$16 sps:$4 sm:$0xff]  }
 0x3de   :  { %7263 = vmatpush1.bf16.msra.mxu0 %v15257_v43  ;;  %6731 = vmatprep.subr.bf16.mxu1 %v15262_v44  ;;  %v15319_v43 = vld [vmem:[#allocation7 + $0xc0c] ss:$16 sps:$4 sm:$0xff]   ;;  %v15314_v44 = vld [vmem:[#allocation7 + $0xc00] ss:$16 sps:$4 sm:$0xff]  }
 0x3df   :  { %7264 = vmatprep.subr.bf16.mxu0 %v15265_v45  ;;  %v1482_v45 = vpack.c.bf16 %v17584_v52, %v17584_v52  ;;  %v15331_v52 = vld [vmem:[#allocation7 + $0xc4c] ss:$16 sps:$4 sm:$0xff]  }
 0x3e1   :  { %6732 = vmatpush1.bf16.msra.mxu1 %v15260_v46  ;;  %v15317_v46 = vld [vmem:[#allocation7 + $0xc08] ss:$16 sps:$4 sm:$0xff]  }
 0x3e2   :  { %7265 = vmatpush1.bf16.msra.mxu0 %v15263_v48  ;;  %6733 = vmatprep.subr.bf16.mxu1 %v15268_v55  ;;  %v15322_v48 = vld [vmem:[#allocation7 + $0xc24] ss:$16 sps:$4 sm:$0xff]   ;;  %v1485_v55 = vpack.c.bf16 %v17611_v30, %v17611_v30  ;;  %v15337_v30 = vld [vmem:[#allocation7 + $0xc6c] ss:$16 sps:$4 sm:$0xff]  }
 0x3e3   :  { %7266 = vmatprep.subr.bf16.mxu0 %v15271_v2  ;;  %v15325_v2 = vld [vmem:[#allocation7 + $0xc2c] ss:$16 sps:$4 sm:$0xff]  }
 0x3e5   :  { %6734 = vmatpush1.bf16.msra.mxu1 %v15266_v62  ;;  %v15320_v62 = vld [vmem:[#allocation7 + $0xc20] ss:$16 sps:$4 sm:$0xff]  }
 0x3e6   :  { %7267 = vmatpush1.bf16.msra.mxu0 %v15269_v9  ;;  %6735 = vmatprep.subr.bf16.mxu1 %v15274_v5  ;;  %v15323_v9 = vld [vmem:[#allocation7 + $0xc28] ss:$16 sps:$4 sm:$0xff]   ;;  %v15328_v5 = vld [vmem:[#allocation7 + $0xc44] ss:$16 sps:$4 sm:$0xff]  }
 0x3e7   :  { %7268 = vmatprep.subr.bf16.mxu0 %v15277_v14  ;;  %v15326_v14 = vld [vmem:[#allocation7 + $0xc40] ss:$16 sps:$4 sm:$0xff]  }
 0x3e9   :  { %6736 = vmatpush1.bf16.msra.mxu1 %v15272_v38  ;;  %v15329_v38 = vld [vmem:[#allocation7 + $0xc48] ss:$16 sps:$4 sm:$0xff]  }
 0x3ea   :  { %7269 = vmatpush1.bf16.msra.mxu0 %v15275_v7  ;;  %6737 = vmatprep.subr.bf16.mxu1 %v15280_v56  ;;  %v15334_v7 = vld [vmem:[#allocation7 + $0xc64] ss:$16 sps:$4 sm:$0xff]   ;;  %v15332_v56 = vld [vmem:[#allocation7 + $0xc60] ss:$16 sps:$4 sm:$0xff]  }
 0x3eb   :  { %7270 = vmatprep.subr.bf16.mxu0 %v15283_v16  ;;  %v15335_v16 = vld [vmem:[#allocation7 + $0xc68] ss:$16 sps:$4 sm:$0xff]  }
 0x3ed   :  { %6738 = vmatpush1.bf16.msra.mxu1 %v15278_v10  ;;  %v15340_v10 = vld [vmem:[#allocation7 + $0xc84] ss:$16 sps:$4 sm:$0xff]  }
 0x3ee   :  { %7271 = vmatpush1.bf16.msra.mxu0 %v15281_v34  ;;  %6739 = vmatprep.subr.bf16.mxu1 %v15286_v50  ;;  %v15343_v34 = vld [vmem:[#allocation7 + $0xc8c] ss:$16 sps:$4 sm:$0xff]   ;;  %v15338_v50 = vld [vmem:[#allocation7 + $0xc80] ss:$16 sps:$4 sm:$0xff]  }
 0x3ef   :  { %7272 = vmatprep.subr.bf16.mxu0 %v15289_v11  ;;  %v15341_v11 = vld [vmem:[#allocation7 + $0xc88] ss:$16 sps:$4 sm:$0xff]  }
 0x3f1   :  { %6740 = vmatpush1.bf16.msra.mxu1 %v15284_v12  ;;  %v15346_v12 = vld [vmem:[#allocation7 + $0xca4] ss:$16 sps:$4 sm:$0xff]  }
 0x3f2   :  { %7273 = vmatpush1.bf16.msra.mxu0 %v15287_v19  ;;  %6741 = vmatprep.subr.bf16.mxu1 %v15292_v35  ;;  %v15349_v19 = vld [vmem:[#allocation7 + $0xcac] ss:$16 sps:$4 sm:$0xff]   ;;  %v15344_v35 = vld [vmem:[#allocation7 + $0xca0] ss:$16 sps:$4 sm:$0xff]  }
 0x3f3   :  { %7274 = vmatprep.subr.bf16.mxu0 %v15295_v13  ;;  %v15347_v13 = vld [vmem:[#allocation7 + $0xca8] ss:$16 sps:$4 sm:$0xff]  }
 0x3f5   :  { %6742 = vmatpush1.bf16.msra.mxu1 %v15290_v17  ;;  %v15352_v17 = vld [vmem:[#allocation7 + $0xcc4] ss:$16 sps:$4 sm:$0xff]  }
 0x3f6   :  { %7275 = vmatpush1.bf16.msra.mxu0 %v15293_v57  ;;  %6743 = vmatprep.subr.bf16.mxu1 %v15298_v53  ;;  %v15355_v57 = vld [vmem:[#allocation7 + $0xccc] ss:$16 sps:$4 sm:$0xff]   ;;  %v15350_v53 = vld [vmem:[#allocation7 + $0xcc0] ss:$16 sps:$4 sm:$0xff]  }
 0x3f7   :  { %7276 = vmatprep.subr.bf16.mxu0 %v15301_v18  ;;  %v15353_v18 = vld [vmem:[#allocation7 + $0xcc8] ss:$16 sps:$4 sm:$0xff]  }
 0x3f9   :  { %6744 = vmatpush1.bf16.msra.mxu1 %v15296_v21  ;;  %v15358_v21 = vld [vmem:[#allocation7 + $0xce4] ss:$16 sps:$4 sm:$0xff]  }
 0x3fa   :  { %7277 = vmatpush1.bf16.msra.mxu0 %v15299_v22  ;;  %6745 = vmatprep.subr.bf16.mxu1 %v15304_v23  ;;  %v15361_v22 = vld [vmem:[#allocation7 + $0xcec] ss:$16 sps:$4 sm:$0xff]   ;;  %v15356_v23 = vld [vmem:[#allocation7 + $0xce0] ss:$16 sps:$4 sm:$0xff]  }
 0x3fb   :  { %7278 = vmatprep.subr.bf16.mxu0 %v15307_v26  ;;  %v15359_v26 = vld [vmem:[#allocation7 + $0xce8] ss:$16 sps:$4 sm:$0xff]  }
 0x3fd   :  { %6746 = vmatpush1.bf16.msra.mxu1 %v15302_v27  ;;  %v15364_v27 = vld [vmem:[#allocation7 + $0xd04] ss:$16 sps:$4 sm:$0xff]  }
 0x3fe   :  { %7279 = vmatpush1.bf16.msra.mxu0 %v15305_v32  ;;  %6747 = vmatprep.subr.bf16.mxu1 %v15310_v33  ;;  %v15367_v32 = vld [vmem:[#allocation7 + $0xd0c] ss:$16 sps:$4 sm:$0xff]   ;;  %v15362_v33 = vld [vmem:[#allocation7 + $0xd00] ss:$16 sps:$4 sm:$0xff]  }
 0x3ff   :  { %7280 = vmatprep.subr.bf16.mxu0 %v15313_v20  ;;  %v15365_v20 = vld [vmem:[#allocation7 + $0xd08] ss:$16 sps:$4 sm:$0xff]  }
 0x401   :  { %6748 = vmatpush1.bf16.msra.mxu1 %v15308_v36  ;;  %v15370_v36 = vld [vmem:[#allocation7 + $0xd24] ss:$16 sps:$4 sm:$0xff]  }
 0x402   :  { %7281 = vmatpush1.bf16.msra.mxu0 %v15311_v41  ;;  %6758 = vmatprep.subr.bf16.mxu1 %v15316_v42  ;;  %v15373_v41 = vld [vmem:[#allocation7 + $0xd2c] ss:$16 sps:$4 sm:$0xff]   ;;  %v15368_v42 = vld [vmem:[#allocation7 + $0xd20] ss:$16 sps:$4 sm:$0xff]  }
 0x403   :  { %7291 = vmatprep.subr.bf16.mxu0 %v15319_v43  ;;  %v15371_v43 = vld [vmem:[#allocation7 + $0xd28] ss:$16 sps:$4 sm:$0xff]  }
 0x404   :  { %6750 = vmatmul.mubr.bf16.vlgmr.msra.gmra.mrb[24].mxu1 %v1482_v45 }
 0x405   :  { %7283 = vmatmul.mubr.bf16.vlgmr.msra.gmra.mrb[28].mxu0 %v1482_v45  ;;  %6759 = vmatpush1.bf16.msra.mxu1 %v15314_v44  ;;  %v15376_v44 = vld [vmem:[#allocation7 + $0xd44] ss:$16 sps:$4 sm:$0xff]   ;;  %v15379_v45 = vld [vmem:[#allocation7 + $0xd4c] ss:$16 sps:$4 sm:$0xff]  }
 0x406   :  { %6790 = vmatprep.mubr.bf16.mxu1 %v1485_v55  ;;  %7292 = vmatpush1.bf16.msra.mxu0 %v15317_v46  ;;  %v15374_v46 = vld [vmem:[#allocation7 + $0xd40] ss:$16 sps:$4 sm:$0xff]  }
 0x407   :  { %7323 = vmatprep.mubr.bf16.mxu0 %v1485_v55  ;;  %6760 = vmatprep.subr.bf16.mxu1 %v15322_v48  ;;  %v15377_v48 = vld [vmem:[#allocation7 + $0xd48] ss:$16 sps:$4 sm:$0xff]   ;;  %v15382_v55 = vld [vmem:[#allocation7 + $0xd64] ss:$16 sps:$4 sm:$0xff]  }
 0x408   :  { %7293 = vmatprep.subr.bf16.mxu0 %v15325_v2  ;;  %v15385_v2 = vld [vmem:[#allocation7 + $0xd6c] ss:$16 sps:$4 sm:$0xff]  }
 0x409   :  { %6761 = vmatpush1.bf16.msra.mxu1 %v15320_v62  ;;  %v15380_v62 = vld [vmem:[#allocation7 + $0xd60] ss:$16 sps:$4 sm:$0xff]  }
 0x40a   :  { %7294 = vmatpush1.bf16.msra.mxu0 %v15323_v9  ;;  %6762 = vmatprep.subr.bf16.mxu1 %v15328_v5  ;;  %v15383_v9 = vld [vmem:[#allocation7 + $0xd68] ss:$16 sps:$4 sm:$0xff]   ;;  %v15388_v5 = vld [vmem:[#allocation7 + $0xd84] ss:$16 sps:$4 sm:$0xff]  }
 0x40b   :  { %7295 = vmatprep.subr.bf16.mxu0 %v15331_v52  ;;  %v15391_v52 = vld [vmem:[#allocation7 + $0xd8c] ss:$16 sps:$4 sm:$0xff]  }
 0x40d   :  { %6763 = vmatpush1.bf16.msra.mxu1 %v15326_v14  ;;  %v15386_v14 = vld [vmem:[#allocation7 + $0xd80] ss:$16 sps:$4 sm:$0xff]  }
 0x40e   :  { %7296 = vmatpush1.bf16.msra.mxu0 %v15329_v38  ;;  %6764 = vmatprep.subr.bf16.mxu1 %v15334_v7  ;;  %v15389_v38 = vld [vmem:[#allocation7 + $0xd88] ss:$16 sps:$4 sm:$0xff]   ;;  %v15394_v7 = vld [vmem:[#allocation7 + $0xda4] ss:$16 sps:$4 sm:$0xff]  }
 0x40f   :  { %7297 = vmatprep.subr.bf16.mxu0 %v15337_v30  ;;  %v15397_v30 = vld [vmem:[#allocation7 + $0xdac] ss:$16 sps:$4 sm:$0xff]  }
 0x411   :  { %6765 = vmatpush1.bf16.msra.mxu1 %v15332_v56  ;;  %v15392_v56 = vld [vmem:[#allocation7 + $0xda0] ss:$16 sps:$4 sm:$0xff]  }
 0x412   :  { %7298 = vmatpush1.bf16.msra.mxu0 %v15335_v16  ;;  %6766 = vmatprep.subr.bf16.mxu1 %v15340_v10  ;;  %v15395_v16 = vld [vmem:[#allocation7 + $0xda8] ss:$16 sps:$4 sm:$0xff]   ;;  %v15400_v10 = vld [vmem:[#allocation7 + $0xdc4] ss:$16 sps:$4 sm:$0xff]  }
 0x413   :  { %7299 = vmatprep.subr.bf16.mxu0 %v15343_v34  ;;  %v15403_v34 = vld [vmem:[#allocation7 + $0xdcc] ss:$16 sps:$4 sm:$0xff]  }
 0x415   :  { %6767 = vmatpush1.bf16.msra.mxu1 %v15338_v50  ;;  %v15398_v50 = vld [vmem:[#allocation7 + $0xdc0] ss:$16 sps:$4 sm:$0xff]  }
 0x416   :  { %7300 = vmatpush1.bf16.msra.mxu0 %v15341_v11  ;;  %6768 = vmatprep.subr.bf16.mxu1 %v15346_v12  ;;  %v15401_v11 = vld [vmem:[#allocation7 + $0xdc8] ss:$16 sps:$4 sm:$0xff]   ;;  %v15406_v12 = vld [vmem:[#allocation7 + $0xde4] ss:$16 sps:$4 sm:$0xff]  }
 0x417   :  { %7301 = vmatprep.subr.bf16.mxu0 %v15349_v19  ;;  %v15409_v19 = vld [vmem:[#allocation7 + $0xdec] ss:$16 sps:$4 sm:$0xff]  }
 0x419   :  { %6769 = vmatpush1.bf16.msra.mxu1 %v15344_v35  ;;  %v15404_v35 = vld [vmem:[#allocation7 + $0xde0] ss:$16 sps:$4 sm:$0xff]  }
 0x41a   :  { %7302 = vmatpush1.bf16.msra.mxu0 %v15347_v13  ;;  %6770 = vmatprep.subr.bf16.mxu1 %v15352_v17  ;;  %v15407_v13 = vld [vmem:[#allocation7 + $0xde8] ss:$16 sps:$4 sm:$0xff]   ;;  %v15412_v17 = vld [vmem:[#allocation7 + $0xe04] ss:$16 sps:$4 sm:$0xff]  }
 0x41b   :  { %7303 = vmatprep.subr.bf16.mxu0 %v15355_v57  ;;  %v15415_v57 = vld [vmem:[#allocation7 + $0xe0c] ss:$16 sps:$4 sm:$0xff]  }
 0x41d   :  { %6771 = vmatpush1.bf16.msra.mxu1 %v15350_v53  ;;  %v15410_v53 = vld [vmem:[#allocation7 + $0xe00] ss:$16 sps:$4 sm:$0xff]  }
 0x41e   :  { %7304 = vmatpush1.bf16.msra.mxu0 %v15353_v18  ;;  %6772 = vmatprep.subr.bf16.mxu1 %v15358_v21  ;;  %v1484_v18 = vpack.c.bf16 %v17607_v24, %v17607_v24  ;;  %v15413_v21 = vld [vmem:[#allocation7 + $0xe08] ss:$16 sps:$4 sm:$0xff]   ;;  %v15427_v24 = vld [vmem:[#allocation7 + $0xe4c] ss:$16 sps:$4 sm:$0xff]  }
 0x41f   :  { %7305 = vmatprep.subr.bf16.mxu0 %v15361_v22  ;;  %v15418_v22 = vld [vmem:[#allocation7 + $0xe24] ss:$16 sps:$4 sm:$0xff]  }
 0x421   :  { %6773 = vmatpush1.bf16.msra.mxu1 %v15356_v23  ;;  %v1487_v23 = vpack.c.bf16 %v17613_v31, %v17613_v31  ;;  %v15433_v31 = vld [vmem:[#allocation7 + $0xe6c] ss:$16 sps:$4 sm:$0xff]  }
 0x422   :  { %7306 = vmatpush1.bf16.msra.mxu0 %v15359_v26  ;;  %6774 = vmatprep.subr.bf16.mxu1 %v15364_v27  ;;  %v15421_v26 = vld [vmem:[#allocation7 + $0xe2c] ss:$16 sps:$4 sm:$0xff]   ;;  %v15416_v27 = vld [vmem:[#allocation7 + $0xe20] ss:$16 sps:$4 sm:$0xff]  }
 0x423   :  { %7307 = vmatprep.subr.bf16.mxu0 %v15367_v32  ;;  %v15419_v32 = vld [vmem:[#allocation7 + $0xe28] ss:$16 sps:$4 sm:$0xff]  }
 0x425   :  { %6775 = vmatpush1.bf16.msra.mxu1 %v15362_v33  ;;  %v15424_v33 = vld [vmem:[#allocation7 + $0xe44] ss:$16 sps:$4 sm:$0xff]  }
 0x426   :  { %7308 = vmatpush1.bf16.msra.mxu0 %v15365_v20  ;;  %6776 = vmatprep.subr.bf16.mxu1 %v15370_v36  ;;  %v15422_v20 = vld [vmem:[#allocation7 + $0xe40] ss:$16 sps:$4 sm:$0xff]   ;;  %v15425_v36 = vld [vmem:[#allocation7 + $0xe48] ss:$16 sps:$4 sm:$0xff]  }
 0x427   :  { %7309 = vmatprep.subr.bf16.mxu0 %v15373_v41  ;;  %v15430_v41 = vld [vmem:[#allocation7 + $0xe64] ss:$16 sps:$4 sm:$0xff]  }
 0x429   :  { %6777 = vmatpush1.bf16.msra.mxu1 %v15368_v42  ;;  %v15428_v42 = vld [vmem:[#allocation7 + $0xe60] ss:$16 sps:$4 sm:$0xff]  }
 0x42a   :  { %7310 = vmatpush1.bf16.msra.mxu0 %v15371_v43  ;;  %6778 = vmatprep.subr.bf16.mxu1 %v15376_v44  ;;  %v15431_v43 = vld [vmem:[#allocation7 + $0xe68] ss:$16 sps:$4 sm:$0xff]   ;;  %v15436_v44 = vld [vmem:[#allocation7 + $0xe84] ss:$16 sps:$4 sm:$0xff]  }
 0x42b   :  { %7311 = vmatprep.subr.bf16.mxu0 %v15379_v45  ;;  %v15439_v45 = vld [vmem:[#allocation7 + $0xe8c] ss:$16 sps:$4 sm:$0xff]  }
 0x42d   :  { %6779 = vmatpush1.bf16.msra.mxu1 %v15374_v46  ;;  %v15434_v46 = vld [vmem:[#allocation7 + $0xe80] ss:$16 sps:$4 sm:$0xff]  }
 0x42e   :  { %7312 = vmatpush1.bf16.msra.mxu0 %v15377_v48  ;;  %6780 = vmatprep.subr.bf16.mxu1 %v15382_v55  ;;  %v15437_v48 = vld [vmem:[#allocation7 + $0xe88] ss:$16 sps:$4 sm:$0xff]   ;;  %v15442_v55 = vld [vmem:[#allocation7 + $0xea4] ss:$16 sps:$4 sm:$0xff]  }
 0x42f   :  { %7313 = vmatprep.subr.bf16.mxu0 %v15385_v2  ;;  %v15445_v2 = vld [vmem:[#allocation7 + $0xeac] ss:$16 sps:$4 sm:$0xff]  }
 0x431   :  { %6781 = vmatpush1.bf16.msra.mxu1 %v15380_v62  ;;  %v15440_v62 = vld [vmem:[#allocation7 + $0xea0] ss:$16 sps:$4 sm:$0xff]  }
 0x432   :  { %7314 = vmatpush1.bf16.msra.mxu0 %v15383_v9  ;;  %6782 = vmatprep.subr.bf16.mxu1 %v15388_v5  ;;  %v15443_v9 = vld [vmem:[#allocation7 + $0xea8] ss:$16 sps:$4 sm:$0xff]   ;;  %v15448_v5 = vld [vmem:[#allocation7 + $0xec4] ss:$16 sps:$4 sm:$0xff]  }
 0x433   :  { %7315 = vmatprep.subr.bf16.mxu0 %v15391_v52  ;;  %v15451_v52 = vld [vmem:[#allocation7 + $0xecc] ss:$16 sps:$4 sm:$0xff]  }
 0x435   :  { %6783 = vmatpush1.bf16.msra.mxu1 %v15386_v14  ;;  %v15446_v14 = vld [vmem:[#allocation7 + $0xec0] ss:$16 sps:$4 sm:$0xff]  }
 0x436   :  { %7316 = vmatpush1.bf16.msra.mxu0 %v15389_v38  ;;  %6784 = vmatprep.subr.bf16.mxu1 %v15394_v7  ;;  %v15449_v38 = vld [vmem:[#allocation7 + $0xec8] ss:$16 sps:$4 sm:$0xff]   ;;  %v15454_v7 = vld [vmem:[#allocation7 + $0xee4] ss:$16 sps:$4 sm:$0xff]  }
 0x437   :  { %7317 = vmatprep.subr.bf16.mxu0 %v15397_v30  ;;  %v15457_v30 = vld [vmem:[#allocation7 + $0xeec] ss:$16 sps:$4 sm:$0xff]  }
 0x439   :  { %6785 = vmatpush1.bf16.msra.mxu1 %v15392_v56  ;;  %v15452_v56 = vld [vmem:[#allocation7 + $0xee0] ss:$16 sps:$4 sm:$0xff]  }
 0x43a   :  { %7318 = vmatpush1.bf16.msra.mxu0 %v15395_v16  ;;  %6786 = vmatprep.subr.bf16.mxu1 %v15400_v10  ;;  %v15455_v16 = vld [vmem:[#allocation7 + $0xee8] ss:$16 sps:$4 sm:$0xff]   ;;  %v15460_v10 = vld [vmem:[#allocation7 + $0xf04] ss:$16 sps:$4 sm:$0xff]  }
 0x43b   :  { %7319 = vmatprep.subr.bf16.mxu0 %v15403_v34  ;;  %v15463_v34 = vld [vmem:[#allocation7 + $0xf0c] ss:$16 sps:$4 sm:$0xff]  }
 0x43d   :  { %6787 = vmatpush1.bf16.msra.mxu1 %v15398_v50  ;;  %v15458_v50 = vld [vmem:[#allocation7 + $0xf00] ss:$16 sps:$4 sm:$0xff]  }
 0x43e   :  { %7320 = vmatpush1.bf16.msra.mxu0 %v15401_v11  ;;  %6788 = vmatprep.subr.bf16.mxu1 %v15406_v12  ;;  %v15461_v11 = vld [vmem:[#allocation7 + $0xf08] ss:$16 sps:$4 sm:$0xff]   ;;  %v15466_v12 = vld [vmem:[#allocation7 + $0xf24] ss:$16 sps:$4 sm:$0xff]  }
 0x43f   :  { %7321 = vmatprep.subr.bf16.mxu0 %v15409_v19  ;;  %v15469_v19 = vld [vmem:[#allocation7 + $0xf2c] ss:$16 sps:$4 sm:$0xff]  }
 0x441   :  { %6789 = vmatpush1.bf16.msra.mxu1 %v15404_v35  ;;  %v15464_v35 = vld [vmem:[#allocation7 + $0xf20] ss:$16 sps:$4 sm:$0xff]  }
 0x442   :  { %7322 = vmatpush1.bf16.msra.mxu0 %v15407_v13  ;;  %6799 = vmatprep.subr.bf16.mxu1 %v15412_v17  ;;  %v15467_v13 = vld [vmem:[#allocation7 + $0xf28] ss:$16 sps:$4 sm:$0xff]   ;;  %v15472_v17 = vld [vmem:[#allocation7 + $0xf44] ss:$16 sps:$4 sm:$0xff]  }
 0x443   :  { %7332 = vmatprep.subr.bf16.mxu0 %v15415_v57  ;;  %v15475_v57 = vld [vmem:[#allocation7 + $0xf4c] ss:$16 sps:$4 sm:$0xff]  }
 0x444   :  { %6791 = vmatmul.mubr.bf16.vlgmr.msra.gmra.mrb[24].mxu1 %v1484_v18 }
 0x445   :  { %7324 = vmatmul.mubr.bf16.vlgmr.msra.gmra.mrb[28].mxu0 %v1484_v18  ;;  %6800 = vmatpush1.bf16.msra.mxu1 %v15410_v53  ;;  %v15470_v53 = vld [vmem:[#allocation7 + $0xf40] ss:$16 sps:$4 sm:$0xff]   ;;  %v15473_v18 = vld [vmem:[#allocation7 + $0xf48] ss:$16 sps:$4 sm:$0xff]  }
 0x446   :  { %6831 = vmatprep.mubr.bf16.mxu1 %v1487_v23  ;;  %7333 = vmatpush1.bf16.msra.mxu0 %v15413_v21  ;;  %v15478_v21 = vld [vmem:[#allocation7 + $0xf64] ss:$16 sps:$4 sm:$0xff]  }
 0x447   :  { %7364 = vmatprep.mubr.bf16.mxu0 %v1487_v23  ;;  %6801 = vmatprep.subr.bf16.mxu1 %v15418_v22  ;;  %v15481_v22 = vld [vmem:[#allocation7 + $0xf6c] ss:$16 sps:$4 sm:$0xff]   ;;  %v15476_v23 = vld [vmem:[#allocation7 + $0xf60] ss:$16 sps:$4 sm:$0xff]  }
 0x448   :  { %7334 = vmatprep.subr.bf16.mxu0 %v15421_v26  ;;  %v15479_v26 = vld [vmem:[#allocation7 + $0xf68] ss:$16 sps:$4 sm:$0xff]  }
 0x449   :  { %6802 = vmatpush1.bf16.msra.mxu1 %v15416_v27  ;;  %v15484_v27 = vld [vmem:[#allocation7 + $0xf84] ss:$16 sps:$4 sm:$0xff]  }
 0x44a   :  { %7335 = vmatpush1.bf16.msra.mxu0 %v15419_v32  ;;  %6803 = vmatprep.subr.bf16.mxu1 %v15424_v33  ;;  %v15487_v32 = vld [vmem:[#allocation7 + $0xf8c] ss:$16 sps:$4 sm:$0xff]   ;;  %v15482_v33 = vld [vmem:[#allocation7 + $0xf80] ss:$16 sps:$4 sm:$0xff]  }
 0x44b   :  { %7336 = vmatprep.subr.bf16.mxu0 %v15427_v24  ;;  %v15485_v24 = vld [vmem:[#allocation7 + $0xf88] ss:$16 sps:$4 sm:$0xff]  }
 0x44d   :  { %6804 = vmatpush1.bf16.msra.mxu1 %v15422_v20  ;;  %v15490_v20 = vld [vmem:[#allocation7 + $0xfa4] ss:$16 sps:$4 sm:$0xff]  }
 0x44e   :  { %7337 = vmatpush1.bf16.msra.mxu0 %v15425_v36  ;;  %6805 = vmatprep.subr.bf16.mxu1 %v15430_v41  ;;  %v15493_v36 = vld [vmem:[#allocation7 + $0xfac] ss:$16 sps:$4 sm:$0xff]   ;;  %v15488_v41 = vld [vmem:[#allocation7 + $0xfa0] ss:$16 sps:$4 sm:$0xff]  }
 0x44f   :  { %7338 = vmatprep.subr.bf16.mxu0 %v15433_v31  ;;  %v15491_v31 = vld [vmem:[#allocation7 + $0xfa8] ss:$16 sps:$4 sm:$0xff]  }
 0x451   :  { %6806 = vmatpush1.bf16.msra.mxu1 %v15428_v42  ;;  %v15496_v42 = vld [vmem:[#allocation7 + $0xfc4] ss:$16 sps:$4 sm:$0xff]  }
 0x452   :  { %7339 = vmatpush1.bf16.msra.mxu0 %v15431_v43  ;;  %6807 = vmatprep.subr.bf16.mxu1 %v15436_v44  ;;  %v15499_v43 = vld [vmem:[#allocation7 + $0xfcc] ss:$16 sps:$4 sm:$0xff]   ;;  %v15494_v44 = vld [vmem:[#allocation7 + $0xfc0] ss:$16 sps:$4 sm:$0xff]  }
 0x453   :  { %7340 = vmatprep.subr.bf16.mxu0 %v15439_v45  ;;  %v15497_v45 = vld [vmem:[#allocation7 + $0xfc8] ss:$16 sps:$4 sm:$0xff]  }
 0x455   :  { %6808 = vmatpush1.bf16.msra.mxu1 %v15434_v46  ;;  %v15502_v46 = vld [vmem:[#allocation7 + $0xfe4] ss:$16 sps:$4 sm:$0xff]  }
 0x456   :  { %7341 = vmatpush1.bf16.msra.mxu0 %v15437_v48  ;;  %6809 = vmatprep.subr.bf16.mxu1 %v15442_v55  ;;  %v15505_v48 = vld [vmem:[#allocation7 + $0xfec] ss:$16 sps:$4 sm:$0xff]  }
 0x457   :  { %7342 = vmatprep.subr.bf16.mxu0 %v15445_v2  ;;  %v17676_v55 = vld [vmem:[#allocation5 + $0x10] sm:$0xff] }
 0x458   :  { %v612_v2 = vrot.slane %v17676_v55, %v17549_v3 }
 0x459   :  { %6810 = vmatpush1.bf16.msra.mxu1 %v15440_v62  ;;  %v15500_v62 = vld [vmem:[#allocation7 + $0xfe0] ss:$16 sps:$4 sm:$0xff]  }
 0x45a   :  { %7343 = vmatpush1.bf16.msra.mxu0 %v15443_v9  ;;  %6811 = vmatprep.subr.bf16.mxu1 %v15448_v5  ;;  %v15503_v9 = vld [vmem:[#allocation7 + $0xfe8] ss:$16 sps:$4 sm:$0xff]   ;;  %v15508_v5 = vld [vmem:[#allocation7 + $0x1004] ss:$16 sps:$4 sm:$0xff]  }
 0x45b   :  { %7344 = vmatprep.subr.bf16.mxu0 %v15451_v52  ;;  %v15511_v52 = vld [vmem:[#allocation7 + $0x100c] ss:$16 sps:$4 sm:$0xff]  }
 0x45d   :  { %6812 = vmatpush1.bf16.msra.mxu1 %v15446_v14  ;;  %v1304_v14 = vadd.f32 %v17621_v54, %v612_v2  ;;  %v15520_v54 = vld [vmem:[#allocation7 + $0x1044] ss:$16 sps:$4 sm:$0xff]   ;;  %v15565_v2 = vld [vmem:[#allocation7 + $0x112c] ss:$16 sps:$4 sm:$0xff]  }
 0x45e   :  { %7345 = vmatpush1.bf16.msra.mxu0 %v15449_v38  ;;  %6813 = vmatprep.subr.bf16.mxu1 %v15454_v7  ;;  %v15506_v38 = vld [vmem:[#allocation7 + $0x1000] ss:$16 sps:$4 sm:$0xff]   ;;  %v1486_v7 = vpack.c.bf16 %v17609_v25, %v17609_v25 }
 0x45f   :  { %7346 = vmatprep.subr.bf16.mxu0 %v15457_v30  ;;  %v15509_v30 = vld [vmem:[#allocation7 + $0x1008] ss:$16 sps:$4 sm:$0xff]   ;;  %v15518_v25 = vld [vmem:[#allocation7 + $0x1040] ss:$16 sps:$4 sm:$0xff]  }
 0x461   :  { %6814 = vmatpush1.bf16.msra.mxu1 %v15452_v56  ;;  %v15514_v56 = vld [vmem:[#allocation7 + $0x1024] ss:$16 sps:$4 sm:$0xff]  }
 0x462   :  { %7347 = vmatpush1.bf16.msra.mxu0 %v15455_v16  ;;  %6815 = vmatprep.subr.bf16.mxu1 %v15460_v10  ;;  %v1489_v16 = vpack.c.bf16 %v1304_v14, %v1304_v14  ;;  %v15517_v10 = vld [vmem:[#allocation7 + $0x102c] ss:$16 sps:$4 sm:$0xff]   ;;  %v15566_v14 = vld [vmem:[#allocation7 + $0x1140] ss:$16 sps:$4 sm:$0xff]  }
 0x463   :  { %7348 = vmatprep.subr.bf16.mxu0 %v15463_v34  ;;  %v15512_v34 = vld [vmem:[#allocation7 + $0x1020] ss:$16 sps:$4 sm:$0xff]  }
 0x465   :  { %6816 = vmatpush1.bf16.msra.mxu1 %v15458_v50  ;;  %v15515_v50 = vld [vmem:[#allocation7 + $0x1028] ss:$16 sps:$4 sm:$0xff]  }
 0x466   :  { %7349 = vmatpush1.bf16.msra.mxu0 %v15461_v11  ;;  %6817 = vmatprep.subr.bf16.mxu1 %v15466_v12  ;;  %v15523_v11 = vld [vmem:[#allocation7 + $0x104c] ss:$16 sps:$4 sm:$0xff]   ;;  %v15521_v12 = vld [vmem:[#allocation7 + $0x1048] ss:$16 sps:$4 sm:$0xff]  }
 0x467   :  { %7350 = vmatprep.subr.bf16.mxu0 %v15469_v19  ;;  %v15526_v19 = vld [vmem:[#allocation7 + $0x1064] ss:$16 sps:$4 sm:$0xff]  }
 0x469   :  { %6818 = vmatpush1.bf16.msra.mxu1 %v15464_v35  ;;  %v15529_v35 = vld [vmem:[#allocation7 + $0x106c] ss:$16 sps:$4 sm:$0xff]  }
 0x46a   :  { %7351 = vmatpush1.bf16.msra.mxu0 %v15467_v13  ;;  %6819 = vmatprep.subr.bf16.mxu1 %v15472_v17  ;;  %v15524_v13 = vld [vmem:[#allocation7 + $0x1060] ss:$16 sps:$4 sm:$0xff]   ;;  %v15527_v17 = vld [vmem:[#allocation7 + $0x1068] ss:$16 sps:$4 sm:$0xff]  }
 0x46b   :  { %7352 = vmatprep.subr.bf16.mxu0 %v15475_v57  ;;  %v15532_v57 = vld [vmem:[#allocation7 + $0x1084] ss:$16 sps:$4 sm:$0xff]  }
 0x46d   :  { %6820 = vmatpush1.bf16.msra.mxu1 %v15470_v53  ;;  %v15535_v53 = vld [vmem:[#allocation7 + $0x108c] ss:$16 sps:$4 sm:$0xff]  }
 0x46e   :  { %7353 = vmatpush1.bf16.msra.mxu0 %v15473_v18  ;;  %6821 = vmatprep.subr.bf16.mxu1 %v15478_v21  ;;  %v15530_v18 = vld [vmem:[#allocation7 + $0x1080] ss:$16 sps:$4 sm:$0xff]   ;;  %v15533_v21 = vld [vmem:[#allocation7 + $0x1088] ss:$16 sps:$4 sm:$0xff]  }
 0x46f   :  { %7354 = vmatprep.subr.bf16.mxu0 %v15481_v22  ;;  %v15538_v22 = vld [vmem:[#allocation7 + $0x10a4] ss:$16 sps:$4 sm:$0xff]  }
 0x471   :  { %6822 = vmatpush1.bf16.msra.mxu1 %v15476_v23  ;;  %v15541_v23 = vld [vmem:[#allocation7 + $0x10ac] ss:$16 sps:$4 sm:$0xff]  }
 0x472   :  { %7355 = vmatpush1.bf16.msra.mxu0 %v15479_v26  ;;  %6823 = vmatprep.subr.bf16.mxu1 %v15484_v27  ;;  %v15536_v26 = vld [vmem:[#allocation7 + $0x10a0] ss:$16 sps:$4 sm:$0xff]   ;;  %v15539_v27 = vld [vmem:[#allocation7 + $0x10a8] ss:$16 sps:$4 sm:$0xff]  }
 0x473   :  { %7356 = vmatprep.subr.bf16.mxu0 %v15487_v32  ;;  %v15544_v32 = vld [vmem:[#allocation7 + $0x10c4] ss:$16 sps:$4 sm:$0xff]  }
 0x475   :  { %6824 = vmatpush1.bf16.msra.mxu1 %v15482_v33  ;;  %v15547_v33 = vld [vmem:[#allocation7 + $0x10cc] ss:$16 sps:$4 sm:$0xff]  }
 0x476   :  { %7357 = vmatpush1.bf16.msra.mxu0 %v15485_v24  ;;  %6825 = vmatprep.subr.bf16.mxu1 %v15490_v20  ;;  %v15542_v24 = vld [vmem:[#allocation7 + $0x10c0] ss:$16 sps:$4 sm:$0xff]   ;;  %v15545_v20 = vld [vmem:[#allocation7 + $0x10c8] ss:$16 sps:$4 sm:$0xff]  }
 0x477   :  { %7358 = vmatprep.subr.bf16.mxu0 %v15493_v36  ;;  %v15550_v36 = vld [vmem:[#allocation7 + $0x10e4] ss:$16 sps:$4 sm:$0xff]  }
 0x479   :  { %6826 = vmatpush1.bf16.msra.mxu1 %v15488_v41  ;;  %v15553_v41 = vld [vmem:[#allocation7 + $0x10ec] ss:$16 sps:$4 sm:$0xff]  }
 0x47a   :  { %7359 = vmatpush1.bf16.msra.mxu0 %v15491_v31  ;;  %6827 = vmatprep.subr.bf16.mxu1 %v15496_v42  ;;  %v15548_v31 = vld [vmem:[#allocation7 + $0x10e0] ss:$16 sps:$4 sm:$0xff]   ;;  %v15551_v42 = vld [vmem:[#allocation7 + $0x10e8] ss:$16 sps:$4 sm:$0xff]  }
 0x47b   :  { %7360 = vmatprep.subr.bf16.mxu0 %v15499_v43  ;;  %v15556_v43 = vld [vmem:[#allocation7 + $0x1104] ss:$16 sps:$4 sm:$0xff]  }
 0x47d   :  { %6828 = vmatpush1.bf16.msra.mxu1 %v15494_v44  ;;  %v15559_v44 = vld [vmem:[#allocation7 + $0x110c] ss:$16 sps:$4 sm:$0xff]  }
 0x47e   :  { %7361 = vmatpush1.bf16.msra.mxu0 %v15497_v45  ;;  %6829 = vmatprep.subr.bf16.mxu1 %v15502_v46  ;;  %v15554_v45 = vld [vmem:[#allocation7 + $0x1100] ss:$16 sps:$4 sm:$0xff]   ;;  %v15557_v46 = vld [vmem:[#allocation7 + $0x1108] ss:$16 sps:$4 sm:$0xff]  }
 0x47f   :  { %7362 = vmatprep.subr.bf16.mxu0 %v15505_v48  ;;  %v15562_v48 = vld [vmem:[#allocation7 + $0x1124] ss:$16 sps:$4 sm:$0xff]  }
 0x481   :  { %6830 = vmatpush1.bf16.msra.mxu1 %v15500_v62  ;;  %v15560_v62 = vld [vmem:[#allocation7 + $0x1120] ss:$16 sps:$4 sm:$0xff]  }
 0x482   :  { %7363 = vmatpush1.bf16.msra.mxu0 %v15503_v9  ;;  %6840 = vmatprep.subr.bf16.mxu1 %v15508_v5  ;;  %v15563_v9 = vld [vmem:[#allocation7 + $0x1128] ss:$16 sps:$4 sm:$0xff]   ;;  %v15568_v5 = vld [vmem:[#allocation7 + $0x1144] ss:$16 sps:$4 sm:$0xff]  }
 0x483   :  { %7373 = vmatprep.subr.bf16.mxu0 %v15511_v52  ;;  %v15571_v52 = vld [vmem:[#allocation7 + $0x114c] ss:$16 sps:$4 sm:$0xff]  }
 0x484   :  { %6832 = vmatmul.mubr.bf16.vlgmr.msra.gmra.mrb[24].mxu1 %v1486_v7 }
 0x485   :  { %7365 = vmatmul.mubr.bf16.vlgmr.msra.gmra.mrb[28].mxu0 %v1486_v7  ;;  %6841 = vmatpush1.bf16.msra.mxu1 %v15506_v38  ;;  %v15569_v38 = vld [vmem:[#allocation7 + $0x1148] ss:$16 sps:$4 sm:$0xff]   ;;  %v15574_v7 = vld [vmem:[#allocation7 + $0x1164] ss:$16 sps:$4 sm:$0xff]  }
 0x486   :  { %6872 = vmatprep.mubr.bf16.mxu1 %v1489_v16  ;;  %7374 = vmatpush1.bf16.msra.mxu0 %v15509_v30  ;;  %v15577_v30 = vld [vmem:[#allocation7 + $0x116c] ss:$16 sps:$4 sm:$0xff]  }
 0x487   :  { %7405 = vmatprep.mubr.bf16.mxu0 %v1489_v16  ;;  %6842 = vmatprep.subr.bf16.mxu1 %v15514_v56  ;;  %v15572_v56 = vld [vmem:[#allocation7 + $0x1160] ss:$16 sps:$4 sm:$0xff]   ;;  %v15575_v16 = vld [vmem:[#allocation7 + $0x1168] ss:$16 sps:$4 sm:$0xff]  }
 0x488   :  { %7375 = vmatprep.subr.bf16.mxu0 %v15517_v10  ;;  %v15580_v10 = vld [vmem:[#allocation7 + $0x1184] ss:$16 sps:$4 sm:$0xff]  }
 0x489   :  { %6843 = vmatpush1.bf16.msra.mxu1 %v15512_v34  ;;  %v15583_v34 = vld [vmem:[#allocation7 + $0x118c] ss:$16 sps:$4 sm:$0xff]  }
 0x48a   :  { %7376 = vmatpush1.bf16.msra.mxu0 %v15515_v50  ;;  %6844 = vmatprep.subr.bf16.mxu1 %v15520_v54  ;;  %v15578_v50 = vld [vmem:[#allocation7 + $0x1180] ss:$16 sps:$4 sm:$0xff]   ;;  %v15581_v54 = vld [vmem:[#allocation7 + $0x1188] ss:$16 sps:$4 sm:$0xff]  }
 0x48b   :  { %7377 = vmatprep.subr.bf16.mxu0 %v15523_v11  ;;  %v15586_v11 = vld [vmem:[#allocation7 + $0x11a4] ss:$16 sps:$4 sm:$0xff]  }
 0x48d   :  { %6845 = vmatpush1.bf16.msra.mxu1 %v15518_v25  ;;  %v15589_v25 = vld [vmem:[#allocation7 + $0x11ac] ss:$16 sps:$4 sm:$0xff]  }
 0x48e   :  { %7378 = vmatpush1.bf16.msra.mxu0 %v15521_v12  ;;  %6846 = vmatprep.subr.bf16.mxu1 %v15526_v19  ;;  %v15584_v12 = vld [vmem:[#allocation7 + $0x11a0] ss:$16 sps:$4 sm:$0xff]   ;;  %v15587_v19 = vld [vmem:[#allocation7 + $0x11a8] ss:$16 sps:$4 sm:$0xff]  }
 0x48f   :  { %7379 = vmatprep.subr.bf16.mxu0 %v15529_v35  ;;  %v15592_v35 = vld [vmem:[#allocation7 + $0x11c4] ss:$16 sps:$4 sm:$0xff]  }
 0x491   :  { %6847 = vmatpush1.bf16.msra.mxu1 %v15524_v13  ;;  %v15595_v13 = vld [vmem:[#allocation7 + $0x11cc] ss:$16 sps:$4 sm:$0xff]  }
 0x492   :  { %7380 = vmatpush1.bf16.msra.mxu0 %v15527_v17  ;;  %6848 = vmatprep.subr.bf16.mxu1 %v15532_v57  ;;  %v15590_v17 = vld [vmem:[#allocation7 + $0x11c0] ss:$16 sps:$4 sm:$0xff]   ;;  %v608_v57 = vrot.slane %v17676_v55, %v17544_v1  ;;  %v15605_v55 = vld [vmem:[#allocation7 + $0x1208] ss:$16 sps:$4 sm:$0xff]  }
 0x493   :  { %7381 = vmatprep.subr.bf16.mxu0 %v15535_v53  ;;  %v15593_v53 = vld [vmem:[#allocation7 + $0x11c8] ss:$16 sps:$4 sm:$0xff]  }
 0x495   :  { %6849 = vmatpush1.bf16.msra.mxu1 %v15530_v18  ;;  %v15598_v18 = vld [vmem:[#allocation7 + $0x11e4] ss:$16 sps:$4 sm:$0xff]  }
 0x496   :  { %7382 = vmatpush1.bf16.msra.mxu0 %v15533_v21  ;;  %6850 = vmatprep.subr.bf16.mxu1 %v15538_v22  ;;  %v15601_v21 = vld [vmem:[#allocation7 + $0x11ec] ss:$16 sps:$4 sm:$0xff]   ;;  %v15596_v22 = vld [vmem:[#allocation7 + $0x11e0] ss:$16 sps:$4 sm:$0xff]  }
 0x497   :  { %7383 = vmatprep.subr.bf16.mxu0 %v15541_v23  ;;  %v1302_v23 = vadd.f32 %v17617_v47, %v608_v57  ;;  %v15608_v47 = vld [vmem:[#allocation7 + $0x1220] ss:$16 sps:$4 sm:$0xff]   ;;  %v15661_v57 = vld [vmem:[#allocation7 + $0x132c] ss:$16 sps:$4 sm:$0xff]  }
 0x499   :  { %6851 = vmatpush1.bf16.msra.mxu1 %v15536_v26  ;;  %v15599_v26 = vld [vmem:[#allocation7 + $0x11e8] ss:$16 sps:$4 sm:$0xff]  }
 0x49a   :  { %7384 = vmatpush1.bf16.msra.mxu0 %v15539_v27  ;;  %6852 = vmatprep.subr.bf16.mxu1 %v15544_v32  ;;  %v15604_v27 = vld [vmem:[#allocation7 + $0x1204] ss:$16 sps:$4 sm:$0xff]   ;;  %v15607_v32 = vld [vmem:[#allocation7 + $0x120c] ss:$16 sps:$4 sm:$0xff]  }
 0x49b   :  { %7385 = vmatprep.subr.bf16.mxu0 %v15547_v33  ;;  %v15602_v33 = vld [vmem:[#allocation7 + $0x1200] ss:$16 sps:$4 sm:$0xff]  }
 0x49d   :  { %6853 = vmatpush1.bf16.msra.mxu1 %v15542_v24  ;;  %v1488_v24 = vpack.c.bf16 %v1302_v23, %v1302_v23  ;;  %v15662_v23 = vld [vmem:[#allocation7 + $0x1340] ss:$16 sps:$4 sm:$0xff]  }
 0x49e   :  { %7386 = vmatpush1.bf16.msra.mxu0 %v15545_v20  ;;  %6854 = vmatprep.subr.bf16.mxu1 %v15550_v36  ;;  %v15610_v20 = vld [vmem:[#allocation7 + $0x1224] ss:$16 sps:$4 sm:$0xff]   ;;  %v1491_v36 = vpack.c.bf16 %v17623_v59, %v17623_v59  ;;  %v15625_v59 = vld [vmem:[#allocation7 + $0x126c] ss:$16 sps:$4 sm:$0xff]  }
 0x49f   :  { %7387 = vmatprep.subr.bf16.mxu0 %v15553_v41  ;;  %v15613_v41 = vld [vmem:[#allocation7 + $0x122c] ss:$16 sps:$4 sm:$0xff]  }
 0x4a1   :  { %6855 = vmatpush1.bf16.msra.mxu1 %v15548_v31  ;;  %v15611_v31 = vld [vmem:[#allocation7 + $0x1228] ss:$16 sps:$4 sm:$0xff]  }
 0x4a2   :  { %7388 = vmatpush1.bf16.msra.mxu0 %v15551_v42  ;;  %6856 = vmatprep.subr.bf16.mxu1 %v15556_v43  ;;  %v15616_v42 = vld [vmem:[#allocation7 + $0x1244] ss:$16 sps:$4 sm:$0xff]   ;;  %v15619_v43 = vld [vmem:[#allocation7 + $0x124c] ss:$16 sps:$4 sm:$0xff]  }
 0x4a3   :  { %7389 = vmatprep.subr.bf16.mxu0 %v15559_v44  ;;  %v15614_v44 = vld [vmem:[#allocation7 + $0x1240] ss:$16 sps:$4 sm:$0xff]  }
 0x4a5   :  { %6857 = vmatpush1.bf16.msra.mxu1 %v15554_v45  ;;  %v15617_v45 = vld [vmem:[#allocation7 + $0x1248] ss:$16 sps:$4 sm:$0xff]  }
 0x4a6   :  { %7390 = vmatpush1.bf16.msra.mxu0 %v15557_v46  ;;  %6858 = vmatprep.subr.bf16.mxu1 %v15562_v48  ;;  %v15622_v46 = vld [vmem:[#allocation7 + $0x1264] ss:$16 sps:$4 sm:$0xff]   ;;  %v15620_v48 = vld [vmem:[#allocation7 + $0x1260] ss:$16 sps:$4 sm:$0xff]  }
 0x4a7   :  { %7391 = vmatprep.subr.bf16.mxu0 %v15565_v2  ;;  %v15623_v2 = vld [vmem:[#allocation7 + $0x1268] ss:$16 sps:$4 sm:$0xff]  }
 0x4a9   :  { %6859 = vmatpush1.bf16.msra.mxu1 %v15560_v62  ;;  %v15628_v62 = vld [vmem:[#allocation7 + $0x1284] ss:$16 sps:$4 sm:$0xff]  }
 0x4aa   :  { %7392 = vmatpush1.bf16.msra.mxu0 %v15563_v9  ;;  %6860 = vmatprep.subr.bf16.mxu1 %v15568_v5  ;;  %v15631_v9 = vld [vmem:[#allocation7 + $0x128c] ss:$16 sps:$4 sm:$0xff]   ;;  %v15626_v5 = vld [vmem:[#allocation7 + $0x1280] ss:$16 sps:$4 sm:$0xff]  }
 0x4ab   :  { %7393 = vmatprep.subr.bf16.mxu0 %v15571_v52  ;;  %v15629_v52 = vld [vmem:[#allocation7 + $0x1288] ss:$16 sps:$4 sm:$0xff]  }
 0x4ad   :  { %6861 = vmatpush1.bf16.msra.mxu1 %v15566_v14  ;;  %v15634_v14 = vld [vmem:[#allocation7 + $0x12a4] ss:$16 sps:$4 sm:$0xff]  }
 0x4ae   :  { %7394 = vmatpush1.bf16.msra.mxu0 %v15569_v38  ;;  %6862 = vmatprep.subr.bf16.mxu1 %v15574_v7  ;;  %v15637_v38 = vld [vmem:[#allocation7 + $0x12ac] ss:$16 sps:$4 sm:$0xff]   ;;  %v15632_v7 = vld [vmem:[#allocation7 + $0x12a0] ss:$16 sps:$4 sm:$0xff]  }
 0x4af   :  { %7395 = vmatprep.subr.bf16.mxu0 %v15577_v30  ;;  %v15635_v30 = vld [vmem:[#allocation7 + $0x12a8] ss:$16 sps:$4 sm:$0xff]  }
 0x4b1   :  { %6863 = vmatpush1.bf16.msra.mxu1 %v15572_v56  ;;  %v15640_v56 = vld [vmem:[#allocation7 + $0x12c4] ss:$16 sps:$4 sm:$0xff]  }
 0x4b2   :  { %7396 = vmatpush1.bf16.msra.mxu0 %v15575_v16  ;;  %6864 = vmatprep.subr.bf16.mxu1 %v15580_v10  ;;  %v15643_v16 = vld [vmem:[#allocation7 + $0x12cc] ss:$16 sps:$4 sm:$0xff]   ;;  %v15638_v10 = vld [vmem:[#allocation7 + $0x12c0] ss:$16 sps:$4 sm:$0xff]  }
 0x4b3   :  { %7397 = vmatprep.subr.bf16.mxu0 %v15583_v34  ;;  %v15641_v34 = vld [vmem:[#allocation7 + $0x12c8] ss:$16 sps:$4 sm:$0xff]  }
 0x4b5   :  { %6865 = vmatpush1.bf16.msra.mxu1 %v15578_v50  ;;  %v15646_v50 = vld [vmem:[#allocation7 + $0x12e4] ss:$16 sps:$4 sm:$0xff]  }
 0x4b6   :  { %7398 = vmatpush1.bf16.msra.mxu0 %v15581_v54  ;;  %6866 = vmatprep.subr.bf16.mxu1 %v15586_v11  ;;  %v15649_v54 = vld [vmem:[#allocation7 + $0x12ec] ss:$16 sps:$4 sm:$0xff]   ;;  %v15644_v11 = vld [vmem:[#allocation7 + $0x12e0] ss:$16 sps:$4 sm:$0xff]  }
 0x4b7   :  { %7399 = vmatprep.subr.bf16.mxu0 %v15589_v25  ;;  %v15647_v25 = vld [vmem:[#allocation7 + $0x12e8] ss:$16 sps:$4 sm:$0xff]  }
 0x4b9   :  { %6867 = vmatpush1.bf16.msra.mxu1 %v15584_v12  ;;  %v15652_v12 = vld [vmem:[#allocation7 + $0x1304] ss:$16 sps:$4 sm:$0xff]  }
 0x4ba   :  { %7400 = vmatpush1.bf16.msra.mxu0 %v15587_v19  ;;  %6868 = vmatprep.subr.bf16.mxu1 %v15592_v35  ;;  %v15655_v19 = vld [vmem:[#allocation7 + $0x130c] ss:$16 sps:$4 sm:$0xff]   ;;  %v15650_v35 = vld [vmem:[#allocation7 + $0x1300] ss:$16 sps:$4 sm:$0xff]  }
 0x4bb   :  { %7401 = vmatprep.subr.bf16.mxu0 %v15595_v13  ;;  %v15653_v13 = vld [vmem:[#allocation7 + $0x1308] ss:$16 sps:$4 sm:$0xff]  }
 0x4bd   :  { %6869 = vmatpush1.bf16.msra.mxu1 %v15590_v17  ;;  %v15658_v17 = vld [vmem:[#allocation7 + $0x1324] ss:$16 sps:$4 sm:$0xff]  }
 0x4be   :  { %7402 = vmatpush1.bf16.msra.mxu0 %v15593_v53  ;;  %6870 = vmatprep.subr.bf16.mxu1 %v15598_v18  ;;  %v15656_v53 = vld [vmem:[#allocation7 + $0x1320] ss:$16 sps:$4 sm:$0xff]   ;;  %v15659_v18 = vld [vmem:[#allocation7 + $0x1328] ss:$16 sps:$4 sm:$0xff]  }
 0x4bf   :  { %7403 = vmatprep.subr.bf16.mxu0 %v15601_v21  ;;  %v15664_v21 = vld [vmem:[#allocation7 + $0x1344] ss:$16 sps:$4 sm:$0xff]  }
 0x4c1   :  { %6871 = vmatpush1.bf16.msra.mxu1 %v15596_v22  ;;  %v15667_v22 = vld [vmem:[#allocation7 + $0x134c] ss:$16 sps:$4 sm:$0xff]  }
 0x4c2   :  { %7404 = vmatpush1.bf16.msra.mxu0 %v15599_v26  ;;  %6881 = vmatprep.subr.bf16.mxu1 %v15604_v27  ;;  %v15665_v26 = vld [vmem:[#allocation7 + $0x1348] ss:$16 sps:$4 sm:$0xff]   ;;  %v15670_v27 = vld [vmem:[#allocation7 + $0x1364] ss:$16 sps:$4 sm:$0xff]  }
 0x4c3   :  { %7414 = vmatprep.subr.bf16.mxu0 %v15607_v32  ;;  %v15673_v32 = vld [vmem:[#allocation7 + $0x136c] ss:$16 sps:$4 sm:$0xff]  }
 0x4c4   :  { %6873 = vmatmul.mubr.bf16.vlgmr.msra.gmra.mrb[24].mxu1 %v1488_v24 }
 0x4c5   :  { %7406 = vmatmul.mubr.bf16.vlgmr.msra.gmra.mrb[28].mxu0 %v1488_v24  ;;  %6882 = vmatpush1.bf16.msra.mxu1 %v15602_v33  ;;  %v15668_v33 = vld [vmem:[#allocation7 + $0x1360] ss:$16 sps:$4 sm:$0xff]   ;;  %v15671_v24 = vld [vmem:[#allocation7 + $0x1368] ss:$16 sps:$4 sm:$0xff]  }
 0x4c6   :  { %6913 = vmatprep.mubr.bf16.mxu1 %v1491_v36  ;;  %7415 = vmatpush1.bf16.msra.mxu0 %v15605_v55  ;;  %v15676_v55 = vld [vmem:[#allocation7 + $0x1384] ss:$16 sps:$4 sm:$0xff]  }
 0x4c7   :  { %7446 = vmatprep.mubr.bf16.mxu0 %v1491_v36  ;;  %6883 = vmatprep.subr.bf16.mxu1 %v15610_v20  ;;  %v15679_v20 = vld [vmem:[#allocation7 + $0x138c] ss:$16 sps:$4 sm:$0xff]   ;;  %v15674_v36 = vld [vmem:[#allocation7 + $0x1380] ss:$16 sps:$4 sm:$0xff]  }
 0x4c8   :  { %7416 = vmatprep.subr.bf16.mxu0 %v15613_v41  ;;  %v15677_v41 = vld [vmem:[#allocation7 + $0x1388] ss:$16 sps:$4 sm:$0xff]  }
 0x4c9   :  { %6884 = vmatpush1.bf16.msra.mxu1 %v15608_v47  ;;  %v15682_v47 = vld [vmem:[#allocation7 + $0x13a4] ss:$16 sps:$4 sm:$0xff]  }
 0x4ca   :  { %7417 = vmatpush1.bf16.msra.mxu0 %v15611_v31  ;;  %6885 = vmatprep.subr.bf16.mxu1 %v15616_v42  ;;  %v15685_v31 = vld [vmem:[#allocation7 + $0x13ac] ss:$16 sps:$4 sm:$0xff]   ;;  %v15680_v42 = vld [vmem:[#allocation7 + $0x13a0] ss:$16 sps:$4 sm:$0xff]  }
 0x4cb   :  { %7418 = vmatprep.subr.bf16.mxu0 %v15619_v43  ;;  %v15683_v43 = vld [vmem:[#allocation7 + $0x13a8] ss:$16 sps:$4 sm:$0xff]  }
 0x4cd   :  { %6886 = vmatpush1.bf16.msra.mxu1 %v15614_v44  ;;  %v15688_v44 = vld [vmem:[#allocation7 + $0x13c4] ss:$16 sps:$4 sm:$0xff]  }
 0x4ce   :  { %7419 = vmatpush1.bf16.msra.mxu0 %v15617_v45  ;;  %6887 = vmatprep.subr.bf16.mxu1 %v15622_v46  ;;  %v15691_v45 = vld [vmem:[#allocation7 + $0x13cc] ss:$16 sps:$4 sm:$0xff]   ;;  %v15686_v46 = vld [vmem:[#allocation7 + $0x13c0] ss:$16 sps:$4 sm:$0xff]  }
 0x4cf   :  { %7420 = vmatprep.subr.bf16.mxu0 %v15625_v59  ;;  %v15689_v59 = vld [vmem:[#allocation7 + $0x13c8] ss:$16 sps:$4 sm:$0xff]  }
 0x4d1   :  { %6888 = vmatpush1.bf16.msra.mxu1 %v15620_v48  ;;  %v15694_v48 = vld [vmem:[#allocation7 + $0x13e4] ss:$16 sps:$4 sm:$0xff]  }
 0x4d2   :  { %7421 = vmatpush1.bf16.msra.mxu0 %v15623_v2  ;;  %6889 = vmatprep.subr.bf16.mxu1 %v15628_v62  ;;  %v15697_v2 = vld [vmem:[#allocation7 + $0x13ec] ss:$16 sps:$4 sm:$0xff]   ;;  %v15692_v62 = vld [vmem:[#allocation7 + $0x13e0] ss:$16 sps:$4 sm:$0xff]  }
 0x4d3   :  { %7422 = vmatprep.subr.bf16.mxu0 %v15631_v9  ;;  %v15695_v9 = vld [vmem:[#allocation7 + $0x13e8] ss:$16 sps:$4 sm:$0xff]  }
 0x4d5   :  { %6890 = vmatpush1.bf16.msra.mxu1 %v15626_v5  ;;  %v15700_v5 = vld [vmem:[#allocation7 + $0x1404] ss:$16 sps:$4 sm:$0xff]  }
 0x4d6   :  { %7423 = vmatpush1.bf16.msra.mxu0 %v15629_v52  ;;  %6891 = vmatprep.subr.bf16.mxu1 %v15634_v14  ;;  %v15703_v52 = vld [vmem:[#allocation7 + $0x140c] ss:$16 sps:$4 sm:$0xff]   ;;  %v15698_v14 = vld [vmem:[#allocation7 + $0x1400] ss:$16 sps:$4 sm:$0xff]  }
 0x4d7   :  { %7424 = vmatprep.subr.bf16.mxu0 %v15637_v38  ;;  %v1490_v38 = vpack.c.bf16 %v17619_v51, %v17619_v51  ;;  %v15715_v51 = vld [vmem:[#allocation7 + $0x144c] ss:$16 sps:$4 sm:$0xff]  }
 0x4d9   :  { %6892 = vmatpush1.bf16.msra.mxu1 %v15632_v7  ;;  %v15701_v7 = vld [vmem:[#allocation7 + $0x1408] ss:$16 sps:$4 sm:$0xff]  }
 0x4da   :  { %7425 = vmatpush1.bf16.msra.mxu0 %v15635_v30  ;;  %6893 = vmatprep.subr.bf16.mxu1 %v15640_v56  ;;  %v15706_v30 = vld [vmem:[#allocation7 + $0x1424] ss:$16 sps:$4 sm:$0xff]   ;;  %v1493_v56 = vpack.c.bf16 %v17633_v39, %v17633_v39  ;;  %v15721_v39 = vld [vmem:[#allocation7 + $0x146c] ss:$16 sps:$4 sm:$0xff]  }
 0x4db   :  { %7426 = vmatprep.subr.bf16.mxu0 %v15643_v16  ;;  %v15709_v16 = vld [vmem:[#allocation7 + $0x142c] ss:$16 sps:$4 sm:$0xff]  }
 0x4dd   :  { %6894 = vmatpush1.bf16.msra.mxu1 %v15638_v10  ;;  %v15704_v10 = vld [vmem:[#allocation7 + $0x1420] ss:$16 sps:$4 sm:$0xff]  }
 0x4de   :  { %7427 = vmatpush1.bf16.msra.mxu0 %v15641_v34  ;;  %6895 = vmatprep.subr.bf16.mxu1 %v15646_v50  ;;  %v15707_v34 = vld [vmem:[#allocation7 + $0x1428] ss:$16 sps:$4 sm:$0xff]   ;;  %v15712_v50 = vld [vmem:[#allocation7 + $0x1444] ss:$16 sps:$4 sm:$0xff]  }
 0x4df   :  { %7428 = vmatprep.subr.bf16.mxu0 %v15649_v54  ;;  %v15710_v54 = vld [vmem:[#allocation7 + $0x1440] ss:$16 sps:$4 sm:$0xff]  }
 0x4e1   :  { %6896 = vmatpush1.bf16.msra.mxu1 %v15644_v11  ;;  %v15713_v11 = vld [vmem:[#allocation7 + $0x1448] ss:$16 sps:$4 sm:$0xff]  }
 0x4e2   :  { %7429 = vmatpush1.bf16.msra.mxu0 %v15647_v25  ;;  %6897 = vmatprep.subr.bf16.mxu1 %v15652_v12  ;;  %v15718_v25 = vld [vmem:[#allocation7 + $0x1464] ss:$16 sps:$4 sm:$0xff]   ;;  %v15716_v12 = vld [vmem:[#allocation7 + $0x1460] ss:$16 sps:$4 sm:$0xff]  }
 0x4e3   :  { %7430 = vmatprep.subr.bf16.mxu0 %v15655_v19  ;;  %v15719_v19 = vld [vmem:[#allocation7 + $0x1468] ss:$16 sps:$4 sm:$0xff]  }
 0x4e5   :  { %6898 = vmatpush1.bf16.msra.mxu1 %v15650_v35  ;;  %v15724_v35 = vld [vmem:[#allocation7 + $0x1484] ss:$16 sps:$4 sm:$0xff]  }
 0x4e6   :  { %7431 = vmatpush1.bf16.msra.mxu0 %v15653_v13  ;;  %6899 = vmatprep.subr.bf16.mxu1 %v15658_v17  ;;  %v15727_v13 = vld [vmem:[#allocation7 + $0x148c] ss:$16 sps:$4 sm:$0xff]   ;;  %v15722_v17 = vld [vmem:[#allocation7 + $0x1480] ss:$16 sps:$4 sm:$0xff]  }
 0x4e7   :  { %7432 = vmatprep.subr.bf16.mxu0 %v15661_v57  ;;  %v15725_v57 = vld [vmem:[#allocation7 + $0x1488] ss:$16 sps:$4 sm:$0xff]  }
 0x4e9   :  { %6900 = vmatpush1.bf16.msra.mxu1 %v15656_v53  ;;  %v15730_v53 = vld [vmem:[#allocation7 + $0x14a4] ss:$16 sps:$4 sm:$0xff]  }
 0x4ea   :  { %7433 = vmatpush1.bf16.msra.mxu0 %v15659_v18  ;;  %6901 = vmatprep.subr.bf16.mxu1 %v15664_v21  ;;  %v15733_v18 = vld [vmem:[#allocation7 + $0x14ac] ss:$16 sps:$4 sm:$0xff]   ;;  %v15728_v21 = vld [vmem:[#allocation7 + $0x14a0] ss:$16 sps:$4 sm:$0xff]  }
 0x4eb   :  { %7434 = vmatprep.subr.bf16.mxu0 %v15667_v22  ;;  %v15731_v22 = vld [vmem:[#allocation7 + $0x14a8] ss:$16 sps:$4 sm:$0xff]  }
 0x4ed   :  { %6902 = vmatpush1.bf16.msra.mxu1 %v15662_v23  ;;  %v15736_v23 = vld [vmem:[#allocation7 + $0x14c4] ss:$16 sps:$4 sm:$0xff]  }
 0x4ee   :  { %7435 = vmatpush1.bf16.msra.mxu0 %v15665_v26  ;;  %6903 = vmatprep.subr.bf16.mxu1 %v15670_v27  ;;  %v15739_v26 = vld [vmem:[#allocation7 + $0x14cc] ss:$16 sps:$4 sm:$0xff]   ;;  %v15734_v27 = vld [vmem:[#allocation7 + $0x14c0] ss:$16 sps:$4 sm:$0xff]  }
 0x4ef   :  { %7436 = vmatprep.subr.bf16.mxu0 %v15673_v32  ;;  %v15737_v32 = vld [vmem:[#allocation7 + $0x14c8] ss:$16 sps:$4 sm:$0xff]  }
 0x4f1   :  { %6904 = vmatpush1.bf16.msra.mxu1 %v15668_v33  ;;  %v15742_v33 = vld [vmem:[#allocation7 + $0x14e4] ss:$16 sps:$4 sm:$0xff]  }
 0x4f2   :  { %7437 = vmatpush1.bf16.msra.mxu0 %v15671_v24  ;;  %6905 = vmatprep.subr.bf16.mxu1 %v15676_v55  ;;  %v15745_v24 = vld [vmem:[#allocation7 + $0x14ec] ss:$16 sps:$4 sm:$0xff]   ;;  %v15740_v55 = vld [vmem:[#allocation7 + $0x14e0] ss:$16 sps:$4 sm:$0xff]  }
 0x4f3   :  { %7438 = vmatprep.subr.bf16.mxu0 %v15679_v20  ;;  %v15743_v20 = vld [vmem:[#allocation7 + $0x14e8] ss:$16 sps:$4 sm:$0xff]  }
 0x4f5   :  { %6906 = vmatpush1.bf16.msra.mxu1 %v15674_v36  ;;  %v15748_v36 = vld [vmem:[#allocation7 + $0x1504] ss:$16 sps:$4 sm:$0xff]  }
 0x4f6   :  { %7439 = vmatpush1.bf16.msra.mxu0 %v15677_v41  ;;  %6907 = vmatprep.subr.bf16.mxu1 %v15682_v47  ;;  %v15751_v41 = vld [vmem:[#allocation7 + $0x150c] ss:$16 sps:$4 sm:$0xff]   ;;  %v15746_v47 = vld [vmem:[#allocation7 + $0x1500] ss:$16 sps:$4 sm:$0xff]  }
 0x4f7   :  { %7440 = vmatprep.subr.bf16.mxu0 %v15685_v31  ;;  %v15749_v31 = vld [vmem:[#allocation7 + $0x1508] ss:$16 sps:$4 sm:$0xff]  }
 0x4f9   :  { %6908 = vmatpush1.bf16.msra.mxu1 %v15680_v42  ;;  %v15754_v42 = vld [vmem:[#allocation7 + $0x1524] ss:$16 sps:$4 sm:$0xff]  }
 0x4fa   :  { %7441 = vmatpush1.bf16.msra.mxu0 %v15683_v43  ;;  %6909 = vmatprep.subr.bf16.mxu1 %v15688_v44  ;;  %v15757_v43 = vld [vmem:[#allocation7 + $0x152c] ss:$16 sps:$4 sm:$0xff]   ;;  %v15752_v44 = vld [vmem:[#allocation7 + $0x1520] ss:$16 sps:$4 sm:$0xff]  }
 0x4fb   :  { %7442 = vmatprep.subr.bf16.mxu0 %v15691_v45  ;;  %v15755_v45 = vld [vmem:[#allocation7 + $0x1528] ss:$16 sps:$4 sm:$0xff]  }
 0x4fd   :  { %6910 = vmatpush1.bf16.msra.mxu1 %v15686_v46  ;;  %v15760_v46 = vld [vmem:[#allocation7 + $0x1544] ss:$16 sps:$4 sm:$0xff]  }
 0x4fe   :  { %7443 = vmatpush1.bf16.msra.mxu0 %v15689_v59  ;;  %6911 = vmatprep.subr.bf16.mxu1 %v15694_v48  ;;  %v15763_v59 = vld [vmem:[#allocation7 + $0x154c] ss:$16 sps:$4 sm:$0xff]   ;;  %v15758_v48 = vld [vmem:[#allocation7 + $0x1540] ss:$16 sps:$4 sm:$0xff]  }
 0x4ff   :  { %7444 = vmatprep.subr.bf16.mxu0 %v15697_v2  ;;  %v15761_v2 = vld [vmem:[#allocation7 + $0x1548] ss:$16 sps:$4 sm:$0xff]  }
 0x501   :  { %6912 = vmatpush1.bf16.msra.mxu1 %v15692_v62  ;;  %v15766_v62 = vld [vmem:[#allocation7 + $0x1564] ss:$16 sps:$4 sm:$0xff]  }
 0x502   :  { %7445 = vmatpush1.bf16.msra.mxu0 %v15695_v9  ;;  %6922 = vmatprep.subr.bf16.mxu1 %v15700_v5  ;;  %v15769_v9 = vld [vmem:[#allocation7 + $0x156c] ss:$16 sps:$4 sm:$0xff]   ;;  %v15764_v5 = vld [vmem:[#allocation7 + $0x1560] ss:$16 sps:$4 sm:$0xff]  }
 0x503   :  { %7455 = vmatprep.subr.bf16.mxu0 %v15703_v52  ;;  %v15767_v52 = vld [vmem:[#allocation7 + $0x1568] ss:$16 sps:$4 sm:$0xff]  }
 0x504   :  { %6914 = vmatmul.mubr.bf16.vlgmr.msra.gmra.mrb[24].mxu1 %v1490_v38 }
 0x505   :  { %7447 = vmatmul.mubr.bf16.vlgmr.msra.gmra.mrb[28].mxu0 %v1490_v38  ;;  %6923 = vmatpush1.bf16.msra.mxu1 %v15698_v14  ;;  %v15772_v14 = vld [vmem:[#allocation7 + $0x1584] ss:$16 sps:$4 sm:$0xff]   ;;  %v15775_v38 = vld [vmem:[#allocation7 + $0x158c] ss:$16 sps:$4 sm:$0xff]  }
 0x506   :  { %6954 = vmatprep.mubr.bf16.mxu1 %v1493_v56  ;;  %7456 = vmatpush1.bf16.msra.mxu0 %v15701_v7  ;;  %v15770_v7 = vld [vmem:[#allocation7 + $0x1580] ss:$16 sps:$4 sm:$0xff]  }
 0x507   :  { %7487 = vmatprep.mubr.bf16.mxu0 %v1493_v56  ;;  %6924 = vmatprep.subr.bf16.mxu1 %v15706_v30  ;;  %v15773_v30 = vld [vmem:[#allocation7 + $0x1588] ss:$16 sps:$4 sm:$0xff]   ;;  %v15778_v56 = vld [vmem:[#allocation7 + $0x15a4] ss:$16 sps:$4 sm:$0xff]  }
 0x508   :  { %7457 = vmatprep.subr.bf16.mxu0 %v15709_v16  ;;  %v15781_v16 = vld [vmem:[#allocation7 + $0x15ac] ss:$16 sps:$4 sm:$0xff]  }
 0x509   :  { %6925 = vmatpush1.bf16.msra.mxu1 %v15704_v10  ;;  %v15776_v10 = vld [vmem:[#allocation7 + $0x15a0] ss:$16 sps:$4 sm:$0xff]  }
 0x50a   :  { %7458 = vmatpush1.bf16.msra.mxu0 %v15707_v34  ;;  %6926 = vmatprep.subr.bf16.mxu1 %v15712_v50  ;;  %v15779_v34 = vld [vmem:[#allocation7 + $0x15a8] ss:$16 sps:$4 sm:$0xff]   ;;  %v15784_v50 = vld [vmem:[#allocation7 + $0x15c4] ss:$16 sps:$4 sm:$0xff]  }
 0x50b   :  { %7459 = vmatprep.subr.bf16.mxu0 %v15715_v51  ;;  %v15787_v51 = vld [vmem:[#allocation7 + $0x15cc] ss:$16 sps:$4 sm:$0xff]  }
 0x50d   :  { %6927 = vmatpush1.bf16.msra.mxu1 %v15710_v54  ;;  %v15782_v54 = vld [vmem:[#allocation7 + $0x15c0] ss:$16 sps:$4 sm:$0xff]  }
 0x50e   :  { %7460 = vmatpush1.bf16.msra.mxu0 %v15713_v11  ;;  %6928 = vmatprep.subr.bf16.mxu1 %v15718_v25  ;;  %v15785_v11 = vld [vmem:[#allocation7 + $0x15c8] ss:$16 sps:$4 sm:$0xff]   ;;  %v15790_v25 = vld [vmem:[#allocation7 + $0x15e4] ss:$16 sps:$4 sm:$0xff]  }
 0x50f   :  { %7461 = vmatprep.subr.bf16.mxu0 %v15721_v39  ;;  %v15793_v39 = vld [vmem:[#allocation7 + $0x15ec] ss:$16 sps:$4 sm:$0xff]  }
 0x511   :  { %6929 = vmatpush1.bf16.msra.mxu1 %v15716_v12  ;;  %v15788_v12 = vld [vmem:[#allocation7 + $0x15e0] ss:$16 sps:$4 sm:$0xff]  }
 0x512   :  { %7462 = vmatpush1.bf16.msra.mxu0 %v15719_v19  ;;  %6930 = vmatprep.subr.bf16.mxu1 %v15724_v35  ;;  %v15791_v19 = vld [vmem:[#allocation7 + $0x15e8] ss:$16 sps:$4 sm:$0xff]   ;;  %v15796_v35 = vld [vmem:[#allocation7 + $0x1604] ss:$16 sps:$4 sm:$0xff]  }
 0x513   :  { %7463 = vmatprep.subr.bf16.mxu0 %v15727_v13  ;;  %v15799_v13 = vld [vmem:[#allocation7 + $0x160c] ss:$16 sps:$4 sm:$0xff]  }
 0x515   :  { %6931 = vmatpush1.bf16.msra.mxu1 %v15722_v17  ;;  %v15794_v17 = vld [vmem:[#allocation7 + $0x1600] ss:$16 sps:$4 sm:$0xff]  }
 0x516   :  { %7464 = vmatpush1.bf16.msra.mxu0 %v15725_v57  ;;  %6932 = vmatprep.subr.bf16.mxu1 %v15730_v53  ;;  %v1492_v57 = vpack.c.bf16 %v17629_v28, %v17629_v28  ;;  %v15797_v53 = vld [vmem:[#allocation7 + $0x1608] ss:$16 sps:$4 sm:$0xff]   ;;  %v15811_v28 = vld [vmem:[#allocation7 + $0x164c] ss:$16 sps:$4 sm:$0xff]  }
 0x517   :  { %7465 = vmatprep.subr.bf16.mxu0 %v15733_v18  ;;  %v15802_v18 = vld [vmem:[#allocation7 + $0x1624] ss:$16 sps:$4 sm:$0xff]  }
 0x519   :  { %6933 = vmatpush1.bf16.msra.mxu1 %v15728_v21  ;;  %v1495_v21 = vpack.c.bf16 %v17635_v40, %v17635_v40  ;;  %v15817_v40 = vld [vmem:[#allocation7 + $0x166c] ss:$16 sps:$4 sm:$0xff]  }
 0x51a   :  { %7466 = vmatpush1.bf16.msra.mxu0 %v15731_v22  ;;  %6934 = vmatprep.subr.bf16.mxu1 %v15736_v23  ;;  %v15805_v22 = vld [vmem:[#allocation7 + $0x162c] ss:$16 sps:$4 sm:$0xff]   ;;  %v15800_v23 = vld [vmem:[#allocation7 + $0x1620] ss:$16 sps:$4 sm:$0xff]  }
 0x51b   :  { %7467 = vmatprep.subr.bf16.mxu0 %v15739_v26  ;;  %v15803_v26 = vld [vmem:[#allocation7 + $0x1628] ss:$16 sps:$4 sm:$0xff]  }
 0x51d   :  { %6935 = vmatpush1.bf16.msra.mxu1 %v15734_v27  ;;  %v15808_v27 = vld [vmem:[#allocation7 + $0x1644] ss:$16 sps:$4 sm:$0xff]  }
 0x51e   :  { %7468 = vmatpush1.bf16.msra.mxu0 %v15737_v32  ;;  %6936 = vmatprep.subr.bf16.mxu1 %v15742_v33  ;;  %v15806_v32 = vld [vmem:[#allocation7 + $0x1640] ss:$16 sps:$4 sm:$0xff]   ;;  %v15809_v33 = vld [vmem:[#allocation7 + $0x1648] ss:$16 sps:$4 sm:$0xff]  }
 0x51f   :  { %7469 = vmatprep.subr.bf16.mxu0 %v15745_v24  ;;  %v15814_v24 = vld [vmem:[#allocation7 + $0x1664] ss:$16 sps:$4 sm:$0xff]  }
 0x521   :  { %6937 = vmatpush1.bf16.msra.mxu1 %v15740_v55  ;;  %v15812_v55 = vld [vmem:[#allocation7 + $0x1660] ss:$16 sps:$4 sm:$0xff]  }
 0x522   :  { %7470 = vmatpush1.bf16.msra.mxu0 %v15743_v20  ;;  %6938 = vmatprep.subr.bf16.mxu1 %v15748_v36  ;;  %v15815_v20 = vld [vmem:[#allocation7 + $0x1668] ss:$16 sps:$4 sm:$0xff]   ;;  %v15820_v36 = vld [vmem:[#allocation7 + $0x1684] ss:$16 sps:$4 sm:$0xff]  }
 0x523   :  { %7471 = vmatprep.subr.bf16.mxu0 %v15751_v41  ;;  %v15823_v41 = vld [vmem:[#allocation7 + $0x168c] ss:$16 sps:$4 sm:$0xff]  }
 0x525   :  { %6939 = vmatpush1.bf16.msra.mxu1 %v15746_v47  ;;  %v15818_v47 = vld [vmem:[#allocation7 + $0x1680] ss:$16 sps:$4 sm:$0xff]  }
 0x526   :  { %7472 = vmatpush1.bf16.msra.mxu0 %v15749_v31  ;;  %6940 = vmatprep.subr.bf16.mxu1 %v15754_v42  ;;  %v15821_v31 = vld [vmem:[#allocation7 + $0x1688] ss:$16 sps:$4 sm:$0xff]   ;;  %v15826_v42 = vld [vmem:[#allocation7 + $0x16a4] ss:$16 sps:$4 sm:$0xff]  }
 0x527   :  { %7473 = vmatprep.subr.bf16.mxu0 %v15757_v43  ;;  %v15829_v43 = vld [vmem:[#allocation7 + $0x16ac] ss:$16 sps:$4 sm:$0xff]  }
 0x529   :  { %6941 = vmatpush1.bf16.msra.mxu1 %v15752_v44  ;;  %v15824_v44 = vld [vmem:[#allocation7 + $0x16a0] ss:$16 sps:$4 sm:$0xff]  }
 0x52a   :  { %7474 = vmatpush1.bf16.msra.mxu0 %v15755_v45  ;;  %6942 = vmatprep.subr.bf16.mxu1 %v15760_v46  ;;  %v15827_v45 = vld [vmem:[#allocation7 + $0x16a8] ss:$16 sps:$4 sm:$0xff]   ;;  %v15832_v46 = vld [vmem:[#allocation7 + $0x16c4] ss:$16 sps:$4 sm:$0xff]  }
 0x52b   :  { %7475 = vmatprep.subr.bf16.mxu0 %v15763_v59  ;;  %v15835_v59 = vld [vmem:[#allocation7 + $0x16cc] ss:$16 sps:$4 sm:$0xff]  }
 0x52d   :  { %6943 = vmatpush1.bf16.msra.mxu1 %v15758_v48  ;;  %v15830_v48 = vld [vmem:[#allocation7 + $0x16c0] ss:$16 sps:$4 sm:$0xff]  }
 0x52e   :  { %7476 = vmatpush1.bf16.msra.mxu0 %v15761_v2  ;;  %6944 = vmatprep.subr.bf16.mxu1 %v15766_v62  ;;  %v15833_v2 = vld [vmem:[#allocation7 + $0x16c8] ss:$16 sps:$4 sm:$0xff]   ;;  %v15838_v62 = vld [vmem:[#allocation7 + $0x16e4] ss:$16 sps:$4 sm:$0xff]  }
 0x52f   :  { %7477 = vmatprep.subr.bf16.mxu0 %v15769_v9  ;;  %v15841_v9 = vld [vmem:[#allocation7 + $0x16ec] ss:$16 sps:$4 sm:$0xff]  }
 0x531   :  { %6945 = vmatpush1.bf16.msra.mxu1 %v15764_v5  ;;  %v15836_v5 = vld [vmem:[#allocation7 + $0x16e0] ss:$16 sps:$4 sm:$0xff]  }
 0x532   :  { %7478 = vmatpush1.bf16.msra.mxu0 %v15767_v52  ;;  %6946 = vmatprep.subr.bf16.mxu1 %v15772_v14  ;;  %v15839_v52 = vld [vmem:[#allocation7 + $0x16e8] ss:$16 sps:$4 sm:$0xff]   ;;  %v15844_v14 = vld [vmem:[#allocation7 + $0x1704] ss:$16 sps:$4 sm:$0xff]  }
 0x533   :  { %7479 = vmatprep.subr.bf16.mxu0 %v15775_v38  ;;  %v15847_v38 = vld [vmem:[#allocation7 + $0x170c] ss:$16 sps:$4 sm:$0xff]  }
 0x535   :  { %6947 = vmatpush1.bf16.msra.mxu1 %v15770_v7  ;;  %v15842_v7 = vld [vmem:[#allocation7 + $0x1700] ss:$16 sps:$4 sm:$0xff]  }
 0x536   :  { %7480 = vmatpush1.bf16.msra.mxu0 %v15773_v30  ;;  %6948 = vmatprep.subr.bf16.mxu1 %v15778_v56  ;;  %v15845_v30 = vld [vmem:[#allocation7 + $0x1708] ss:$16 sps:$4 sm:$0xff]   ;;  %v15850_v56 = vld [vmem:[#allocation7 + $0x1724] ss:$16 sps:$4 sm:$0xff]  }
 0x537   :  { %7481 = vmatprep.subr.bf16.mxu0 %v15781_v16  ;;  %v15853_v16 = vld [vmem:[#allocation7 + $0x172c] ss:$16 sps:$4 sm:$0xff]  }
 0x539   :  { %6949 = vmatpush1.bf16.msra.mxu1 %v15776_v10  ;;  %v15848_v10 = vld [vmem:[#allocation7 + $0x1720] ss:$16 sps:$4 sm:$0xff]  }
 0x53a   :  { %7482 = vmatpush1.bf16.msra.mxu0 %v15779_v34  ;;  %6950 = vmatprep.subr.bf16.mxu1 %v15784_v50  ;;  %v15851_v34 = vld [vmem:[#allocation7 + $0x1728] ss:$16 sps:$4 sm:$0xff]   ;;  %v15856_v50 = vld [vmem:[#allocation7 + $0x1744] ss:$16 sps:$4 sm:$0xff]  }
 0x53b   :  { %7483 = vmatprep.subr.bf16.mxu0 %v15787_v51  ;;  %v15859_v51 = vld [vmem:[#allocation7 + $0x174c] ss:$16 sps:$4 sm:$0xff]  }
 0x53d   :  { %6951 = vmatpush1.bf16.msra.mxu1 %v15782_v54  ;;  %v15854_v54 = vld [vmem:[#allocation7 + $0x1740] ss:$16 sps:$4 sm:$0xff]  }
 0x53e   :  { %7484 = vmatpush1.bf16.msra.mxu0 %v15785_v11  ;;  %6952 = vmatprep.subr.bf16.mxu1 %v15790_v25  ;;  %v15857_v11 = vld [vmem:[#allocation7 + $0x1748] ss:$16 sps:$4 sm:$0xff]   ;;  %v15862_v25 = vld [vmem:[#allocation7 + $0x1764] ss:$16 sps:$4 sm:$0xff]  }
 0x53f   :  { %7485 = vmatprep.subr.bf16.mxu0 %v15793_v39  ;;  %v15865_v39 = vld [vmem:[#allocation7 + $0x176c] ss:$16 sps:$4 sm:$0xff]  }
 0x541   :  { %6953 = vmatpush1.bf16.msra.mxu1 %v15788_v12  ;;  %v15860_v12 = vld [vmem:[#allocation7 + $0x1760] ss:$16 sps:$4 sm:$0xff]  }
 0x542   :  { %7486 = vmatpush1.bf16.msra.mxu0 %v15791_v19  ;;  %6963 = vmatprep.subr.bf16.mxu1 %v15796_v35  ;;  %v15863_v19 = vld [vmem:[#allocation7 + $0x1768] ss:$16 sps:$4 sm:$0xff]   ;;  %v15868_v35 = vld [vmem:[#allocation7 + $0x1784] ss:$16 sps:$4 sm:$0xff]  }
 0x543   :  { %7496 = vmatprep.subr.bf16.mxu0 %v15799_v13  ;;  %v15871_v13 = vld [vmem:[#allocation7 + $0x178c] ss:$16 sps:$4 sm:$0xff]  }
 0x544   :  { %6955 = vmatmul.mubr.bf16.vlgmr.msra.gmra.mrb[24].mxu1 %v1492_v57 }
 0x545   :  { %7488 = vmatmul.mubr.bf16.vlgmr.msra.gmra.mrb[28].mxu0 %v1492_v57  ;;  %6964 = vmatpush1.bf16.msra.mxu1 %v15794_v17  ;;  %v15866_v17 = vld [vmem:[#allocation7 + $0x1780] ss:$16 sps:$4 sm:$0xff]   ;;  %v15869_v57 = vld [vmem:[#allocation7 + $0x1788] ss:$16 sps:$4 sm:$0xff]  }
 0x546   :  { %6995 = vmatprep.mubr.bf16.mxu1 %v1495_v21  ;;  %7497 = vmatpush1.bf16.msra.mxu0 %v15797_v53  ;;  %v15874_v53 = vld [vmem:[#allocation7 + $0x17a4] ss:$16 sps:$4 sm:$0xff]  }
 0x547   :  { %7528 = vmatprep.mubr.bf16.mxu0 %v1495_v21  ;;  %6965 = vmatprep.subr.bf16.mxu1 %v15802_v18  ;;  %v15877_v18 = vld [vmem:[#allocation7 + $0x17ac] ss:$16 sps:$4 sm:$0xff]   ;;  %v15872_v21 = vld [vmem:[#allocation7 + $0x17a0] ss:$16 sps:$4 sm:$0xff]  }
 0x548   :  { %7498 = vmatprep.subr.bf16.mxu0 %v15805_v22  ;;  %v15875_v22 = vld [vmem:[#allocation7 + $0x17a8] ss:$16 sps:$4 sm:$0xff]  }
 0x549   :  { %6966 = vmatpush1.bf16.msra.mxu1 %v15800_v23  ;;  %v15880_v23 = vld [vmem:[#allocation7 + $0x17c4] ss:$16 sps:$4 sm:$0xff]  }
 0x54a   :  { %7499 = vmatpush1.bf16.msra.mxu0 %v15803_v26  ;;  %6967 = vmatprep.subr.bf16.mxu1 %v15808_v27  ;;  %v15883_v26 = vld [vmem:[#allocation7 + $0x17cc] ss:$16 sps:$4 sm:$0xff]  }
 0x54b   :  { %7500 = vmatprep.subr.bf16.mxu0 %v15811_v28  ;;  %v17696_v27 = vld [vmem:[#allocation5 + $0x18] sm:$0x3]  ;;  %v15878_v28 = vld [vmem:[#allocation7 + $0x17c0] ss:$16 sps:$4 sm:$0xff]  }
 0x54d   :  { %6968 = vmatpush1.bf16.msra.mxu1 %v15806_v32  ;;  %v15881_v32 = vld [vmem:[#allocation7 + $0x17c8] ss:$16 sps:$4 sm:$0xff]  }
 0x54e   :  { %7501 = vmatpush1.bf16.msra.mxu0 %v15809_v33  ;;  %6969 = vmatprep.subr.bf16.mxu1 %v15814_v24  ;;  %v15886_v33 = vld [vmem:[#allocation7 + $0x17e4] ss:$16 sps:$4 sm:$0xff]   ;;  %v15889_v24 = vld [vmem:[#allocation7 + $0x17ec] ss:$16 sps:$4 sm:$0xff]  }
 0x54f   :  { %7502 = vmatprep.subr.bf16.mxu0 %v15817_v40  ;;  %v644_v40 = vrot.slane %v17696_v27, %v17549_v3 }
 0x551   :  { %6970 = vmatpush1.bf16.msra.mxu1 %v15812_v55  ;;  %v15884_v55 = vld [vmem:[#allocation7 + $0x17e0] ss:$16 sps:$4 sm:$0xff]  }
 0x552   :  { %7503 = vmatpush1.bf16.msra.mxu0 %v15815_v20  ;;  %6971 = vmatprep.subr.bf16.mxu1 %v15820_v36  ;;  %v15887_v20 = vld [vmem:[#allocation7 + $0x17e8] ss:$16 sps:$4 sm:$0xff]   ;;  %v15892_v36 = vld [vmem:[#allocation7 + $0x1804] ss:$16 sps:$4 sm:$0xff]  }
 0x553   :  { %7504 = vmatprep.subr.bf16.mxu0 %v15823_v41  ;;  %v15895_v41 = vld [vmem:[#allocation7 + $0x180c] ss:$16 sps:$4 sm:$0xff]  }
 0x555   :  { %6972 = vmatpush1.bf16.msra.mxu1 %v15818_v47  ;;  %v1468_v47 = vadd.f32 %v17639_v61, %v644_v40  ;;  %v15904_v61 = vld [vmem:[#allocation7 + $0x1844] ss:$16 sps:$4 sm:$0xff]   ;;  %v15961_v40 = vld [vmem:[#allocation7 + $0x196c] ss:$16 sps:$4 sm:$0xff]  }
 0x556   :  { %7505 = vmatpush1.bf16.msra.mxu0 %v15821_v31  ;;  %6973 = vmatprep.subr.bf16.mxu1 %v15826_v42  ;;  %v15890_v31 = vld [vmem:[#allocation7 + $0x1800] ss:$16 sps:$4 sm:$0xff]   ;;  %v1494_v42 = vpack.c.bf16 %v17631_v29, %v17631_v29 }
 0x557   :  { %7506 = vmatprep.subr.bf16.mxu0 %v15829_v43  ;;  %v15893_v43 = vld [vmem:[#allocation7 + $0x1808] ss:$16 sps:$4 sm:$0xff]   ;;  %v15902_v29 = vld [vmem:[#allocation7 + $0x1840] ss:$16 sps:$4 sm:$0xff]  }
 0x559   :  { %6974 = vmatpush1.bf16.msra.mxu1 %v15824_v44  ;;  %v15898_v44 = vld [vmem:[#allocation7 + $0x1824] ss:$16 sps:$4 sm:$0xff]  }
 0x55a   :  { %7507 = vmatpush1.bf16.msra.mxu0 %v15827_v45  ;;  %6975 = vmatprep.subr.bf16.mxu1 %v15832_v46  ;;  %v1497_v45 = vpack.c.bf16 %v1468_v47, %v1468_v47  ;;  %v15901_v46 = vld [vmem:[#allocation7 + $0x182c] ss:$16 sps:$4 sm:$0xff]   ;;  %v15962_v47 = vld [vmem:[#allocation7 + $0x1980] ss:$16 sps:$4 sm:$0xff]  }
 0x55b   :  { %7508 = vmatprep.subr.bf16.mxu0 %v15835_v59  ;;  %v15896_v59 = vld [vmem:[#allocation7 + $0x1820] ss:$16 sps:$4 sm:$0xff]  }
 0x55d   :  { %6976 = vmatpush1.bf16.msra.mxu1 %v15830_v48  ;;  %v15899_v48 = vld [vmem:[#allocation7 + $0x1828] ss:$16 sps:$4 sm:$0xff]  }
 0x55e   :  { %7509 = vmatpush1.bf16.msra.mxu0 %v15833_v2  ;;  %6977 = vmatprep.subr.bf16.mxu1 %v15838_v62  ;;  %v15907_v2 = vld [vmem:[#allocation7 + $0x184c] ss:$16 sps:$4 sm:$0xff]   ;;  %v15905_v62 = vld [vmem:[#allocation7 + $0x1848] ss:$16 sps:$4 sm:$0xff]  }
 0x55f   :  { %7510 = vmatprep.subr.bf16.mxu0 %v15841_v9  ;;  %v15910_v9 = vld [vmem:[#allocation7 + $0x1864] ss:$16 sps:$4 sm:$0xff]  }
 0x561   :  { %6978 = vmatpush1.bf16.msra.mxu1 %v15836_v5  ;;  %v15913_v5 = vld [vmem:[#allocation7 + $0x186c] ss:$16 sps:$4 sm:$0xff]  }
 0x562   :  { %7511 = vmatpush1.bf16.msra.mxu0 %v15839_v52  ;;  %6979 = vmatprep.subr.bf16.mxu1 %v15844_v14  ;;  %v15908_v52 = vld [vmem:[#allocation7 + $0x1860] ss:$16 sps:$4 sm:$0xff]   ;;  %v15911_v14 = vld [vmem:[#allocation7 + $0x1868] ss:$16 sps:$4 sm:$0xff]  }
 0x563   :  { %7512 = vmatprep.subr.bf16.mxu0 %v15847_v38  ;;  %v15916_v38 = vld [vmem:[#allocation7 + $0x1884] ss:$16 sps:$4 sm:$0xff]  }
 0x565   :  { %6980 = vmatpush1.bf16.msra.mxu1 %v15842_v7  ;;  %v15919_v7 = vld [vmem:[#allocation7 + $0x188c] ss:$16 sps:$4 sm:$0xff]  }
 0x566   :  { %7513 = vmatpush1.bf16.msra.mxu0 %v15845_v30  ;;  %6981 = vmatprep.subr.bf16.mxu1 %v15850_v56  ;;  %v15914_v30 = vld [vmem:[#allocation7 + $0x1880] ss:$16 sps:$4 sm:$0xff]   ;;  %v15917_v56 = vld [vmem:[#allocation7 + $0x1888] ss:$16 sps:$4 sm:$0xff]  }
 0x567   :  { %7514 = vmatprep.subr.bf16.mxu0 %v15853_v16  ;;  %v15922_v16 = vld [vmem:[#allocation7 + $0x18a4] ss:$16 sps:$4 sm:$0xff]  }
 0x569   :  { %6982 = vmatpush1.bf16.msra.mxu1 %v15848_v10  ;;  %v15925_v10 = vld [vmem:[#allocation7 + $0x18ac] ss:$16 sps:$4 sm:$0xff]  }
 0x56a   :  { %7515 = vmatpush1.bf16.msra.mxu0 %v15851_v34  ;;  %6983 = vmatprep.subr.bf16.mxu1 %v15856_v50  ;;  %v15920_v34 = vld [vmem:[#allocation7 + $0x18a0] ss:$16 sps:$4 sm:$0xff]   ;;  %v15923_v50 = vld [vmem:[#allocation7 + $0x18a8] ss:$16 sps:$4 sm:$0xff]  }
 0x56b   :  { %7516 = vmatprep.subr.bf16.mxu0 %v15859_v51  ;;  %v15928_v51 = vld [vmem:[#allocation7 + $0x18c4] ss:$16 sps:$4 sm:$0xff]  }
 0x56d   :  { %6984 = vmatpush1.bf16.msra.mxu1 %v15854_v54  ;;  %v15931_v54 = vld [vmem:[#allocation7 + $0x18cc] ss:$16 sps:$4 sm:$0xff]  }
 0x56e   :  { %7517 = vmatpush1.bf16.msra.mxu0 %v15857_v11  ;;  %6985 = vmatprep.subr.bf16.mxu1 %v15862_v25  ;;  %v15926_v11 = vld [vmem:[#allocation7 + $0x18c0] ss:$16 sps:$4 sm:$0xff]   ;;  %v15929_v25 = vld [vmem:[#allocation7 + $0x18c8] ss:$16 sps:$4 sm:$0xff]  }
 0x56f   :  { %7518 = vmatprep.subr.bf16.mxu0 %v15865_v39  ;;  %v15934_v39 = vld [vmem:[#allocation7 + $0x18e4] ss:$16 sps:$4 sm:$0xff]  }
 0x571   :  { %6986 = vmatpush1.bf16.msra.mxu1 %v15860_v12  ;;  %v15937_v12 = vld [vmem:[#allocation7 + $0x18ec] ss:$16 sps:$4 sm:$0xff]  }
 0x572   :  { %7519 = vmatpush1.bf16.msra.mxu0 %v15863_v19  ;;  %6987 = vmatprep.subr.bf16.mxu1 %v15868_v35  ;;  %v15932_v19 = vld [vmem:[#allocation7 + $0x18e0] ss:$16 sps:$4 sm:$0xff]   ;;  %v15935_v35 = vld [vmem:[#allocation7 + $0x18e8] ss:$16 sps:$4 sm:$0xff]  }
 0x573   :  { %7520 = vmatprep.subr.bf16.mxu0 %v15871_v13  ;;  %v15940_v13 = vld [vmem:[#allocation7 + $0x1904] ss:$16 sps:$4 sm:$0xff]  }
 0x575   :  { %6988 = vmatpush1.bf16.msra.mxu1 %v15866_v17  ;;  %v15943_v17 = vld [vmem:[#allocation7 + $0x190c] ss:$16 sps:$4 sm:$0xff]  }
 0x576   :  { %7521 = vmatpush1.bf16.msra.mxu0 %v15869_v57  ;;  %6989 = vmatprep.subr.bf16.mxu1 %v15874_v53  ;;  %v15938_v57 = vld [vmem:[#allocation7 + $0x1900] ss:$16 sps:$4 sm:$0xff]   ;;  %v15941_v53 = vld [vmem:[#allocation7 + $0x1908] ss:$16 sps:$4 sm:$0xff]  }
 0x577   :  { %7522 = vmatprep.subr.bf16.mxu0 %v15877_v18  ;;  %v15946_v18 = vld [vmem:[#allocation7 + $0x1924] ss:$16 sps:$4 sm:$0xff]  }
 0x579   :  { %6990 = vmatpush1.bf16.msra.mxu1 %v15872_v21  ;;  %v15949_v21 = vld [vmem:[#allocation7 + $0x192c] ss:$16 sps:$4 sm:$0xff]  }
 0x57a   :  { %7523 = vmatpush1.bf16.msra.mxu0 %v15875_v22  ;;  %6991 = vmatprep.subr.bf16.mxu1 %v15880_v23  ;;  %v15944_v22 = vld [vmem:[#allocation7 + $0x1920] ss:$16 sps:$4 sm:$0xff]   ;;  %v15947_v23 = vld [vmem:[#allocation7 + $0x1928] ss:$16 sps:$4 sm:$0xff]  }
 0x57b   :  { %7524 = vmatprep.subr.bf16.mxu0 %v15883_v26  ;;  %v15952_v26 = vld [vmem:[#allocation7 + $0x1944] ss:$16 sps:$4 sm:$0xff]  }
 0x57d   :  { %6992 = vmatpush1.bf16.msra.mxu1 %v15878_v28  ;;  %v15955_v28 = vld [vmem:[#allocation7 + $0x194c] ss:$16 sps:$4 sm:$0xff]  }
 0x57e   :  { %7525 = vmatpush1.bf16.msra.mxu0 %v15881_v32  ;;  %6993 = vmatprep.subr.bf16.mxu1 %v15886_v33  ;;  %v15950_v32 = vld [vmem:[#allocation7 + $0x1940] ss:$16 sps:$4 sm:$0xff]   ;;  %v15953_v33 = vld [vmem:[#allocation7 + $0x1948] ss:$16 sps:$4 sm:$0xff]  }
 0x57f   :  { %7526 = vmatprep.subr.bf16.mxu0 %v15889_v24  ;;  %v15958_v24 = vld [vmem:[#allocation7 + $0x1964] ss:$16 sps:$4 sm:$0xff]  }
 0x581   :  { %6994 = vmatpush1.bf16.msra.mxu1 %v15884_v55  ;;  %v15956_v55 = vld [vmem:[#allocation7 + $0x1960] ss:$16 sps:$4 sm:$0xff]  }
 0x582   :  { %7527 = vmatpush1.bf16.msra.mxu0 %v15887_v20  ;;  %7004 = vmatprep.subr.bf16.mxu1 %v15892_v36  ;;  %v15959_v20 = vld [vmem:[#allocation7 + $0x1968] ss:$16 sps:$4 sm:$0xff]   ;;  %v15964_v36 = vld [vmem:[#allocation7 + $0x1984] ss:$16 sps:$4 sm:$0xff]  }
 0x583   :  { %7537 = vmatprep.subr.bf16.mxu0 %v15895_v41  ;;  %v15967_v41 = vld [vmem:[#allocation7 + $0x198c] ss:$16 sps:$4 sm:$0xff]  }
 0x584   :  { %6996 = vmatmul.mubr.bf16.vlgmr.msra.gmra.mrb[24].mxu1 %v1494_v42 }
 0x585   :  { %7529 = vmatmul.mubr.bf16.vlgmr.msra.gmra.mrb[28].mxu0 %v1494_v42  ;;  %7005 = vmatpush1.bf16.msra.mxu1 %v15890_v31  ;;  %v15965_v31 = vld [vmem:[#allocation7 + $0x1988] ss:$16 sps:$4 sm:$0xff]   ;;  %v15970_v42 = vld [vmem:[#allocation7 + $0x19a4] ss:$16 sps:$4 sm:$0xff]  }
 0x586   :  { %7036 = vmatprep.mubr.bf16.mxu1 %v1497_v45  ;;  %7538 = vmatpush1.bf16.msra.mxu0 %v15893_v43  ;;  %v15973_v43 = vld [vmem:[#allocation7 + $0x19ac] ss:$16 sps:$4 sm:$0xff]  }
 0x587   :  { %7569 = vmatprep.mubr.bf16.mxu0 %v1497_v45  ;;  %7006 = vmatprep.subr.bf16.mxu1 %v15898_v44  ;;  %v15968_v44 = vld [vmem:[#allocation7 + $0x19a0] ss:$16 sps:$4 sm:$0xff]   ;;  %v15971_v45 = vld [vmem:[#allocation7 + $0x19a8] ss:$16 sps:$4 sm:$0xff]  }
 0x588   :  { %7539 = vmatprep.subr.bf16.mxu0 %v15901_v46  ;;  %v15976_v46 = vld [vmem:[#allocation7 + $0x19c4] ss:$16 sps:$4 sm:$0xff]  }
 0x589   :  { %7007 = vmatpush1.bf16.msra.mxu1 %v15896_v59  ;;  %v15979_v59 = vld [vmem:[#allocation7 + $0x19cc] ss:$16 sps:$4 sm:$0xff]  }
 0x58a   :  { %7540 = vmatpush1.bf16.msra.mxu0 %v15899_v48  ;;  %7008 = vmatprep.subr.bf16.mxu1 %v15904_v61  ;;  %v15974_v48 = vld [vmem:[#allocation7 + $0x19c0] ss:$16 sps:$4 sm:$0xff]   ;;  %v640_v61 = vrot.slane %v17696_v27, %v17544_v1  ;;  %v15989_v27 = vld [vmem:[#allocation10 + $0x8] ss:$16 sps:$4 sm:$0xff]  }
 0x58b   :  { %7541 = vmatprep.subr.bf16.mxu0 %v15907_v2  ;;  %v15977_v2 = vld [vmem:[#allocation7 + $0x19c8] ss:$16 sps:$4 sm:$0xff]  }
 0x58d   :  { %7009 = vmatpush1.bf16.msra.mxu1 %v15902_v29  ;;  %v15982_v29 = vld [vmem:[#allocation7 + $0x19e4] ss:$16 sps:$4 sm:$0xff]  }
 0x58e   :  { %7542 = vmatpush1.bf16.msra.mxu0 %v15905_v62  ;;  %7010 = vmatprep.subr.bf16.mxu1 %v15910_v9  ;;  %v15985_v62 = vld [vmem:[#allocation7 + $0x19ec] ss:$16 sps:$4 sm:$0xff]   ;;  %v15980_v9 = vld [vmem:[#allocation7 + $0x19e0] ss:$16 sps:$4 sm:$0xff]  }
 0x58f   :  { %7543 = vmatprep.subr.bf16.mxu0 %v15913_v5  ;;  %v1466_v5 = vadd.f32 %v17637_v58, %v640_v61  ;;  %v15995_v58 = vld [vmem:[#allocation10 + $0x28] ss:$16 sps:$4 sm:$0xff]   ;;  %v16057_v61 = vld [vmem:[#allocation10 + $0x16c] ss:$16 sps:$4 sm:$0xff]  }
 0x591   :  { %7011 = vmatpush1.bf16.msra.mxu1 %v15908_v52  ;;  %v15983_v52 = vld [vmem:[#allocation7 + $0x19e8] ss:$16 sps:$4 sm:$0xff]  }
 0x592   :  { %7544 = vmatpush1.bf16.msra.mxu0 %v15911_v14  ;;  %7012 = vmatprep.subr.bf16.mxu1 %v15916_v38  ;;  %v15988_v14 = vld [vmem:[#allocation10 + $0x4] ss:$16 sps:$4 sm:$0xff]   ;;  %v15991_v38 = vld [vmem:[#allocation10 + $0xc] ss:$16 sps:$4 sm:$0xff]  }
 0x593   :  { %7545 = vmatprep.subr.bf16.mxu0 %v15919_v7  ;;  %v15986_v7 = vld [vmem:[#allocation10] ss:$16 sps:$4 sm:$0xff]  }
 0x595   :  { %7013 = vmatpush1.bf16.msra.mxu1 %v15914_v30  ;;  %v1496_v30 = vpack.c.bf16 %v1466_v5, %v1466_v5  ;;  %v16058_v5 = vld [vmem:[#allocation10 + $0x180] ss:$16 sps:$4 sm:$0xff]  }
 0x596   :  { %7546 = vmatpush1.bf16.msra.mxu0 %v15917_v56  ;;  %7014 = vmatprep.subr.bf16.mxu1 %v15922_v16  ;;  %v15994_v56 = vld [vmem:[#allocation10 + $0x24] ss:$16 sps:$4 sm:$0xff]   ;;  %v15997_v16 = vld [vmem:[#allocation10 + $0x2c] ss:$16 sps:$4 sm:$0xff]  }
 0x597   :  { %7547 = vmatprep.subr.bf16.mxu0 %v15925_v10  ;;  %v15992_v10 = vld [vmem:[#allocation10 + $0x20] ss:$16 sps:$4 sm:$0xff]  }
 0x599   :  { %7015 = vmatpush1.bf16.msra.mxu1 %v15920_v34  ;;  %v16000_v34 = vld [vmem:[#allocation10 + $0x44] ss:$16 sps:$4 sm:$0xff]  }
 0x59a   :  { %7548 = vmatpush1.bf16.msra.mxu0 %v15923_v50  ;;  %7016 = vmatprep.subr.bf16.mxu1 %v15928_v51  ;;  %v16003_v50 = vld [vmem:[#allocation10 + $0x4c] ss:$16 sps:$4 sm:$0xff]   ;;  %v15998_v51 = vld [vmem:[#allocation10 + $0x40] ss:$16 sps:$4 sm:$0xff]  }
 0x59b   :  { %7549 = vmatprep.subr.bf16.mxu0 %v15931_v54  ;;  %v16001_v54 = vld [vmem:[#allocation10 + $0x48] ss:$16 sps:$4 sm:$0xff]  }
 0x59d   :  { %7017 = vmatpush1.bf16.msra.mxu1 %v15926_v11  ;;  %v16006_v11 = vld [vmem:[#allocation10 + $0x64] ss:$16 sps:$4 sm:$0xff]  }
 0x59e   :  { %7550 = vmatpush1.bf16.msra.mxu0 %v15929_v25  ;;  %7018 = vmatprep.subr.bf16.mxu1 %v15934_v39  ;;  %v16009_v25 = vld [vmem:[#allocation10 + $0x6c] ss:$16 sps:$4 sm:$0xff]   ;;  %v16004_v39 = vld [vmem:[#allocation10 + $0x60] ss:$16 sps:$4 sm:$0xff]  }
 0x59f   :  { %7551 = vmatprep.subr.bf16.mxu0 %v15937_v12  ;;  %v16007_v12 = vld [vmem:[#allocation10 + $0x68] ss:$16 sps:$4 sm:$0xff]  }
 0x5a1   :  { %7019 = vmatpush1.bf16.msra.mxu1 %v15932_v19  ;;  %v16012_v19 = vld [vmem:[#allocation10 + $0x84] ss:$16 sps:$4 sm:$0xff]  }
 0x5a2   :  { %7552 = vmatpush1.bf16.msra.mxu0 %v15935_v35  ;;  %7020 = vmatprep.subr.bf16.mxu1 %v15940_v13  ;;  %v16015_v35 = vld [vmem:[#allocation10 + $0x8c] ss:$16 sps:$4 sm:$0xff]   ;;  %v16010_v13 = vld [vmem:[#allocation10 + $0x80] ss:$16 sps:$4 sm:$0xff]  }
 0x5a3   :  { %7553 = vmatprep.subr.bf16.mxu0 %v15943_v17  ;;  %v16013_v17 = vld [vmem:[#allocation10 + $0x88] ss:$16 sps:$4 sm:$0xff]  }
 0x5a5   :  { %7021 = vmatpush1.bf16.msra.mxu1 %v15938_v57  ;;  %v16018_v57 = vld [vmem:[#allocation10 + $0xa4] ss:$16 sps:$4 sm:$0xff]  }
 0x5a6   :  { %7554 = vmatpush1.bf16.msra.mxu0 %v15941_v53  ;;  %7022 = vmatprep.subr.bf16.mxu1 %v15946_v18  ;;  %v16021_v53 = vld [vmem:[#allocation10 + $0xac] ss:$16 sps:$4 sm:$0xff]   ;;  %v16016_v18 = vld [vmem:[#allocation10 + $0xa0] ss:$16 sps:$4 sm:$0xff]  }
 0x5a7   :  { %7555 = vmatprep.subr.bf16.mxu0 %v15949_v21  ;;  %v16019_v21 = vld [vmem:[#allocation10 + $0xa8] ss:$16 sps:$4 sm:$0xff]  }
 0x5a9   :  { %7023 = vmatpush1.bf16.msra.mxu1 %v15944_v22  ;;  %v16024_v22 = vld [vmem:[#allocation10 + $0xc4] ss:$16 sps:$4 sm:$0xff]  }
 0x5aa   :  { %7556 = vmatpush1.bf16.msra.mxu0 %v15947_v23  ;;  %7024 = vmatprep.subr.bf16.mxu1 %v15952_v26  ;;  %v16027_v23 = vld [vmem:[#allocation10 + $0xcc] ss:$16 sps:$4 sm:$0xff]   ;;  %v16022_v26 = vld [vmem:[#allocation10 + $0xc0] ss:$16 sps:$4 sm:$0xff]  }
 0x5ab   :  { %7557 = vmatprep.subr.bf16.mxu0 %v15955_v28  ;;  %v16025_v28 = vld [vmem:[#allocation10 + $0xc8] ss:$16 sps:$4 sm:$0xff]  }
 0x5ad   :  { %7025 = vmatpush1.bf16.msra.mxu1 %v15950_v32  ;;  %v16030_v32 = vld [vmem:[#allocation10 + $0xe4] ss:$16 sps:$4 sm:$0xff]  }
 0x5ae   :  { %7558 = vmatpush1.bf16.msra.mxu0 %v15953_v33  ;;  %7026 = vmatprep.subr.bf16.mxu1 %v15958_v24  ;;  %v16033_v33 = vld [vmem:[#allocation10 + $0xec] ss:$16 sps:$4 sm:$0xff]   ;;  %v16028_v24 = vld [vmem:[#allocation10 + $0xe0] ss:$16 sps:$4 sm:$0xff]  }
 0x5af   :  { %7559 = vmatprep.subr.bf16.mxu0 %v15961_v40  ;;  %v16031_v40 = vld [vmem:[#allocation10 + $0xe8] ss:$16 sps:$4 sm:$0xff]  }
 0x5b1   :  { %7027 = vmatpush1.bf16.msra.mxu1 %v15956_v55  ;;  %v16036_v55 = vld [vmem:[#allocation10 + $0x104] ss:$16 sps:$4 sm:$0xff]  }
 0x5b2   :  { %7560 = vmatpush1.bf16.msra.mxu0 %v15959_v20  ;;  %7028 = vmatprep.subr.bf16.mxu1 %v15964_v36  ;;  %v16039_v20 = vld [vmem:[#allocation10 + $0x10c] ss:$16 sps:$4 sm:$0xff]   ;;  %v16034_v36 = vld [vmem:[#allocation10 + $0x100] ss:$16 sps:$4 sm:$0xff]  }
 0x5b3   :  { %7561 = vmatprep.subr.bf16.mxu0 %v15967_v41  ;;  %v16037_v41 = vld [vmem:[#allocation10 + $0x108] ss:$16 sps:$4 sm:$0xff]  }
 0x5b5   :  { %7029 = vmatpush1.bf16.msra.mxu1 %v15962_v47  ;;  %v16042_v47 = vld [vmem:[#allocation10 + $0x124] ss:$16 sps:$4 sm:$0xff]  }
 0x5b6   :  { %7562 = vmatpush1.bf16.msra.mxu0 %v15965_v31  ;;  %7030 = vmatprep.subr.bf16.mxu1 %v15970_v42  ;;  %v16045_v31 = vld [vmem:[#allocation10 + $0x12c] ss:$16 sps:$4 sm:$0xff]   ;;  %v16040_v42 = vld [vmem:[#allocation10 + $0x120] ss:$16 sps:$4 sm:$0xff]  }
 0x5b7   :  { %7563 = vmatprep.subr.bf16.mxu0 %v15973_v43  ;;  %v16043_v43 = vld [vmem:[#allocation10 + $0x128] ss:$16 sps:$4 sm:$0xff]  }
 0x5b9   :  { %7031 = vmatpush1.bf16.msra.mxu1 %v15968_v44  ;;  %v16048_v44 = vld [vmem:[#allocation10 + $0x144] ss:$16 sps:$4 sm:$0xff]  }
 0x5ba   :  { %7564 = vmatpush1.bf16.msra.mxu0 %v15971_v45  ;;  %7032 = vmatprep.subr.bf16.mxu1 %v15976_v46  ;;  %v16051_v45 = vld [vmem:[#allocation10 + $0x14c] ss:$16 sps:$4 sm:$0xff]   ;;  %v16046_v46 = vld [vmem:[#allocation10 + $0x140] ss:$16 sps:$4 sm:$0xff]  }
 0x5bb   :  { %7565 = vmatprep.subr.bf16.mxu0 %v15979_v59  ;;  %v16049_v59 = vld [vmem:[#allocation10 + $0x148] ss:$16 sps:$4 sm:$0xff]  }
 0x5bd   :  { %7033 = vmatpush1.bf16.msra.mxu1 %v15974_v48  ;;  %v16054_v48 = vld [vmem:[#allocation10 + $0x164] ss:$16 sps:$4 sm:$0xff]  }
 0x5be   :  { %7566 = vmatpush1.bf16.msra.mxu0 %v15977_v2  ;;  %7034 = vmatprep.subr.bf16.mxu1 %v15982_v29  ;;  %v16052_v2 = vld [vmem:[#allocation10 + $0x160] ss:$16 sps:$4 sm:$0xff]   ;;  %v16055_v29 = vld [vmem:[#allocation10 + $0x168] ss:$16 sps:$4 sm:$0xff]  }
 0x5bf   :  { %7567 = vmatprep.subr.bf16.mxu0 %v15985_v62  ;;  %v16060_v62 = vld [vmem:[#allocation10 + $0x184] ss:$16 sps:$4 sm:$0xff]  }
 0x5c1   :  { %7035 = vmatpush1.bf16.msra.mxu1 %v15980_v9  ;;  %v16063_v9 = vld [vmem:[#allocation10 + $0x18c] ss:$16 sps:$4 sm:$0xff]  }
 0x5c2   :  { %7568 = vmatpush1.bf16.msra.mxu0 %v15983_v52  ;;  %8372 = vmatprep.subr.bf16.mxu1 %v15988_v14  ;;  %v16061_v52 = vld [vmem:[#allocation10 + $0x188] ss:$16 sps:$4 sm:$0xff]   ;;  %v16066_v14 = vld [vmem:[#allocation10 + $0x1a4] ss:$16 sps:$4 sm:$0xff]  }
 0x5c3   :  { %8454 = vmatprep.subr.bf16.mxu0 %v15991_v38  ;;  %v16069_v38 = vld [vmem:[#allocation10 + $0x1ac] ss:$16 sps:$4 sm:$0xff]  }
 0x5c4   :  { %7037 = vmatmul.mubr.bf16.vlgmr.msra.gmra.mrb[24].mxu1 %v1496_v30 }
 0x5c5   :  { %7570 = vmatmul.mubr.bf16.vlgmr.msra.gmra.mrb[28].mxu0 %v1496_v30  ;;  %8373 = vmatpush1.bf16.msra.mxu1 %v15986_v7  ;;  %v16064_v7 = vld [vmem:[#allocation10 + $0x1a0] ss:$16 sps:$4 sm:$0xff]   ;;  %v16067_v30 = vld [vmem:[#allocation10 + $0x1a8] ss:$16 sps:$4 sm:$0xff]  }
 0x5c6   :  { %8455 = vmatpush1.bf16.msra.mxu0 %v15989_v27  ;;  %8374 = vmatprep.subr.bf16.mxu1 %v15994_v56  ;;  %v16072_v27 = vld [vmem:[#allocation10 + $0x1c4] ss:$16 sps:$4 sm:$0xff]   ;;  %v16075_v56 = vld [vmem:[#allocation10 + $0x1cc] ss:$16 sps:$4 sm:$0xff]  }
 0x5c7   :  { %8456 = vmatprep.subr.bf16.mxu0 %v15997_v16  ;;  %v16070_v16 = vld [vmem:[#allocation10 + $0x1c0] ss:$16 sps:$4 sm:$0xff]  }
 0x5c9   :  { %8375 = vmatpush1.bf16.msra.mxu1 %v15992_v10  ;;  %v16073_v10 = vld [vmem:[#allocation10 + $0x1c8] ss:$16 sps:$4 sm:$0xff]  }
 0x5ca   :  { %8457 = vmatpush1.bf16.msra.mxu0 %v15995_v58  ;;  %8376 = vmatprep.subr.bf16.mxu1 %v16000_v34  ;;  %v16078_v58 = vld [vmem:[#allocation10 + $0x1e4] ss:$16 sps:$4 sm:$0xff]   ;;  %v16081_v34 = vld [vmem:[#allocation10 + $0x1ec] ss:$16 sps:$4 sm:$0xff]  }
 0x5cb   :  { %8458 = vmatprep.subr.bf16.mxu0 %v16003_v50  ;;  %v16076_v50 = vld [vmem:[#allocation10 + $0x1e0] ss:$16 sps:$4 sm:$0xff]  }
 0x5cd   :  { %8377 = vmatpush1.bf16.msra.mxu1 %v15998_v51  ;;  %v16079_v51 = vld [vmem:[#allocation10 + $0x1e8] ss:$16 sps:$4 sm:$0xff]  }
 0x5ce   :  { %8459 = vmatpush1.bf16.msra.mxu0 %v16001_v54  ;;  %8378 = vmatprep.subr.bf16.mxu1 %v16006_v11  ;;  %v16084_v54 = vld [vmem:[#allocation10 + $0x204] ss:$16 sps:$4 sm:$0xff]   ;;  %v16087_v11 = vld [vmem:[#allocation10 + $0x20c] ss:$16 sps:$4 sm:$0xff]  }
 0x5cf   :  { %8460 = vmatprep.subr.bf16.mxu0 %v16009_v25  ;;  %v17706_v25 = vld [vmem:[#allocation8] sm:$0xf] }
 0x5d1   :  { %8379 = vmatpush1.bf16.msra.mxu1 %v16004_v39  ;;  %v2335_v39 = vrot.slane %v17706_v25, %v17544_v1 }
 0x5d2   :  { %8461 = vmatpush1.bf16.msra.mxu0 %v16007_v12  ;;  %8380 = vmatprep.subr.bf16.mxu1 %v16012_v19  ;;  %v2339_v12 = vrot.slane %v17706_v25, %v17549_v3  ;;  %v2347_v19 = vrot.slane %v17706_v25, %v17552_v4 }
 0x5d3   :  { %8462 = vmatprep.subr.bf16.mxu0 %v16015_v35 }
 0x5d5   :  { %8381 = vmatpush1.bf16.msra.mxu1 %v16010_v13 }
 0x5d6   :  { %8463 = vmatpush1.bf16.msra.mxu0 %v16013_v17  ;;  %8382 = vmatprep.subr.bf16.mxu1 %v16018_v57 }
 0x5d7   :  { %8464 = vmatprep.subr.bf16.mxu0 %v16021_v53 }
 0x5d9   :  { %8383 = vmatpush1.bf16.msra.mxu1 %v16016_v18 }
 0x5da   :  { %8465 = vmatpush1.bf16.msra.mxu0 %v16019_v21  ;;  %8384 = vmatprep.subr.bf16.mxu1 %v16024_v22 }
 0x5db   :  { %8466 = vmatprep.subr.bf16.mxu0 %v16027_v23 }
 0x5dd   :  { %8385 = vmatpush1.bf16.msra.mxu1 %v16022_v26 }
 0x5de   :  { %8467 = vmatpush1.bf16.msra.mxu0 %v16025_v28  ;;  %8386 = vmatprep.subr.bf16.mxu1 %v16030_v32 }
 0x5df   :  { %8468 = vmatprep.subr.bf16.mxu0 %v16033_v33  ;;  %v16082_v33 = vld [vmem:[#allocation10 + $0x200] ss:$16 sps:$4 sm:$0xff]  }
 0x5e1   :  { %8387 = vmatpush1.bf16.msra.mxu1 %v16028_v24  ;;  %v16085_v24 = vld [vmem:[#allocation10 + $0x208] ss:$16 sps:$4 sm:$0xff]  }
 0x5e2   :  { %8469 = vmatpush1.bf16.msra.mxu0 %v16031_v40  ;;  %8388 = vmatprep.subr.bf16.mxu1 %v16036_v55  ;;  %v16090_v55 = vld [vmem:[#allocation10 + $0x224] ss:$16 sps:$4 sm:$0xff]  }
 0x5e3   :  { %8470 = vmatprep.subr.bf16.mxu0 %v16039_v20  ;;  %v16093_v20 = vld [vmem:[#allocation10 + $0x22c] ss:$16 sps:$4 sm:$0xff]  }
 0x5e5   :  { %8389 = vmatpush1.bf16.msra.mxu1 %v16034_v36 }
 0x5e6   :  { %8471 = vmatpush1.bf16.msra.mxu0 %v16037_v41  ;;  %8390 = vmatprep.subr.bf16.mxu1 %v16042_v47  ;;  %v16088_v41 = vld [vmem:[#allocation10 + $0x220] ss:$16 sps:$4 sm:$0xff]   ;;  %v16091_v47 = vld [vmem:[#allocation10 + $0x228] ss:$16 sps:$4 sm:$0xff]  }
 0x5e7   :  { %8472 = vmatprep.subr.bf16.mxu0 %v16045_v31  ;;  %v16096_v31 = vld [vmem:[#allocation10 + $0x244] ss:$16 sps:$4 sm:$0xff]  }
 0x5e9   :  { %8391 = vmatpush1.bf16.msra.mxu1 %v16040_v42  ;;  %v16099_v42 = vld [vmem:[#allocation10 + $0x24c] ss:$16 sps:$4 sm:$0xff]  }
 0x5ea   :  { %8473 = vmatpush1.bf16.msra.mxu0 %v16043_v43  ;;  %8392 = vmatprep.subr.bf16.mxu1 %v16048_v44  ;;  %v16094_v43 = vld [vmem:[#allocation10 + $0x240] ss:$16 sps:$4 sm:$0xff]   ;;  %v16097_v44 = vld [vmem:[#allocation10 + $0x248] ss:$16 sps:$4 sm:$0xff]  }
 0x5eb   :  { %8474 = vmatprep.subr.bf16.mxu0 %v16051_v45  ;;  %v16102_v45 = vld [vmem:[#allocation10 + $0x264] ss:$16 sps:$4 sm:$0xff]  }
 0x5ed   :  { %8393 = vmatpush1.bf16.msra.mxu1 %v16046_v46  ;;  %v16105_v46 = vld [vmem:[#allocation10 + $0x26c] ss:$16 sps:$4 sm:$0xff]  }
 0x5ee   :  { %8475 = vmatpush1.bf16.msra.mxu0 %v16049_v59  ;;  %8394 = vmatprep.subr.bf16.mxu1 %v16054_v48  ;;  %v16100_v59 = vld [vmem:[#allocation10 + $0x260] ss:$16 sps:$4 sm:$0xff]   ;;  %v16103_v48 = vld [vmem:[#allocation10 + $0x268] ss:$16 sps:$4 sm:$0xff]  }
 0x5ef   :  { %8476 = vmatprep.subr.bf16.mxu0 %v16057_v61  ;;  %v16108_v61 = vld [vmem:[#allocation10 + $0x284] ss:$16 sps:$4 sm:$0xff]  }
 0x5f1   :  { %8395 = vmatpush1.bf16.msra.mxu1 %v16052_v2  ;;  %v16111_v2 = vld [vmem:[#allocation10 + $0x28c] ss:$16 sps:$4 sm:$0xff]  }
 0x5f2   :  { %8477 = vmatpush1.bf16.msra.mxu0 %v16055_v29  ;;  %8396 = vmatprep.subr.bf16.mxu1 %v16060_v62  ;;  %v16106_v29 = vld [vmem:[#allocation10 + $0x280] ss:$16 sps:$4 sm:$0xff]   ;;  %v16109_v62 = vld [vmem:[#allocation10 + $0x288] ss:$16 sps:$4 sm:$0xff]  }
 0x5f3   :  { %8478 = vmatprep.subr.bf16.mxu0 %v16063_v9  ;;  %v16114_v9 = vld [vmem:[#allocation10 + $0x2a4] ss:$16 sps:$4 sm:$0xff]  }
 0x5f5   :  { %8397 = vmatpush1.bf16.msra.mxu1 %v16058_v5  ;;  %v16117_v5 = vld [vmem:[#allocation10 + $0x2ac] ss:$16 sps:$4 sm:$0xff]  }
 0x5f6   :  { %8479 = vmatpush1.bf16.msra.mxu0 %v16061_v52  ;;  %8398 = vmatprep.subr.bf16.mxu1 %v16066_v14  ;;  %v16112_v52 = vld [vmem:[#allocation10 + $0x2a0] ss:$16 sps:$4 sm:$0xff]   ;;  %v16115_v14 = vld [vmem:[#allocation10 + $0x2a8] ss:$16 sps:$4 sm:$0xff]  }
 0x5f7   :  { %8480 = vmatprep.subr.bf16.mxu0 %v16069_v38  ;;  %v16120_v38 = vld [vmem:[#allocation10 + $0x2c4] ss:$16 sps:$4 sm:$0xff]  }
 0x5f9   :  { %8399 = vmatpush1.bf16.msra.mxu1 %v16064_v7  ;;  %v16123_v7 = vld [vmem:[#allocation10 + $0x2cc] ss:$16 sps:$4 sm:$0xff]  }
 0x5fa   :  { %8481 = vmatpush1.bf16.msra.mxu0 %v16067_v30  ;;  %8400 = vmatprep.subr.bf16.mxu1 %v16072_v27  ;;  %v16118_v30 = vld [vmem:[#allocation10 + $0x2c0] ss:$16 sps:$4 sm:$0xff]   ;;  %v16121_v27 = vld [vmem:[#allocation10 + $0x2c8] ss:$16 sps:$4 sm:$0xff]  }
 0x5fb   :  { %8482 = vmatprep.subr.bf16.mxu0 %v16075_v56  ;;  %v16126_v56 = vld [vmem:[#allocation10 + $0x2e4] ss:$16 sps:$4 sm:$0xff]  }
 0x5fd   :  { %8401 = vmatpush1.bf16.msra.mxu1 %v16070_v16  ;;  %v16129_v16 = vld [vmem:[#allocation10 + $0x2ec] ss:$16 sps:$4 sm:$0xff]  }
 0x5fe   :  { %8483 = vmatpush1.bf16.msra.mxu0 %v16073_v10  ;;  %8402 = vmatprep.subr.bf16.mxu1 %v16078_v58  ;;  %v16124_v10 = vld [vmem:[#allocation10 + $0x2e0] ss:$16 sps:$4 sm:$0xff]   ;;  %v16127_v58 = vld [vmem:[#allocation10 + $0x2e8] ss:$16 sps:$4 sm:$0xff]  }
 0x5ff   :  { %8484 = vmatprep.subr.bf16.mxu0 %v16081_v34  ;;  %v16132_v34 = vld [vmem:[#allocation10 + $0x304] ss:$16 sps:$4 sm:$0xff]  }
 0x601   :  { %8403 = vmatpush1.bf16.msra.mxu1 %v16076_v50  ;;  %v16135_v50 = vld [vmem:[#allocation10 + $0x30c] ss:$16 sps:$4 sm:$0xff]  }
 0x602   :  { %8485 = vmatpush1.bf16.msra.mxu0 %v16079_v51  ;;  %8413 = vmatprep.subr.bf16.mxu1 %v16084_v54  ;;  %v16130_v51 = vld [vmem:[#allocation10 + $0x300] ss:$16 sps:$4 sm:$0xff]   ;;  %v16133_v54 = vld [vmem:[#allocation10 + $0x308] ss:$16 sps:$4 sm:$0xff]  }
 0x603   :  { %8495 = vmatprep.subr.bf16.mxu0 %v16087_v11  ;;  %v16138_v11 = vld [vmem:[#allocation10 + $0x324] ss:$16 sps:$4 sm:$0xff]  }
 0x697   :  { %v7038_v35 = vpop.f32.mrb[24].mxu1 }
 0x698   :  { %v14508_v13 = vadd.f32 %v7038_v35, %v2335_v39  ;;  %v17714_v17 = vpop.f32.mrb[28].mxu0  ;;  %v7040_v57 = vpop.f32.mrb[25].mxu1  ;;  %v16141_v39 = vld [vmem:[#allocation10 + $0x32c] ss:$16 sps:$4 sm:$0xff]   ;;  %v16144_v35 = vld [vmem:[#allocation10 + $0x344] ss:$16 sps:$4 sm:$0xff]  }
 0x699   :  { %v14509_v53 = vadd.f32 %v7040_v57, %v2339_v12  ;;  %v7573_v18 = vpop.f32.mrb[29].mxu0  ;;  %v7042_v21 = vpop.f32.mrb[26].mxu1  ;;  %v16136_v12 = vld [vmem:[#allocation10 + $0x320] ss:$16 sps:$4 sm:$0xff]  }
 0x69a   :  { %v14511_v22 = vadd.f32 %v7573_v18, %v2347_v19  ;;  %v7575_v23 = vpop.f32.mrb[30].mxu0  ;;  %v7043_v26 = vpop.f32.mrb[27].mxu1  ;;  %v7578_v40 = vpack.c.bf16 %v14508_v13, %v14508_v13  ;;  %v16139_v19 = vld [vmem:[#allocation10 + $0x328] ss:$16 sps:$4 sm:$0xff]   ;;  %v16147_v13 = vld [vmem:[#allocation10 + $0x34c] ss:$16 sps:$4 sm:$0xff]  }
 0x69b   :  { %v7579_v28 = vpack.c.bf16 %v14509_v53, %v14509_v53  ;;  %v7576_v32 = vpop.f32.mrb[31].mxu0  ;;  %v16142_v57 = vld [vmem:[#allocation10 + $0x340] ss:$16 sps:$4 sm:$0xff]   ;;  %v16145_v53 = vld [vmem:[#allocation10 + $0x348] ss:$16 sps:$4 sm:$0xff]  }
 0x69c   :  { %v7581_v36 = vpack.c.bf16 %v14511_v22, %v14511_v22  ;;  %v16150_v18 = vld [vmem:[#allocation10 + $0x364] ss:$16 sps:$4 sm:$0xff]   ;;  %v16153_v21 = vld [vmem:[#allocation10 + $0x36c] ss:$16 sps:$4 sm:$0xff]   ;;  %v16148_v22 = vld [vmem:[#allocation10 + $0x360] ss:$16 sps:$4 sm:$0xff]  }
 0x69d   :  { %8404 = vmatprep.mubr.bf16.mxu1 %v7579_v28  ;;  %8486 = vmatprep.mubr.bf16.mxu0 %v7579_v28  ;;  %v16151_v23 = vld [vmem:[#allocation10 + $0x368] ss:$16 sps:$4 sm:$0xff]   ;;  %v16156_v26 = vld [vmem:[#allocation10 + $0x384] ss:$16 sps:$4 sm:$0xff]   ;;  %v16159_v28 = vld [vmem:[#allocation10 + $0x38c] ss:$16 sps:$4 sm:$0xff]  }
 0x69e   :  { %8405 = vmatmul.mubr.bf16.vlgmr.msra.gmra.mrb[28].mxu1 %v7578_v40  ;;  %8487 = vmatmul.mubr.bf16.vlgmr.msra.gmra.mrb[32].mxu0 %v7578_v40  ;;  %v16154_v32 = vld [vmem:[#allocation10 + $0x380] ss:$16 sps:$4 sm:$0xff]   ;;  %v16165_v40 = vld [vmem:[#allocation10 + $0x3ac] ss:$16 sps:$4 sm:$0xff]  }
 0x69f   :  { %8414 = vmatpush1.bf16.msra.mxu1 %v16082_v33  ;;  %8496 = vmatpush1.bf16.msra.mxu0 %v16085_v24  ;;  %v16157_v33 = vld [vmem:[#allocation10 + $0x388] ss:$16 sps:$4 sm:$0xff]   ;;  %v16162_v24 = vld [vmem:[#allocation10 + $0x3a4] ss:$16 sps:$4 sm:$0xff]  }
 0x6a0   :  { %8445 = vmatprep.mubr.bf16.mxu1 %v7581_v36  ;;  %8527 = vmatprep.mubr.bf16.mxu0 %v7581_v36  ;;  %v16168_v36 = vld [vmem:[#allocation10 + $0x3c4] ss:$16 sps:$4 sm:$0xff]  }
 0x6a1   :  { %8415 = vmatprep.subr.bf16.mxu1 %v16090_v55  ;;  %8497 = vmatprep.subr.bf16.mxu0 %v16093_v20  ;;  %v16160_v55 = vld [vmem:[#allocation10 + $0x3a0] ss:$16 sps:$4 sm:$0xff]   ;;  %v16163_v20 = vld [vmem:[#allocation10 + $0x3a8] ss:$16 sps:$4 sm:$0xff]  }
 0x6a3   :  { %8416 = vmatpush1.bf16.msra.mxu1 %v16088_v41  ;;  %8498 = vmatpush1.bf16.msra.mxu0 %v16091_v47  ;;  %v16171_v41 = vld [vmem:[#allocation10 + $0x3cc] ss:$16 sps:$4 sm:$0xff]   ;;  %v16166_v47 = vld [vmem:[#allocation10 + $0x3c0] ss:$16 sps:$4 sm:$0xff]  }
 0x6a4   :  { %8417 = vmatprep.subr.bf16.mxu1 %v16096_v31  ;;  %8499 = vmatprep.subr.bf16.mxu0 %v16099_v42  ;;  %v16169_v31 = vld [vmem:[#allocation10 + $0x3c8] ss:$16 sps:$4 sm:$0xff]   ;;  %v2343_v42 = vrot.slane %v17706_v25, %v17571_v15 }
 0x6a5   :  { %v8556_v25 = vld [vmem:[#allocation13 + $0x60] sm:$0xff] }
 0x6a7   :  { %8418 = vmatpush1.bf16.msra.mxu1 %v16094_v43  ;;  %8500 = vmatpush1.bf16.msra.mxu0 %v16097_v44  ;;  %v16174_v43 = vld [vmem:[#allocation10 + $0x3e4] ss:$16 sps:$4 sm:$0xff]   ;;  %v16177_v44 = vld [vmem:[#allocation10 + $0x3ec] ss:$16 sps:$4 sm:$0xff]  }
 0x6a8   :  { %8419 = vmatprep.subr.bf16.mxu1 %v16102_v45  ;;  %8501 = vmatprep.subr.bf16.mxu0 %v16105_v46  ;;  %v8544_v45 = vld [vmem:[#allocation13] sm:$0xff] }
 0x6a9   :  { %v8548_v46 = vld [vmem:[#allocation13 + $0x20] sm:$0xff] }
 0x6ab   :  { %8420 = vmatpush1.bf16.msra.mxu1 %v16100_v59  ;;  %8502 = vmatpush1.bf16.msra.mxu0 %v16103_v48  ;;  %v8545_v59 = vld [vmem:[#allocation13 + $0x8] sm:$0xff] }
 0x6ac   :  { %8421 = vmatprep.subr.bf16.mxu1 %v16108_v61  ;;  %8503 = vmatprep.subr.bf16.mxu0 %v16111_v2  ;;  %v8549_v48 = vld [vmem:[#allocation13 + $0x28] sm:$0xff]  ;;  %v16175_v2 = vld [vmem:[#allocation10 + $0x3e8] ss:$16 sps:$4 sm:$0xff]  }
 0x6ad   :  { %v16172_v61 = vld [vmem:[#allocation10 + $0x3e0] ss:$16 sps:$4 sm:$0xff]  }
 0x6af   :  { %8422 = vmatpush1.bf16.msra.mxu1 %v16106_v29  ;;  %8504 = vmatpush1.bf16.msra.mxu0 %v16109_v62  ;;  %v14510_v29 = vadd.f32 %v17714_v17, %v2343_v42  ;;  %v13916_v62 = vcombine.high %v8544_v45, %v8548_v46  ;;  %v8561_v17 = vld [vmem:[#allocation13 + $0x88] sm:$0xff]  ;;  %v8592_v42 = vld [vmem:[#allocation13 + $0x180] sm:$0xff] }
 0x6b0   :  { %8423 = vmatprep.subr.bf16.mxu1 %v16114_v9  ;;  %8505 = vmatprep.subr.bf16.mxu0 %v16117_v5  ;;  %v13918_v9 = vcombine.high %v8545_v59, %v8549_v48  ;;  %v8552_v5 = vld [vmem:[#allocation13 + $0x40] sm:$0xff] }
 0x6b3   :  { %8424 = vmatpush1.bf16.msra.mxu1 %v16112_v52  ;;  %8506 = vmatpush1.bf16.msra.mxu0 %v16115_v14  ;;  %v8553_v52 = vld [vmem:[#allocation13 + $0x48] sm:$0xff] }
 0x6b4   :  { %8425 = vmatprep.subr.bf16.mxu1 %v16120_v38  ;;  %8507 = vmatprep.subr.bf16.mxu0 %v16123_v7  ;;  %v8557_v14 = vld [vmem:[#allocation13 + $0x68] sm:$0xff]  ;;  %v13915_v38 = vcombine.low %v8544_v45, %v8548_v46  ;;  %v13917_v7 = vcombine.low %v8545_v59, %v8549_v48 }
 0x6b5   :  { %v8597_v45 = vld [vmem:[#allocation13 + $0x1a8] sm:$0xff] }
 0x6b7   :  { %8426 = vmatpush1.bf16.msra.mxu1 %v16118_v30  ;;  %8508 = vmatpush1.bf16.msra.mxu0 %v16121_v27  ;;  %v7580_v30 = vpack.c.bf16 %v14510_v29, %v14510_v29  ;;  %v13924_v27 = vcombine.high %v8552_v5, %v8556_v25  ;;  %v8604_v29 = vld [vmem:[#allocation13 + $0x1e0] sm:$0xff] }
 0x6b8   :  { %8427 = vmatprep.subr.bf16.mxu1 %v16126_v56  ;;  %8509 = vmatprep.subr.bf16.mxu0 %v16129_v16  ;;  %v13926_v56 = vcombine.high %v8553_v52, %v8557_v14  ;;  %v8560_v16 = vld [vmem:[#allocation13 + $0x80] sm:$0xff] }
 0x6bb   :  { %8428 = vmatpush1.bf16.msra.mxu1 %v16124_v10  ;;  %8510 = vmatpush1.bf16.msra.mxu0 %v16127_v58  ;;  %v8564_v10 = vld [vmem:[#allocation13 + $0xa0] sm:$0xff]  ;;  %v8565_v58 = vld [vmem:[#allocation13 + $0xa8] sm:$0xff] }
 0x6bc   :  { %8429 = vmatprep.subr.bf16.mxu1 %v16132_v34  ;;  %8511 = vmatprep.subr.bf16.mxu0 %v16135_v50  ;;  %v13923_v34 = vcombine.low %v8552_v5, %v8556_v25  ;;  %v13925_v50 = vcombine.low %v8553_v52, %v8557_v14 }
 0x6bf   :  { %8430 = vmatpush1.bf16.msra.mxu1 %v16130_v51  ;;  %8512 = vmatpush1.bf16.msra.mxu0 %v16133_v54  ;;  %v13932_v51 = vcombine.high %v8560_v16, %v8564_v10  ;;  %v13934_v54 = vcombine.high %v8561_v17, %v8565_v58 }
 0x6c0   :  { %8431 = vmatprep.subr.bf16.mxu1 %v16138_v11  ;;  %8513 = vmatprep.subr.bf16.mxu0 %v16141_v39  ;;  %v8568_v11 = vld [vmem:[#allocation13 + $0xc0] sm:$0xff] }
 0x6c1   :  { %v8572_v39 = vld [vmem:[#allocation13 + $0xe0] sm:$0xff] }
 0x6c3   :  { %8432 = vmatpush1.bf16.msra.mxu1 %v16136_v12  ;;  %8514 = vmatpush1.bf16.msra.mxu0 %v16139_v19  ;;  %v8569_v12 = vld [vmem:[#allocation13 + $0xc8] sm:$0xff] }
 0x6c4   :  { %8433 = vmatprep.subr.bf16.mxu1 %v16144_v35  ;;  %8515 = vmatprep.subr.bf16.mxu0 %v16147_v13  ;;  %v8573_v19 = vld [vmem:[#allocation13 + $0xe8] sm:$0xff]  ;;  %v13931_v35 = vcombine.low %v8560_v16, %v8564_v10  ;;  %v13933_v13 = vcombine.low %v8561_v17, %v8565_v58  ;;  %v8616_v58 = vld [vmem:[#allocation13 + $0x240] sm:$0xff] }
 0x6c7   :  { %8434 = vmatpush1.bf16.msra.mxu1 %v16142_v57  ;;  %8516 = vmatpush1.bf16.msra.mxu0 %v16145_v53  ;;  %v13940_v57 = vcombine.high %v8568_v11, %v8572_v39  ;;  %v13942_v53 = vcombine.high %v8569_v12, %v8573_v19 }
 0x6c8   :  { %8435 = vmatprep.subr.bf16.mxu1 %v16150_v18  ;;  %8517 = vmatprep.subr.bf16.mxu0 %v16153_v21  ;;  %v8576_v18 = vld [vmem:[#allocation13 + $0x100] sm:$0xff] }
 0x6c9   :  { %v8580_v21 = vld [vmem:[#allocation13 + $0x120] sm:$0xff] }
 0x6cb   :  { %8436 = vmatpush1.bf16.msra.mxu1 %v16148_v22  ;;  %8518 = vmatpush1.bf16.msra.mxu0 %v16151_v23  ;;  %v8577_v22 = vld [vmem:[#allocation13 + $0x108] sm:$0xff] }
 0x6cc   :  { %8437 = vmatprep.subr.bf16.mxu1 %v16156_v26  ;;  %8519 = vmatprep.subr.bf16.mxu0 %v16159_v28  ;;  %v8581_v23 = vld [vmem:[#allocation13 + $0x128] sm:$0xff]  ;;  %v13939_v26 = vcombine.low %v8568_v11, %v8572_v39  ;;  %v13941_v28 = vcombine.low %v8569_v12, %v8573_v19  ;;  %v8624_v19 = vld [vmem:[#allocation13 + $0x280] sm:$0xff] }
 0x6cf   :  { %8438 = vmatpush1.bf16.msra.mxu1 %v16154_v32  ;;  %8520 = vmatpush1.bf16.msra.mxu0 %v16157_v33  ;;  %v13948_v32 = vcombine.high %v8576_v18, %v8580_v21  ;;  %v13950_v33 = vcombine.high %v8577_v22, %v8581_v23 }
 0x6d0   :  { %8439 = vmatprep.subr.bf16.mxu1 %v16162_v24  ;;  %8521 = vmatprep.subr.bf16.mxu0 %v16165_v40  ;;  %v8584_v24 = vld [vmem:[#allocation13 + $0x140] sm:$0xff] }
 0x6d1   :  { %v8588_v40 = vld [vmem:[#allocation13 + $0x160] sm:$0xff] }
 0x6d2   :  { %v13955_v46 = vcombine.low %v8584_v24, %v8588_v40 }
 0x6d3   :  { %8440 = vmatpush1.bf16.msra.mxu1 %v16160_v55  ;;  %8522 = vmatpush1.bf16.msra.mxu0 %v16163_v20  ;;  %v8585_v55 = vld [vmem:[#allocation13 + $0x148] sm:$0xff] }
 0x6d4   :  { %8441 = vmatprep.subr.bf16.mxu1 %v16168_v36  ;;  %8523 = vmatprep.subr.bf16.mxu0 %v16171_v41  ;;  %v8589_v20 = vld [vmem:[#allocation13 + $0x168] sm:$0xff]  ;;  %v13947_v36 = vcombine.low %v8576_v18, %v8580_v21  ;;  %v13949_v41 = vcombine.low %v8577_v22, %v8581_v23  ;;  %v8632_v23 = vld [vmem:[#allocation13 + $0x2c0] sm:$0xff] }
 0x6d5   :  { %v13957_v59 = vcombine.low %v8585_v55, %v8589_v20 }
 0x6d7   :  { %8442 = vmatpush1.bf16.msra.mxu1 %v16166_v47  ;;  %8524 = vmatpush1.bf16.msra.mxu0 %v16169_v31  ;;  %v13956_v47 = vcombine.high %v8584_v24, %v8588_v40  ;;  %v13958_v31 = vcombine.high %v8585_v55, %v8589_v20  ;;  %v8640_v20 = vld [vmem:[#allocation13 + $0x300] sm:$0xff] }
 0x6d8   :  { %8443 = vmatprep.subr.bf16.mxu1 %v16174_v43  ;;  %8525 = vmatprep.subr.bf16.mxu0 %v16177_v44  ;;  %v8596_v43 = vld [vmem:[#allocation13 + $0x1a0] sm:$0xff]  ;;  %v8593_v44 = vld [vmem:[#allocation13 + $0x188] sm:$0xff] }
 0x6d9   :  { %v13964_v48 = vcombine.high %v8592_v42, %v8596_v43  ;;  %v13963_v5 = vcombine.low %v8592_v42, %v8596_v43  ;;  %v13965_v25 = vcombine.low %v8593_v44, %v8597_v45 }
 0x6db   :  { %8444 = vmatpush1.bf16.msra.mxu1 %v16172_v61  ;;  %8526 = vmatpush1.bf16.msra.mxu0 %v16175_v2  ;;  %v13966_v61 = vcombine.high %v8593_v44, %v8597_v45  ;;  %v8600_v2 = vld [vmem:[#allocation13 + $0x1c0] sm:$0xff] }
 0x6dc   :  { %10122 = vmatprep.subr.bf16.mxu1 %v13916_v62  ;;  %10204 = vmatprep.subr.bf16.mxu0 %v13918_v9  ;;  %v8601_v62 = vld [vmem:[#allocation13 + $0x1c8] sm:$0xff]  ;;  %v13972_v52 = vcombine.high %v8600_v2, %v8604_v29  ;;  %v8648_v45 = vld [vmem:[#allocation13 + $0x340] sm:$0xff] }
 0x6dd   :  { %v8605_v9 = vld [vmem:[#allocation13 + $0x1e8] sm:$0xff] }
 0x6de   :  { %8446 = vmatmul.mubr.bf16.vlgmr.msra.gmra.mrb[28].mxu1 %v7580_v30  ;;  %8528 = vmatmul.mubr.bf16.vlgmr.msra.gmra.mrb[32].mxu0 %v7580_v30  ;;  %v13974_v14 = vcombine.high %v8601_v62, %v8605_v9  ;;  %v8609_v30 = vld [vmem:[#allocation13 + $0x208] sm:$0xff]  ;;  %v13973_v16 = vcombine.low %v8601_v62, %v8605_v9  ;;  %v8656_v9 = vld [vmem:[#allocation13 + $0x380] sm:$0xff] }
 0x6df   :  { %10123 = vmatpush1.bf16.msra.mxu1 %v13915_v38  ;;  %10205 = vmatpush1.bf16.msra.mxu0 %v13917_v7  ;;  %v8608_v38 = vld [vmem:[#allocation13 + $0x200] sm:$0xff] }
 0x6e0   :  { %10124 = vmatprep.subr.bf16.mxu1 %v13924_v27  ;;  %10206 = vmatprep.subr.bf16.mxu0 %v13926_v56  ;;  %v8612_v7 = vld [vmem:[#allocation13 + $0x220] sm:$0xff]  ;;  %v8613_v27 = vld [vmem:[#allocation13 + $0x228] sm:$0xff]  ;;  %v13971_v56 = vcombine.low %v8600_v2, %v8604_v29 }
 0x6e1   :  { %v13980_v10 = vcombine.high %v8608_v38, %v8612_v7  ;;  %v13982_v17 = vcombine.high %v8609_v30, %v8613_v27  ;;  %v13981_v11 = vcombine.low %v8609_v30, %v8613_v27 }
 0x6e3   :  { %10125 = vmatpush1.bf16.msra.mxu1 %v13923_v34  ;;  %10207 = vmatpush1.bf16.msra.mxu0 %v13925_v50  ;;  %v8620_v34 = vld [vmem:[#allocation13 + $0x260] sm:$0xff]  ;;  %v8617_v50 = vld [vmem:[#allocation13 + $0x248] sm:$0xff] }
 0x6e4   :  { %10126 = vmatprep.subr.bf16.mxu1 %v13932_v51  ;;  %10208 = vmatprep.subr.bf16.mxu0 %v13934_v54  ;;  %v8621_v51 = vld [vmem:[#allocation13 + $0x268] sm:$0xff]  ;;  %v13979_v54 = vcombine.low %v8608_v38, %v8612_v7  ;;  %v13988_v39 = vcombine.high %v8616_v58, %v8620_v34 }
 0x6e5   :  { %v13990_v12 = vcombine.high %v8617_v50, %v8621_v51  ;;  %v13989_v18 = vcombine.low %v8617_v50, %v8621_v51 }
 0x6e7   :  { %10127 = vmatpush1.bf16.msra.mxu1 %v13931_v35  ;;  %10209 = vmatpush1.bf16.msra.mxu0 %v13933_v13  ;;  %v8628_v35 = vld [vmem:[#allocation13 + $0x2a0] sm:$0xff]  ;;  %v8625_v13 = vld [vmem:[#allocation13 + $0x288] sm:$0xff] }
 0x6e8   :  { %10128 = vmatprep.subr.bf16.mxu1 %v13940_v57  ;;  %10210 = vmatprep.subr.bf16.mxu0 %v13942_v53  ;;  %v8629_v57 = vld [vmem:[#allocation13 + $0x2a8] sm:$0xff]  ;;  %v13987_v53 = vcombine.low %v8616_v58, %v8620_v34  ;;  %v13996_v21 = vcombine.high %v8624_v19, %v8628_v35 }
 0x6e9   :  { %v13998_v22 = vcombine.high %v8625_v13, %v8629_v57  ;;  %v13997_v24 = vcombine.low %v8625_v13, %v8629_v57  ;;  %v8669_v34 = vld [vmem:[#allocation13 + $0x3e8] sm:$0xff] }
 0x6eb   :  { %10129 = vmatpush1.bf16.msra.mxu1 %v13939_v26  ;;  %10211 = vmatpush1.bf16.msra.mxu0 %v13941_v28  ;;  %v8636_v26 = vld [vmem:[#allocation13 + $0x2e0] sm:$0xff]  ;;  %v8633_v28 = vld [vmem:[#allocation13 + $0x2c8] sm:$0xff] }
 0x6ec   :  { %10130 = vmatprep.subr.bf16.mxu1 %v13948_v32  ;;  %10212 = vmatprep.subr.bf16.mxu0 %v13950_v33  ;;  %v8637_v32 = vld [vmem:[#allocation13 + $0x2e8] sm:$0xff]  ;;  %v13995_v33 = vcombine.low %v8624_v19, %v8628_v35  ;;  %v14004_v40 = vcombine.high %v8632_v23, %v8636_v26 }
 0x6ed   :  { %v14006_v55 = vcombine.high %v8633_v28, %v8637_v32  ;;  %v14005_v42 = vcombine.low %v8633_v28, %v8637_v32  ;;  %v8677_v35 = vld [vmem:[#allocation13 + $0x428] sm:$0xff] }
 0x6ef   :  { %10131 = vmatpush1.bf16.msra.mxu1 %v13947_v36  ;;  %10213 = vmatpush1.bf16.msra.mxu0 %v13949_v41  ;;  %v8644_v36 = vld [vmem:[#allocation13 + $0x320] sm:$0xff]  ;;  %v8641_v41 = vld [vmem:[#allocation13 + $0x308] sm:$0xff] }
 0x6f0   :  { %10132 = vmatprep.subr.bf16.mxu1 %v13956_v47  ;;  %10214 = vmatprep.subr.bf16.mxu0 %v13958_v31  ;;  %v8645_v47 = vld [vmem:[#allocation13 + $0x328] sm:$0xff]  ;;  %v14003_v31 = vcombine.low %v8632_v23, %v8636_v26  ;;  %v14012_v43 = vcombine.high %v8640_v20, %v8644_v36 }
 0x6f1   :  { %v14014_v44 = vcombine.high %v8641_v41, %v8645_v47  ;;  %v14013_v2 = vcombine.low %v8641_v41, %v8645_v47 }
 0x6f3   :  { %10133 = vmatpush1.bf16.msra.mxu1 %v13955_v46  ;;  %10215 = vmatpush1.bf16.msra.mxu0 %v13957_v59  ;;  %v8652_v46 = vld [vmem:[#allocation13 + $0x360] sm:$0xff]  ;;  %v8649_v59 = vld [vmem:[#allocation13 + $0x348] sm:$0xff] }
 0x6f4   :  { %10134 = vmatprep.subr.bf16.mxu1 %v13964_v48  ;;  %10216 = vmatprep.subr.bf16.mxu0 %v13966_v61  ;;  %v8653_v48 = vld [vmem:[#allocation13 + $0x368] sm:$0xff]  ;;  %v14011_v61 = vcombine.low %v8640_v20, %v8644_v36  ;;  %v14020_v29 = vcombine.high %v8648_v45, %v8652_v46 }
 0x6f5   :  { %v14022_v62 = vcombine.high %v8649_v59, %v8653_v48  ;;  %v14021_v38 = vcombine.low %v8649_v59, %v8653_v48 }
 0x6f7   :  { %10135 = vmatpush1.bf16.msra.mxu1 %v13963_v5  ;;  %10217 = vmatpush1.bf16.msra.mxu0 %v13965_v25  ;;  %v8660_v5 = vld [vmem:[#allocation13 + $0x3a0] sm:$0xff]  ;;  %v8657_v25 = vld [vmem:[#allocation13 + $0x388] sm:$0xff] }
 0x6f8   :  { %10136 = vmatprep.subr.bf16.mxu1 %v13972_v52  ;;  %10218 = vmatprep.subr.bf16.mxu0 %v13974_v14  ;;  %v8661_v52 = vld [vmem:[#allocation13 + $0x3a8] sm:$0xff]  ;;  %v14019_v14 = vcombine.low %v8648_v45, %v8652_v46  ;;  %v14028_v7 = vcombine.high %v8656_v9, %v8660_v5  ;;  %v14027_v27 = vcombine.low %v8656_v9, %v8660_v5 }
 0x6f9   :  { %v14030_v30 = vcombine.high %v8657_v25, %v8661_v52  ;;  %v8681_v45 = vld [vmem:[#allocation13 + $0x448] sm:$0xff] }
 0x6fa   :  { %v8685_v46 = vld [vmem:[#allocation13 + $0x468] sm:$0xff] }
 0x6fb   :  { %10137 = vmatpush1.bf16.msra.mxu1 %v13971_v56  ;;  %10219 = vmatpush1.bf16.msra.mxu0 %v13973_v16  ;;  %v14029_v56 = vcombine.low %v8657_v25, %v8661_v52  ;;  %v8664_v16 = vld [vmem:[#allocation13 + $0x3c0] sm:$0xff]  ;;  %v8689_v9 = vld [vmem:[#allocation13 + $0x488] sm:$0xff] }
 0x6fc   :  { %10138 = vmatprep.subr.bf16.mxu1 %v13980_v10  ;;  %10220 = vmatprep.subr.bf16.mxu0 %v13982_v17  ;;  %v8668_v10 = vld [vmem:[#allocation13 + $0x3e0] sm:$0xff]  ;;  %v8665_v17 = vld [vmem:[#allocation13 + $0x3c8] sm:$0xff] }
 0x6fd   :  { %v14036_v58 = vcombine.high %v8664_v16, %v8668_v10  ;;  %v14035_v50 = vcombine.low %v8664_v16, %v8668_v10  ;;  %v14037_v51 = vcombine.low %v8665_v17, %v8669_v34  ;;  %v8693_v5 = vld [vmem:[#allocation13 + $0x4a8] sm:$0xff] }
 0x6fe   :  { %v8701_v16 = vld [vmem:[#allocation13 + $0x4e8] sm:$0xff] }
 0x6ff   :  { %10139 = vmatpush1.bf16.msra.mxu1 %v13979_v54  ;;  %10221 = vmatpush1.bf16.msra.mxu0 %v13981_v11  ;;  %v14038_v54 = vcombine.high %v8665_v17, %v8669_v34  ;;  %v8672_v11 = vld [vmem:[#allocation13 + $0x400] sm:$0xff]  ;;  %v14061_v17 = vcombine.low %v8689_v9, %v8693_v5 }
 0x700   :  { %10140 = vmatprep.subr.bf16.mxu1 %v13988_v39  ;;  %10222 = vmatprep.subr.bf16.mxu0 %v13990_v12  ;;  %v8676_v39 = vld [vmem:[#allocation13 + $0x420] sm:$0xff]  ;;  %v8673_v12 = vld [vmem:[#allocation13 + $0x408] sm:$0xff] }
 0x701   :  { %v14044_v19 = vcombine.high %v8672_v11, %v8676_v39  ;;  %v14043_v13 = vcombine.low %v8672_v11, %v8676_v39  ;;  %v14045_v57 = vcombine.low %v8673_v12, %v8677_v35  ;;  %v8709_v11 = vld [vmem:[#allocation13 + $0x528] sm:$0xff] }
 0x703   :  { %10141 = vmatpush1.bf16.msra.mxu1 %v13987_v53  ;;  %10223 = vmatpush1.bf16.msra.mxu0 %v13989_v18  ;;  %v14046_v53 = vcombine.high %v8673_v12, %v8677_v35  ;;  %v7710_v18 = vld [vmem:[#allocation11] sm:$0xf] }
 0x704   :  { %10142 = vmatprep.subr.bf16.mxu1 %v13996_v21  ;;  %10224 = vmatprep.subr.bf16.mxu0 %v13998_v22  ;;  %v7715_v21 = vrot.slane %v7710_v18, %v17544_v1  ;;  %v7723_v22 = vrot.slane %v7710_v18, %v17571_v15  ;;  %v7719_v23 = vrot.slane %v7710_v18, %v17549_v3 }
 0x705   :  { %v7727_v26 = vrot.slane %v7710_v18, %v17552_v4  ;;  %v8717_v18 = vld [vmem:[#allocation13 + $0x568] sm:$0xff] }
 0x707   :  { %10143 = vmatpush1.bf16.msra.mxu1 %v13995_v33  ;;  %10225 = vmatpush1.bf16.msra.mxu0 %v13997_v24 }
 0x708   :  { %10144 = vmatprep.subr.bf16.mxu1 %v14004_v40  ;;  %10226 = vmatprep.subr.bf16.mxu0 %v14006_v55 }
 0x70b   :  { %10145 = vmatpush1.bf16.msra.mxu1 %v14003_v31  ;;  %10227 = vmatpush1.bf16.msra.mxu0 %v14005_v42  ;;  %v8680_v31 = vld [vmem:[#allocation13 + $0x440] sm:$0xff] }
 0x70c   :  { %10146 = vmatprep.subr.bf16.mxu1 %v14012_v43  ;;  %10228 = vmatprep.subr.bf16.mxu0 %v14014_v44  ;;  %v8684_v44 = vld [vmem:[#allocation13 + $0x460] sm:$0xff] }
 0x70d   :  { %v14051_v52 = vcombine.low %v8680_v31, %v8684_v44 }
 0x70f   :  { %10147 = vmatpush1.bf16.msra.mxu1 %v14011_v61  ;;  %10229 = vmatpush1.bf16.msra.mxu0 %v14013_v2  ;;  %v8688_v61 = vld [vmem:[#allocation13 + $0x480] sm:$0xff]  ;;  %v14052_v2 = vcombine.high %v8680_v31, %v8684_v44 }
 0x710   :  { %10148 = vmatprep.subr.bf16.mxu1 %v14020_v29  ;;  %10230 = vmatprep.subr.bf16.mxu0 %v14022_v62  ;;  %v14054_v29 = vcombine.high %v8681_v45, %v8685_v46  ;;  %v8692_v62 = vld [vmem:[#allocation13 + $0x4a0] sm:$0xff] }
 0x711   :  { %v14059_v10 = vcombine.low %v8688_v61, %v8692_v62  ;;  %v8732_v31 = vld [vmem:[#allocation13 + $0x5e0] sm:$0xff] }
 0x713   :  { %10149 = vmatpush1.bf16.msra.mxu1 %v14019_v14  ;;  %10231 = vmatpush1.bf16.msra.mxu0 %v14021_v38  ;;  %v14053_v14 = vcombine.low %v8681_v45, %v8685_v46  ;;  %v14060_v38 = vcombine.high %v8688_v61, %v8692_v62  ;;  %v8737_v62 = vld [vmem:[#allocation13 + $0x608] sm:$0xff] }
 0x714   :  { %10150 = vmatprep.subr.bf16.mxu1 %v14028_v7  ;;  %10232 = vmatprep.subr.bf16.mxu0 %v14030_v30  ;;  %v14062_v7 = vcombine.high %v8689_v9, %v8693_v5  ;;  %v8696_v30 = vld [vmem:[#allocation13 + $0x4c0] sm:$0xff]  ;;  %v8741_v9 = vld [vmem:[#allocation13 + $0x628] sm:$0xff] }
 0x717   :  { %10151 = vmatpush1.bf16.msra.mxu1 %v14027_v27  ;;  %10233 = vmatpush1.bf16.msra.mxu0 %v14029_v56  ;;  %v8700_v27 = vld [vmem:[#allocation13 + $0x4e0] sm:$0xff]  ;;  %v8697_v56 = vld [vmem:[#allocation13 + $0x4c8] sm:$0xff] }
 0x718   :  { %10152 = vmatprep.subr.bf16.mxu1 %v14036_v58  ;;  %10234 = vmatprep.subr.bf16.mxu0 %v14038_v54  ;;  %v14068_v58 = vcombine.high %v8696_v30, %v8700_v27  ;;  %v14070_v34 = vcombine.high %v8697_v56, %v8701_v16  ;;  %v8705_v54 = vld [vmem:[#allocation13 + $0x508] sm:$0xff]  ;;  %v14067_v39 = vcombine.low %v8696_v30, %v8700_v27  ;;  %v8748_v30 = vld [vmem:[#allocation13 + $0x660] sm:$0xff] }
 0x719   :  { %v14069_v12 = vcombine.low %v8697_v56, %v8701_v16  ;;  %v14078_v35 = vcombine.high %v8705_v54, %v8709_v11  ;;  %v8745_v27 = vld [vmem:[#allocation13 + $0x648] sm:$0xff] }
 0x71a   :  { %v8749_v56 = vld [vmem:[#allocation13 + $0x668] sm:$0xff] }
 0x71b   :  { %10153 = vmatpush1.bf16.msra.mxu1 %v14035_v50  ;;  %10235 = vmatpush1.bf16.msra.mxu0 %v14037_v51  ;;  %v8704_v50 = vld [vmem:[#allocation13 + $0x500] sm:$0xff] }
 0x71c   :  { %10163 = vmatprep.subr.bf16.mxu1 %v14044_v19  ;;  %10245 = vmatprep.subr.bf16.mxu0 %v14046_v53  ;;  %v8708_v51 = vld [vmem:[#allocation13 + $0x520] sm:$0xff]  ;;  %v8713_v53 = vld [vmem:[#allocation13 + $0x548] sm:$0xff] }
 0x71d   :  { %v14076_v19 = vcombine.high %v8704_v50, %v8708_v51 }
 0x7b1   :  { %v8447_v28 = vpop.f32.mrb[28].mxu1  ;;  %v8529_v32 = vpop.f32.mrb[32].mxu0 }
 0x7b2   :  { %v14512_v33 = vadd.f32 %v8447_v28, %v7715_v21  ;;  %v17723_v24 = vadd.f32 %v8529_v32, %v7723_v22  ;;  %v8449_v40 = vpop.f32.mrb[29].mxu1  ;;  %v8531_v55 = vpop.f32.mrb[33].mxu0  ;;  %v14075_v21 = vcombine.low %v8704_v50, %v8708_v51  ;;  %v14077_v22 = vcombine.low %v8705_v54, %v8709_v11  ;;  %v8720_v28 = vld [vmem:[#allocation13 + $0x580] sm:$0xff]  ;;  %v8753_v51 = vld [vmem:[#allocation13 + $0x688] sm:$0xff] }
 0x7b3   :  { %v14513_v20 = vadd.f32 %v8449_v40, %v7719_v23  ;;  %v14515_v36 = vadd.f32 %v8531_v55, %v7727_v26  ;;  %v8451_v41 = vpop.f32.mrb[30].mxu1  ;;  %v8533_v47 = vpop.f32.mrb[34].mxu0  ;;  %v14086_v26 = vcombine.high %v8713_v53, %v8717_v18  ;;  %v8724_v32 = vld [vmem:[#allocation13 + $0x5a0] sm:$0xff]  ;;  %v8725_v40 = vld [vmem:[#allocation13 + $0x5a8] sm:$0xff] }
 0x7b4   :  { %8536 = vst [vmem:[%s17845_s17] sm:$0xff] %v14512_v33  ;;  %8538 = vst [vmem:[%s17845_s17 + $0x10] sm:$0xff] %v17723_v24  ;;  %v8452_v42 = vpop.f32.mrb[31].mxu1  ;;  %v8534_v43 = vpop.f32.mrb[35].mxu0  ;;  %v17740_v48 = vpack.c.bf16 %v14512_v33, %v14512_v33  ;;  %v8721_v33 = vld [vmem:[#allocation13 + $0x588] sm:$0xff]  ;;  %v8728_v47 = vld [vmem:[#allocation13 + $0x5c0] sm:$0xff]  ;;  %v14091_v44 = vcombine.low %v8720_v28, %v8724_v32 }
 0x7b5   :  { %8537 = vst [vmem:[%s17845_s17 + $0x8] sm:$0xff] %v14513_v20  ;;  %v17735_v59 = vpack.c.bf16 %v14513_v20, %v14513_v20  ;;  %8539 = vst [vmem:[%s17845_s17 + $0x18] sm:$0xff] %v14515_v36  ;;  %v17744_v25 = vpack.c.bf16 %v14515_v36, %v14515_v36  ;;  %v14085_v20 = vcombine.low %v8713_v53, %v8717_v18  ;;  %v8729_v42 = vld [vmem:[#allocation13 + $0x5c8] sm:$0xff]  ;;  %v8756_v50 = vld [vmem:[#allocation13 + $0x6a0] sm:$0xff] }
 0x7b6   :  { %v14092_v36 = vcombine.high %v8720_v28, %v8724_v32  ;;  %v14094_v41 = vcombine.high %v8721_v33, %v8725_v40  ;;  %v8733_v43 = vld [vmem:[#allocation13 + $0x5e8] sm:$0xff]  ;;  %v14093_v45 = vcombine.low %v8721_v33, %v8725_v40  ;;  %v14100_v46 = vcombine.high %v8728_v47, %v8732_v31  ;;  %v8772_v28 = vld [vmem:[#allocation13 + $0x720] sm:$0xff] }
 0x7b7   :  { %10154 = vmatprep.mubr.bf16.mxu1 %v17735_v59  ;;  %10236 = vmatprep.mubr.bf16.mxu0 %v17735_v59  ;;  %v14102_v61 = vcombine.high %v8729_v42, %v8733_v43  ;;  %v14099_v5 = vcombine.low %v8728_v47, %v8732_v31  ;;  %v8757_v54 = vld [vmem:[#allocation13 + $0x6a8] sm:$0xff]  ;;  %v8780_v47 = vld [vmem:[#allocation13 + $0x760] sm:$0xff] }
 0x7b8   :  { %10155 = vmatmul.mubr.bf16.vlgmr.msra.gmra.mrb[32].mxu1 %v17740_v48  ;;  %10237 = vmatmul.mubr.bf16.vlgmr.msra.gmra.mrb[36].mxu0 %v17740_v48  ;;  %v8765_v53 = vld [vmem:[#allocation13 + $0x6e8] sm:$0xff] }
 0x7b9   :  { %10164 = vmatpush1.bf16.msra.mxu1 %v14043_v13  ;;  %10246 = vmatpush1.bf16.msra.mxu0 %v14045_v57  ;;  %v8712_v13 = vld [vmem:[#allocation13 + $0x540] sm:$0xff]  ;;  %v8769_v32 = vld [vmem:[#allocation13 + $0x708] sm:$0xff] }
 0x7ba   :  { %10195 = vmatprep.mubr.bf16.mxu1 %v17744_v25  ;;  %10277 = vmatprep.mubr.bf16.mxu0 %v17744_v25  ;;  %v8716_v57 = vld [vmem:[#allocation13 + $0x560] sm:$0xff]  ;;  %v8773_v33 = vld [vmem:[#allocation13 + $0x728] sm:$0xff] }
 0x7bb   :  { %10165 = vmatprep.subr.bf16.mxu1 %v14052_v2  ;;  %10247 = vmatprep.subr.bf16.mxu0 %v14054_v29  ;;  %v14084_v23 = vcombine.high %v8712_v13, %v8716_v57  ;;  %v14083_v55 = vcombine.low %v8712_v13, %v8716_v57  ;;  %v8736_v2 = vld [vmem:[#allocation13 + $0x600] sm:$0xff]  ;;  %v8761_v57 = vld [vmem:[#allocation13 + $0x6c8] sm:$0xff] }
 0x7bc   :  { %v8740_v29 = vld [vmem:[#allocation13 + $0x620] sm:$0xff]  ;;  %v8777_v31 = vld [vmem:[#allocation13 + $0x748] sm:$0xff] }
 0x7bd   :  { %10166 = vmatpush1.bf16.msra.mxu1 %v14051_v52  ;;  %10248 = vmatpush1.bf16.msra.mxu0 %v14053_v14  ;;  %v14101_v52 = vcombine.low %v8729_v42, %v8733_v43  ;;  %v14108_v14 = vcombine.high %v8736_v2, %v8740_v29  ;;  %v14107_v16 = vcombine.low %v8736_v2, %v8740_v29  ;;  %v8764_v13 = vld [vmem:[#allocation13 + $0x6e0] sm:$0xff]  ;;  %v8781_v42 = vld [vmem:[#allocation13 + $0x768] sm:$0xff] }
 0x7be   :  { %10167 = vmatprep.subr.bf16.mxu1 %v14060_v38  ;;  %10249 = vmatprep.subr.bf16.mxu0 %v14062_v7  ;;  %v14110_v38 = vcombine.high %v8737_v62, %v8741_v9  ;;  %v8744_v7 = vld [vmem:[#allocation13 + $0x640] sm:$0xff]  ;;  %v8785_v29 = vld [vmem:[#allocation13 + $0x788] sm:$0xff] }
 0x7bf   :  { %v14115_v11 = vcombine.low %v8744_v7, %v8748_v30  ;;  %v8788_v2 = vld [vmem:[#allocation13 + $0x7a0] sm:$0xff] }
 0x7c1   :  { %10168 = vmatpush1.bf16.msra.mxu1 %v14059_v10  ;;  %10250 = vmatpush1.bf16.msra.mxu0 %v14061_v17  ;;  %v14109_v10 = vcombine.low %v8737_v62, %v8741_v9  ;;  %v14116_v17 = vcombine.high %v8744_v7, %v8748_v30  ;;  %v8789_v62 = vld [vmem:[#allocation13 + $0x7a8] sm:$0xff]  ;;  %v8796_v7 = vld [vmem:[#allocation13 + $0x7e0] sm:$0xff] }
 0x7c2   :  { %10169 = vmatprep.subr.bf16.mxu1 %v14068_v58  ;;  %10251 = vmatprep.subr.bf16.mxu0 %v14070_v34  ;;  %v14118_v58 = vcombine.high %v8745_v27, %v8749_v56  ;;  %v8752_v34 = vld [vmem:[#allocation13 + $0x680] sm:$0xff]  ;;  %v8793_v30 = vld [vmem:[#allocation13 + $0x7c8] sm:$0xff] }
 0x7c3   :  { %v14123_v18 = vcombine.low %v8752_v34, %v8756_v50 }
 0x7c5   :  { %10170 = vmatpush1.bf16.msra.mxu1 %v14067_v39  ;;  %10252 = vmatpush1.bf16.msra.mxu0 %v14069_v12  ;;  %v14117_v39 = vcombine.low %v8745_v27, %v8749_v56  ;;  %v14124_v12 = vcombine.high %v8752_v34, %v8756_v50  ;;  %v8797_v27 = vld [vmem:[#allocation13 + $0x7e8] sm:$0xff]  ;;  %v8550_v34 = vld [vmem:[#allocation13 + $0x30] sm:$0xff]  ;;  %v8547_v50 = vld [vmem:[#allocation13 + $0x18] sm:$0xff] }
 0x7c6   :  { %10171 = vmatprep.subr.bf16.mxu1 %v14076_v19  ;;  %10253 = vmatprep.subr.bf16.mxu0 %v14078_v35  ;;  %v14126_v19 = vcombine.high %v8753_v51, %v8757_v54  ;;  %v8760_v35 = vld [vmem:[#allocation13 + $0x6c0] sm:$0xff] }
 0x7c7   :  { %v14131_v40 = vcombine.low %v8760_v35, %v8764_v13 }
 0x7c9   :  { %10172 = vmatpush1.bf16.msra.mxu1 %v14075_v21  ;;  %10254 = vmatpush1.bf16.msra.mxu0 %v14077_v22  ;;  %v14125_v21 = vcombine.low %v8753_v51, %v8757_v54  ;;  %v14132_v22 = vcombine.high %v8760_v35, %v8764_v13  ;;  %v8551_v51 = vld [vmem:[#allocation13 + $0x38] sm:$0xff]  ;;  %v8558_v35 = vld [vmem:[#allocation13 + $0x70] sm:$0xff] }
 0x7ca   :  { %10173 = vmatprep.subr.bf16.mxu1 %v14084_v23  ;;  %10255 = vmatprep.subr.bf16.mxu0 %v14086_v26  ;;  %v14134_v23 = vcombine.high %v8761_v57, %v8765_v53  ;;  %v8768_v26 = vld [vmem:[#allocation13 + $0x700] sm:$0xff]  ;;  %v8555_v13 = vld [vmem:[#allocation13 + $0x58] sm:$0xff] }
 0x7cb   :  { %v14139_v43 = vcombine.low %v8768_v26, %v8772_v28 }
 0x7cd   :  { %10174 = vmatpush1.bf16.msra.mxu1 %v14083_v55  ;;  %10256 = vmatpush1.bf16.msra.mxu0 %v14085_v20  ;;  %v14133_v55 = vcombine.low %v8761_v57, %v8765_v53  ;;  %v14140_v20 = vcombine.high %v8768_v26, %v8772_v28  ;;  %v8559_v57 = vld [vmem:[#allocation13 + $0x78] sm:$0xff]  ;;  %v8562_v26 = vld [vmem:[#allocation13 + $0x90] sm:$0xff] }
 0x7ce   :  { %10175 = vmatprep.subr.bf16.mxu1 %v14092_v36  ;;  %10257 = vmatprep.subr.bf16.mxu0 %v14094_v41  ;;  %v14142_v36 = vcombine.high %v8769_v32, %v8773_v33  ;;  %v8776_v41 = vld [vmem:[#allocation13 + $0x740] sm:$0xff]  ;;  %v8566_v28 = vld [vmem:[#allocation13 + $0xb0] sm:$0xff] }
 0x7cf   :  { %v14147_v9 = vcombine.low %v8776_v41, %v8780_v47 }
 0x7d1   :  { %10176 = vmatpush1.bf16.msra.mxu1 %v14091_v44  ;;  %10258 = vmatpush1.bf16.msra.mxu0 %v14093_v45  ;;  %v14141_v44 = vcombine.low %v8769_v32, %v8773_v33  ;;  %v14148_v45 = vcombine.high %v8776_v41, %v8780_v47  ;;  %v8563_v32 = vld [vmem:[#allocation13 + $0x98] sm:$0xff]  ;;  %v8574_v41 = vld [vmem:[#allocation13 + $0xf0] sm:$0xff] }
 0x7d2   :  { %10177 = vmatprep.subr.bf16.mxu1 %v14100_v46  ;;  %10259 = vmatprep.subr.bf16.mxu0 %v14102_v61  ;;  %v14150_v46 = vcombine.high %v8777_v31, %v8781_v42  ;;  %v8784_v61 = vld [vmem:[#allocation13 + $0x780] sm:$0xff]  ;;  %v8567_v33 = vld [vmem:[#allocation13 + $0xb8] sm:$0xff] }
 0x7d3   :  { %v14155_v56 = vcombine.low %v8784_v61, %v8788_v2  ;;  %v8571_v47 = vld [vmem:[#allocation13 + $0xd8] sm:$0xff] }
 0x7d5   :  { %10178 = vmatpush1.bf16.msra.mxu1 %v14099_v5  ;;  %10260 = vmatpush1.bf16.msra.mxu0 %v14101_v52  ;;  %v14149_v5 = vcombine.low %v8777_v31, %v8781_v42  ;;  %v14156_v52 = vcombine.high %v8784_v61, %v8788_v2  ;;  %v8575_v31 = vld [vmem:[#allocation13 + $0xf8] sm:$0xff]  ;;  %v13935_v42 = vcombine.low %v8562_v26, %v8566_v28  ;;  %v8582_v61 = vld [vmem:[#allocation13 + $0x130] sm:$0xff] }
 0x7d6   :  { %10179 = vmatprep.subr.bf16.mxu1 %v14108_v14  ;;  %10261 = vmatprep.subr.bf16.mxu0 %v14110_v38  ;;  %v14158_v14 = vcombine.high %v8785_v29, %v8789_v62  ;;  %v8792_v38 = vld [vmem:[#allocation13 + $0x7c0] sm:$0xff]  ;;  %v8579_v2 = vld [vmem:[#allocation13 + $0x118] sm:$0xff] }
 0x7d7   :  { %v14163_v54 = vcombine.low %v8792_v38, %v8796_v7 }
 0x7d9   :  { %10180 = vmatpush1.bf16.msra.mxu1 %v14107_v16  ;;  %10262 = vmatpush1.bf16.msra.mxu0 %v14109_v10  ;;  %v14157_v16 = vcombine.low %v8785_v29, %v8789_v62  ;;  %v14164_v10 = vcombine.high %v8792_v38, %v8796_v7  ;;  %v8583_v29 = vld [vmem:[#allocation13 + $0x138] sm:$0xff]  ;;  %v8590_v38 = vld [vmem:[#allocation13 + $0x170] sm:$0xff] }
 0x7da   :  { %10181 = vmatprep.subr.bf16.mxu1 %v14116_v17  ;;  %10263 = vmatprep.subr.bf16.mxu0 %v14118_v58  ;;  %v14166_v17 = vcombine.high %v8793_v30, %v8797_v27  ;;  %v8546_v58 = vld [vmem:[#allocation13 + $0x10] sm:$0xff]  ;;  %v8587_v7 = vld [vmem:[#allocation13 + $0x158] sm:$0xff] }
 0x7db   :  { %v13919_v53 = vcombine.low %v8546_v58, %v8550_v34 }
 0x7dd   :  { %10182 = vmatpush1.bf16.msra.mxu1 %v14115_v11  ;;  %10264 = vmatpush1.bf16.msra.mxu0 %v14117_v39  ;;  %v14165_v11 = vcombine.low %v8793_v30, %v8797_v27  ;;  %v13920_v39 = vcombine.high %v8546_v58, %v8550_v34  ;;  %v8591_v30 = vld [vmem:[#allocation13 + $0x178] sm:$0xff]  ;;  %v8598_v58 = vld [vmem:[#allocation13 + $0x1b0] sm:$0xff] }
 0x7de   :  { %10183 = vmatprep.subr.bf16.mxu1 %v14124_v12  ;;  %10265 = vmatprep.subr.bf16.mxu0 %v14126_v19  ;;  %v13922_v12 = vcombine.high %v8547_v50, %v8551_v51  ;;  %v8554_v19 = vld [vmem:[#allocation13 + $0x50] sm:$0xff]  ;;  %v8595_v34 = vld [vmem:[#allocation13 + $0x198] sm:$0xff] }
 0x7e1   :  { %10184 = vmatpush1.bf16.msra.mxu1 %v14123_v18  ;;  %10266 = vmatpush1.bf16.msra.mxu0 %v14125_v21  ;;  %v17752_v18 = vpack.c.bf16 %v17723_v24, %v17723_v24  ;;  %v13921_v21 = vcombine.low %v8547_v50, %v8551_v51  ;;  %v13929_v24 = vcombine.low %v8555_v13, %v8559_v57  ;;  %v8599_v50 = vld [vmem:[#allocation13 + $0x1b8] sm:$0xff] }
 0x7e2   :  { %10185 = vmatprep.subr.bf16.mxu1 %v14132_v22  ;;  %10267 = vmatprep.subr.bf16.mxu0 %v14134_v23  ;;  %v13928_v22 = vcombine.high %v8554_v19, %v8558_v35  ;;  %v13930_v23 = vcombine.high %v8555_v13, %v8559_v57  ;;  %v8607_v13 = vld [vmem:[#allocation13 + $0x1f8] sm:$0xff] }
 0x7e5   :  { %10186 = vmatpush1.bf16.msra.mxu1 %v14131_v40  ;;  %10268 = vmatpush1.bf16.msra.mxu0 %v14133_v55  ;;  %v13927_v40 = vcombine.low %v8554_v19, %v8558_v35  ;;  %v13936_v55 = vcombine.high %v8562_v26, %v8566_v28  ;;  %v8606_v19 = vld [vmem:[#allocation13 + $0x1f0] sm:$0xff]  ;;  %v8603_v35 = vld [vmem:[#allocation13 + $0x1d8] sm:$0xff] }
 0x7e6   :  { %10187 = vmatprep.subr.bf16.mxu1 %v14140_v20  ;;  %10269 = vmatprep.subr.bf16.mxu0 %v14142_v36  ;;  %v13938_v20 = vcombine.high %v8563_v32, %v8567_v33  ;;  %v8570_v36 = vld [vmem:[#allocation13 + $0xd0] sm:$0xff]  ;;  %v8611_v28 = vld [vmem:[#allocation13 + $0x218] sm:$0xff] }
 0x7e7   :  { %v13943_v62 = vcombine.low %v8570_v36, %v8574_v41  ;;  %v8614_v26 = vld [vmem:[#allocation13 + $0x230] sm:$0xff] }
 0x7e9   :  { %10188 = vmatpush1.bf16.msra.mxu1 %v14139_v43  ;;  %10270 = vmatpush1.bf16.msra.mxu0 %v14141_v44  ;;  %v13937_v43 = vcombine.low %v8563_v32, %v8567_v33  ;;  %v13944_v44 = vcombine.high %v8570_v36, %v8574_v41  ;;  %v8615_v32 = vld [vmem:[#allocation13 + $0x238] sm:$0xff]  ;;  %v8622_v36 = vld [vmem:[#allocation13 + $0x270] sm:$0xff] }
 0x7ea   :  { %10189 = vmatprep.subr.bf16.mxu1 %v14148_v45  ;;  %10271 = vmatprep.subr.bf16.mxu0 %v14150_v46  ;;  %v13946_v45 = vcombine.high %v8571_v47, %v8575_v31  ;;  %v8578_v46 = vld [vmem:[#allocation13 + $0x110] sm:$0xff]  ;;  %v8619_v41 = vld [vmem:[#allocation13 + $0x258] sm:$0xff] }
 0x7eb   :  { %v13951_v27 = vcombine.low %v8578_v46, %v8582_v61 }
 0x7ed   :  { %10190 = vmatpush1.bf16.msra.mxu1 %v14147_v9  ;;  %10272 = vmatpush1.bf16.msra.mxu0 %v14149_v5  ;;  %v13945_v9 = vcombine.low %v8571_v47, %v8575_v31  ;;  %v13952_v5 = vcombine.high %v8578_v46, %v8582_v61  ;;  %v8623_v47 = vld [vmem:[#allocation13 + $0x278] sm:$0xff]  ;;  %v8630_v46 = vld [vmem:[#allocation13 + $0x2b0] sm:$0xff] }
 0x7ee   :  { %10191 = vmatprep.subr.bf16.mxu1 %v14156_v52  ;;  %10273 = vmatprep.subr.bf16.mxu0 %v14158_v14  ;;  %v13954_v52 = vcombine.high %v8579_v2, %v8583_v29  ;;  %v8586_v14 = vld [vmem:[#allocation13 + $0x150] sm:$0xff]  ;;  %v8627_v61 = vld [vmem:[#allocation13 + $0x298] sm:$0xff] }
 0x7ef   :  { %v13959_v51 = vcombine.low %v8586_v14, %v8590_v38 }
 0x7f1   :  { %10192 = vmatpush1.bf16.msra.mxu1 %v14155_v56  ;;  %10274 = vmatpush1.bf16.msra.mxu0 %v14157_v16  ;;  %v13953_v56 = vcombine.low %v8579_v2, %v8583_v29  ;;  %v13960_v16 = vcombine.high %v8586_v14, %v8590_v38  ;;  %v8631_v2 = vld [vmem:[#allocation13 + $0x2b8] sm:$0xff]  ;;  %v8638_v14 = vld [vmem:[#allocation13 + $0x2f0] sm:$0xff] }
 0x7f2   :  { %10193 = vmatprep.subr.bf16.mxu1 %v14164_v10  ;;  %10275 = vmatprep.subr.bf16.mxu0 %v14166_v17  ;;  %v13962_v10 = vcombine.high %v8587_v7, %v8591_v30  ;;  %v8594_v17 = vld [vmem:[#allocation13 + $0x190] sm:$0xff]  ;;  %v8635_v38 = vld [vmem:[#allocation13 + $0x2d8] sm:$0xff] }
 0x7f3   :  { %v13967_v57 = vcombine.low %v8594_v17, %v8598_v58 }
 0x7f5   :  { %10194 = vmatpush1.bf16.msra.mxu1 %v14163_v54  ;;  %10276 = vmatpush1.bf16.msra.mxu0 %v14165_v11  ;;  %v13961_v54 = vcombine.low %v8587_v7, %v8591_v30  ;;  %v13968_v11 = vcombine.high %v8594_v17, %v8598_v58  ;;  %v8639_v7 = vld [vmem:[#allocation13 + $0x2f8] sm:$0xff]  ;;  %v8646_v17 = vld [vmem:[#allocation13 + $0x330] sm:$0xff] }
 0x7f6   :  { %10286 = vmatprep.subr.bf16.mxu1 %v13920_v39  ;;  %10368 = vmatprep.subr.bf16.mxu0 %v13922_v12  ;;  %v13970_v39 = vcombine.high %v8595_v34, %v8599_v50  ;;  %v8602_v12 = vld [vmem:[#allocation13 + $0x1d0] sm:$0xff]  ;;  %v8643_v58 = vld [vmem:[#allocation13 + $0x318] sm:$0xff] }
 0x7f7   :  { %v13975_v33 = vcombine.low %v8602_v12, %v8606_v19 }
 0x7f8   :  { %10196 = vmatmul.mubr.bf16.vlgmr.msra.gmra.mrb[32].mxu1 %v17752_v18  ;;  %10278 = vmatmul.mubr.bf16.vlgmr.msra.gmra.mrb[36].mxu0 %v17752_v18 }
 0x7f9   :  { %10287 = vmatpush1.bf16.msra.mxu1 %v13919_v53  ;;  %10318 = vmatprep.mubr.bf16.mxu1 %v17735_v59  ;;  %v13969_v53 = vcombine.low %v8595_v34, %v8599_v50  ;;  %v8647_v34 = vld [vmem:[#allocation13 + $0x338] sm:$0xff] }
 0x7fa   :  { %10369 = vmatpush1.bf16.msra.mxu0 %v13921_v21  ;;  %10400 = vmatprep.mubr.bf16.mxu0 %v17735_v59  ;;  %v13976_v21 = vcombine.high %v8602_v12, %v8606_v19  ;;  %v8654_v12 = vld [vmem:[#allocation13 + $0x370] sm:$0xff]  ;;  %v8651_v19 = vld [vmem:[#allocation13 + $0x358] sm:$0xff] }
 0x7fb   :  { %10288 = vmatprep.subr.bf16.mxu1 %v13928_v22  ;;  %10370 = vmatprep.subr.bf16.mxu0 %v13930_v23  ;;  %v13978_v22 = vcombine.high %v8603_v35, %v8607_v13  ;;  %v8610_v23 = vld [vmem:[#allocation13 + $0x210] sm:$0xff] }
 0x7fc   :  { %v13983_v31 = vcombine.low %v8610_v23, %v8614_v26 }
 0x7fd   :  { %10289 = vmatpush1.bf16.msra.mxu1 %v13927_v40  ;;  %v13977_v40 = vcombine.low %v8603_v35, %v8607_v13  ;;  %v8655_v35 = vld [vmem:[#allocation13 + $0x378] sm:$0xff] }
 0x7fe   :  { %10371 = vmatpush1.bf16.msra.mxu0 %v13929_v24  ;;  %10290 = vmatprep.subr.bf16.mxu1 %v13936_v55  ;;  %v13984_v24 = vcombine.high %v8610_v23, %v8614_v26  ;;  %v13986_v55 = vcombine.high %v8611_v28, %v8615_v32  ;;  %v8662_v23 = vld [vmem:[#allocation13 + $0x3b0] sm:$0xff]  ;;  %v8659_v26 = vld [vmem:[#allocation13 + $0x398] sm:$0xff] }
 0x7ff   :  { %10372 = vmatprep.subr.bf16.mxu0 %v13938_v20  ;;  %v8618_v20 = vld [vmem:[#allocation13 + $0x250] sm:$0xff] }
 0x800   :  { %v13991_v29 = vcombine.low %v8618_v20, %v8622_v36 }
 0x801   :  { %10291 = vmatpush1.bf16.msra.mxu1 %v13935_v42  ;;  %v13985_v42 = vcombine.low %v8611_v28, %v8615_v32  ;;  %v8663_v28 = vld [vmem:[#allocation13 + $0x3b8] sm:$0xff] }
 0x802   :  { %10373 = vmatpush1.bf16.msra.mxu0 %v13937_v43  ;;  %10292 = vmatprep.subr.bf16.mxu1 %v13944_v44  ;;  %v13992_v43 = vcombine.high %v8618_v20, %v8622_v36  ;;  %v13994_v44 = vcombine.high %v8619_v41, %v8623_v47  ;;  %v8670_v20 = vld [vmem:[#allocation13 + $0x3f0] sm:$0xff]  ;;  %v8667_v36 = vld [vmem:[#allocation13 + $0x3d8] sm:$0xff] }
 0x803   :  { %10374 = vmatprep.subr.bf16.mxu0 %v13946_v45  ;;  %v8626_v45 = vld [vmem:[#allocation13 + $0x290] sm:$0xff] }
 0x804   :  { %v13999_v30 = vcombine.low %v8626_v45, %v8630_v46 }
 0x805   :  { %10293 = vmatpush1.bf16.msra.mxu1 %v13943_v62  ;;  %v13993_v62 = vcombine.low %v8619_v41, %v8623_v47  ;;  %v8671_v41 = vld [vmem:[#allocation13 + $0x3f8] sm:$0xff] }
 0x806   :  { %10375 = vmatpush1.bf16.msra.mxu0 %v13945_v9  ;;  %10294 = vmatprep.subr.bf16.mxu1 %v13952_v5  ;;  %v14000_v9 = vcombine.high %v8626_v45, %v8630_v46  ;;  %v14002_v5 = vcombine.high %v8627_v61, %v8631_v2  ;;  %v8678_v45 = vld [vmem:[#allocation13 + $0x430] sm:$0xff]  ;;  %v8675_v46 = vld [vmem:[#allocation13 + $0x418] sm:$0xff] }
 0x807   :  { %10376 = vmatprep.subr.bf16.mxu0 %v13954_v52  ;;  %v8634_v52 = vld [vmem:[#allocation13 + $0x2d0] sm:$0xff] }
 0x808   :  { %v14007_v50 = vcombine.low %v8634_v52, %v8638_v14 }
 0x809   :  { %10295 = vmatpush1.bf16.msra.mxu1 %v13951_v27  ;;  %v14001_v27 = vcombine.low %v8627_v61, %v8631_v2  ;;  %v8679_v61 = vld [vmem:[#allocation13 + $0x438] sm:$0xff] }
 0x80a   :  { %10377 = vmatpush1.bf16.msra.mxu0 %v13953_v56  ;;  %10296 = vmatprep.subr.bf16.mxu1 %v13960_v16  ;;  %v14008_v56 = vcombine.high %v8634_v52, %v8638_v14  ;;  %v14010_v16 = vcombine.high %v8635_v38, %v8639_v7  ;;  %v8686_v52 = vld [vmem:[#allocation13 + $0x470] sm:$0xff] }
 0x80b   :  { %10378 = vmatprep.subr.bf16.mxu0 %v13962_v10  ;;  %v8642_v10 = vld [vmem:[#allocation13 + $0x310] sm:$0xff] }
 0x80c   :  { %v14015_v13 = vcombine.low %v8642_v10, %v8646_v17 }
 0x80d   :  { %10297 = vmatpush1.bf16.msra.mxu1 %v13959_v51  ;;  %v14009_v51 = vcombine.low %v8635_v38, %v8639_v7  ;;  %v8683_v38 = vld [vmem:[#allocation13 + $0x458] sm:$0xff] }
 0x80e   :  { %10379 = vmatpush1.bf16.msra.mxu0 %v13961_v54  ;;  %10298 = vmatprep.subr.bf16.mxu1 %v13968_v11  ;;  %v14016_v54 = vcombine.high %v8642_v10, %v8646_v17  ;;  %v14018_v11 = vcombine.high %v8643_v58, %v8647_v34  ;;  %v8687_v7 = vld [vmem:[#allocation13 + $0x478] sm:$0xff] }
 0x80f   :  { %10380 = vmatprep.subr.bf16.mxu0 %v13970_v39  ;;  %v8650_v39 = vld [vmem:[#allocation13 + $0x350] sm:$0xff]  ;;  %v14058_v10 = vcombine.high %v8683_v38, %v8687_v7  ;;  %v8691_v17 = vld [vmem:[#allocation13 + $0x498] sm:$0xff] }
 0x810   :  { %v14023_v32 = vcombine.low %v8650_v39, %v8654_v12 }
 0x811   :  { %10299 = vmatpush1.bf16.msra.mxu1 %v13967_v57  ;;  %v14017_v57 = vcombine.low %v8643_v58, %v8647_v34  ;;  %v8695_v58 = vld [vmem:[#allocation13 + $0x4b8] sm:$0xff] }
 0x812   :  { %10381 = vmatpush1.bf16.msra.mxu0 %v13969_v53  ;;  %10300 = vmatprep.subr.bf16.mxu1 %v13976_v21  ;;  %v14024_v53 = vcombine.high %v8650_v39, %v8654_v12  ;;  %v14026_v21 = vcombine.high %v8651_v19, %v8655_v35  ;;  %v8702_v39 = vld [vmem:[#allocation13 + $0x4f0] sm:$0xff]  ;;  %v8699_v12 = vld [vmem:[#allocation13 + $0x4d8] sm:$0xff] }
 0x813   :  { %10382 = vmatprep.subr.bf16.mxu0 %v13978_v22  ;;  %v8658_v22 = vld [vmem:[#allocation13 + $0x390] sm:$0xff] }
 0x814   :  { %v14031_v47 = vcombine.low %v8658_v22, %v8662_v23 }
 0x815   :  { %10301 = vmatpush1.bf16.msra.mxu1 %v13975_v33  ;;  %v14025_v33 = vcombine.low %v8651_v19, %v8655_v35  ;;  %v8703_v19 = vld [vmem:[#allocation13 + $0x4f8] sm:$0xff] }
 0x816   :  { %10383 = vmatpush1.bf16.msra.mxu0 %v13977_v40  ;;  %10302 = vmatprep.subr.bf16.mxu1 %v13984_v24  ;;  %v14032_v40 = vcombine.high %v8658_v22, %v8662_v23  ;;  %v14034_v24 = vcombine.high %v8659_v26, %v8663_v28  ;;  %v8710_v22 = vld [vmem:[#allocation13 + $0x530] sm:$0xff]  ;;  %v8707_v23 = vld [vmem:[#allocation13 + $0x518] sm:$0xff] }
 0x817   :  { %10384 = vmatprep.subr.bf16.mxu0 %v13986_v55  ;;  %v8666_v55 = vld [vmem:[#allocation13 + $0x3d0] sm:$0xff] }
 0x818   :  { %v14039_v2 = vcombine.low %v8666_v55, %v8670_v20 }
 0x819   :  { %10303 = vmatpush1.bf16.msra.mxu1 %v13983_v31  ;;  %v14033_v31 = vcombine.low %v8659_v26, %v8663_v28  ;;  %v8711_v26 = vld [vmem:[#allocation13 + $0x538] sm:$0xff] }
 0x81a   :  { %10385 = vmatpush1.bf16.msra.mxu0 %v13985_v42  ;;  %10304 = vmatprep.subr.bf16.mxu1 %v13992_v43  ;;  %v14040_v42 = vcombine.high %v8666_v55, %v8670_v20  ;;  %v14042_v43 = vcombine.high %v8667_v36, %v8671_v41  ;;  %v8718_v55 = vld [vmem:[#allocation13 + $0x570] sm:$0xff]  ;;  %v8715_v20 = vld [vmem:[#allocation13 + $0x558] sm:$0xff] }
 0x81b   :  { %10386 = vmatprep.subr.bf16.mxu0 %v13994_v44  ;;  %v8674_v44 = vld [vmem:[#allocation13 + $0x410] sm:$0xff] }
 0x81c   :  { %v14047_v14 = vcombine.low %v8674_v44, %v8678_v45 }
 0x81d   :  { %10305 = vmatpush1.bf16.msra.mxu1 %v13991_v29  ;;  %v14041_v29 = vcombine.low %v8667_v36, %v8671_v41  ;;  %v8719_v36 = vld [vmem:[#allocation13 + $0x578] sm:$0xff] }
 0x81e   :  { %10387 = vmatpush1.bf16.msra.mxu0 %v13993_v62  ;;  %10306 = vmatprep.subr.bf16.mxu1 %v14000_v9  ;;  %v14048_v62 = vcombine.high %v8674_v44, %v8678_v45  ;;  %v14050_v9 = vcombine.high %v8675_v46, %v8679_v61  ;;  %v8726_v44 = vld [vmem:[#allocation13 + $0x5b0] sm:$0xff]  ;;  %v8723_v45 = vld [vmem:[#allocation13 + $0x598] sm:$0xff] }
 0x81f   :  { %10388 = vmatprep.subr.bf16.mxu0 %v14002_v5  ;;  %v8682_v5 = vld [vmem:[#allocation13 + $0x450] sm:$0xff] }
 0x820   :  { %v14055_v34 = vcombine.low %v8682_v5, %v8686_v52 }
 0x821   :  { %10307 = vmatpush1.bf16.msra.mxu1 %v13999_v30  ;;  %v14049_v30 = vcombine.low %v8675_v46, %v8679_v61  ;;  %v8727_v46 = vld [vmem:[#allocation13 + $0x5b8] sm:$0xff] }
 0x822   :  { %10389 = vmatpush1.bf16.msra.mxu0 %v14001_v27  ;;  %10308 = vmatprep.subr.bf16.mxu1 %v14008_v56  ;;  %v14056_v27 = vcombine.high %v8682_v5, %v8686_v52  ;;  %v8690_v56 = vld [vmem:[#allocation13 + $0x490] sm:$0xff]  ;;  %v8731_v52 = vld [vmem:[#allocation13 + $0x5d8] sm:$0xff] }
 0x823   :  { %10390 = vmatprep.subr.bf16.mxu0 %v14010_v16  ;;  %v8694_v16 = vld [vmem:[#allocation13 + $0x4b0] sm:$0xff] }
 0x824   :  { %v14063_v35 = vcombine.low %v8690_v56, %v8694_v16  ;;  %v8734_v5 = vld [vmem:[#allocation13 + $0x5f0] sm:$0xff] }
 0x825   :  { %10309 = vmatpush1.bf16.msra.mxu1 %v14007_v50  ;;  %v14057_v50 = vcombine.low %v8683_v38, %v8687_v7  ;;  %v14097_v7 = vcombine.low %v8723_v45, %v8727_v46 }
 0x826   :  { %10391 = vmatpush1.bf16.msra.mxu0 %v14009_v51  ;;  %10310 = vmatprep.subr.bf16.mxu1 %v14016_v54  ;;  %v14064_v51 = vcombine.high %v8690_v56, %v8694_v16  ;;  %v14066_v54 = vcombine.high %v8691_v17, %v8695_v58  ;;  %v8738_v56 = vld [vmem:[#allocation13 + $0x610] sm:$0xff] }
 0x827   :  { %10392 = vmatprep.subr.bf16.mxu0 %v14018_v11  ;;  %v8698_v11 = vld [vmem:[#allocation13 + $0x4d0] sm:$0xff] }
 0x828   :  { %v14071_v28 = vcombine.low %v8698_v11, %v8702_v39  ;;  %v8742_v16 = vld [vmem:[#allocation13 + $0x630] sm:$0xff] }
 0x829   :  { %10311 = vmatpush1.bf16.msra.mxu1 %v14015_v13  ;;  %v14065_v13 = vcombine.low %v8691_v17, %v8695_v58  ;;  %v8743_v17 = vld [vmem:[#allocation13 + $0x638] sm:$0xff] }
 0x82a   :  { %10393 = vmatpush1.bf16.msra.mxu0 %v14017_v57  ;;  %10312 = vmatprep.subr.bf16.mxu1 %v14024_v53  ;;  %v14072_v57 = vcombine.high %v8698_v11, %v8702_v39  ;;  %v14074_v53 = vcombine.high %v8699_v12, %v8703_v19  ;;  %v8750_v11 = vld [vmem:[#allocation13 + $0x670] sm:$0xff]  ;;  %v8747_v39 = vld [vmem:[#allocation13 + $0x658] sm:$0xff] }
 0x82b   :  { %10394 = vmatprep.subr.bf16.mxu0 %v14026_v21  ;;  %v8706_v21 = vld [vmem:[#allocation13 + $0x510] sm:$0xff] }
 0x82c   :  { %v14079_v41 = vcombine.low %v8706_v21, %v8710_v22 }
 0x82d   :  { %10313 = vmatpush1.bf16.msra.mxu1 %v14023_v32  ;;  %v14073_v32 = vcombine.low %v8699_v12, %v8703_v19  ;;  %v8751_v12 = vld [vmem:[#allocation13 + $0x678] sm:$0xff]  ;;  %v14111_v19 = vcombine.low %v8738_v56, %v8742_v16 }
 0x82e   :  { %10395 = vmatpush1.bf16.msra.mxu0 %v14025_v33  ;;  %10314 = vmatprep.subr.bf16.mxu1 %v14032_v40  ;;  %v14080_v33 = vcombine.high %v8706_v21, %v8710_v22  ;;  %v14082_v40 = vcombine.high %v8707_v23, %v8711_v26  ;;  %v8758_v21 = vld [vmem:[#allocation13 + $0x6b0] sm:$0xff]  ;;  %v8755_v22 = vld [vmem:[#allocation13 + $0x698] sm:$0xff] }
 0x82f   :  { %10396 = vmatprep.subr.bf16.mxu0 %v14034_v24  ;;  %v8714_v24 = vld [vmem:[#allocation13 + $0x550] sm:$0xff] }
 0x830   :  { %v14087_v61 = vcombine.low %v8714_v24, %v8718_v55 }
 0x831   :  { %10315 = vmatpush1.bf16.msra.mxu1 %v14031_v47  ;;  %v14081_v47 = vcombine.low %v8707_v23, %v8711_v26  ;;  %v8759_v23 = vld [vmem:[#allocation13 + $0x6b8] sm:$0xff] }
 0x832   :  { %10397 = vmatpush1.bf16.msra.mxu0 %v14033_v31  ;;  %10316 = vmatprep.subr.bf16.mxu1 %v14040_v42  ;;  %v14088_v31 = vcombine.high %v8714_v24, %v8718_v55  ;;  %v14090_v42 = vcombine.high %v8715_v20, %v8719_v36  ;;  %v8766_v24 = vld [vmem:[#allocation13 + $0x6f0] sm:$0xff]  ;;  %v8763_v55 = vld [vmem:[#allocation13 + $0x6d8] sm:$0xff] }
 0x833   :  { %10398 = vmatprep.subr.bf16.mxu0 %v14042_v43  ;;  %v8722_v43 = vld [vmem:[#allocation13 + $0x590] sm:$0xff] }
 0x834   :  { %v14095_v38 = vcombine.low %v8722_v43, %v8726_v44 }
 0x835   :  { %10317 = vmatpush1.bf16.msra.mxu1 %v14039_v2  ;;  %v14089_v2 = vcombine.low %v8715_v20, %v8719_v36  ;;  %v8767_v20 = vld [vmem:[#allocation13 + $0x6f8] sm:$0xff] }
 0x836   :  { %10399 = vmatpush1.bf16.msra.mxu0 %v14041_v29  ;;  %10327 = vmatprep.subr.bf16.mxu1 %v14048_v62  ;;  %v14096_v29 = vcombine.high %v8722_v43, %v8726_v44  ;;  %v14098_v62 = vcombine.high %v8723_v45, %v8727_v46  ;;  %v8774_v43 = vld [vmem:[#allocation13 + $0x730] sm:$0xff]  ;;  %v8771_v44 = vld [vmem:[#allocation13 + $0x718] sm:$0xff] }
 0x837   :  { %10409 = vmatprep.subr.bf16.mxu0 %v14050_v9  ;;  %v8730_v9 = vld [vmem:[#allocation13 + $0x5d0] sm:$0xff]  ;;  %v8775_v45 = vld [vmem:[#allocation13 + $0x738] sm:$0xff] }
 0x838   :  { %10319 = vmatmul.mubr.bf16.vlgmr.msra.gmra.mrb[36].mxu1 %v17740_v48  ;;  %v14103_v58 = vcombine.low %v8730_v9, %v8734_v5 }
 0x839   :  { %10401 = vmatmul.mubr.bf16.vlgmr.msra.gmra.mrb[40].mxu0 %v17740_v48  ;;  %10328 = vmatpush1.bf16.msra.mxu1 %v14047_v14  ;;  %v8735_v14 = vld [vmem:[#allocation13 + $0x5f8] sm:$0xff] }
 0x83a   :  { %10359 = vmatprep.mubr.bf16.mxu1 %v17744_v25  ;;  %10410 = vmatpush1.bf16.msra.mxu0 %v14049_v30  ;;  %v14104_v30 = vcombine.high %v8730_v9, %v8734_v5  ;;  %v8782_v9 = vld [vmem:[#allocation13 + $0x770] sm:$0xff]  ;;  %v8779_v5 = vld [vmem:[#allocation13 + $0x758] sm:$0xff] }
 0x83b   :  { %10441 = vmatprep.mubr.bf16.mxu0 %v17744_v25  ;;  %10329 = vmatprep.subr.bf16.mxu1 %v14056_v27  ;;  %v14106_v27 = vcombine.high %v8731_v52, %v8735_v14 }
 0x83c   :  { %10411 = vmatprep.subr.bf16.mxu0 %v14058_v10  ;;  %v8739_v10 = vld [vmem:[#allocation13 + $0x618] sm:$0xff] }
 0x83d   :  { %10330 = vmatpush1.bf16.msra.mxu1 %v14055_v34  ;;  %v14105_v34 = vcombine.low %v8731_v52, %v8735_v14  ;;  %v8783_v52 = vld [vmem:[#allocation13 + $0x778] sm:$0xff] }
 0x83e   :  { %10412 = vmatpush1.bf16.msra.mxu0 %v14057_v50  ;;  %10331 = vmatprep.subr.bf16.mxu1 %v14064_v51  ;;  %v14112_v50 = vcombine.high %v8738_v56, %v8742_v16  ;;  %v14114_v51 = vcombine.high %v8739_v10, %v8743_v17  ;;  %v8790_v56 = vld [vmem:[#allocation13 + $0x7b0] sm:$0xff]  ;;  %v8787_v16 = vld [vmem:[#allocation13 + $0x798] sm:$0xff] }
 0x83f   :  { %10413 = vmatprep.subr.bf16.mxu0 %v14066_v54  ;;  %v8746_v54 = vld [vmem:[#allocation13 + $0x650] sm:$0xff] }
 0x840   :  { %v14119_v26 = vcombine.low %v8746_v54, %v8750_v11 }
 0x841   :  { %10332 = vmatpush1.bf16.msra.mxu1 %v14063_v35  ;;  %v14113_v35 = vcombine.low %v8739_v10, %v8743_v17  ;;  %v8791_v10 = vld [vmem:[#allocation13 + $0x7b8] sm:$0xff] }
 0x842   :  { %10414 = vmatpush1.bf16.msra.mxu0 %v14065_v13  ;;  %10333 = vmatprep.subr.bf16.mxu1 %v14072_v57  ;;  %v14120_v13 = vcombine.high %v8746_v54, %v8750_v11  ;;  %v14122_v57 = vcombine.high %v8747_v39, %v8751_v12  ;;  %v8798_v54 = vld [vmem:[#allocation13 + $0x7f0] sm:$0xff]  ;;  %v8795_v11 = vld [vmem:[#allocation13 + $0x7d8] sm:$0xff] }
 0x843   :  { %10415 = vmatprep.subr.bf16.mxu0 %v14074_v53  ;;  %v8754_v53 = vld [vmem:[#allocation13 + $0x690] sm:$0xff] }
 0x844   :  { %v14127_v36 = vcombine.low %v8754_v53, %v8758_v21 }
 0x845   :  { %10334 = vmatpush1.bf16.msra.mxu1 %v14071_v28  ;;  %v14121_v28 = vcombine.low %v8747_v39, %v8751_v12  ;;  %v8799_v39 = vld [vmem:[#allocation13 + $0x7f8] sm:$0xff] }
 0x846   :  { %10416 = vmatpush1.bf16.msra.mxu0 %v14073_v32  ;;  %10335 = vmatprep.subr.bf16.mxu1 %v14080_v33  ;;  %v14128_v32 = vcombine.high %v8754_v53, %v8758_v21  ;;  %v14130_v33 = vcombine.high %v8755_v22, %v8759_v23  ;;  %v14169_v53 = vcombine.low %v8795_v11, %v8799_v39  ;;  %v16180_v21 = vld [vmem:[#allocation16 + $0x4] ss:$16 sps:$4 sm:$0xff]  }
 0x847   :  { %10417 = vmatprep.subr.bf16.mxu0 %v14082_v40  ;;  %v8762_v40 = vld [vmem:[#allocation13 + $0x6d0] sm:$0xff] }
 0x848   :  { %v14135_v46 = vcombine.low %v8762_v40, %v8766_v24 }
 0x849   :  { %10336 = vmatpush1.bf16.msra.mxu1 %v14079_v41  ;;  %v14129_v41 = vcombine.low %v8755_v22, %v8759_v23  ;;  %v16183_v22 = vld [vmem:[#allocation16 + $0xc] ss:$16 sps:$4 sm:$0xff]   ;;  %v16178_v23 = vld [vmem:[#allocation16] ss:$16 sps:$4 sm:$0xff]  }
 0x84a   :  { %10418 = vmatpush1.bf16.msra.mxu0 %v14081_v47  ;;  %10337 = vmatprep.subr.bf16.mxu1 %v14088_v31  ;;  %v14136_v47 = vcombine.high %v8762_v40, %v8766_v24  ;;  %v14138_v31 = vcombine.high %v8763_v55, %v8767_v20  ;;  %v16187_v40 = vld [vmem:[#allocation16 + $0x28] ss:$16 sps:$4 sm:$0xff]   ;;  %v16192_v24 = vld [vmem:[#allocation16 + $0x44] ss:$16 sps:$4 sm:$0xff]  }
 0x84b   :  { %10419 = vmatprep.subr.bf16.mxu0 %v14090_v42  ;;  %v8770_v42 = vld [vmem:[#allocation13 + $0x710] sm:$0xff] }
 0x84c   :  { %v14143_v14 = vcombine.low %v8770_v42, %v8774_v43 }
 0x84d   :  { %10338 = vmatpush1.bf16.msra.mxu1 %v14087_v61  ;;  %v14137_v61 = vcombine.low %v8763_v55, %v8767_v20  ;;  %v16195_v55 = vld [vmem:[#allocation16 + $0x4c] ss:$16 sps:$4 sm:$0xff]   ;;  %v16190_v20 = vld [vmem:[#allocation16 + $0x40] ss:$16 sps:$4 sm:$0xff]  }
 0x84e   :  { %10420 = vmatpush1.bf16.msra.mxu0 %v14089_v2  ;;  %10339 = vmatprep.subr.bf16.mxu1 %v14096_v29  ;;  %v14144_v2 = vcombine.high %v8770_v42, %v8774_v43  ;;  %v14146_v29 = vcombine.high %v8771_v44, %v8775_v45  ;;  %v16199_v42 = vld [vmem:[#allocation16 + $0x68] ss:$16 sps:$4 sm:$0xff]   ;;  %v16204_v43 = vld [vmem:[#allocation16 + $0x84] ss:$16 sps:$4 sm:$0xff]  }
 0x84f   :  { %10421 = vmatprep.subr.bf16.mxu0 %v14098_v62  ;;  %v8778_v62 = vld [vmem:[#allocation13 + $0x750] sm:$0xff] }
 0x850   :  { %v14151_v17 = vcombine.low %v8778_v62, %v8782_v9 }
 0x851   :  { %10340 = vmatpush1.bf16.msra.mxu1 %v14095_v38  ;;  %v14145_v38 = vcombine.low %v8771_v44, %v8775_v45  ;;  %v16207_v44 = vld [vmem:[#allocation16 + $0x8c] ss:$16 sps:$4 sm:$0xff]   ;;  %v16202_v45 = vld [vmem:[#allocation16 + $0x80] ss:$16 sps:$4 sm:$0xff]  }
 0x852   :  { %10422 = vmatpush1.bf16.msra.mxu0 %v14097_v7  ;;  %10341 = vmatprep.subr.bf16.mxu1 %v14104_v30  ;;  %v14152_v7 = vcombine.high %v8778_v62, %v8782_v9  ;;  %v14154_v30 = vcombine.high %v8779_v5, %v8783_v52  ;;  %v16211_v62 = vld [vmem:[#allocation16 + $0xa8] ss:$16 sps:$4 sm:$0xff]   ;;  %v16216_v9 = vld [vmem:[#allocation16 + $0xc4] ss:$16 sps:$4 sm:$0xff]  }
 0x853   :  { %10423 = vmatprep.subr.bf16.mxu0 %v14106_v27  ;;  %v8786_v27 = vld [vmem:[#allocation13 + $0x790] sm:$0xff] }
 0x854   :  { %v14159_v12 = vcombine.low %v8786_v27, %v8790_v56 }
 0x855   :  { %10342 = vmatpush1.bf16.msra.mxu1 %v14103_v58  ;;  %v14153_v58 = vcombine.low %v8779_v5, %v8783_v52  ;;  %v16219_v5 = vld [vmem:[#allocation16 + $0xcc] ss:$16 sps:$4 sm:$0xff]   ;;  %v16214_v52 = vld [vmem:[#allocation16 + $0xc0] ss:$16 sps:$4 sm:$0xff]  }
 0x856   :  { %10424 = vmatpush1.bf16.msra.mxu0 %v14105_v34  ;;  %10343 = vmatprep.subr.bf16.mxu1 %v14112_v50  ;;  %v14160_v34 = vcombine.high %v8786_v27, %v8790_v56  ;;  %v14162_v50 = vcombine.high %v8787_v16, %v8791_v10  ;;  %v16223_v27 = vld [vmem:[#allocation16 + $0xe8] ss:$16 sps:$4 sm:$0xff]   ;;  %v16228_v56 = vld [vmem:[#allocation16 + $0x104] ss:$16 sps:$4 sm:$0xff]  }
 0x857   :  { %10425 = vmatprep.subr.bf16.mxu0 %v14114_v51  ;;  %v8794_v51 = vld [vmem:[#allocation13 + $0x7d0] sm:$0xff] }
 0x859   :  { %10344 = vmatpush1.bf16.msra.mxu1 %v14111_v19  ;;  %v14161_v19 = vcombine.low %v8787_v16, %v8791_v10  ;;  %v16231_v16 = vld [vmem:[#allocation16 + $0x10c] ss:$16 sps:$4 sm:$0xff]   ;;  %v16226_v10 = vld [vmem:[#allocation16 + $0x100] ss:$16 sps:$4 sm:$0xff]  }
 0x85a   :  { %10426 = vmatpush1.bf16.msra.mxu0 %v14113_v35  ;;  %10345 = vmatprep.subr.bf16.mxu1 %v14120_v13  ;;  %v14168_v35 = vcombine.high %v8794_v51, %v8798_v54  ;;  %v14170_v13 = vcombine.high %v8795_v11, %v8799_v39  ;;  %v16243_v11 = vld [vmem:[#allocation16 + $0x14c] ss:$16 sps:$4 sm:$0xff]   ;;  %v16238_v39 = vld [vmem:[#allocation16 + $0x140] ss:$16 sps:$4 sm:$0xff]  }
 0x85b   :  { %10427 = vmatprep.subr.bf16.mxu0 %v14122_v57  ;;  %v14167_v57 = vcombine.low %v8794_v51, %v8798_v54  ;;  %v16235_v51 = vld [vmem:[#allocation16 + $0x128] ss:$16 sps:$4 sm:$0xff]   ;;  %v16240_v54 = vld [vmem:[#allocation16 + $0x144] ss:$16 sps:$4 sm:$0xff]  }
 0x85d   :  { %10346 = vmatpush1.bf16.msra.mxu1 %v14119_v26  ;;  %v16181_v26 = vld [vmem:[#allocation16 + $0x8] ss:$16 sps:$4 sm:$0xff]  }
 0x85e   :  { %10428 = vmatpush1.bf16.msra.mxu0 %v14121_v28  ;;  %10347 = vmatprep.subr.bf16.mxu1 %v14128_v32  ;;  %v16186_v28 = vld [vmem:[#allocation16 + $0x24] ss:$16 sps:$4 sm:$0xff]   ;;  %v16189_v32 = vld [vmem:[#allocation16 + $0x2c] ss:$16 sps:$4 sm:$0xff]  }
 0x85f   :  { %10429 = vmatprep.subr.bf16.mxu0 %v14130_v33  ;;  %v16184_v33 = vld [vmem:[#allocation16 + $0x20] ss:$16 sps:$4 sm:$0xff]  }
 0x861   :  { %10348 = vmatpush1.bf16.msra.mxu1 %v14127_v36  ;;  %v16193_v36 = vld [vmem:[#allocation16 + $0x48] ss:$16 sps:$4 sm:$0xff]  }
 0x862   :  { %10430 = vmatpush1.bf16.msra.mxu0 %v14129_v41  ;;  %10349 = vmatprep.subr.bf16.mxu1 %v14136_v47  ;;  %v16198_v41 = vld [vmem:[#allocation16 + $0x64] ss:$16 sps:$4 sm:$0xff]   ;;  %v16201_v47 = vld [vmem:[#allocation16 + $0x6c] ss:$16 sps:$4 sm:$0xff]  }
 0x863   :  { %10431 = vmatprep.subr.bf16.mxu0 %v14138_v31  ;;  %v16196_v31 = vld [vmem:[#allocation16 + $0x60] ss:$16 sps:$4 sm:$0xff]  }
 0x865   :  { %10350 = vmatpush1.bf16.msra.mxu1 %v14135_v46  ;;  %v16205_v46 = vld [vmem:[#allocation16 + $0x88] ss:$16 sps:$4 sm:$0xff]  }
 0x866   :  { %10432 = vmatpush1.bf16.msra.mxu0 %v14137_v61  ;;  %10351 = vmatprep.subr.bf16.mxu1 %v14144_v2  ;;  %v16210_v61 = vld [vmem:[#allocation16 + $0xa4] ss:$16 sps:$4 sm:$0xff]   ;;  %v16213_v2 = vld [vmem:[#allocation16 + $0xac] ss:$16 sps:$4 sm:$0xff]  }
 0x867   :  { %10433 = vmatprep.subr.bf16.mxu0 %v14146_v29  ;;  %v16208_v29 = vld [vmem:[#allocation16 + $0xa0] ss:$16 sps:$4 sm:$0xff]  }
 0x869   :  { %10352 = vmatpush1.bf16.msra.mxu1 %v14143_v14  ;;  %v16217_v14 = vld [vmem:[#allocation16 + $0xc8] ss:$16 sps:$4 sm:$0xff]  }
 0x86a   :  { %10434 = vmatpush1.bf16.msra.mxu0 %v14145_v38  ;;  %10353 = vmatprep.subr.bf16.mxu1 %v14152_v7  ;;  %v16222_v38 = vld [vmem:[#allocation16 + $0xe4] ss:$16 sps:$4 sm:$0xff]   ;;  %v16225_v7 = vld [vmem:[#allocation16 + $0xec] ss:$16 sps:$4 sm:$0xff]  }
 0x86b   :  { %10435 = vmatprep.subr.bf16.mxu0 %v14154_v30  ;;  %v16220_v30 = vld [vmem:[#allocation16 + $0xe0] ss:$16 sps:$4 sm:$0xff]  }
 0x86d   :  { %10354 = vmatpush1.bf16.msra.mxu1 %v14151_v17  ;;  %v16229_v17 = vld [vmem:[#allocation16 + $0x108] ss:$16 sps:$4 sm:$0xff]  }
 0x86e   :  { %10436 = vmatpush1.bf16.msra.mxu0 %v14153_v58  ;;  %10355 = vmatprep.subr.bf16.mxu1 %v14160_v34  ;;  %v16234_v58 = vld [vmem:[#allocation16 + $0x124] ss:$16 sps:$4 sm:$0xff]   ;;  %v16237_v34 = vld [vmem:[#allocation16 + $0x12c] ss:$16 sps:$4 sm:$0xff]  }
 0x86f   :  { %10437 = vmatprep.subr.bf16.mxu0 %v14162_v50  ;;  %v16232_v50 = vld [vmem:[#allocation16 + $0x120] ss:$16 sps:$4 sm:$0xff]  }
 0x871   :  { %10356 = vmatpush1.bf16.msra.mxu1 %v14159_v12  ;;  %v16241_v12 = vld [vmem:[#allocation16 + $0x148] ss:$16 sps:$4 sm:$0xff]  }
 0x872   :  { %10438 = vmatpush1.bf16.msra.mxu0 %v14161_v19  ;;  %10357 = vmatprep.subr.bf16.mxu1 %v14168_v35  ;;  %v16246_v19 = vld [vmem:[#allocation16 + $0x164] ss:$16 sps:$4 sm:$0xff]   ;;  %v16249_v35 = vld [vmem:[#allocation16 + $0x16c] ss:$16 sps:$4 sm:$0xff]  }
 0x873   :  { %10439 = vmatprep.subr.bf16.mxu0 %v14170_v13  ;;  %v16244_v13 = vld [vmem:[#allocation16 + $0x160] ss:$16 sps:$4 sm:$0xff]  }
 0x875   :  { %10358 = vmatpush1.bf16.msra.mxu1 %v14167_v57  ;;  %v16247_v57 = vld [vmem:[#allocation16 + $0x168] ss:$16 sps:$4 sm:$0xff]  }
 0x876   :  { %10440 = vmatpush1.bf16.msra.mxu0 %v14169_v53  ;;  %12024 = vmatprep.subr.bf16.mxu1 %v16180_v21  ;;  %v16252_v53 = vld [vmem:[#allocation16 + $0x184] ss:$16 sps:$4 sm:$0xff]   ;;  %v16255_v21 = vld [vmem:[#allocation16 + $0x18c] ss:$16 sps:$4 sm:$0xff]  }
 0x877   :  { %12188 = vmatprep.subr.bf16.mxu0 %v16183_v22  ;;  %v16250_v22 = vld [vmem:[#allocation16 + $0x180] ss:$16 sps:$4 sm:$0xff]  }
 0x878   :  { %10360 = vmatmul.mubr.bf16.vlgmr.msra.gmra.mrb[36].mxu1 %v17752_v18 }
 0x879   :  { %10442 = vmatmul.mubr.bf16.vlgmr.msra.gmra.mrb[40].mxu0 %v17752_v18  ;;  %12025 = vmatpush1.bf16.msra.mxu1 %v16178_v23  ;;  %v16253_v23 = vld [vmem:[#allocation16 + $0x188] ss:$16 sps:$4 sm:$0xff]  }
 0x87a   :  { %12189 = vmatpush1.bf16.msra.mxu0 %v16181_v26  ;;  %12026 = vmatprep.subr.bf16.mxu1 %v16186_v28  ;;  %v16258_v26 = vld [vmem:[#allocation16 + $0x1a4] ss:$16 sps:$4 sm:$0xff]   ;;  %v16261_v28 = vld [vmem:[#allocation16 + $0x1ac] ss:$16 sps:$4 sm:$0xff]  }
 0x87b   :  { %12190 = vmatprep.subr.bf16.mxu0 %v16189_v32  ;;  %v16256_v32 = vld [vmem:[#allocation16 + $0x1a0] ss:$16 sps:$4 sm:$0xff]  }
 0x87d   :  { %12027 = vmatpush1.bf16.msra.mxu1 %v16184_v33  ;;  %v16259_v33 = vld [vmem:[#allocation16 + $0x1a8] ss:$16 sps:$4 sm:$0xff]  }
 0x87e   :  { %12191 = vmatpush1.bf16.msra.mxu0 %v16187_v40  ;;  %12028 = vmatprep.subr.bf16.mxu1 %v16192_v24  ;;  %v16264_v40 = vld [vmem:[#allocation16 + $0x1c4] ss:$16 sps:$4 sm:$0xff]   ;;  %v16267_v24 = vld [vmem:[#allocation16 + $0x1cc] ss:$16 sps:$4 sm:$0xff]  }
 0x87f   :  { %12192 = vmatprep.subr.bf16.mxu0 %v16195_v55  ;;  %v16262_v55 = vld [vmem:[#allocation16 + $0x1c0] ss:$16 sps:$4 sm:$0xff]  }
 0x881   :  { %12029 = vmatpush1.bf16.msra.mxu1 %v16190_v20  ;;  %v16265_v20 = vld [vmem:[#allocation16 + $0x1c8] ss:$16 sps:$4 sm:$0xff]  }
 0x882   :  { %12193 = vmatpush1.bf16.msra.mxu0 %v16193_v36  ;;  %12030 = vmatprep.subr.bf16.mxu1 %v16198_v41  ;;  %v16270_v36 = vld [vmem:[#allocation16 + $0x1e4] ss:$16 sps:$4 sm:$0xff]   ;;  %v16273_v41 = vld [vmem:[#allocation16 + $0x1ec] ss:$16 sps:$4 sm:$0xff]  }
 0x883   :  { %12194 = vmatprep.subr.bf16.mxu0 %v16201_v47  ;;  %v16268_v47 = vld [vmem:[#allocation16 + $0x1e0] ss:$16 sps:$4 sm:$0xff]  }
 0x885   :  { %12031 = vmatpush1.bf16.msra.mxu1 %v16196_v31  ;;  %v16271_v31 = vld [vmem:[#allocation16 + $0x1e8] ss:$16 sps:$4 sm:$0xff]  }
 0x886   :  { %12195 = vmatpush1.bf16.msra.mxu0 %v16199_v42  ;;  %12032 = vmatprep.subr.bf16.mxu1 %v16204_v43  ;;  %v16276_v42 = vld [vmem:[#allocation16 + $0x204] ss:$16 sps:$4 sm:$0xff]   ;;  %v16279_v43 = vld [vmem:[#allocation16 + $0x20c] ss:$16 sps:$4 sm:$0xff]  }
 0x887   :  { %12196 = vmatprep.subr.bf16.mxu0 %v16207_v44  ;;  %v17764_v44 = vld [vmem:[#allocation14] sm:$0xff] }
 0x889   :  { %12033 = vmatpush1.bf16.msra.mxu1 %v16202_v45  ;;  %v8805_v45 = vrot.slane %v17764_v44, %v17544_v1 }
 0x88a   :  { %12197 = vmatpush1.bf16.msra.mxu0 %v16205_v46  ;;  %12034 = vmatprep.subr.bf16.mxu1 %v16210_v61  ;;  %v8809_v46 = vrot.slane %v17764_v44, %v17549_v3  ;;  %v8817_v61 = vrot.slane %v17764_v44, %v17552_v4 }
 0x88b   :  { %12198 = vmatprep.subr.bf16.mxu0 %v16213_v2 }
 0x88d   :  { %12035 = vmatpush1.bf16.msra.mxu1 %v16208_v29 }
 0x88e   :  { %12199 = vmatpush1.bf16.msra.mxu0 %v16211_v62  ;;  %12036 = vmatprep.subr.bf16.mxu1 %v16216_v9 }
 0x88f   :  { %12200 = vmatprep.subr.bf16.mxu0 %v16219_v5 }
 0x891   :  { %12037 = vmatpush1.bf16.msra.mxu1 %v16214_v52 }
 0x892   :  { %12201 = vmatpush1.bf16.msra.mxu0 %v16217_v14  ;;  %12038 = vmatprep.subr.bf16.mxu1 %v16222_v38 }
 0x893   :  { %12202 = vmatprep.subr.bf16.mxu0 %v16225_v7 }
 0x895   :  { %12039 = vmatpush1.bf16.msra.mxu1 %v16220_v30 }
 0x896   :  { %12203 = vmatpush1.bf16.msra.mxu0 %v16223_v27  ;;  %12040 = vmatprep.subr.bf16.mxu1 %v16228_v56 }
 0x897   :  { %12204 = vmatprep.subr.bf16.mxu0 %v16231_v16 }
 0x899   :  { %12041 = vmatpush1.bf16.msra.mxu1 %v16226_v10 }
 0x89a   :  { %12205 = vmatpush1.bf16.msra.mxu0 %v16229_v17  ;;  %12042 = vmatprep.subr.bf16.mxu1 %v16234_v58  ;;  %v16274_v58 = vld [vmem:[#allocation16 + $0x200] ss:$16 sps:$4 sm:$0xff]  }
 0x89b   :  { %12206 = vmatprep.subr.bf16.mxu0 %v16237_v34  ;;  %v16277_v34 = vld [vmem:[#allocation16 + $0x208] ss:$16 sps:$4 sm:$0xff]  }
 0x89d   :  { %12043 = vmatpush1.bf16.msra.mxu1 %v16232_v50 }
 0x89e   :  { %12207 = vmatpush1.bf16.msra.mxu0 %v16235_v51  ;;  %12044 = vmatprep.subr.bf16.mxu1 %v16240_v54  ;;  %v16282_v51 = vld [vmem:[#allocation16 + $0x224] ss:$16 sps:$4 sm:$0xff]   ;;  %v16285_v54 = vld [vmem:[#allocation16 + $0x22c] ss:$16 sps:$4 sm:$0xff]  }
 0x89f   :  { %12208 = vmatprep.subr.bf16.mxu0 %v16243_v11 }
 0x8a1   :  { %12045 = vmatpush1.bf16.msra.mxu1 %v16238_v39  ;;  %v16280_v39 = vld [vmem:[#allocation16 + $0x220] ss:$16 sps:$4 sm:$0xff]  }
 0x8a2   :  { %12209 = vmatpush1.bf16.msra.mxu0 %v16241_v12  ;;  %12046 = vmatprep.subr.bf16.mxu1 %v16246_v19  ;;  %v16283_v12 = vld [vmem:[#allocation16 + $0x228] ss:$16 sps:$4 sm:$0xff]   ;;  %v16288_v19 = vld [vmem:[#allocation16 + $0x244] ss:$16 sps:$4 sm:$0xff]  }
 0x8a3   :  { %12210 = vmatprep.subr.bf16.mxu0 %v16249_v35  ;;  %v16291_v35 = vld [vmem:[#allocation16 + $0x24c] ss:$16 sps:$4 sm:$0xff]  }
 0x8a5   :  { %12047 = vmatpush1.bf16.msra.mxu1 %v16244_v13  ;;  %v16286_v13 = vld [vmem:[#allocation16 + $0x240] ss:$16 sps:$4 sm:$0xff]  }
 0x8a6   :  { %12211 = vmatpush1.bf16.msra.mxu0 %v16247_v57  ;;  %12048 = vmatprep.subr.bf16.mxu1 %v16252_v53  ;;  %v16289_v57 = vld [vmem:[#allocation16 + $0x248] ss:$16 sps:$4 sm:$0xff]   ;;  %v16294_v53 = vld [vmem:[#allocation16 + $0x264] ss:$16 sps:$4 sm:$0xff]  }
 0x8a7   :  { %12212 = vmatprep.subr.bf16.mxu0 %v16255_v21  ;;  %v16297_v21 = vld [vmem:[#allocation16 + $0x26c] ss:$16 sps:$4 sm:$0xff]  }
 0x8a9   :  { %12049 = vmatpush1.bf16.msra.mxu1 %v16250_v22  ;;  %v16292_v22 = vld [vmem:[#allocation16 + $0x260] ss:$16 sps:$4 sm:$0xff]  }
 0x8aa   :  { %12213 = vmatpush1.bf16.msra.mxu0 %v16253_v23  ;;  %12050 = vmatprep.subr.bf16.mxu1 %v16258_v26  ;;  %v16295_v23 = vld [vmem:[#allocation16 + $0x268] ss:$16 sps:$4 sm:$0xff]   ;;  %v16300_v26 = vld [vmem:[#allocation16 + $0x284] ss:$16 sps:$4 sm:$0xff]  }
 0x8ab   :  { %12214 = vmatprep.subr.bf16.mxu0 %v16261_v28  ;;  %v16303_v28 = vld [vmem:[#allocation16 + $0x28c] ss:$16 sps:$4 sm:$0xff]  }
 0x8ad   :  { %12051 = vmatpush1.bf16.msra.mxu1 %v16256_v32  ;;  %v16298_v32 = vld [vmem:[#allocation16 + $0x280] ss:$16 sps:$4 sm:$0xff]  }
 0x8ae   :  { %12215 = vmatpush1.bf16.msra.mxu0 %v16259_v33  ;;  %12052 = vmatprep.subr.bf16.mxu1 %v16264_v40  ;;  %v16301_v33 = vld [vmem:[#allocation16 + $0x288] ss:$16 sps:$4 sm:$0xff]   ;;  %v16306_v40 = vld [vmem:[#allocation16 + $0x2a4] ss:$16 sps:$4 sm:$0xff]  }
 0x8af   :  { %12216 = vmatprep.subr.bf16.mxu0 %v16267_v24  ;;  %v16309_v24 = vld [vmem:[#allocation16 + $0x2ac] ss:$16 sps:$4 sm:$0xff]  }
 0x8b1   :  { %12053 = vmatpush1.bf16.msra.mxu1 %v16262_v55  ;;  %v16304_v55 = vld [vmem:[#allocation16 + $0x2a0] ss:$16 sps:$4 sm:$0xff]  }
 0x8b2   :  { %12217 = vmatpush1.bf16.msra.mxu0 %v16265_v20  ;;  %12054 = vmatprep.subr.bf16.mxu1 %v16270_v36  ;;  %v16307_v20 = vld [vmem:[#allocation16 + $0x2a8] ss:$16 sps:$4 sm:$0xff]   ;;  %v16312_v36 = vld [vmem:[#allocation16 + $0x2c4] ss:$16 sps:$4 sm:$0xff]  }
 0x8b3   :  { %12218 = vmatprep.subr.bf16.mxu0 %v16273_v41  ;;  %v16315_v41 = vld [vmem:[#allocation16 + $0x2cc] ss:$16 sps:$4 sm:$0xff]  }
 0x8b5   :  { %12055 = vmatpush1.bf16.msra.mxu1 %v16268_v47  ;;  %v16310_v47 = vld [vmem:[#allocation16 + $0x2c0] ss:$16 sps:$4 sm:$0xff]  }
 0x8b6   :  { %12219 = vmatpush1.bf16.msra.mxu0 %v16271_v31  ;;  %12065 = vmatprep.subr.bf16.mxu1 %v16276_v42  ;;  %v16313_v31 = vld [vmem:[#allocation16 + $0x2c8] ss:$16 sps:$4 sm:$0xff]   ;;  %v16318_v42 = vld [vmem:[#allocation16 + $0x2e4] ss:$16 sps:$4 sm:$0xff]  }
 0x8b7   :  { %12229 = vmatprep.subr.bf16.mxu0 %v16279_v43  ;;  %v16321_v43 = vld [vmem:[#allocation16 + $0x2ec] ss:$16 sps:$4 sm:$0xff]  }
 0x8cb   :  { %v10197_v2 = vpop.f32.mrb[32].mxu1  ;;  %v17772_v29 = vpop.f32.mrb[36].mxu0 }
 0x8cc   :  { %v14516_v62 = vadd.f32 %v10197_v2, %v8805_v45  ;;  %v10199_v9 = vpop.f32.mrb[33].mxu1  ;;  %v10281_v5 = vpop.f32.mrb[37].mxu0  ;;  %v16316_v45 = vld [vmem:[#allocation16 + $0x2e0] ss:$16 sps:$4 sm:$0xff]   ;;  %v16327_v2 = vld [vmem:[#allocation16 + $0x30c] ss:$16 sps:$4 sm:$0xff]  }
 0x8cd   :  { %v14517_v52 = vadd.f32 %v10199_v9, %v8809_v46  ;;  %v14519_v14 = vadd.f32 %v10281_v5, %v8817_v61  ;;  %v10201_v38 = vpop.f32.mrb[34].mxu1  ;;  %v10283_v7 = vpop.f32.mrb[38].mxu0  ;;  %v16319_v46 = vld [vmem:[#allocation16 + $0x2e8] ss:$16 sps:$4 sm:$0xff]   ;;  %v16324_v61 = vld [vmem:[#allocation16 + $0x304] ss:$16 sps:$4 sm:$0xff]  }
 0x8ce   :  { %v10450_v30 = vmax.f32 %v14516_v62, 0.0  ;;  %v10202_v27 = vpop.f32.mrb[35].mxu1  ;;  %v10284_v56 = vpop.f32.mrb[39].mxu0  ;;  %v16322_v62 = vld [vmem:[#allocation16 + $0x300] ss:$16 sps:$4 sm:$0xff]  }
 0x8cf   :  { %v10451_v16 = vmax.f32 %v14517_v52, 0.0  ;;  %v10453_v10 = vmax.f32 %v14519_v14, 0.0  ;;  %v16325_v9 = vld [vmem:[#allocation16 + $0x308] ss:$16 sps:$4 sm:$0xff]   ;;  %v16330_v5 = vld [vmem:[#allocation16 + $0x324] ss:$16 sps:$4 sm:$0xff]  }
 0x8d0   :  { %v10458_v50 = vpack.c.bf16 %v10450_v30, %v10450_v30  ;;  %v16333_v52 = vld [vmem:[#allocation16 + $0x32c] ss:$16 sps:$4 sm:$0xff]   ;;  %v16328_v14 = vld [vmem:[#allocation16 + $0x320] ss:$16 sps:$4 sm:$0xff]   ;;  %v16331_v38 = vld [vmem:[#allocation16 + $0x328] ss:$16 sps:$4 sm:$0xff]  }
 0x8d1   :  { %v10459_v17 = vpack.c.bf16 %v10451_v16, %v10451_v16  ;;  %v10461_v11 = vpack.c.bf16 %v10453_v10, %v10453_v10  ;;  %v16336_v7 = vld [vmem:[#allocation16 + $0x344] ss:$16 sps:$4 sm:$0xff]   ;;  %v16339_v30 = vld [vmem:[#allocation16 + $0x34c] ss:$16 sps:$4 sm:$0xff]   ;;  %v16334_v27 = vld [vmem:[#allocation16 + $0x340] ss:$16 sps:$4 sm:$0xff]  }
 0x8d2   :  { %v16337_v56 = vld [vmem:[#allocation16 + $0x348] ss:$16 sps:$4 sm:$0xff]   ;;  %v16342_v16 = vld [vmem:[#allocation16 + $0x364] ss:$16 sps:$4 sm:$0xff]   ;;  %v16345_v10 = vld [vmem:[#allocation16 + $0x36c] ss:$16 sps:$4 sm:$0xff]  }
 0x8d3   :  { %12056 = vmatprep.mubr.bf16.mxu1 %v10459_v17  ;;  %12220 = vmatprep.mubr.bf16.mxu0 %v10459_v17  ;;  %v16340_v17 = vld [vmem:[#allocation16 + $0x360] ss:$16 sps:$4 sm:$0xff]  }
 0x8d4   :  { %12057 = vmatmul.mubr.bf16.vlgmr.msra.gmra.mrb[40].mxu1 %v10458_v50  ;;  %12221 = vmatmul.mubr.bf16.vlgmr.msra.gmra.mrb[44].mxu0 %v10458_v50  ;;  %v16351_v50 = vld [vmem:[#allocation16 + $0x38c] ss:$16 sps:$4 sm:$0xff]  }
 0x8d5   :  { %12066 = vmatpush1.bf16.msra.mxu1 %v16274_v58  ;;  %12230 = vmatpush1.bf16.msra.mxu0 %v16277_v34  ;;  %v16343_v58 = vld [vmem:[#allocation16 + $0x368] ss:$16 sps:$4 sm:$0xff]   ;;  %v16348_v34 = vld [vmem:[#allocation16 + $0x384] ss:$16 sps:$4 sm:$0xff]  }
 0x8d6   :  { %12097 = vmatprep.mubr.bf16.mxu1 %v10461_v11  ;;  %12261 = vmatprep.mubr.bf16.mxu0 %v10461_v11  ;;  %v16354_v11 = vld [vmem:[#allocation16 + $0x3a4] ss:$16 sps:$4 sm:$0xff]  }
 0x8d7   :  { %12067 = vmatprep.subr.bf16.mxu1 %v16282_v51  ;;  %12231 = vmatprep.subr.bf16.mxu0 %v16285_v54  ;;  %v16346_v51 = vld [vmem:[#allocation16 + $0x380] ss:$16 sps:$4 sm:$0xff]   ;;  %v16349_v54 = vld [vmem:[#allocation16 + $0x388] ss:$16 sps:$4 sm:$0xff]  }
 0x8d9   :  { %12068 = vmatpush1.bf16.msra.mxu1 %v16280_v39  ;;  %12232 = vmatpush1.bf16.msra.mxu0 %v16283_v12  ;;  %v16357_v39 = vld [vmem:[#allocation16 + $0x3ac] ss:$16 sps:$4 sm:$0xff]   ;;  %v16352_v12 = vld [vmem:[#allocation16 + $0x3a0] ss:$16 sps:$4 sm:$0xff]  }
 0x8da   :  { %12069 = vmatprep.subr.bf16.mxu1 %v16288_v19  ;;  %12233 = vmatprep.subr.bf16.mxu0 %v16291_v35  ;;  %v16355_v19 = vld [vmem:[#allocation16 + $0x3a8] ss:$16 sps:$4 sm:$0xff]   ;;  %v8813_v35 = vrot.slane %v17764_v44, %v17571_v15 }
 0x8dd   :  { %12070 = vmatpush1.bf16.msra.mxu1 %v16286_v13  ;;  %12234 = vmatpush1.bf16.msra.mxu0 %v16289_v57  ;;  %v16360_v13 = vld [vmem:[#allocation16 + $0x3c4] ss:$16 sps:$4 sm:$0xff]   ;;  %v16363_v57 = vld [vmem:[#allocation16 + $0x3cc] ss:$16 sps:$4 sm:$0xff]  }
 0x8de   :  { %12071 = vmatprep.subr.bf16.mxu1 %v16294_v53  ;;  %12235 = vmatprep.subr.bf16.mxu0 %v16297_v21  ;;  %v16358_v53 = vld [vmem:[#allocation16 + $0x3c0] ss:$16 sps:$4 sm:$0xff]   ;;  %v16361_v21 = vld [vmem:[#allocation16 + $0x3c8] ss:$16 sps:$4 sm:$0xff]  }
 0x8e1   :  { %12072 = vmatpush1.bf16.msra.mxu1 %v16292_v22  ;;  %12236 = vmatpush1.bf16.msra.mxu0 %v16295_v23  ;;  %v14518_v22 = vadd.f32 %v17772_v29, %v8813_v35  ;;  %v16366_v23 = vld [vmem:[#allocation16 + $0x3e4] ss:$16 sps:$4 sm:$0xff]  }
 0x8e2   :  { %12073 = vmatprep.subr.bf16.mxu1 %v16300_v26  ;;  %12237 = vmatprep.subr.bf16.mxu0 %v16303_v28  ;;  %v16369_v26 = vld [vmem:[#allocation16 + $0x3ec] ss:$16 sps:$4 sm:$0xff]   ;;  %v16364_v28 = vld [vmem:[#allocation16 + $0x3e0] ss:$16 sps:$4 sm:$0xff]   ;;  %v16378_v29 = vld [vmem:[#allocation16 + $0x424] ss:$16 sps:$4 sm:$0xff]  }
 0x8e3   :  { %v16426_v35 = vld [vmem:[#allocation16 + $0x524] ss:$16 sps:$4 sm:$0xff]  }
 0x8e5   :  { %12074 = vmatpush1.bf16.msra.mxu1 %v16298_v32  ;;  %12238 = vmatpush1.bf16.msra.mxu0 %v16301_v33  ;;  %v16367_v32 = vld [vmem:[#allocation16 + $0x3e8] ss:$16 sps:$4 sm:$0xff]   ;;  %v10452_v33 = vmax.f32 %v14518_v22, 0.0  ;;  %v16435_v22 = vld [vmem:[#allocation16 + $0x54c] ss:$16 sps:$4 sm:$0xff]  }
 0x8e6   :  { %12075 = vmatprep.subr.bf16.mxu1 %v16306_v40  ;;  %12239 = vmatprep.subr.bf16.mxu0 %v16309_v24  ;;  %v16372_v40 = vld [vmem:[#allocation16 + $0x404] ss:$16 sps:$4 sm:$0xff]   ;;  %v16375_v24 = vld [vmem:[#allocation16 + $0x40c] ss:$16 sps:$4 sm:$0xff]  }
 0x8e9   :  { %12076 = vmatpush1.bf16.msra.mxu1 %v16304_v55  ;;  %12240 = vmatpush1.bf16.msra.mxu0 %v16307_v20  ;;  %v16370_v55 = vld [vmem:[#allocation16 + $0x400] ss:$16 sps:$4 sm:$0xff]   ;;  %v16373_v20 = vld [vmem:[#allocation16 + $0x408] ss:$16 sps:$4 sm:$0xff]  }
 0x8ea   :  { %12077 = vmatprep.subr.bf16.mxu1 %v16312_v36  ;;  %12241 = vmatprep.subr.bf16.mxu0 %v16315_v41  ;;  %v10460_v36 = vpack.c.bf16 %v10452_v33, %v10452_v33  ;;  %v16381_v41 = vld [vmem:[#allocation16 + $0x42c] ss:$16 sps:$4 sm:$0xff]   ;;  %v16436_v33 = vld [vmem:[#allocation16 + $0x560] ss:$16 sps:$4 sm:$0xff]  }
 0x8ed   :  { %12078 = vmatpush1.bf16.msra.mxu1 %v16310_v47  ;;  %12242 = vmatpush1.bf16.msra.mxu0 %v16313_v31  ;;  %v16376_v47 = vld [vmem:[#allocation16 + $0x420] ss:$16 sps:$4 sm:$0xff]   ;;  %v16379_v31 = vld [vmem:[#allocation16 + $0x428] ss:$16 sps:$4 sm:$0xff]  }
 0x8ee   :  { %12079 = vmatprep.subr.bf16.mxu1 %v16318_v42  ;;  %12243 = vmatprep.subr.bf16.mxu0 %v16321_v43  ;;  %v16384_v42 = vld [vmem:[#allocation16 + $0x444] ss:$16 sps:$4 sm:$0xff]   ;;  %v16387_v43 = vld [vmem:[#allocation16 + $0x44c] ss:$16 sps:$4 sm:$0xff]  }
 0x8f1   :  { %12080 = vmatpush1.bf16.msra.mxu1 %v16316_v45  ;;  %12244 = vmatpush1.bf16.msra.mxu0 %v16319_v46  ;;  %v16382_v45 = vld [vmem:[#allocation16 + $0x440] ss:$16 sps:$4 sm:$0xff]   ;;  %v16385_v46 = vld [vmem:[#allocation16 + $0x448] ss:$16 sps:$4 sm:$0xff]  }
 0x8f2   :  { %12081 = vmatprep.subr.bf16.mxu1 %v16324_v61  ;;  %12245 = vmatprep.subr.bf16.mxu0 %v16327_v2  ;;  %v16390_v61 = vld [vmem:[#allocation16 + $0x464] ss:$16 sps:$4 sm:$0xff]   ;;  %v16393_v2 = vld [vmem:[#allocation16 + $0x46c] ss:$16 sps:$4 sm:$0xff]  }
 0x8f5   :  { %12082 = vmatpush1.bf16.msra.mxu1 %v16322_v62  ;;  %12246 = vmatpush1.bf16.msra.mxu0 %v16325_v9  ;;  %v16388_v62 = vld [vmem:[#allocation16 + $0x460] ss:$16 sps:$4 sm:$0xff]   ;;  %v16391_v9 = vld [vmem:[#allocation16 + $0x468] ss:$16 sps:$4 sm:$0xff]  }
 0x8f6   :  { %12083 = vmatprep.subr.bf16.mxu1 %v16330_v5  ;;  %12247 = vmatprep.subr.bf16.mxu0 %v16333_v52  ;;  %v16396_v5 = vld [vmem:[#allocation16 + $0x484] ss:$16 sps:$4 sm:$0xff]   ;;  %v16399_v52 = vld [vmem:[#allocation16 + $0x48c] ss:$16 sps:$4 sm:$0xff]  }
 0x8f9   :  { %12084 = vmatpush1.bf16.msra.mxu1 %v16328_v14  ;;  %12248 = vmatpush1.bf16.msra.mxu0 %v16331_v38  ;;  %v16394_v14 = vld [vmem:[#allocation16 + $0x480] ss:$16 sps:$4 sm:$0xff]   ;;  %v16397_v38 = vld [vmem:[#allocation16 + $0x488] ss:$16 sps:$4 sm:$0xff]  }
 0x8fa   :  { %12085 = vmatprep.subr.bf16.mxu1 %v16336_v7  ;;  %12249 = vmatprep.subr.bf16.mxu0 %v16339_v30  ;;  %v16402_v7 = vld [vmem:[#allocation16 + $0x4a4] ss:$16 sps:$4 sm:$0xff]   ;;  %v16405_v30 = vld [vmem:[#allocation16 + $0x4ac] ss:$16 sps:$4 sm:$0xff]  }
 0x8fd   :  { %12086 = vmatpush1.bf16.msra.mxu1 %v16334_v27  ;;  %12250 = vmatpush1.bf16.msra.mxu0 %v16337_v56  ;;  %v16400_v27 = vld [vmem:[#allocation16 + $0x4a0] ss:$16 sps:$4 sm:$0xff]   ;;  %v16403_v56 = vld [vmem:[#allocation16 + $0x4a8] ss:$16 sps:$4 sm:$0xff]  }
 0x8fe   :  { %12087 = vmatprep.subr.bf16.mxu1 %v16342_v16  ;;  %12251 = vmatprep.subr.bf16.mxu0 %v16345_v10  ;;  %v16408_v16 = vld [vmem:[#allocation16 + $0x4c4] ss:$16 sps:$4 sm:$0xff]   ;;  %v16411_v10 = vld [vmem:[#allocation16 + $0x4cc] ss:$16 sps:$4 sm:$0xff]  }
 0x901   :  { %12088 = vmatpush1.bf16.msra.mxu1 %v16340_v17  ;;  %12252 = vmatpush1.bf16.msra.mxu0 %v16343_v58  ;;  %v16406_v17 = vld [vmem:[#allocation16 + $0x4c0] ss:$16 sps:$4 sm:$0xff]   ;;  %v16409_v58 = vld [vmem:[#allocation16 + $0x4c8] ss:$16 sps:$4 sm:$0xff]  }
 0x902   :  { %12089 = vmatprep.subr.bf16.mxu1 %v16348_v34  ;;  %12253 = vmatprep.subr.bf16.mxu0 %v16351_v50  ;;  %v16414_v34 = vld [vmem:[#allocation16 + $0x4e4] ss:$16 sps:$4 sm:$0xff]   ;;  %v16417_v50 = vld [vmem:[#allocation16 + $0x4ec] ss:$16 sps:$4 sm:$0xff]  }
 0x905   :  { %12090 = vmatpush1.bf16.msra.mxu1 %v16346_v51  ;;  %12254 = vmatpush1.bf16.msra.mxu0 %v16349_v54  ;;  %v16412_v51 = vld [vmem:[#allocation16 + $0x4e0] ss:$16 sps:$4 sm:$0xff]   ;;  %v16415_v54 = vld [vmem:[#allocation16 + $0x4e8] ss:$16 sps:$4 sm:$0xff]  }
 0x906   :  { %12091 = vmatprep.subr.bf16.mxu1 %v16354_v11  ;;  %12255 = vmatprep.subr.bf16.mxu0 %v16357_v39  ;;  %v16420_v11 = vld [vmem:[#allocation16 + $0x504] ss:$16 sps:$4 sm:$0xff]   ;;  %v16423_v39 = vld [vmem:[#allocation16 + $0x50c] ss:$16 sps:$4 sm:$0xff]  }
 0x909   :  { %12092 = vmatpush1.bf16.msra.mxu1 %v16352_v12  ;;  %12256 = vmatpush1.bf16.msra.mxu0 %v16355_v19  ;;  %v16418_v12 = vld [vmem:[#allocation16 + $0x500] ss:$16 sps:$4 sm:$0xff]   ;;  %v16421_v19 = vld [vmem:[#allocation16 + $0x508] ss:$16 sps:$4 sm:$0xff]  }
 0x90a   :  { %12093 = vmatprep.subr.bf16.mxu1 %v16360_v13  ;;  %12257 = vmatprep.subr.bf16.mxu0 %v16363_v57  ;;  %v16429_v13 = vld [vmem:[#allocation16 + $0x52c] ss:$16 sps:$4 sm:$0xff]   ;;  %v16424_v57 = vld [vmem:[#allocation16 + $0x520] ss:$16 sps:$4 sm:$0xff]  }
 0x90d   :  { %12094 = vmatpush1.bf16.msra.mxu1 %v16358_v53  ;;  %12258 = vmatpush1.bf16.msra.mxu0 %v16361_v21  ;;  %v16427_v53 = vld [vmem:[#allocation16 + $0x528] ss:$16 sps:$4 sm:$0xff]   ;;  %v16432_v21 = vld [vmem:[#allocation16 + $0x544] ss:$16 sps:$4 sm:$0xff]  }
 0x90e   :  { %12095 = vmatprep.subr.bf16.mxu1 %v16366_v23  ;;  %12259 = vmatprep.subr.bf16.mxu0 %v16369_v26  ;;  %v16430_v23 = vld [vmem:[#allocation16 + $0x540] ss:$16 sps:$4 sm:$0xff]   ;;  %v16433_v26 = vld [vmem:[#allocation16 + $0x548] ss:$16 sps:$4 sm:$0xff]  }
 0x911   :  { %12096 = vmatpush1.bf16.msra.mxu1 %v16364_v28  ;;  %12260 = vmatpush1.bf16.msra.mxu0 %v16367_v32  ;;  %v16438_v28 = vld [vmem:[#allocation16 + $0x564] ss:$16 sps:$4 sm:$0xff]   ;;  %v16441_v32 = vld [vmem:[#allocation16 + $0x56c] ss:$16 sps:$4 sm:$0xff]  }
 0x912   :  { %12106 = vmatprep.subr.bf16.mxu1 %v16372_v40  ;;  %12270 = vmatprep.subr.bf16.mxu0 %v16375_v24  ;;  %v16439_v40 = vld [vmem:[#allocation16 + $0x568] ss:$16 sps:$4 sm:$0xff]   ;;  %v16444_v24 = vld [vmem:[#allocation16 + $0x584] ss:$16 sps:$4 sm:$0xff]  }
 0x914   :  { %12098 = vmatmul.mubr.bf16.vlgmr.msra.gmra.mrb[40].mxu1 %v10460_v36  ;;  %12262 = vmatmul.mubr.bf16.vlgmr.msra.gmra.mrb[44].mxu0 %v10460_v36  ;;  %v16445_v36 = vld [vmem:[#allocation16 + $0x588] ss:$16 sps:$4 sm:$0xff]  }
 0x915   :  { %12107 = vmatpush1.bf16.msra.mxu1 %v16370_v55  ;;  %12271 = vmatpush1.bf16.msra.mxu0 %v16373_v20  ;;  %v16447_v55 = vld [vmem:[#allocation16 + $0x58c] ss:$16 sps:$4 sm:$0xff]   ;;  %v16442_v20 = vld [vmem:[#allocation16 + $0x580] ss:$16 sps:$4 sm:$0xff]  }
 0x916   :  { %12108 = vmatprep.subr.bf16.mxu1 %v16378_v29  ;;  %12272 = vmatprep.subr.bf16.mxu0 %v16381_v41  ;;  %v16450_v29 = vld [vmem:[#allocation16 + $0x5a4] ss:$16 sps:$4 sm:$0xff]   ;;  %v16453_v41 = vld [vmem:[#allocation16 + $0x5ac] ss:$16 sps:$4 sm:$0xff]  }
 0x919   :  { %12109 = vmatpush1.bf16.msra.mxu1 %v16376_v47  ;;  %12273 = vmatpush1.bf16.msra.mxu0 %v16379_v31  ;;  %v16448_v47 = vld [vmem:[#allocation16 + $0x5a0] ss:$16 sps:$4 sm:$0xff]   ;;  %v16451_v31 = vld [vmem:[#allocation16 + $0x5a8] ss:$16 sps:$4 sm:$0xff]  }
 0x91a   :  { %12110 = vmatprep.subr.bf16.mxu1 %v16384_v42  ;;  %12274 = vmatprep.subr.bf16.mxu0 %v16387_v43  ;;  %v16456_v42 = vld [vmem:[#allocation16 + $0x5c4] ss:$16 sps:$4 sm:$0xff]   ;;  %v16459_v43 = vld [vmem:[#allocation16 + $0x5cc] ss:$16 sps:$4 sm:$0xff]  }
 0x91d   :  { %12111 = vmatpush1.bf16.msra.mxu1 %v16382_v45  ;;  %12275 = vmatpush1.bf16.msra.mxu0 %v16385_v46  ;;  %v8821_v45 = vrot.slane %v17764_v44, %v17580_v49  ;;  %v16454_v46 = vld [vmem:[#allocation16 + $0x5c0] ss:$16 sps:$4 sm:$0xff]  }
 0x91e   :  { %12112 = vmatprep.subr.bf16.mxu1 %v16390_v61  ;;  %12276 = vmatprep.subr.bf16.mxu0 %v16393_v2  ;;  %v16457_v61 = vld [vmem:[#allocation16 + $0x5c8] ss:$16 sps:$4 sm:$0xff]   ;;  %v8825_v2 = vrot.slane %v17764_v44, %v17594_v6  ;;  %v16460_v49 = vld [vmem:[#allocation16 + $0x5e0] ss:$16 sps:$4 sm:$0xff]   ;;  %v16468_v6 = vld [vmem:[#allocation16 + $0x604] ss:$16 sps:$4 sm:$0xff]  }
 0x921   :  { %12113 = vmatpush1.bf16.msra.mxu1 %v16388_v62  ;;  %12277 = vmatpush1.bf16.msra.mxu0 %v16391_v9  ;;  %v8833_v62 = vrot.slane %v17764_v44, %v17597_v8  ;;  %v16462_v9 = vld [vmem:[#allocation16 + $0x5e4] ss:$16 sps:$4 sm:$0xff]   ;;  %v16471_v8 = vld [vmem:[#allocation16 + $0x60c] ss:$16 sps:$4 sm:$0xff]  }
 0x922   :  { %12114 = vmatprep.subr.bf16.mxu1 %v16396_v5  ;;  %12278 = vmatprep.subr.bf16.mxu0 %v16399_v52  ;;  %v16465_v5 = vld [vmem:[#allocation16 + $0x5ec] ss:$16 sps:$4 sm:$0xff]  }
 0x925   :  { %12115 = vmatpush1.bf16.msra.mxu1 %v16394_v14  ;;  %12279 = vmatpush1.bf16.msra.mxu0 %v16397_v38 }
 0x926   :  { %12116 = vmatprep.subr.bf16.mxu1 %v16402_v7  ;;  %12280 = vmatprep.subr.bf16.mxu0 %v16405_v30 }
 0x929   :  { %12117 = vmatpush1.bf16.msra.mxu1 %v16400_v27  ;;  %12281 = vmatpush1.bf16.msra.mxu0 %v16403_v56 }
 0x92a   :  { %12118 = vmatprep.subr.bf16.mxu1 %v16408_v16  ;;  %12282 = vmatprep.subr.bf16.mxu0 %v16411_v10  ;;  %v16463_v16 = vld [vmem:[#allocation16 + $0x5e8] ss:$16 sps:$4 sm:$0xff]  }
 0x92d   :  { %12119 = vmatpush1.bf16.msra.mxu1 %v16406_v17  ;;  %12283 = vmatpush1.bf16.msra.mxu0 %v16409_v58 }
 0x92e   :  { %12120 = vmatprep.subr.bf16.mxu1 %v16414_v34  ;;  %12284 = vmatprep.subr.bf16.mxu0 %v16417_v50 }
 0x931   :  { %12121 = vmatpush1.bf16.msra.mxu1 %v16412_v51  ;;  %12285 = vmatpush1.bf16.msra.mxu0 %v16415_v54 }
 0x932   :  { %12122 = vmatprep.subr.bf16.mxu1 %v16420_v11  ;;  %12286 = vmatprep.subr.bf16.mxu0 %v16423_v39  ;;  %v16466_v39 = vld [vmem:[#allocation16 + $0x600] ss:$16 sps:$4 sm:$0xff]  }
 0x935   :  { %12123 = vmatpush1.bf16.msra.mxu1 %v16418_v12  ;;  %12287 = vmatpush1.bf16.msra.mxu0 %v16421_v19  ;;  %v16469_v12 = vld [vmem:[#allocation16 + $0x608] ss:$16 sps:$4 sm:$0xff]  }
 0x936   :  { %12124 = vmatprep.subr.bf16.mxu1 %v16426_v35  ;;  %12288 = vmatprep.subr.bf16.mxu0 %v16429_v13  ;;  %v16474_v35 = vld [vmem:[#allocation16 + $0x624] ss:$16 sps:$4 sm:$0xff]   ;;  %v16477_v13 = vld [vmem:[#allocation16 + $0x62c] ss:$16 sps:$4 sm:$0xff]  }
 0x939   :  { %12125 = vmatpush1.bf16.msra.mxu1 %v16424_v57  ;;  %12289 = vmatpush1.bf16.msra.mxu0 %v16427_v53  ;;  %v16472_v53 = vld [vmem:[#allocation16 + $0x620] ss:$16 sps:$4 sm:$0xff]  }
 0x93a   :  { %12126 = vmatprep.subr.bf16.mxu1 %v16432_v21  ;;  %12290 = vmatprep.subr.bf16.mxu0 %v16435_v22  ;;  %v16475_v21 = vld [vmem:[#allocation16 + $0x628] ss:$16 sps:$4 sm:$0xff]   ;;  %v16480_v22 = vld [vmem:[#allocation16 + $0x644] ss:$16 sps:$4 sm:$0xff]  }
 0x93d   :  { %12127 = vmatpush1.bf16.msra.mxu1 %v16430_v23  ;;  %12291 = vmatpush1.bf16.msra.mxu0 %v16433_v26  ;;  %v16483_v23 = vld [vmem:[#allocation16 + $0x64c] ss:$16 sps:$4 sm:$0xff]   ;;  %v16478_v26 = vld [vmem:[#allocation16 + $0x640] ss:$16 sps:$4 sm:$0xff]  }
 0x93e   :  { %12128 = vmatprep.subr.bf16.mxu1 %v16438_v28  ;;  %12292 = vmatprep.subr.bf16.mxu0 %v16441_v32  ;;  %v16481_v28 = vld [vmem:[#allocation16 + $0x648] ss:$16 sps:$4 sm:$0xff]   ;;  %v16486_v32 = vld [vmem:[#allocation16 + $0x664] ss:$16 sps:$4 sm:$0xff]  }
 0x941   :  { %12129 = vmatpush1.bf16.msra.mxu1 %v16436_v33  ;;  %12293 = vmatpush1.bf16.msra.mxu0 %v16439_v40  ;;  %v16489_v33 = vld [vmem:[#allocation16 + $0x66c] ss:$16 sps:$4 sm:$0xff]   ;;  %v16484_v40 = vld [vmem:[#allocation16 + $0x660] ss:$16 sps:$4 sm:$0xff]  }
 0x942   :  { %12130 = vmatprep.subr.bf16.mxu1 %v16444_v24  ;;  %12294 = vmatprep.subr.bf16.mxu0 %v16447_v55  ;;  %v16487_v24 = vld [vmem:[#allocation16 + $0x668] ss:$16 sps:$4 sm:$0xff]   ;;  %v16492_v55 = vld [vmem:[#allocation16 + $0x684] ss:$16 sps:$4 sm:$0xff]  }
 0x945   :  { %12131 = vmatpush1.bf16.msra.mxu1 %v16442_v20  ;;  %12295 = vmatpush1.bf16.msra.mxu0 %v16445_v36  ;;  %v16495_v20 = vld [vmem:[#allocation16 + $0x68c] ss:$16 sps:$4 sm:$0xff]   ;;  %v16490_v36 = vld [vmem:[#allocation16 + $0x680] ss:$16 sps:$4 sm:$0xff]  }
 0x946   :  { %12132 = vmatprep.subr.bf16.mxu1 %v16450_v29  ;;  %12296 = vmatprep.subr.bf16.mxu0 %v16453_v41  ;;  %v16493_v29 = vld [vmem:[#allocation16 + $0x688] ss:$16 sps:$4 sm:$0xff]   ;;  %v16498_v41 = vld [vmem:[#allocation16 + $0x6a4] ss:$16 sps:$4 sm:$0xff]  }
 0x949   :  { %12133 = vmatpush1.bf16.msra.mxu1 %v16448_v47  ;;  %12297 = vmatpush1.bf16.msra.mxu0 %v16451_v31  ;;  %v16501_v47 = vld [vmem:[#allocation16 + $0x6ac] ss:$16 sps:$4 sm:$0xff]   ;;  %v16496_v31 = vld [vmem:[#allocation16 + $0x6a0] ss:$16 sps:$4 sm:$0xff]  }
 0x94a   :  { %12134 = vmatprep.subr.bf16.mxu1 %v16456_v42  ;;  %12298 = vmatprep.subr.bf16.mxu0 %v16459_v43  ;;  %v16499_v42 = vld [vmem:[#allocation16 + $0x6a8] ss:$16 sps:$4 sm:$0xff]   ;;  %v16504_v43 = vld [vmem:[#allocation16 + $0x6c4] ss:$16 sps:$4 sm:$0xff]  }
 0x94b   :  { %v10361_v52 = vpop.f32.mrb[36].mxu1 }
 0x94c   :  { %v14520_v14 = vadd.f32 %v10361_v52, %v8821_v45  ;;  %v17783_v38 = vpop.f32.mrb[40].mxu0  ;;  %v10363_v7 = vpop.f32.mrb[37].mxu1  ;;  %v16507_v45 = vld [vmem:[#allocation16 + $0x6cc] ss:$16 sps:$4 sm:$0xff]   ;;  %v16516_v52 = vld [vmem:[#allocation16 + $0x704] ss:$16 sps:$4 sm:$0xff]  }
 0x94d   :  { %v14521_v30 = vadd.f32 %v10363_v7, %v8825_v2  ;;  %v10445_v27 = vpop.f32.mrb[41].mxu0  ;;  %12135 = vmatpush1.bf16.msra.mxu1 %v16454_v46  ;;  %12299 = vmatpush1.bf16.msra.mxu0 %v16457_v61  ;;  %v10365_v56 = vpop.f32.mrb[38].mxu1  ;;  %v16502_v46 = vld [vmem:[#allocation16 + $0x6c0] ss:$16 sps:$4 sm:$0xff]   ;;  %v16505_v61 = vld [vmem:[#allocation16 + $0x6c8] ss:$16 sps:$4 sm:$0xff]  }
 0x94e   :  { %v10454_v10 = vmax.f32 %v14520_v14, 0.0  ;;  %v14523_v17 = vadd.f32 %v10445_v27, %v8833_v62  ;;  %v10447_v58 = vpop.f32.mrb[42].mxu0  ;;  %v10366_v34 = vpop.f32.mrb[39].mxu1  ;;  %12136 = vmatprep.subr.bf16.mxu1 %v16462_v9  ;;  %12300 = vmatprep.subr.bf16.mxu0 %v16465_v5  ;;  %v16510_v2 = vld [vmem:[#allocation16 + $0x6e4] ss:$16 sps:$4 sm:$0xff]  }
 0x94f   :  { %v10455_v50 = vmax.f32 %v14521_v30, 0.0  ;;  %v10448_v51 = vpop.f32.mrb[43].mxu0  ;;  %v16513_v62 = vld [vmem:[#allocation16 + $0x6ec] ss:$16 sps:$4 sm:$0xff]   ;;  %v16508_v9 = vld [vmem:[#allocation16 + $0x6e0] ss:$16 sps:$4 sm:$0xff]  }
 0x950   :  { %v10457_v54 = vmax.f32 %v14523_v17, 0.0  ;;  %v10462_v19 = vpack.c.bf16 %v10454_v10, %v10454_v10  ;;  %v16511_v5 = vld [vmem:[#allocation16 + $0x6e8] ss:$16 sps:$4 sm:$0xff]   ;;  %v16519_v14 = vld [vmem:[#allocation16 + $0x70c] ss:$16 sps:$4 sm:$0xff]  }
 0x951   :  { %v10463_v11 = vpack.c.bf16 %v10455_v50, %v10455_v50  ;;  %12137 = vmatpush1.bf16.msra.mxu1 %v16460_v49  ;;  %12301 = vmatpush1.bf16.msra.mxu0 %v16463_v16  ;;  %v16514_v7 = vld [vmem:[#allocation16 + $0x700] ss:$16 sps:$4 sm:$0xff]   ;;  %v16517_v49 = vld [vmem:[#allocation16 + $0x708] ss:$16 sps:$4 sm:$0xff]   ;;  %v16522_v30 = vld [vmem:[#allocation16 + $0x724] ss:$16 sps:$4 sm:$0xff]  }
 0x952   :  { %12147 = vmatprep.subr.bf16.mxu1 %v16468_v6  ;;  %12311 = vmatprep.subr.bf16.mxu0 %v16471_v8  ;;  %v10465_v57 = vpack.c.bf16 %v10457_v54, %v10457_v54  ;;  %v16525_v27 = vld [vmem:[#allocation16 + $0x72c] ss:$16 sps:$4 sm:$0xff]   ;;  %v16520_v56 = vld [vmem:[#allocation16 + $0x720] ss:$16 sps:$4 sm:$0xff]   ;;  %v16523_v16 = vld [vmem:[#allocation16 + $0x728] ss:$16 sps:$4 sm:$0xff]  }
 0x953   :  { %12138 = vmatprep.mubr.bf16.mxu1 %v10463_v11  ;;  %12302 = vmatprep.mubr.bf16.mxu0 %v10463_v11  ;;  %v16528_v6 = vld [vmem:[#allocation16 + $0x744] ss:$16 sps:$4 sm:$0xff]   ;;  %v16531_v10 = vld [vmem:[#allocation16 + $0x74c] ss:$16 sps:$4 sm:$0xff]   ;;  %v16526_v17 = vld [vmem:[#allocation16 + $0x740] ss:$16 sps:$4 sm:$0xff]  }
 0x954   :  { %12139 = vmatmul.mubr.bf16.vlgmr.msra.gmra.mrb[40].mxu1 %v10462_v19  ;;  %12303 = vmatmul.mubr.bf16.vlgmr.msra.gmra.mrb[44].mxu0 %v10462_v19  ;;  %v16529_v58 = vld [vmem:[#allocation16 + $0x748] ss:$16 sps:$4 sm:$0xff]   ;;  %v16534_v34 = vld [vmem:[#allocation16 + $0x764] ss:$16 sps:$4 sm:$0xff]   ;;  %v16537_v8 = vld [vmem:[#allocation16 + $0x76c] ss:$16 sps:$4 sm:$0xff]  }
 0x955   :  { %12148 = vmatpush1.bf16.msra.mxu1 %v16466_v39  ;;  %12312 = vmatpush1.bf16.msra.mxu0 %v16469_v12  ;;  %v16532_v50 = vld [vmem:[#allocation16 + $0x760] ss:$16 sps:$4 sm:$0xff]   ;;  %v16535_v51 = vld [vmem:[#allocation16 + $0x768] ss:$16 sps:$4 sm:$0xff]   ;;  %v16540_v54 = vld [vmem:[#allocation16 + $0x784] ss:$16 sps:$4 sm:$0xff]  }
 0x956   :  { %12179 = vmatprep.mubr.bf16.mxu1 %v10465_v57  ;;  %12343 = vmatprep.mubr.bf16.mxu0 %v10465_v57  ;;  %v16543_v11 = vld [vmem:[#allocation16 + $0x78c] ss:$16 sps:$4 sm:$0xff]   ;;  %v16538_v39 = vld [vmem:[#allocation16 + $0x780] ss:$16 sps:$4 sm:$0xff]   ;;  %v16541_v12 = vld [vmem:[#allocation16 + $0x788] ss:$16 sps:$4 sm:$0xff]  }
 0x957   :  { %12149 = vmatprep.subr.bf16.mxu1 %v16474_v35  ;;  %12313 = vmatprep.subr.bf16.mxu0 %v16477_v13  ;;  %v16546_v19 = vld [vmem:[#allocation16 + $0x7a4] ss:$16 sps:$4 sm:$0xff]   ;;  %v16549_v35 = vld [vmem:[#allocation16 + $0x7ac] ss:$16 sps:$4 sm:$0xff]   ;;  %v16544_v13 = vld [vmem:[#allocation16 + $0x7a0] ss:$16 sps:$4 sm:$0xff]  }
 0x958   :  { %v16547_v57 = vld [vmem:[#allocation16 + $0x7a8] ss:$16 sps:$4 sm:$0xff]  }
 0x959   :  { %12150 = vmatpush1.bf16.msra.mxu1 %v16472_v53  ;;  %12314 = vmatpush1.bf16.msra.mxu0 %v16475_v21  ;;  %v8829_v53 = vrot.slane %v17764_v44, %v17591_v0  ;;  %v16552_v21 = vld [vmem:[#allocation16 + $0x7c4] ss:$16 sps:$4 sm:$0xff]   ;;  %v16562_v0 = vld [vmem:[#allocation22 + $0x40] sm:$0xff]  }
 0x95a   :  { %12151 = vmatprep.subr.bf16.mxu1 %v16480_v22  ;;  %12315 = vmatprep.subr.bf16.mxu0 %v16483_v23  ;;  %v16555_v22 = vld [vmem:[#allocation16 + $0x7cc] ss:$16 sps:$4 sm:$0xff]   ;;  %v16550_v23 = vld [vmem:[#allocation16 + $0x7c0] ss:$16 sps:$4 sm:$0xff]  }
 0x95b   :  { %v16563_v44 = vld [vmem:[#allocation22 + $0xc0] sm:$0xff]  }
 0x95d   :  { %12152 = vmatpush1.bf16.msra.mxu1 %v16478_v26  ;;  %12316 = vmatpush1.bf16.msra.mxu0 %v16481_v28  ;;  %v16553_v26 = vld [vmem:[#allocation16 + $0x7c8] ss:$16 sps:$4 sm:$0xff]   ;;  %v14522_v28 = vadd.f32 %v17783_v38, %v8829_v53 }
 0x95e   :  { %12153 = vmatprep.subr.bf16.mxu1 %v16486_v32  ;;  %12317 = vmatprep.subr.bf16.mxu0 %v16489_v33  ;;  %v16558_v32 = vld [vmem:[#allocation16 + $0x7e4] ss:$16 sps:$4 sm:$0xff]   ;;  %v16561_v33 = vld [vmem:[#allocation16 + $0x7ec] ss:$16 sps:$4 sm:$0xff]  }
 0x95f   :  { %v16565_v38 = vld [vmem:[#allocation22 + $0x80] sm:$0xff]  }
 0x961   :  { %12154 = vmatpush1.bf16.msra.mxu1 %v16484_v40  ;;  %12318 = vmatpush1.bf16.msra.mxu0 %v16487_v24  ;;  %v16556_v40 = vld [vmem:[#allocation16 + $0x7e0] ss:$16 sps:$4 sm:$0xff]   ;;  %v16559_v24 = vld [vmem:[#allocation16 + $0x7e8] ss:$16 sps:$4 sm:$0xff]  }
 0x962   :  { %12155 = vmatprep.subr.bf16.mxu1 %v16492_v55  ;;  %12319 = vmatprep.subr.bf16.mxu0 %v16495_v20  ;;  %v10456_v55 = vmax.f32 %v14522_v28, 0.0  ;;  %v16564_v20 = vld [vmem:[#allocation22] sm:$0xff]  }
 0x965   :  { %12156 = vmatpush1.bf16.msra.mxu1 %v16490_v36  ;;  %12320 = vmatpush1.bf16.msra.mxu0 %v16493_v29  ;;  %v10464_v36 = vpack.c.bf16 %v10456_v55, %v10456_v55  ;;  %v16566_v29 = vld [vmem:[#allocation22 + $0x48] sm:$0xff]  }
 0x966   :  { %12157 = vmatprep.subr.bf16.mxu1 %v16498_v41  ;;  %12321 = vmatprep.subr.bf16.mxu0 %v16501_v47  ;;  %v16567_v41 = vld [vmem:[#allocation22 + $0xc8] sm:$0xff]  }
 0x967   :  { %v16568_v47 = vld [vmem:[#allocation22 + $0x8] sm:$0xff]  }
 0x969   :  { %12158 = vmatpush1.bf16.msra.mxu1 %v16496_v31  ;;  %12322 = vmatpush1.bf16.msra.mxu0 %v16499_v42  ;;  %v16569_v31 = vld [vmem:[#allocation22 + $0x88] sm:$0xff]   ;;  %v16570_v42 = vld [vmem:[#allocation22 + $0x50] sm:$0xff]  }
 0x96a   :  { %12159 = vmatprep.subr.bf16.mxu1 %v16504_v43  ;;  %12323 = vmatprep.subr.bf16.mxu0 %v16507_v45  ;;  %v16571_v43 = vld [vmem:[#allocation22 + $0xd0] sm:$0xff]  }
 0x96b   :  { %v16572_v45 = vld [vmem:[#allocation22 + $0x10] sm:$0xff]  }
 0x96d   :  { %12160 = vmatpush1.bf16.msra.mxu1 %v16502_v46  ;;  %12324 = vmatpush1.bf16.msra.mxu0 %v16505_v61  ;;  %v16573_v46 = vld [vmem:[#allocation22 + $0x90] sm:$0xff]   ;;  %v16574_v61 = vld [vmem:[#allocation22 + $0x58] sm:$0xff]  }
 0x96e   :  { %12161 = vmatprep.subr.bf16.mxu1 %v16510_v2  ;;  %12325 = vmatprep.subr.bf16.mxu0 %v16513_v62  ;;  %v16575_v2 = vld [vmem:[#allocation22 + $0xd8] sm:$0xff]  }
 0x96f   :  { %v16576_v62 = vld [vmem:[#allocation22 + $0x18] sm:$0xff]  }
 0x971   :  { %12162 = vmatpush1.bf16.msra.mxu1 %v16508_v9  ;;  %12326 = vmatpush1.bf16.msra.mxu0 %v16511_v5  ;;  %v16578_v9 = vld [vmem:[#allocation22 + $0x60] sm:$0xff]  }
 0x972   :  { %12163 = vmatprep.subr.bf16.mxu1 %v16516_v52  ;;  %12327 = vmatprep.subr.bf16.mxu0 %v16519_v14  ;;  %v16580_v5 = vld [vmem:[#allocation22 + $0x20] sm:$0xff]   ;;  %v16582_v14 = vld [vmem:[#allocation22 + $0x68] sm:$0xff]  }
 0x973   :  { %v16581_v52 = vld [vmem:[#allocation22 + $0xa0] sm:$0xff]  }
 0x975   :  { %12164 = vmatpush1.bf16.msra.mxu1 %v16514_v7  ;;  %12328 = vmatpush1.bf16.msra.mxu0 %v16517_v49  ;;  %v16583_v7 = vld [vmem:[#allocation22 + $0xe8] sm:$0xff]  }
 0x976   :  { %12165 = vmatprep.subr.bf16.mxu1 %v16522_v30  ;;  %12329 = vmatprep.subr.bf16.mxu0 %v16525_v27  ;;  %v16584_v49 = vld [vmem:[#allocation22 + $0x28] sm:$0xff]   ;;  %v16586_v27 = vld [vmem:[#allocation22 + $0x70] sm:$0xff]  }
 0x977   :  { %v16585_v30 = vld [vmem:[#allocation22 + $0xa8] sm:$0xff]  }
 0x979   :  { %12166 = vmatpush1.bf16.msra.mxu1 %v16520_v56  ;;  %12330 = vmatpush1.bf16.msra.mxu0 %v16523_v16  ;;  %v16587_v56 = vld [vmem:[#allocation22 + $0xf0] sm:$0xff]  }
 0x97a   :  { %12167 = vmatprep.subr.bf16.mxu1 %v16528_v6  ;;  %12331 = vmatprep.subr.bf16.mxu0 %v16531_v10  ;;  %v16588_v16 = vld [vmem:[#allocation22 + $0x30] sm:$0xff]   ;;  %v16590_v10 = vld [vmem:[#allocation22 + $0x78] sm:$0xff]  }
 0x97b   :  { %v16589_v6 = vld [vmem:[#allocation22 + $0xb0] sm:$0xff]  }
 0x97d   :  { %12168 = vmatpush1.bf16.msra.mxu1 %v16526_v17  ;;  %12332 = vmatpush1.bf16.msra.mxu0 %v16529_v58  ;;  %v16591_v17 = vld [vmem:[#allocation22 + $0xf8] sm:$0xff]  }
 0x97e   :  { %12169 = vmatprep.subr.bf16.mxu1 %v16534_v34  ;;  %12333 = vmatprep.subr.bf16.mxu0 %v16537_v8  ;;  %v16592_v58 = vld [vmem:[#allocation22 + $0x38] sm:$0xff]  }
 0x97f   :  { %v16593_v34 = vld [vmem:[#allocation22 + $0xb8] sm:$0xff]  }
 0x980   :  { %v10722_v8 = vld [vmem:[#allocation17] sm:$0xf] }
 0x981   :  { %12170 = vmatpush1.bf16.msra.mxu1 %v16532_v50  ;;  %12334 = vmatpush1.bf16.msra.mxu0 %v16535_v51  ;;  %v10727_v50 = vrot.slane %v10722_v8, %v17544_v1  ;;  %v10735_v51 = vrot.slane %v10722_v8, %v17571_v15 }
 0x982   :  { %12171 = vmatprep.subr.bf16.mxu1 %v16540_v54  ;;  %12335 = vmatprep.subr.bf16.mxu0 %v16543_v11  ;;  %v10731_v54 = vrot.slane %v10722_v8, %v17549_v3  ;;  %v10739_v11 = vrot.slane %v10722_v8, %v17552_v4  ;;  %v14461_v8 = vld [vmem:[#allocation25] ss:$0 sm:$0xff] }
 0x985   :  { %12172 = vmatpush1.bf16.msra.mxu1 %v16538_v39  ;;  %12336 = vmatpush1.bf16.msra.mxu0 %v16541_v12 }
 0x986   :  { %12173 = vmatprep.subr.bf16.mxu1 %v16546_v19  ;;  %12337 = vmatprep.subr.bf16.mxu0 %v16549_v35  ;;  %v16971_v19 = vmov 1934713408  }
 0x987   :  { %v12391_v35 = vunpack.c.l.s4 %v16971_v19  ;;  %v14427_v19 = vld [vmem:[#allocation20] ss:$0 sm:$0xff] }
 0x989   :  { %12174 = vmatpush1.bf16.msra.mxu1 %v16544_v13  ;;  %12338 = vmatpush1.bf16.msra.mxu0 %v16547_v57 }
 0x98a   :  { %12175 = vmatprep.subr.bf16.mxu1 %v16552_v21  ;;  %12339 = vmatprep.subr.bf16.mxu0 %v16555_v22 }
 0x98d   :  { %12176 = vmatpush1.bf16.msra.mxu1 %v16550_v23  ;;  %12340 = vmatpush1.bf16.msra.mxu0 %v16553_v26 }
 0x98e   :  { %12177 = vmatprep.subr.bf16.mxu1 %v16558_v32  ;;  %12341 = vmatprep.subr.bf16.mxu0 %v16561_v33  ;;  %v12392_v33 = vunpack.c.0.s8 %v12391_v35 }
 0x991   :  { %12178 = vmatpush1.bf16.msra.mxu1 %v16556_v40  ;;  %12342 = vmatpush1.bf16.msra.mxu0 %v16559_v24 }
 0x992   :  { %14464 = vmatprep.subr.bf16.mxu1 %v16562_v0  ;;  %14486 = vmatprep.subr.bf16.mxu0 %v16563_v44 }
 0x994   :  { %12180 = vmatmul.mubr.bf16.vlgmr.msra.gmra.mrb[40].mxu1 %v10464_v36  ;;  %12344 = vmatmul.mubr.bf16.vlgmr.msra.gmra.mrb[44].mxu0 %v10464_v36 }
 0x995   :  { %14465 = vmatpush3.bf16.msra.mxu1 %v16564_v20  ;;  %12771 = vmatprep.mubr.bf16.mxu1 %v17735_v59  ;;  %v16577_v59 = vld [vmem:[#allocation22 + $0x98] sm:$0xff]  }
 0x996   :  { %14487 = vmatpush3.bf16.msra.mxu0 %v16565_v38  ;;  %12811 = vmatprep.mubr.bf16.mxu0 %v17744_v25  ;;  %v16579_v25 = vld [vmem:[#allocation22 + $0xe0] sm:$0xff]   ;;  %v12395_v38 = vsub.s32 %v12392_v33, %v17421_v60 }
 0x997   :  { %14466 = vmatprep.subr.bf16.mxu1 %v16566_v29  ;;  %14488 = vmatprep.subr.bf16.mxu0 %v16567_v41 }
 0x999   :  { %14467 = vmatpush3.bf16.msra.mxu1 %v16568_v47 }
 0x99a   :  { %14489 = vmatpush3.bf16.msra.mxu0 %v16569_v31  ;;  %14468 = vmatprep.subr.bf16.mxu1 %v16570_v42  ;;  %v12424_v42 = vld [vmem:[#allocation19] sm:$0xf] }
 0x99b   :  { %14490 = vmatprep.subr.bf16.mxu0 %v16571_v43 }
 0x99d   :  { %14469 = vmatpush3.bf16.msra.mxu1 %v16572_v45 }
 0x99e   :  { %14491 = vmatpush3.bf16.msra.mxu0 %v16573_v46  ;;  %14470 = vmatprep.subr.bf16.mxu1 %v16574_v61 }
 0x99f   :  { %14492 = vmatprep.subr.bf16.mxu0 %v16575_v2 }
 0x9a1   :  { %14471 = vmatpush3.bf16.msra.mxu1 %v16576_v62 }
 0x9a2   :  { %14493 = vmatpush3.bf16.msra.mxu0 %v16577_v59  ;;  %14472 = vmatprep.subr.bf16.mxu1 %v16578_v9 }
 0x9a3   :  { %14494 = vmatprep.subr.bf16.mxu0 %v16579_v25 }
 0x9a5   :  { %14473 = vmatpush3.bf16.msra.mxu1 %v16580_v5 }
 0x9a6   :  { %14495 = vmatpush3.bf16.msra.mxu0 %v16581_v52  ;;  %14474 = vmatprep.subr.bf16.mxu1 %v16582_v14 }
 0x9a7   :  { %14496 = vmatprep.subr.bf16.mxu0 %v16583_v7  ;;  %v14428_v7 = vld [vmem:[#allocation23] ss:$0 sm:$0xff] }
 0x9a9   :  { %14475 = vmatpush3.bf16.msra.mxu1 %v16584_v49 }
 0x9aa   :  { %14497 = vmatpush3.bf16.msra.mxu0 %v16585_v30  ;;  %14476 = vmatprep.subr.bf16.mxu1 %v16586_v27 }
 0x9ab   :  { %14498 = vmatprep.subr.bf16.mxu0 %v16587_v56 }
 0x9ad   :  { %14477 = vmatpush3.bf16.msra.mxu1 %v16588_v16 }
 0x9ae   :  { %14499 = vmatpush3.bf16.msra.mxu0 %v16589_v6  ;;  %14478 = vmatprep.subr.bf16.mxu1 %v16590_v10 }
 0x9af   :  { %14500 = vmatprep.subr.bf16.mxu0 %v16591_v17 }
 0x9b1   :  { %14479 = vmatpush3.bf16.msra.mxu1 %v16592_v58 }
 0x9b2   :  { %14501 = vmatpush3.bf16.msra.mxu0 %v16593_v34 }
 0x9b4   :  { %12772 = vmatmul.mubr.bf16.vlgmr.msra.gmra.mrb[44].mxu1 %v17740_v48 }
 0x9b5   :  { %12812 = vmatmul.mubr.bf16.vlgmr.msra.gmra.mrb[48].mxu0 %v17752_v18 }
 0xa67   :  { %v12181_v39 = vpop.f32.mrb[40].mxu1  ;;  %v12345_v12 = vpop.f32.mrb[44].mxu0 }
 0xa68   :  { %v14524_v13 = vadd.f32 %v12181_v39, %v10727_v50  ;;  %v14526_v57 = vadd.f32 %v12345_v12, %v10735_v51  ;;  %v12183_v53 = vpop.f32.mrb[41].mxu1  ;;  %v12347_v21 = vpop.f32.mrb[45].mxu0  ;;  %v16972_v50 = vmov 0.0  }
 0xa69   :  { %v14525_v48 = vadd.f32 %v12183_v53, %v10731_v54  ;;  %v14527_v22 = vadd.f32 %v12347_v21, %v10739_v11  ;;  %v12185_v18 = vpop.f32.mrb[42].mxu1  ;;  %v12349_v23 = vpop.f32.mrb[46].mxu0 }
 0xa6a   :  { %v12352_v26 = vmax.f32 %v14524_v13, 0.0  ;;  %v12354_v1 = vmax.f32 %v14526_v57, 0.0  ;;  %v12186_v28 = vpop.f32.mrb[43].mxu1  ;;  %v12350_v15 = vpop.f32.mrb[47].mxu0 }
 0xa6b   :  { %v12353_v32 = vmax.f32 %v14525_v48, 0.0  ;;  %v12355_v3 = vmax.f32 %v14527_v22, 0.0 }
 0xa6c   :  { %v12356_v4 = vcombine.low %v12352_v26, %v12354_v1  ;;  %v12357_v40 = vcombine.high %v12352_v26, %v12354_v1 }
 0xa6d   :  { %v12372_v24 = vcombine.low %v12353_v32, %v12355_v3  ;;  %v12373_v55 = vcombine.high %v12353_v32, %v12355_v3 }
 0xa6e   :  { %v12364_v0 = vrot.slane %v12356_v4, %v17424_v63  ;;  %v12371_v44 = vrot.slane %v12357_v40, %v17424_v63  ;;  %v14462_v40 = vld [vmem:[#allocation2] ss:$0 sm:$0xff] }
 0xa6f   :  { %v12380_v20 = vrot.slane %v12372_v24, %v17424_v63  ;;  %v12387_v36 = vrot.slane %v12373_v55, %v17424_v63 }
 0xa71   :  { %v12388_v29 = vcombine.low %v12364_v0, %v12380_v20  ;;  %v12389_v41 = vcombine.high %v12364_v0, %v12380_v20  ;;  %v12404_v47 = vcombine.low %v12371_v44, %v12387_v36  ;;  %v12405_v31 = vcombine.high %v12371_v44, %v12387_v36 }
 0xa73   :  { %v12396_v43 = vrot.slane %v12388_v29, %v12395_v38  ;;  %v12403_v45 = vrot.slane %v12389_v41, %v12395_v38  ;;  %v12412_v62 = vrot.slane %v12404_v47, %v12395_v38  ;;  %v12419_v63 = vrot.slane %v12405_v31, %v12395_v38 }
 0xa75   :  { %v12425_v46 = vmul.f32 %v12424_v42, %v12396_v43  ;;  %v12427_v2 = vmul.f32 %v12424_v42, %v12403_v45  ;;  %v12429_v9 = vmul.f32 %v12424_v42, %v12412_v62  ;;  %v12431_v25 = vmul.f32 %v12424_v42, %v12419_v63 }
 0xa76   :  { %v12420_v51 = vcombine.high %v12396_v43, %v16972_v50  ;;  %v12421_v12 = vcombine.high %v12403_v45, %v16972_v50  ;;  %v12422_v57 = vcombine.high %v12412_v62, %v16972_v50  ;;  %v12423_v48 = vcombine.high %v12419_v63, %v16972_v50 }
 0xa77   :  { %v12434_v61 = vsel %vm12433_vm11, %v12425_v46, 0.0  ;;  %v12440_v59 = vsel %vm12433_vm11, %v12427_v2, 0.0  ;;  %v12446_v60 = vsel %vm12433_vm11, %v12429_v9, 0.0  ;;  %v12452_v5 = vsel %vm12433_vm11, %v12431_v25, 0.0 }
 0xa78   :  { %12435 = vadd.xlane.f32.xlu1 %v12434_v61  ;;  %v12426_v39 = vmul.f32 %v12424_v42, %v12420_v51  ;;  %v12428_v13 = vmul.f32 %v12424_v42, %v12421_v12  ;;  %v12430_v21 = vmul.f32 %v12424_v42, %v12422_v57  ;;  %v12432_v18 = vmul.f32 %v12424_v42, %v12423_v48 }
 0xa7a   :  { %v12437_v35 = vsel %vm12433_vm11, %v12426_v39, 0.0  ;;  %v12443_v53 = vsel %vm12433_vm11, %v12428_v13, 0.0  ;;  %v12449_v22 = vsel %vm12433_vm11, %v12430_v21, 0.0  ;;  %v12455_v23 = vsel %vm12433_vm11, %v12432_v18, 0.0 }
 0xa7c   :  { %12441 = vadd.xlane.f32.xlu1 %v12440_v59 }
 0xa80   :  { %12447 = vadd.xlane.f32.xlu1 %v12446_v60 }
 0xa84   :  { %12453 = vadd.xlane.f32.xlu1 %v12452_v5 }
 0xa87   :  { %v14480_v52 = vpop.f32.mrb[44].mxu1 }
 0xa88   :  { %v14502_v14 = vpop.f32.mrb[48].mxu0  ;;  %v14481_v49 = vpop.f32.mrb[45].mxu1 }
 0xa89   :  { %v14482_v30 = vadd.f32 %v14481_v49, %v14480_v52  ;;  %v14503_v27 = vpop.f32.mrb[49].mxu0  ;;  %v14483_v56 = vpop.f32.mrb[46].mxu1 }
 0xa8a   :  { %v14504_v16 = vadd.f32 %v14503_v27, %v14502_v14  ;;  %v14505_v6 = vpop.f32.mrb[50].mxu0  ;;  %v14484_v10 = vpop.f32.mrb[47].mxu1 }
 0xa8b   :  { %v12774_v17 = vadd.f32 %v14482_v30, %v14428_v7  ;;  %v14506_v58 = vpop.f32.mrb[51].mxu0 }
 0xa8d   :  { %v12814_v34 = vadd.f32 %v14504_v16, %v12774_v17 }
 0xa8f   :  { %v12819_v54 = vmax.f32 %v12814_v34, 0.0 }
 0xa91   :  { %v12827_v11 = vmul.f32 %v14461_v8, %v12819_v54 }
 0xa93   :  { %12828 = vadd.xlane.f32.xlu0 %v12827_v11 }
 0xa95   :  { %12465 = vbcast.lane.b32.xlu1 %v14427_v19, 256 }
 0xa97   :  { %12438 = vadd.xlane.f32.xlu0 %v12437_v35 }
 0xa9b   :  { %12444 = vadd.xlane.f32.xlu0 %v12443_v53 }
 0xa9f   :  { %12450 = vadd.xlane.f32.xlu0 %v12449_v22 }
 0xaa3   :  { %12456 = vadd.xlane.f32.xlu0 %v12455_v23 }
 0xb05   :  { %v12436_v26 = vpop.xlane.xlu1 %12435 }
 0xb09   :  { %v12442_v1 = vpop.xlane.xlu1 %12441 }
 0xb0d   :  { %v12448_v28 = vpop.xlane.xlu1 %12447 }
 0xb11   :  { %v12454_v15 = vpop.xlane.xlu1 %12453 }
 0xb15   :  { %v12466_v32 = vpop.permute.xlu1 %12465 }
 0xb16   :  { %v12470_v3 = vadd.f32 %v12466_v32, %v12442_v1  ;;  %v12468_v33 = vadd.f32 %v12466_v32, %v12436_v26  ;;  %v12472_v4 = vadd.f32 %v12466_v32, %v12448_v28  ;;  %v12474_v24 = vadd.f32 %v12466_v32, %v12454_v15 }
 0xb18   :  { %12859 = vperm.xlu1 %14699, %v12470_v3   ;;  %12853 = vperm.xlu0 %14698, %v12468_v33  }
 0xb1c   :  { %12865 = vperm.xlu1 %14699, %v12472_v4  }
 0xb20   :  { %v12829_v55 = vpop.xlane.xlu0 %12828  ;;  %12871 = vperm.xlu1 %14699, %v12474_v24  }
 0xb21   :  { %v12837_v0 = vadd.f32 %v14462_v40, %v12829_v55 }
 0xb23   :  { %v14463_v44 = vmul.f32 -1.442695, %v12837_v0 }
 0xb24   :  { %v12439_v20 = vpop.xlane.xlu0 %12438 }
 0xb25   :  { %16594 = vpow2.f32 %v14463_v44  ;;  %v12469_v36 = vadd.f32 %v12466_v32, %v12439_v20 }
 0xb27   :  { %12856 = vperm.xlu1 %14699, %v12469_v36  }
 0xb28   :  { %v12445_v38 = vpop.xlane.xlu0 %12444 }
 0xb29   :  { %v12471_v29 = vadd.f32 %v12466_v32, %v12445_v38 }
 0xb2b   :  { %12862 = vperm.xlu1 %14699, %v12471_v29  }
 0xb2c   :  { %v12451_v41 = vpop.xlane.xlu0 %12450 }
 0xb2d   :  { %v12473_v47 = vadd.f32 %v12466_v32, %v12451_v41 }
 0xb2f   :  { %v16595_v31 = vpop.eup %16594  ;;  %12868 = vperm.xlu1 %14699, %v12473_v47  }
 0xb30   :  { %v12841_v42 = vadd.f32 1.0, %v16595_v31  ;;  %v12457_v43 = vpop.xlane.xlu0 %12456 }
 0xb31   :  { %v12475_v45 = vadd.f32 %v12466_v32, %v12457_v43 }
 0xb32   :  { %16596 = vrcp.f32 %v12841_v42 }
 0xb33   :  { %12874 = vperm.xlu1 %14699, %v12475_v45  }
 0xb3c   :  { %v16597_v46 = vpop.eup %16596 }
 0xb3d   :  { %12917 = vrot.lane.b32.xlu1 %v16597_v46, %s16966_s8 }
 0xb97   :  { %v12860_v61 = vpop.permute.xlu1 %12859  ;;  %v12854_v59 = vpop.permute.xlu0 %12853 }
 0xb98   :  { %v12879_v63 = vrot.slane %v12854_v59, %v17455_v37  ;;  %v12887_v5 = vrot.slane %v12860_v61, %v17455_v37 }
 0xb9b   :  { %v12866_v2 = vpop.permute.xlu1 %12865 }
 0xb9c   :  { %v12895_v30 = vrot.slane %v12866_v2, %v17455_v37 }
 0xb9f   :  { %v12872_v62 = vpop.permute.xlu1 %12871 }
 0xba0   :  { %v12903_v10 = vrot.slane %v12872_v62, %v17455_v37 }
 0xba6   :  { %v12857_v9 = vpop.permute.xlu1 %12856 }
 0xba7   :  { %v12883_v60 = vrot.slane %v12857_v9, %v17455_v37 }
 0xba9   :  { %v12908_v25 = vsel %vm721_vm3, %v12883_v60, %v12879_v63 }
 0xbaa   :  { %v12863_v52 = vpop.permute.xlu1 %12862  ;;  %v12909_v7 = vsel %vm723_vm4, %v12887_v5, %v12908_v25 }
 0xbab   :  { %v12891_v14 = vrot.slane %v12863_v52, %v17455_v37 }
 0xbad   :  { %v12910_v49 = vsel %vm725_vm5, %v12891_v14, %v12909_v7 }
 0xbae   :  { %v12869_v27 = vpop.permute.xlu1 %12868  ;;  %v12911_v16 = vsel %vm727_vm6, %v12895_v30, %v12910_v49 }
 0xbaf   :  { %v12899_v56 = vrot.slane %v12869_v27, %v17455_v37 }
 0xbb1   :  { %v12912_v6 = vsel %vm729_vm7, %v12899_v56, %v12911_v16 }
 0xbb2   :  { %v12875_v17 = vpop.permute.xlu1 %12874  ;;  %v12913_v34 = vsel %vm731_vm8, %v12903_v10, %v12912_v6 }
 0xbb3   :  { %v12907_v58 = vrot.slane %v12875_v17, %v17455_v37 }
 0xbb5   :  { %v12914_v8 = vsel %vm733_vm9, %v12907_v58, %v12913_v34 }
 0xbb6   :  { %v12918_v50 = vpop.permute.xlu1 %12917 }
 0xbb7   :  { %v12921_v51 = vsel %vm12920_vm12, %v12914_v8, %v12918_v50 }
 0xbb8   :  { %v12923_v54 = vsel %vm12922_vm13, %v12921_v51, 0.0 }
 0xbb9   :  { %12924 = vst [vmem:[%s17846_s18] sm:$0xff] %v12923_v54 }
 0xbba   :  { %12933 = vsyncpa [#allocation4], 1 }
 0xbbb   :  { %12934 = vsyncpa [#allocation6], 1 }
 0xbbc   :  { %12935 = vsyncpa [#allocation9], 1 }
 0xbbd   :  { %12936 = vsyncpa [#allocation12], 1 }
 0xbbe   :  { %12937 = vsyncpa [#allocation15], 1 }
 0xbbf   :  { %12938 = vsyncpa [#allocation18], 1 }
 0xbc0   :  { %12939 = vsyncpa [#allocation21], 1 }
 0xbc1   :  { %12940 = vsyncpa [#allocation24], 1 }

</bundles_post_ra>
